<compile_context>
chip_gen: v5e
topology: v5e:2x2
jax: 0.10.0
libtpu: 0.0.40
codegen_flags: <defaults>
</compile_context>

<pallas_src>
import functools

import jax
import jax.numpy as jnp
import numpy as np
from jax.experimental import pallas as pl
from jax.experimental.pallas import tpu as pltpu

_EPS = 1e-5
_LEAK = 0.2
_VMEM_LIMIT = 32 * 1024 * 1024


# ----------------------------------------------------------------------------
# In-kernel helpers (f32 epilogue math)
# ----------------------------------------------------------------------------
def _leaky_relu(x):
    return jnp.where(x > 0, x, _LEAK * x)


def _batchnorm_rows(acc, gamma, beta):
    """BatchNorm over rows (every row of the batch is present in `acc`)."""
    m = acc.shape[0]
    s1 = jnp.sum(acc, axis=0, keepdims=True)
    s2 = jnp.sum(acc * acc, axis=0, keepdims=True)
    mean = s1 * (1.0 / m)
    var = s2 * (1.0 / m) - mean * mean          # biased variance (PyTorch norm)
    inv = jax.lax.rsqrt(var + _EPS)
    return (acc - mean) * (inv * gamma) + beta


# ----------------------------------------------------------------------------
# Kernel 1: conv + LeakyReLU  (layer 1, lane-packed, M-tiled, parallel)
# ----------------------------------------------------------------------------
def _conv_leaky_kernel(a_ref, w_ref, o_ref):
    acc = jnp.dot(a_ref[...], w_ref[...], preferred_element_type=jnp.float32)
    o_ref[...] = _leaky_relu(acc).astype(o_ref.dtype)


def conv_leaky(a_packed, w_packed):
    mp, kp = a_packed.shape
    lanes = w_packed.shape[1]
    tm = max(8, min(128, mp // 4))              # >= 2 grid steps per TC
    if mp % tm != 0:
        tm = mp
    tiles = mp // tm
    return pl.pallas_call(
        _conv_leaky_kernel,
        out_shape=jax.ShapeDtypeStruct((mp, lanes), jnp.bfloat16),
        grid=(tiles,),
        in_specs=[
            pl.BlockSpec((tm, kp), lambda i: (i, 0)),
            pl.BlockSpec((kp, lanes), lambda i: (0, 0)),
        ],
        out_specs=pl.BlockSpec((tm, lanes), lambda i: (i, 0)),
        compiler_params=pltpu.CompilerParams(
            dimension_semantics=("parallel",),
            vmem_limit_bytes=_VMEM_LIMIT),
    )(a_packed, w_packed)


# ----------------------------------------------------------------------------
# Kernel 2: conv + BatchNorm(batch stats) + LeakyReLU  (layer 2, lane-packed)
# ----------------------------------------------------------------------------
def _conv_bn_leaky_kernel(a_ref, w_ref, fold_ref, g_ref, b_ref, o_ref, *, inv_m):
    acc = jnp.dot(a_ref[...], w_ref[...], preferred_element_type=jnp.float32)
    # Per-lane sums; fold the lane groups (lane l holds channel l % Cout) into
    # true per-channel statistics with an exact 0/1 matmul.
    s1 = jnp.sum(acc, axis=0, keepdims=True)
    s2 = jnp.sum(acc * acc, axis=0, keepdims=True)
    s1 = jnp.dot(s1, fold_ref[...], preferred_element_type=jnp.float32,
                 precision=jax.lax.Precision.HIGHEST)
    s2 = jnp.dot(s2, fold_ref[...], preferred_element_type=jnp.float32,
                 precision=jax.lax.Precision.HIGHEST)
    mean = s1 * inv_m
    var = s2 * inv_m - mean * mean
    inv = jax.lax.rsqrt(var + _EPS)
    y = (acc - mean) * (inv * g_ref[...]) + b_ref[...]
    o_ref[...] = _leaky_relu(y).astype(o_ref.dtype)


def conv_bn_leaky(a_packed, w_packed, fold, gamma, beta, *, groups):
    mp, kp = a_packed.shape
    lanes = w_packed.shape[1]
    kern = functools.partial(_conv_bn_leaky_kernel,
                             inv_m=1.0 / float(mp * groups))
    return pl.pallas_call(
        kern,
        out_shape=jax.ShapeDtypeStruct((mp, lanes), jnp.bfloat16),
        grid=(1,),
        in_specs=[
            pl.BlockSpec((mp, kp), lambda i: (0, 0)),
            pl.BlockSpec((kp, lanes), lambda i: (0, 0)),
            pl.BlockSpec((lanes, lanes), lambda i: (0, 0)),
            pl.BlockSpec((1, lanes), lambda i: (0, 0)),
            pl.BlockSpec((1, lanes), lambda i: (0, 0)),
        ],
        out_specs=pl.BlockSpec((mp, lanes), lambda i: (0, 0)),
        compiler_params=pltpu.CompilerParams(
            dimension_semantics=("arbitrary",),
            vmem_limit_bytes=_VMEM_LIMIT),
    )(a_packed, w_packed, fold, gamma, beta)


# ----------------------------------------------------------------------------
# Kernel 3: layers 3 + 4 + 5 (+ Sigmoid) fused; activations stay in VMEM.
# ----------------------------------------------------------------------------
# Tap (kh, kw) of a pad-1 / stride-2 / 4x4 conv reads the input at original
# position (2i + kh - 1, 2j + kw - 1): row parity = (kh + 1) % 2, and in the
# zero-padded parity quadrant the slice start is {0, 1, 1, 2}[kh].
_TAP_PARITY = (1, 0, 1, 0)
_TAP_START = (0, 1, 1, 2)


def _tail_fused_kernel(p3_ref, w3_ref, g3_ref, b3_ref, w4_ref, g4_ref, b4_ref,
                       w5_ref, o_ref, quad_ref, *, n_batch):
    c4 = w4_ref.shape[2]

    # --- layer 3: conv + BN + LeakyReLU (rows pre-ordered by output quadrant).
    acc3 = jnp.dot(p3_ref[...], w3_ref[...], preferred_element_type=jnp.float32)
    acc3 = _batchnorm_rows(acc3, g3_ref[...], b3_ref[...])
    a3 = _leaky_relu(acc3).astype(jnp.bfloat16)

    # Scatter into the zero-padded parity-quadrant scratch (4, N, 6, 6, C3);
    # the 1-wide zero border doubles as layer 4's spatial padding.
    quad_ref[...] = jnp.zeros(quad_ref.shape, quad_ref.dtype)
    for q in range(4):
        for bi in range(n_batch):
            for a in range(4):
                r0 = ((q * n_batch + bi) * 4 + a) * 4
                quad_ref[q, bi, 1 + a, 1:5, :] = a3[r0:r0 + 4, :]

    # --- layer 4: 4x4 stride-2 conv as 16 static-slice matmuls (no strides).
    acc4 = jnp.zeros((n_batch * 16, c4), jnp.float32)
    for kh in range(4):
        for kw in range(4):
            q = _TAP_PARITY[kh] * 2 + _TAP_PARITY[kw]
            sh, sw = _TAP_START[kh], _TAP_START[kw]
            rows = []
            for bi in range(n_batch):
                for i in range(4):
                    rows.append(quad_ref[q, bi, sh + i, sw:sw + 4, :])
            tap = jnp.concatenate(rows, axis=0)                # (N*16, C3) bf16
            acc4 = acc4 + jnp.dot(tap, w4_ref[kh * 4 + kw],
                                  preferred_element_type=jnp.float32)
    acc4 = _batchnorm_rows(acc4, g4_ref[...], b4_ref[...])
    a4 = _leaky_relu(acc4)
    a4 = a4.astype(jnp.bfloat16).astype(jnp.float32)   # bf16 operand rounding

    # --- layer 5 + Sigmoid: 4x4 valid conv to one unit == multiply-reduce.
    w5 = w5_ref[...].astype(jnp.float32)               # (16, C4)
    logits = []
    for bi in range(n_batch):
        blk = a4[bi * 16:(bi + 1) * 16, :] * w5
        col = jnp.sum(blk, axis=1, keepdims=True)                 # (16, 1)
        logits.append(jnp.sum(col, axis=0, keepdims=True))        # (1, 1)
    logit = jnp.concatenate(logits, axis=0)                       # (N, 1)
    o_ref[...] = 1.0 / (1.0 + jnp.exp(-logit))


def tail_fused(p3q, w3, g3, b3, w4t, g4, b4, w5, *, n_batch):
    m3, k3 = p3q.shape
    c3 = w3.shape[1]
    c4 = w4t.shape[2]
    assert m3 == n_batch * 64 and w4t.shape[0] == 16 and w5.shape == (16, c4)
    kern = functools.partial(_tail_fused_kernel, n_batch=n_batch)
    return pl.pallas_call(
        kern,
        out_shape=jax.ShapeDtypeStruct((n_batch, 1), jnp.float32),
        grid=(1,),
        in_specs=[
            pl.BlockSpec((m3, k3), lambda i: (0, 0)),
            pl.BlockSpec((k3, c3), lambda i: (0, 0)),
            pl.BlockSpec((1, c3), lambda i: (0, 0)),
            pl.BlockSpec((1, c3), lambda i: (0, 0)),
            pl.BlockSpec((16, c3, c4), lambda i: (0, 0, 0)),
            pl.BlockSpec((1, c4), lambda i: (0, 0)),
            pl.BlockSpec((1, c4), lambda i: (0, 0)),
            pl.BlockSpec((16, c4), lambda i: (0, 0)),
        ],
        out_specs=pl.BlockSpec((n_batch, 1), lambda i: (0, 0)),
        scratch_shapes=[pltpu.VMEM((4, n_batch, 6, 6, c3), jnp.bfloat16)],
        compiler_params=pltpu.CompilerParams(
            dimension_semantics=("arbitrary",),
            vmem_limit_bytes=_VMEM_LIMIT),
    )(p3q, w3, g3, b3, w4t, g4, b4, w5)


# ----------------------------------------------------------------------------
# Plain-JAX glue: im2col patch extraction (padding / strided slicing only)
# ----------------------------------------------------------------------------
def extract_patches(x_nhwc, k, stride, pad):
    n, h, w, c = x_nhwc.shape
    xp = jnp.pad(x_nhwc, ((0, 0), (pad, pad), (pad, pad), (0, 0)))
    ho = (h + 2 * pad - k) // stride + 1
    wo = (w + 2 * pad - k) // stride + 1
    cols = []
    for kh in range(k):
        for kw in range(k):
            cols.append(xp[:, kh:kh + stride * ho:stride,
                           kw:kw + stride * wo:stride, :])
    patches = jnp.concatenate(cols, axis=-1)            # (N, Ho, Wo, k*k*C)
    return patches.reshape(n * ho * wo, k * k * c), (n, ho, wo)


# ----------------------------------------------------------------------------
# Discriminator forward
# ----------------------------------------------------------------------------
def discriminator_forward(x_nchw, params):
    """x_nchw: (N, 3, 64, 64). Returns (N, 1) sigmoid probabilities."""
    n = x_nchw.shape[0]
    x = jnp.transpose(x_nchw, (0, 2, 3, 1)).astype(jnp.bfloat16)    # NHWC bf16

    # layer 1: conv + LeakyReLU (lane-dense packed input/output)
    p1, (_, ho, wo) = extract_patches(x, 4, 2, 1)                   # 64 -> 32
    k1 = p1.shape[1]
    r1 = params["w1p"].shape[0] // k1
    c1 = params["w1p"].shape[1] // r1
    assert p1.shape[0] % r1 == 0
    y1 = conv_leaky(p1.reshape(p1.shape[0] // r1, r1 * k1), params["w1p"])
    x1 = y1.reshape(n, ho, wo, c1)

    # layer 2: conv + BatchNorm(batch stats) + LeakyReLU (lane-dense packed)
    p2, (_, ho, wo) = extract_patches(x1, 4, 2, 1)                  # 32 -> 16
    k2 = p2.shape[1]
    r2 = params["w2p"].shape[0] // k2
    c2 = params["w2p"].shape[1] // r2
    assert p2.shape[0] % r2 == 0
    y2 = conv_bn_leaky(p2.reshape(p2.shape[0] // r2, r2 * k2), params["w2p"],
                       params["fold2"], params["g2"], params["b2"], groups=r2)
    x2 = y2.reshape(n, ho, wo, c2)

    # layers 3 + 4 + 5 (+ Sigmoid) fused; layer-3/4 activations stay in VMEM.
    p3, (_, ho, wo) = extract_patches(x2, 4, 2, 1)                  # 16 -> 8
    assert (ho, wo) == (8, 8), "fused tail assumes the DCGAN 64x64 geometry"
    k3 = p3.shape[1]
    # Reorder rows by layer-3 output parity quadrant: (pi, pj, n, h//2, w//2).
    p3q = (p3.reshape(n, ho // 2, 2, wo // 2, 2, k3)
              .transpose(2, 4, 0, 1, 3, 5)
              .reshape(4 * n * (ho // 2) * (wo // 2), k3))
    return tail_fused(p3q, params["w3"], params["g3"], params["b3"],
                      params["w4t"], params["g4"], params["b4"],
                      params["w5"], n_batch=n)


# ----------------------------------------------------------------------------
# Parameter preparation (done once; no per-forward weight munging)
# ----------------------------------------------------------------------------
def _block_diag_pack(w, r):
    """(K, C) -> (r*K, r*C) block-diagonal: lane-dense packed matmul weights."""
    k, c = w.shape
    if r == 1:
        return w
    eye = jnp.eye(r, dtype=w.dtype)
    return (eye[:, None, :, None] * w[None, :, None, :]).reshape(r * k, r * c)


def make_params(key, base=16, output_size=1):
    """Deterministic synthetic weights (DCGAN-style N(0, 0.02) init)."""
    assert output_size == 1, "fused tail kernel assumes a single output unit"
    assert 128 % base == 0 and 128 % (2 * base) == 0
    chans = [(3, base), (base, 2 * base), (2 * base, 4 * base),
             (4 * base, 8 * base), (8 * base, output_size)]
    torch_weights = []
    for cin, cout in chans:
        key, sub = jax.random.split(key)
        torch_weights.append(
            0.02 * jax.random.normal(sub, (cout, cin, 4, 4), jnp.float32))

    def to_mat(w):   # OIHW -> (kh*kw*cin, cout), matching im2col column order
        return jnp.transpose(w, (2, 3, 1, 0)).reshape(-1, w.shape[0])

    c1, c2, c3, c4 = base, 2 * base, 4 * base, 8 * base
    r1, r2 = 128 // c1, 128 // c2

    params = {
        "w1p": _block_diag_pack(to_mat(torch_weights[0]), r1).astype(jnp.bfloat16),
        "w2p": _block_diag_pack(to_mat(torch_weights[1]), r2).astype(jnp.bfloat16),
        "fold2": jnp.tile(jnp.eye(c2, dtype=jnp.float32), (r2, r2)),
        "g2": jnp.tile(jnp.ones((1, c2), jnp.float32), (1, r2)),
        "b2": jnp.tile(jnp.zeros((1, c2), jnp.float32), (1, r2)),
        "w3": to_mat(torch_weights[2]).astype(jnp.bfloat16),
        "g3": jnp.ones((1, c3), jnp.float32),
        "b3": jnp.zeros((1, c3), jnp.float32),
        "w4t": jnp.transpose(torch_weights[3], (2, 3, 1, 0))
                  .reshape(16, c3, c4).astype(jnp.bfloat16),
        "g4": jnp.ones((1, c4), jnp.float32),
        "b4": jnp.zeros((1, c4), jnp.float32),
        "w5": jnp.transpose(torch_weights[4][0], (1, 2, 0))
                 .reshape(16, c4).astype(jnp.bfloat16),
    }
    return params, torch_weights


# ----------------------------------------------------------------------------
# Pure-JAX reference (lax conv, NCHW) with the same mixed-precision policy.
# ----------------------------------------------------------------------------
_LAYER_CFG = [
    (2, 1, False, "leaky"),
    (2, 1, True, "leaky"),
    (2, 1, True, "leaky"),
    (2, 1, True, "leaky"),
    (1, 0, False, "sigmoid"),
]


def reference_forward(x_nchw, torch_weights):
    h = x_nchw.astype(jnp.float32)
    for (stride, pad, use_bn, act), w in zip(_LAYER_CFG, torch_weights):
        h = jax.lax.conv_general_dilated(
            h.astype(jnp.bfloat16), w.astype(jnp.bfloat16),
            window_strides=(stride, stride),
            padding=[(pad, pad), (pad, pad)],
            dimension_numbers=("NCHW", "OIHW", "NCHW"),
            preferred_element_type=jnp.float32)
        if use_bn:
            mean = jnp.mean(h, axis=(0, 2, 3), keepdims=True)
            var = jnp.mean((h - mean) ** 2, axis=(0, 2, 3), keepdims=True)
            h = (h - mean) * jax.lax.rsqrt(var + _EPS)
        if act == "leaky":
            h = jnp.where(h > 0, h, _LEAK * h)
        else:
            h = 1.0 / (1.0 + jnp.exp(-h))
    return h.reshape(h.shape[0], -1)


if __name__ == "__main__":
    key = jax.random.PRNGKey(0)
    k_x, k_w = jax.random.split(key)

    # Small config: batch=2, base filter count=16; spatial must be 64x64 for
    # the DCGAN discriminator geometry (64 -> 32 -> 16 -> 8 -> 4 -> 1).
    x = jax.random.normal(k_x, (2, 3, 64, 64), jnp.float32)
    params, torch_weights = make_params(k_w, base=16, output_size=1)

    fwd = jax.jit(discriminator_forward)
    out = jax.block_until_ready(fwd(x, params))
    assert out.shape == (2, 1), out.shape

    ref = jax.block_until_ready(reference_forward(x, torch_weights))
    np.testing.assert_allclose(np.asarray(out), np.asarray(ref),
                               rtol=2e-3, atol=2e-3)

    print("KERNEL_OK")
</pallas_src>

<mosaic_0001>
module attributes {stable_mosaic.version = 11 : i64} {
  func.func @_conv_leaky_kernel(%arg0: i32, %arg1: memref<64x384xbf16, #tpu.memory_space<vmem>>, %arg2: memref<384x128xbf16, #tpu.memory_space<vmem>>, %arg3: memref<64x128xbf16, #tpu.memory_space<vmem>>) attributes {dimension_semantics = [#tpu.dimension_semantics<parallel>], iteration_bounds = array<i64: 4>, scalar_prefetch = 0 : i64, scratch_operands = 0 : i64, tpu.core_type = #tpu.core_type<tc>, window_params = [{transform_indices = @transform_0, window_bounds = array<i64: 64, 384>}, {pipeline_mode = #tpu.pipeline_mode<synchronous>, transform_indices = @transform_1, window_bounds = array<i64: 384, 128>}, {transform_indices = @transform_2, window_bounds = array<i64: 64, 128>}]} {
    %c0 = arith.constant 0 : index
    %c0_0 = arith.constant 0 : index
    %0 = vector.load %arg1[%c0, %c0_0] : memref<64x384xbf16, #tpu.memory_space<vmem>>, vector<64x384xbf16>
    %c0_1 = arith.constant 0 : index
    %c0_2 = arith.constant 0 : index
    %1 = vector.load %arg2[%c0_1, %c0_2] : memref<384x128xbf16, #tpu.memory_space<vmem>>, vector<384x128xbf16>
    %cst = arith.constant dense<0.000000e+00> : vector<64x128xf32>
    %2 = tpu.matmul %0, %1, %cst {dimension_numbers = #tpu.dot_dimension_numbers<[1], [0], [0], [1], [0, 0, 1, 1], [], []>} : vector<64x384xbf16>, vector<384x128xbf16>, vector<64x128xf32> -> vector<64x128xf32>
    %cst_3 = arith.constant 0.000000e+00 : f32
    %3 = vector.broadcast %cst_3 : f32 to vector<64x128xf32>
    %4 = arith.cmpf ogt, %2, %3 : vector<64x128xf32>
    %cst_4 = arith.constant 2.000000e-01 : f32
    %5 = vector.broadcast %cst_4 : f32 to vector<64x128xf32>
    %6 = arith.mulf %5, %2 : vector<64x128xf32>
    %7 = arith.select %4, %2, %6 : vector<64x128xi1>, vector<64x128xf32>
    %8 = arith.truncf %7 : vector<64x128xf32> to vector<64x128xbf16>
    %c0_5 = arith.constant 0 : index
    %c0_6 = arith.constant 0 : index
    %9 = vector.load %arg3[%c0_5, %c0_6] : memref<64x128xbf16, #tpu.memory_space<vmem>>, vector<64x128xbf16>
    tpu.vector_store %arg3[%c0_5, %c0_6], %8 {strides = array<i32>} : memref<64x128xbf16, #tpu.memory_space<vmem>>, vector<64x128xbf16>,
    return
  }
  func.func @transform_0(%arg0: i32) -> (i32, i32) {
    %c0_i32 = arith.constant 0 : i32
    %c0_i32_0 = arith.constant 0 : i32
    return %arg0, %c0_i32 : i32, i32
  }
  func.func @transform_1(%arg0: i32) -> (i32, i32) {
    %c0_i32 = arith.constant 0 : i32
    %c0_i32_0 = arith.constant 0 : i32
    %c0_i32_1 = arith.constant 0 : i32
    return %c0_i32, %c0_i32_0 : i32, i32
  }
  func.func @transform_2(%arg0: i32) -> (i32, i32) {
    %c0_i32 = arith.constant 0 : i32
    %c0_i32_0 = arith.constant 0 : i32
    return %arg0, %c0_i32 : i32, i32
  }
}

module attributes {stable_mosaic.version = 11 : i64} {
  func.func @_conv_bn_leaky_kernel(%arg0: i32, %arg1: memref<128x1024xbf16, #tpu.memory_space<vmem>>, %arg2: memref<1024x128xbf16, #tpu.memory_space<vmem>>, %arg3: memref<128x128xf32, #tpu.memory_space<vmem>>, %arg4: memref<1x128xf32, #tpu.memory_space<vmem>>, %arg5: memref<1x128xf32, #tpu.memory_space<vmem>>, %arg6: memref<128x128xbf16, #tpu.memory_space<vmem>>) attributes {dimension_semantics = [#tpu.dimension_semantics<arbitrary>], iteration_bounds = array<i64: 1>, scalar_prefetch = 0 : i64, scratch_operands = 0 : i64, tpu.core_type = #tpu.core_type<tc>, window_params = [{pipeline_mode = #tpu.pipeline_mode<synchronous>, transform_indices = @transform_0, window_bounds = array<i64: 128, 1024>}, {pipeline_mode = #tpu.pipeline_mode<synchronous>, transform_indices = @transform_1, window_bounds = array<i64: 1024, 128>}, {pipeline_mode = #tpu.pipeline_mode<synchronous>, transform_indices = @transform_2, window_bounds = array<i64: 128, 128>}, {pipeline_mode = #tpu.pipeline_mode<synchronous>, transform_indices = @transform_3, window_bounds = array<i64: 1, 128>}, {pipeline_mode = #tpu.pipeline_mode<synchronous>, transform_indices = @transform_4, window_bounds = array<i64: 1, 128>}, {pipeline_mode = #tpu.pipeline_mode<synchronous>, transform_indices = @transform_5, window_bounds = array<i64: 128, 128>}]} {
    %c0 = arith.constant 0 : index
    %c0_0 = arith.constant 0 : index
    %0 = vector.load %arg1[%c0, %c0_0] : memref<128x1024xbf16, #tpu.memory_space<vmem>>, vector<128x1024xbf16>
    %c0_1 = arith.constant 0 : index
    %c0_2 = arith.constant 0 : index
    %1 = vector.load %arg2[%c0_1, %c0_2] : memref<1024x128xbf16, #tpu.memory_space<vmem>>, vector<1024x128xbf16>
    %cst = arith.constant dense<0.000000e+00> : vector<128x128xf32>
    %2 = tpu.matmul %0, %1, %cst {dimension_numbers = #tpu.dot_dimension_numbers<[1], [0], [0], [1], [0, 0, 1, 1], [], []>} : vector<128x1024xbf16>, vector<1024x128xbf16>, vector<128x128xf32> -> vector<128x128xf32>
    %cst_3 = arith.constant dense<0.000000e+00> : vector<128xf32>
    %3 = vector.multi_reduction <add>, %2, %cst_3 [0] : vector<128x128xf32> to vector<128xf32>
    %4 = vector.shape_cast %3 : vector<128xf32> to vector<1x128xf32>
    %5 = arith.mulf %2, %2 : vector<128x128xf32>
    %cst_4 = arith.constant dense<0.000000e+00> : vector<128xf32>
    %6 = vector.multi_reduction <add>, %5, %cst_4 [0] : vector<128x128xf32> to vector<128xf32>
    %7 = vector.shape_cast %6 : vector<128xf32> to vector<1x128xf32>
    %c0_5 = arith.constant 0 : index
    %c0_6 = arith.constant 0 : index
    %8 = vector.load %arg3[%c0_5, %c0_6] : memref<128x128xf32, #tpu.memory_space<vmem>>, vector<128x128xf32>
    %cst_7 = arith.constant dense<0.000000e+00> : vector<1x128xf32>
    %9 = tpu.matmul %4, %8, %cst_7 {dimension_numbers = #tpu.dot_dimension_numbers<[1], [0], [0], [1], [0, 0, 1, 1], [], []>, precision = #tpu.contract_precision<fp32>} : vector<1x128xf32>, vector<128x128xf32>, vector<1x128xf32> -> vector<1x128xf32>
    %c0_8 = arith.constant 0 : index
    %c0_9 = arith.constant 0 : index
    %10 = vector.load %arg3[%c0_8, %c0_9] : memref<128x128xf32, #tpu.memory_space<vmem>>, vector<128x128xf32>
    %cst_10 = arith.constant dense<0.000000e+00> : vector<1x128xf32>
    %11 = tpu.matmul %7, %10, %cst_10 {dimension_numbers = #tpu.dot_dimension_numbers<[1], [0], [0], [1], [0, 0, 1, 1], [], []>, precision = #tpu.contract_precision<fp32>} : vector<1x128xf32>, vector<128x128xf32>, vector<1x128xf32> -> vector<1x128xf32>
    %cst_11 = arith.constant 0.001953125 : f32
    %12 = vector.broadcast %cst_11 : f32 to vector<1x128xf32>
    %13 = arith.mulf %9, %12 : vector<1x128xf32>
    %cst_12 = arith.constant 0.001953125 : f32
    %14 = vector.broadcast %cst_12 : f32 to vector<1x128xf32>
    %15 = arith.mulf %11, %14 : vector<1x128xf32>
    %16 = arith.mulf %13, %13 : vector<1x128xf32>
    %17 = arith.subf %15, %16 : vector<1x128xf32>
    %cst_13 = arith.constant 9.99999974E-6 : f32
    %18 = vector.broadcast %cst_13 : f32 to vector<1x128xf32>
    %19 = arith.addf %17, %18 : vector<1x128xf32>
    %20 = math.rsqrt %19 : vector<1x128xf32>
    %21 = vector.broadcast %13 : vector<1x128xf32> to vector<128x128xf32>
    %22 = arith.subf %2, %21 : vector<128x128xf32>
    %c0_14 = arith.constant 0 : index
    %c0_15 = arith.constant 0 : index
    %23 = vector.load %arg4[%c0_14, %c0_15] : memref<1x128xf32, #tpu.memory_space<vmem>>, vector<1x128xf32>
    %24 = arith.mulf %20, %23 : vector<1x128xf32>
    %25 = vector.broadcast %24 : vector<1x128xf32> to vector<128x128xf32>
    %26 = arith.mulf %22, %25 : vector<128x128xf32>
    %c0_16 = arith.constant 0 : index
    %c0_17 = arith.constant 0 : index
    %27 = vector.load %arg5[%c0_16, %c0_17] : memref<1x128xf32, #tpu.memory_space<vmem>>, vector<1x128xf32>
    %28 = vector.broadcast %27 : vector<1x128xf32> to vector<128x128xf32>
    %29 = arith.addf %26, %28 : vector<128x128xf32>
    %cst_18 = arith.constant 0.000000e+00 : f32
    %30 = vector.broadcast %cst_18 : f32 to vector<128x128xf32>
    %31 = arith.cmpf ogt, %29, %30 : vector<128x128xf32>
    %cst_19 = arith.constant 2.000000e-01 : f32
    %32 = vector.broadcast %cst_19 : f32 to vector<128x128xf32>
    %33 = arith.mulf %32, %29 : vector<128x128xf32>
    %34 = arith.select %31, %29, %33 : vector<128x128xi1>, vector<128x128xf32>
    %35 = arith.truncf %34 : vector<128x128xf32> to vector<128x128xbf16>
    %c0_20 = arith.constant 0 : index
    %c0_21 = arith.constant 0 : index
    %36 = vector.load %arg6[%c0_20, %c0_21] : memref<128x128xbf16, #tpu.memory_space<vmem>>, vector<128x128xbf16>
    tpu.vector_store %arg6[%c0_20, %c0_21], %35 {strides = array<i32>} : memref<128x128xbf16, #tpu.memory_space<vmem>>, vector<128x128xbf16>,
    return
  }
  func.func @transform_0(%arg0: i32) -> (i32, i32) {
    %c0_i32 = arith.constant 0 : i32
    %c0_i32_0 = arith.constant 0 : i32
    %c0_i32_1 = arith.constant 0 : i32
    return %c0_i32, %c0_i32_0 : i32, i32
  }
  func.func @transform_1(%arg0: i32) -> (i32, i32) {
    %c0_i32 = arith.constant 0 : i32
    %c0_i32_0 = arith.constant 0 : i32
    %c0_i32_1 = arith.constant 0 : i32
    return %c0_i32, %c0_i32_0 : i32, i32
  }
  func.func @transform_2(%arg0: i32) -> (i32, i32) {
    %c0_i32 = arith.constant 0 : i32
    %c0_i32_0 = arith.constant 0 : i32
    %c0_i32_1 = arith.constant 0 : i32
    return %c0_i32, %c0_i32_0 : i32, i32
  }
  func.func @transform_3(%arg0: i32) -> (i32, i32) {
    %c0_i32 = arith.constant 0 : i32
    %c0_i32_0 = arith.constant 0 : i32
    %c0_i32_1 = arith.constant 0 : i32
    return %c0_i32, %c0_i32_0 : i32, i32
  }
  func.func @transform_4(%arg0: i32) -> (i32, i32) {
    %c0_i32 = arith.constant 0 : i32
    %c0_i32_0 = arith.constant 0 : i32
    %c0_i32_1 = arith.constant 0 : i32
    return %c0_i32, %c0_i32_0 : i32, i32
  }
  func.func @transform_5(%arg0: i32) -> (i32, i32) {
    %c0_i32 = arith.constant 0 : i32
    %c0_i32_0 = arith.constant 0 : i32
    %c0_i32_1 = arith.constant 0 : i32
    return %c0_i32, %c0_i32_0 : i32, i32
  }
}

module attributes {stable_mosaic.version = 11 : i64} {
  func.func @_tail_fused_kernel(%arg0: i32, %arg1: memref<128x512xbf16, #tpu.memory_space<vmem>>, %arg2: memref<512x64xbf16, #tpu.memory_space<vmem>>, %arg3: memref<1x64xf32, #tpu.memory_space<vmem>>, %arg4: memref<1x64xf32, #tpu.memory_space<vmem>>, %arg5: memref<16x64x128xbf16, #tpu.memory_space<vmem>>, %arg6: memref<1x128xf32, #tpu.memory_space<vmem>>, %arg7: memref<1x128xf32, #tpu.memory_space<vmem>>, %arg8: memref<16x128xbf16, #tpu.memory_space<vmem>>, %arg9: memref<2x1xf32, #tpu.memory_space<vmem>>, %arg10: memref<4x2x6x6x64xbf16, #tpu.memory_space<vmem>>) attributes {dimension_semantics = [#tpu.dimension_semantics<arbitrary>], iteration_bounds = array<i64: 1>, scalar_prefetch = 0 : i64, scratch_operands = 1 : i64, tpu.core_type = #tpu.core_type<tc>, window_params = [{pipeline_mode = #tpu.pipeline_mode<synchronous>, transform_indices = @transform_0, window_bounds = array<i64: 128, 512>}, {pipeline_mode = #tpu.pipeline_mode<synchronous>, transform_indices = @transform_1, window_bounds = array<i64: 512, 64>}, {pipeline_mode = #tpu.pipeline_mode<synchronous>, transform_indices = @transform_2, window_bounds = array<i64: 1, 64>}, {pipeline_mode = #tpu.pipeline_mode<synchronous>, transform_indices = @transform_3, window_bounds = array<i64: 1, 64>}, {pipeline_mode = #tpu.pipeline_mode<synchronous>, transform_indices = @transform_4, window_bounds = array<i64: 16, 64, 128>}, {pipeline_mode = #tpu.pipeline_mode<synchronous>, transform_indices = @transform_5, window_bounds = array<i64: 1, 128>}, {pipeline_mode = #tpu.pipeline_mode<synchronous>, transform_indices = @transform_6, window_bounds = array<i64: 1, 128>}, {pipeline_mode = #tpu.pipeline_mode<synchronous>, transform_indices = @transform_7, window_bounds = array<i64: 16, 128>}, {pipeline_mode = #tpu.pipeline_mode<synchronous>, transform_indices = @transform_8, window_bounds = array<i64: 2, 1>}]} {
    %c0 = arith.constant 0 : index
    %c0_0 = arith.constant 0 : index
    %0 = vector.load %arg1[%c0, %c0_0] : memref<128x512xbf16, #tpu.memory_space<vmem>>, vector<128x512xbf16>
    %c0_1 = arith.constant 0 : index
    %c0_2 = arith.constant 0 : index
    %1 = vector.load %arg2[%c0_1, %c0_2] : memref<512x64xbf16, #tpu.memory_space<vmem>>, vector<512x64xbf16>
    %cst = arith.constant dense<0.000000e+00> : vector<128x64xf32>
    %2 = tpu.matmul %0, %1, %cst {dimension_numbers = #tpu.dot_dimension_numbers<[1], [0], [0], [1], [0, 0, 1, 1], [], []>} : vector<128x512xbf16>, vector<512x64xbf16>, vector<128x64xf32> -> vector<128x64xf32>
    %c0_3 = arith.constant 0 : index
    %c0_4 = arith.constant 0 : index
    %3 = vector.load %arg3[%c0_3, %c0_4] : memref<1x64xf32, #tpu.memory_space<vmem>>, vector<1x64xf32>
    %c0_5 = arith.constant 0 : index
    %c0_6 = arith.constant 0 : index
    %4 = vector.load %arg4[%c0_5, %c0_6] : memref<1x64xf32, #tpu.memory_space<vmem>>, vector<1x64xf32>
    %cst_7 = arith.constant dense<0.000000e+00> : vector<64xf32>
    %5 = vector.multi_reduction <add>, %2, %cst_7 [0] : vector<128x64xf32> to vector<64xf32>
    %6 = vector.shape_cast %5 : vector<64xf32> to vector<1x64xf32>
    %7 = arith.mulf %2, %2 : vector<128x64xf32>
    %cst_8 = arith.constant dense<0.000000e+00> : vector<64xf32>
    %8 = vector.multi_reduction <add>, %7, %cst_8 [0] : vector<128x64xf32> to vector<64xf32>
    %9 = vector.shape_cast %8 : vector<64xf32> to vector<1x64xf32>
    %cst_9 = arith.constant 7.812500e-03 : f32
    %10 = vector.broadcast %cst_9 : f32 to vector<1x64xf32>
    %11 = arith.mulf %6, %10 : vector<1x64xf32>
    %cst_10 = arith.constant 7.812500e-03 : f32
    %12 = vector.broadcast %cst_10 : f32 to vector<1x64xf32>
    %13 = arith.mulf %9, %12 : vector<1x64xf32>
    %14 = arith.mulf %11, %11 : vector<1x64xf32>
    %15 = arith.subf %13, %14 : vector<1x64xf32>
    %cst_11 = arith.constant 9.99999974E-6 : f32
    %16 = vector.broadcast %cst_11 : f32 to vector<1x64xf32>
    %17 = arith.addf %15, %16 : vector<1x64xf32>
    %18 = math.rsqrt %17 : vector<1x64xf32>
    %19 = vector.broadcast %11 : vector<1x64xf32> to vector<128x64xf32>
    %20 = arith.subf %2, %19 : vector<128x64xf32>
    %21 = arith.mulf %18, %3 : vector<1x64xf32>
    %22 = vector.broadcast %21 : vector<1x64xf32> to vector<128x64xf32>
    %23 = arith.mulf %20, %22 : vector<128x64xf32>
    %24 = vector.broadcast %4 : vector<1x64xf32> to vector<128x64xf32>
    %25 = arith.addf %23, %24 : vector<128x64xf32>
    %cst_12 = arith.constant 0.000000e+00 : f32
    %26 = vector.broadcast %cst_12 : f32 to vector<128x64xf32>
    %27 = arith.cmpf ogt, %25, %26 : vector<128x64xf32>
    %cst_13 = arith.constant 2.000000e-01 : f32
    %28 = vector.broadcast %cst_13 : f32 to vector<128x64xf32>
    %29 = arith.mulf %28, %25 : vector<128x64xf32>
    %30 = arith.select %27, %25, %29 : vector<128x64xi1>, vector<128x64xf32>
    %31 = arith.truncf %30 : vector<128x64xf32> to vector<128x64xbf16>
    %cst_14 = arith.constant 0.000000e+00 : bf16
    %32 = vector.broadcast %cst_14 : bf16 to vector<4x2x6x6x64xbf16>
    %c0_15 = arith.constant 0 : index
    %c0_16 = arith.constant 0 : index
    %c0_17 = arith.constant 0 : index
    %c0_18 = arith.constant 0 : index
    %c0_19 = arith.constant 0 : index
    %33 = vector.load %arg10[%c0_15, %c0_16, %c0_17, %c0_18, %c0_19] : memref<4x2x6x6x64xbf16, #tpu.memory_space<vmem>>, vector<4x2x6x6x64xbf16>
    tpu.vector_store %arg10[%c0_15, %c0_16, %c0_17, %c0_18, %c0_19], %32 {strides = array<i32>} : memref<4x2x6x6x64xbf16, #tpu.memory_space<vmem>>, vector<4x2x6x6x64xbf16>,
    %34 = vector.extract_strided_slice %31 {offsets = [0, 0], sizes = [4, 64], strides = [1, 1]} : vector<128x64xbf16> to vector<4x64xbf16>
    %c0_20 = arith.constant 0 : index
    %c0_21 = arith.constant 0 : index
    %c1 = arith.constant 1 : index
    %c1_22 = arith.constant 1 : index
    %c0_23 = arith.constant 0 : index
    %35 = vector.load %arg10[%c0_20, %c0_21, %c1, %c1_22, %c0_23] : memref<4x2x6x6x64xbf16, #tpu.memory_space<vmem>>, vector<1x1x1x4x64xbf16>
    %36 = vector.shape_cast %35 : vector<1x1x1x4x64xbf16> to vector<4x64xbf16>
    %37 = vector.shape_cast %34 : vector<4x64xbf16> to vector<1x1x1x4x64xbf16>
    tpu.vector_store %arg10[%c0_20, %c0_21, %c1, %c1_22, %c0_23], %37 {strides = array<i32>} : memref<4x2x6x6x64xbf16, #tpu.memory_space<vmem>>, vector<1x1x1x4x64xbf16>,
    %38 = vector.extract_strided_slice %31 {offsets = [4, 0], sizes = [4, 64], strides = [1, 1]} : vector<128x64xbf16> to vector<4x64xbf16>
    %c0_24 = arith.constant 0 : index
    %c0_25 = arith.constant 0 : index
    %c2 = arith.constant 2 : index
    %c1_26 = arith.constant 1 : index
    %c0_27 = arith.constant 0 : index
    %39 = vector.load %arg10[%c0_24, %c0_25, %c2, %c1_26, %c0_27] : memref<4x2x6x6x64xbf16, #tpu.memory_space<vmem>>, vector<1x1x1x4x64xbf16>
    %40 = vector.shape_cast %39 : vector<1x1x1x4x64xbf16> to vector<4x64xbf16>
    %41 = vector.shape_cast %38 : vector<4x64xbf16> to vector<1x1x1x4x64xbf16>
    tpu.vector_store %arg10[%c0_24, %c0_25, %c2, %c1_26, %c0_27], %41 {strides = array<i32>} : memref<4x2x6x6x64xbf16, #tpu.memory_space<vmem>>, vector<1x1x1x4x64xbf16>,
    %42 = vector.extract_strided_slice %31 {offsets = [8, 0], sizes = [4, 64], strides = [1, 1]} : vector<128x64xbf16> to vector<4x64xbf16>
    %c0_28 = arith.constant 0 : index
    %c0_29 = arith.constant 0 : index
    %c3 = arith.constant 3 : index
    %c1_30 = arith.constant 1 : index
    %c0_31 = arith.constant 0 : index
    %43 = vector.load %arg10[%c0_28, %c0_29, %c3, %c1_30, %c0_31] : memref<4x2x6x6x64xbf16, #tpu.memory_space<vmem>>, vector<1x1x1x4x64xbf16>
    %44 = vector.shape_cast %43 : vector<1x1x1x4x64xbf16> to vector<4x64xbf16>
    %45 = vector.shape_cast %42 : vector<4x64xbf16> to vector<1x1x1x4x64xbf16>
    tpu.vector_store %arg10[%c0_28, %c0_29, %c3, %c1_30, %c0_31], %45 {strides = array<i32>} : memref<4x2x6x6x64xbf16, #tpu.memory_space<vmem>>, vector<1x1x1x4x64xbf16>,
    %46 = vector.extract_strided_slice %31 {offsets = [12, 0], sizes = [4, 64], strides = [1, 1]} : vector<128x64xbf16> to vector<4x64xbf16>
    %c0_32 = arith.constant 0 : index
    %c0_33 = arith.constant 0 : index
    %c4 = arith.constant 4 : index
    %c1_34 = arith.constant 1 : index
    %c0_35 = arith.constant 0 : index
    %47 = vector.load %arg10[%c0_32, %c0_33, %c4, %c1_34, %c0_35] : memref<4x2x6x6x64xbf16, #tpu.memory_space<vmem>>, vector<1x1x1x4x64xbf16>
    %48 = vector.shape_cast %47 : vector<1x1x1x4x64xbf16> to vector<4x64xbf16>
    %49 = vector.shape_cast %46 : vector<4x64xbf16> to vector<1x1x1x4x64xbf16>
    tpu.vector_store %arg10[%c0_32, %c0_33, %c4, %c1_34, %c0_35], %49 {strides = array<i32>} : memref<4x2x6x6x64xbf16, #tpu.memory_space<vmem>>, vector<1x1x1x4x64xbf16>,
    %50 = vector.extract_strided_slice %31 {offsets = [16, 0], sizes = [4, 64], strides = [1, 1]} : vector<128x64xbf16> to vector<4x64xbf16>
    %c0_36 = arith.constant 0 : index
    %c1_37 = arith.constant 1 : index
    %c1_38 = arith.constant 1 : index
    %c1_39 = arith.constant 1 : index
    %c0_40 = arith.constant 0 : index
    %51 = vector.load %arg10[%c0_36, %c1_37, %c1_38, %c1_39, %c0_40] : memref<4x2x6x6x64xbf16, #tpu.memory_space<vmem>>, vector<1x1x1x4x64xbf16>
    %52 = vector.shape_cast %51 : vector<1x1x1x4x64xbf16> to vector<4x64xbf16>
    %53 = vector.shape_cast %50 : vector<4x64xbf16> to vector<1x1x1x4x64xbf16>
    tpu.vector_store %arg10[%c0_36, %c1_37, %c1_38, %c1_39, %c0_40], %53 {strides = array<i32>} : memref<4x2x6x6x64xbf16, #tpu.memory_space<vmem>>, vector<1x1x1x4x64xbf16>,
    %54 = vector.extract_strided_slice %31 {offsets = [20, 0], sizes = [4, 64], strides = [1, 1]} : vector<128x64xbf16> to vector<4x64xbf16>
    %c0_41 = arith.constant 0 : index
    %c1_42 = arith.constant 1 : index
    %c2_43 = arith.constant 2 : index
    %c1_44 = arith.constant 1 : index
    %c0_45 = arith.constant 0 : index
    %55 = vector.load %arg10[%c0_41, %c1_42, %c2_43, %c1_44, %c0_45] : memref<4x2x6x6x64xbf16, #tpu.memory_space<vmem>>, vector<1x1x1x4x64xbf16>
    %56 = vector.shape_cast %55 : vector<1x1x1x4x64xbf16> to vector<4x64xbf16>
    %57 = vector.shape_cast %54 : vector<4x64xbf16> to vector<1x1x1x4x64xbf16>
    tpu.vector_store %arg10[%c0_41, %c1_42, %c2_43, %c1_44, %c0_45], %57 {strides = array<i32>} : memref<4x2x6x6x64xbf16, #tpu.memory_space<vmem>>, vector<1x1x1x4x64xbf16>,
    %58 = vector.extract_strided_slice %31 {offsets = [24, 0], sizes = [4, 64], strides = [1, 1]} : vector<128x64xbf16> to vector<4x64xbf16>
    %c0_46 = arith.constant 0 : index
    %c1_47 = arith.constant 1 : index
    %c3_48 = arith.constant 3 : index
    %c1_49 = arith.constant 1 : index
    %c0_50 = arith.constant 0 : index
    %59 = vector.load %arg10[%c0_46, %c1_47, %c3_48, %c1_49, %c0_50] : memref<4x2x6x6x64xbf16, #tpu.memory_space<vmem>>, vector<1x1x1x4x64xbf16>
    %60 = vector.shape_cast %59 : vector<1x1x1x4x64xbf16> to vector<4x64xbf16>
    %61 = vector.shape_cast %58 : vector<4x64xbf16> to vector<1x1x1x4x64xbf16>
    tpu.vector_store %arg10[%c0_46, %c1_47, %c3_48, %c1_49, %c0_50], %61 {strides = array<i32>} : memref<4x2x6x6x64xbf16, #tpu.memory_space<vmem>>, vector<1x1x1x4x64xbf16>,
    %62 = vector.extract_strided_slice %31 {offsets = [28, 0], sizes = [4, 64], strides = [1, 1]} : vector<128x64xbf16> to vector<4x64xbf16>
    %c0_51 = arith.constant 0 : index
    %c1_52 = arith.constant 1 : index
    %c4_53 = arith.constant 4 : index
    %c1_54 = arith.constant 1 : index
    %c0_55 = arith.constant 0 : index
    %63 = vector.load %arg10[%c0_51, %c1_52, %c4_53, %c1_54, %c0_55] : memref<4x2x6x6x64xbf16, #tpu.memory_space<vmem>>, vector<1x1x1x4x64xbf16>
    %64 = vector.shape_cast %63 : vector<1x1x1x4x64xbf16> to vector<4x64xbf16>
    %65 = vector.shape_cast %62 : vector<4x64xbf16> to vector<1x1x1x4x64xbf16>
    tpu.vector_store %arg10[%c0_51, %c1_52, %c4_53, %c1_54, %c0_55], %65 {strides = array<i32>} : memref<4x2x6x6x64xbf16, #tpu.memory_space<vmem>>, vector<1x1x1x4x64xbf16>,
    %66 = vector.extract_strided_slice %31 {offsets = [32, 0], sizes = [4, 64], strides = [1, 1]} : vector<128x64xbf16> to vector<4x64xbf16>
    %c1_56 = arith.constant 1 : index
    %c0_57 = arith.constant 0 : index
    %c1_58 = arith.constant 1 : index
    %c1_59 = arith.constant 1 : index
    %c0_60 = arith.constant 0 : index
    %67 = vector.load %arg10[%c1_56, %c0_57, %c1_58, %c1_59, %c0_60] : memref<4x2x6x6x64xbf16, #tpu.memory_space<vmem>>, vector<1x1x1x4x64xbf16>
    %68 = vector.shape_cast %67 : vector<1x1x1x4x64xbf16> to vector<4x64xbf16>
    %69 = vector.shape_cast %66 : vector<4x64xbf16> to vector<1x1x1x4x64xbf16>
    tpu.vector_store %arg10[%c1_56, %c0_57, %c1_58, %c1_59, %c0_60], %69 {strides = array<i32>} : memref<4x2x6x6x64xbf16, #tpu.memory_space<vmem>>, vector<1x1x1x4x64xbf16>,
    %70 = vector.extract_strided_slice %31 {offsets = [36, 0], sizes = [4, 64], strides = [1, 1]} : vector<128x64xbf16> to vector<4x64xbf16>
    %c1_61 = arith.constant 1 : index
    %c0_62 = arith.constant 0 : index
    %c2_63 = arith.constant 2 : index
    %c1_64 = arith.constant 1 : index
    %c0_65 = arith.constant 0 : index
    %71 = vector.load %arg10[%c1_61, %c0_62, %c2_63, %c1_64, %c0_65] : memref<4x2x6x6x64xbf16, #tpu.memory_space<vmem>>, vector<1x1x1x4x64xbf16>
    %72 = vector.shape_cast %71 : vector<1x1x1x4x64xbf16> to vector<4x64xbf16>
    %73 = vector.shape_cast %70 : vector<4x64xbf16> to vector<1x1x1x4x64xbf16>
    tpu.vector_store %arg10[%c1_61, %c0_62, %c2_63, %c1_64, %c0_65], %73 {strides = array<i32>} : memref<4x2x6x6x64xbf16, #tpu.memory_space<vmem>>, vector<1x1x1x4x64xbf16>,
    %74 = vector.extract_strided_slice %31 {offsets = [40, 0], sizes = [4, 64], strides = [1, 1]} : vector<128x64xbf16> to vector<4x64xbf16>
    %c1_66 = arith.constant 1 : index
    %c0_67 = arith.constant 0 : index
    %c3_68 = arith.constant 3 : index
    %c1_69 = arith.constant 1 : index
    %c0_70 = arith.constant 0 : index
    %75 = vector.load %arg10[%c1_66, %c0_67, %c3_68, %c1_69, %c0_70] : memref<4x2x6x6x64xbf16, #tpu.memory_space<vmem>>, vector<1x1x1x4x64xbf16>
    %76 = vector.shape_cast %75 : vector<1x1x1x4x64xbf16> to vector<4x64xbf16>
    %77 = vector.shape_cast %74 : vector<4x64xbf16> to vector<1x1x1x4x64xbf16>
    tpu.vector_store %arg10[%c1_66, %c0_67, %c3_68, %c1_69, %c0_70], %77 {strides = array<i32>} : memref<4x2x6x6x64xbf16, #tpu.memory_space<vmem>>, vector<1x1x1x4x64xbf16>,
    %78 = vector.extract_strided_slice %31 {offsets = [44, 0], sizes = [4, 64], strides = [1, 1]} : vector<128x64xbf16> to vector<4x64xbf16>
    %c1_71 = arith.constant 1 : index
    %c0_72 = arith.constant 0 : index
    %c4_73 = arith.constant 4 : index
    %c1_74 = arith.constant 1 : index
    %c0_75 = arith.constant 0 : index
    %79 = vector.load %arg10[%c1_71, %c0_72, %c4_73, %c1_74, %c0_75] : memref<4x2x6x6x64xbf16, #tpu.memory_space<vmem>>, vector<1x1x1x4x64xbf16>
    %80 = vector.shape_cast %79 : vector<1x1x1x4x64xbf16> to vector<4x64xbf16>
    %81 = vector.shape_cast %78 : vector<4x64xbf16> to vector<1x1x1x4x64xbf16>
    tpu.vector_store %arg10[%c1_71, %c0_72, %c4_73, %c1_74, %c0_75], %81 {strides = array<i32>} : memref<4x2x6x6x64xbf16, #tpu.memory_space<vmem>>, vector<1x1x1x4x64xbf16>,
    %82 = vector.extract_strided_slice %31 {offsets = [48, 0], sizes = [4, 64], strides = [1, 1]} : vector<128x64xbf16> to vector<4x64xbf16>
    %c1_76 = arith.constant 1 : index
    %c1_77 = arith.constant 1 : index
    %c1_78 = arith.constant 1 : index
    %c1_79 = arith.constant 1 : index
    %c0_80 = arith.constant 0 : index
    %83 = vector.load %arg10[%c1_76, %c1_77, %c1_78, %c1_79, %c0_80] : memref<4x2x6x6x64xbf16, #tpu.memory_space<vmem>>, vector<1x1x1x4x64xbf16>
    %84 = vector.shape_cast %83 : vector<1x1x1x4x64xbf16> to vector<4x64xbf16>
    %85 = vector.shape_cast %82 : vector<4x64xbf16> to vector<1x1x1x4x64xbf16>
    tpu.vector_store %arg10[%c1_76, %c1_77, %c1_78, %c1_79, %c0_80], %85 {strides = array<i32>} : memref<4x2x6x6x64xbf16, #tpu.memory_space<vmem>>, vector<1x1x1x4x64xbf16>,
    %86 = vector.extract_strided_slice %31 {offsets = [52, 0], sizes = [4, 64], strides = [1, 1]} : vector<128x64xbf16> to vector<4x64xbf16>
    %c1_81 = arith.constant 1 : index
    %c1_82 = arith.constant 1 : index
    %c2_83 = arith.constant 2 : index
    %c1_84 = arith.constant 1 : index
    %c0_85 = arith.constant 0 : index
    %87 = vector.load %arg10[%c1_81, %c1_82, %c2_83, %c1_84, %c0_85] : memref<4x2x6x6x64xbf16, #tpu.memory_space<vmem>>, vector<1x1x1x4x64xbf16>
    %88 = vector.shape_cast %87 : vector<1x1x1x4x64xbf16> to vector<4x64xbf16>
    %89 = vector.shape_cast %86 : vector<4x64xbf16> to vector<1x1x1x4x64xbf16>
    tpu.vector_store %arg10[%c1_81, %c1_82, %c2_83, %c1_84, %c0_85], %89 {strides = array<i32>} : memref<4x2x6x6x64xbf16, #tpu.memory_space<vmem>>, vector<1x1x1x4x64xbf16>,
    %90 = vector.extract_strided_slice %31 {offsets = [56, 0], sizes = [4, 64], strides = [1, 1]} : vector<128x64xbf16> to vector<4x64xbf16>
    %c1_86 = arith.constant 1 : index
    %c1_87 = arith.constant 1 : index
    %c3_88 = arith.constant 3 : index
    %c1_89 = arith.constant 1 : index
    %c0_90 = arith.constant 0 : index
    %91 = vector.load %arg10[%c1_86, %c1_87, %c3_88, %c1_89, %c0_90] : memref<4x2x6x6x64xbf16, #tpu.memory_space<vmem>>, vector<1x1x1x4x64xbf16>
    %92 = vector.shape_cast %91 : vector<1x1x1x4x64xbf16> to vector<4x64xbf16>
    %93 = vector.shape_cast %90 : vector<4x64xbf16> to vector<1x1x1x4x64xbf16>
    tpu.vector_store %arg10[%c1_86, %c1_87, %c3_88, %c1_89, %c0_90], %93 {strides = array<i32>} : memref<4x2x6x6x64xbf16, #tpu.memory_space<vmem>>, vector<1x1x1x4x64xbf16>,
    %94 = vector.extract_strided_slice %31 {offsets = [60, 0], sizes = [4, 64], strides = [1, 1]} : vector<128x64xbf16> to vector<4x64xbf16>
    %c1_91 = arith.constant 1 : index
    %c1_92 = arith.constant 1 : index
    %c4_93 = arith.constant 4 : index
    %c1_94 = arith.constant 1 : index
    %c0_95 = arith.constant 0 : index
    %95 = vector.load %arg10[%c1_91, %c1_92, %c4_93, %c1_94, %c0_95] : memref<4x2x6x6x64xbf16, #tpu.memory_space<vmem>>, vector<1x1x1x4x64xbf16>
    %96 = vector.shape_cast %95 : vector<1x1x1x4x64xbf16> to vector<4x64xbf16>
    %97 = vector.shape_cast %94 : vector<4x64xbf16> to vector<1x1x1x4x64xbf16>
    tpu.vector_store %arg10[%c1_91, %c1_92, %c4_93, %c1_94, %c0_95], %97 {strides = array<i32>} : memref<4x2x6x6x64xbf16, #tpu.memory_space<vmem>>, vector<1x1x1x4x64xbf16>,
    %98 = vector.extract_strided_slice %31 {offsets = [64, 0], sizes = [4, 64], strides = [1, 1]} : vector<128x64xbf16> to vector<4x64xbf16>
    %c2_96 = arith.constant 2 : index
    %c0_97 = arith.constant 0 : index
    %c1_98 = arith.constant 1 : index
    %c1_99 = arith.constant 1 : index
    %c0_100 = arith.constant 0 : index
    %99 = vector.load %arg10[%c2_96, %c0_97, %c1_98, %c1_99, %c0_100] : memref<4x2x6x6x64xbf16, #tpu.memory_space<vmem>>, vector<1x1x1x4x64xbf16>
    %100 = vector.shape_cast %99 : vector<1x1x1x4x64xbf16> to vector<4x64xbf16>
    %101 = vector.shape_cast %98 : vector<4x64xbf16> to vector<1x1x1x4x64xbf16>
    tpu.vector_store %arg10[%c2_96, %c0_97, %c1_98, %c1_99, %c0_100], %101 {strides = array<i32>} : memref<4x2x6x6x64xbf16, #tpu.memory_space<vmem>>, vector<1x1x1x4x64xbf16>,
    %102 = vector.extract_strided_slice %31 {offsets = [68, 0], sizes = [4, 64], strides = [1, 1]} : vector<128x64xbf16> to vector<4x64xbf16>
    %c2_101 = arith.constant 2 : index
    %c0_102 = arith.constant 0 : index
    %c2_103 = arith.constant 2 : index
    %c1_104 = arith.constant 1 : index
    %c0_105 = arith.constant 0 : index
    %103 = vector.load %arg10[%c2_101, %c0_102, %c2_103, %c1_104, %c0_105] : memref<4x2x6x6x64xbf16, #tpu.memory_space<vmem>>, vector<1x1x1x4x64xbf16>
    %104 = vector.shape_cast %103 : vector<1x1x1x4x64xbf16> to vector<4x64xbf16>
    %105 = vector.shape_cast %102 : vector<4x64xbf16> to vector<1x1x1x4x64xbf16>
    tpu.vector_store %arg10[%c2_101, %c0_102, %c2_103, %c1_104, %c0_105], %105 {strides = array<i32>} : memref<4x2x6x6x64xbf16, #tpu.memory_space<vmem>>, vector<1x1x1x4x64xbf16>,
    %106 = vector.extract_strided_slice %31 {offsets = [72, 0], sizes = [4, 64], strides = [1, 1]} : vector<128x64xbf16> to vector<4x64xbf16>
    %c2_106 = arith.constant 2 : index
    %c0_107 = arith.constant 0 : index
    %c3_108 = arith.constant 3 : index
    %c1_109 = arith.constant 1 : index
    %c0_110 = arith.constant 0 : index
    %107 = vector.load %arg10[%c2_106, %c0_107, %c3_108, %c1_109, %c0_110] : memref<4x2x6x6x64xbf16, #tpu.memory_space<vmem>>, vector<1x1x1x4x64xbf16>
    %108 = vector.shape_cast %107 : vector<1x1x1x4x64xbf16> to vector<4x64xbf16>
    %109 = vector.shape_cast %106 : vector<4x64xbf16> to vector<1x1x1x4x64xbf16>
    tpu.vector_store %arg10[%c2_106, %c0_107, %c3_108, %c1_109, %c0_110], %109 {strides = array<i32>} : memref<4x2x6x6x64xbf16, #tpu.memory_space<vmem>>, vector<1x1x1x4x64xbf16>,
    %110 = vector.extract_strided_slice %31 {offsets = [76, 0], sizes = [4, 64], strides = [1, 1]} : vector<128x64xbf16> to vector<4x64xbf16>
    %c2_111 = arith.constant 2 : index
    %c0_112 = arith.constant 0 : index
    %c4_113 = arith.constant 4 : index
    %c1_114 = arith.constant 1 : index
    %c0_115 = arith.constant 0 : index
    %111 = vector.load %arg10[%c2_111, %c0_112, %c4_113, %c1_114, %c0_115] : memref<4x2x6x6x64xbf16, #tpu.memory_space<vmem>>, vector<1x1x1x4x64xbf16>
    %112 = vector.shape_cast %111 : vector<1x1x1x4x64xbf16> to vector<4x64xbf16>
    %113 = vector.shape_cast %110 : vector<4x64xbf16> to vector<1x1x1x4x64xbf16>
    tpu.vector_store %arg10[%c2_111, %c0_112, %c4_113, %c1_114, %c0_115], %113 {strides = array<i32>} : memref<4x2x6x6x64xbf16, #tpu.memory_space<vmem>>, vector<1x1x1x4x64xbf16>,
    %114 = vector.extract_strided_slice %31 {offsets = [80, 0], sizes = [4, 64], strides = [1, 1]} : vector<128x64xbf16> to vector<4x64xbf16>
    %c2_116 = arith.constant 2 : index
    %c1_117 = arith.constant 1 : index
    %c1_118 = arith.constant 1 : index
    %c1_119 = arith.constant 1 : index
    %c0_120 = arith.constant 0 : index
    %115 = vector.load %arg10[%c2_116, %c1_117, %c1_118, %c1_119, %c0_120] : memref<4x2x6x6x64xbf16, #tpu.memory_space<vmem>>, vector<1x1x1x4x64xbf16>
    %116 = vector.shape_cast %115 : vector<1x1x1x4x64xbf16> to vector<4x64xbf16>
    %117 = vector.shape_cast %114 : vector<4x64xbf16> to vector<1x1x1x4x64xbf16>
    tpu.vector_store %arg10[%c2_116, %c1_117, %c1_118, %c1_119, %c0_120], %117 {strides = array<i32>} : memref<4x2x6x6x64xbf16, #tpu.memory_space<vmem>>, vector<1x1x1x4x64xbf16>,
    %118 = vector.extract_strided_slice %31 {offsets = [84, 0], sizes = [4, 64], strides = [1, 1]} : vector<128x64xbf16> to vector<4x64xbf16>
    %c2_121 = arith.constant 2 : index
    %c1_122 = arith.constant 1 : index
    %c2_123 = arith.constant 2 : index
    %c1_124 = arith.constant 1 : index
    %c0_125 = arith.constant 0 : index
    %119 = vector.load %arg10[%c2_121, %c1_122, %c2_123, %c1_124, %c0_125] : memref<4x2x6x6x64xbf16, #tpu.memory_space<vmem>>, vector<1x1x1x4x64xbf16>
    %120 = vector.shape_cast %119 : vector<1x1x1x4x64xbf16> to vector<4x64xbf16>
    %121 = vector.shape_cast %118 : vector<4x64xbf16> to vector<1x1x1x4x64xbf16>
    tpu.vector_store %arg10[%c2_121, %c1_122, %c2_123, %c1_124, %c0_125], %121 {strides = array<i32>} : memref<4x2x6x6x64xbf16, #tpu.memory_space<vmem>>, vector<1x1x1x4x64xbf16>,
    %122 = vector.extract_strided_slice %31 {offsets = [88, 0], sizes = [4, 64], strides = [1, 1]} : vector<128x64xbf16> to vector<4x64xbf16>
    %c2_126 = arith.constant 2 : index
    %c1_127 = arith.constant 1 : index
    %c3_128 = arith.constant 3 : index
    %c1_129 = arith.constant 1 : index
    %c0_130 = arith.constant 0 : index
    %123 = vector.load %arg10[%c2_126, %c1_127, %c3_128, %c1_129, %c0_130] : memref<4x2x6x6x64xbf16, #tpu.memory_space<vmem>>, vector<1x1x1x4x64xbf16>
    %124 = vector.shape_cast %123 : vector<1x1x1x4x64xbf16> to vector<4x64xbf16>
    %125 = vector.shape_cast %122 : vector<4x64xbf16> to vector<1x1x1x4x64xbf16>
    tpu.vector_store %arg10[%c2_126, %c1_127, %c3_128, %c1_129, %c0_130], %125 {strides = array<i32>} : memref<4x2x6x6x64xbf16, #tpu.memory_space<vmem>>, vector<1x1x1x4x64xbf16>,
    %126 = vector.extract_strided_slice %31 {offsets = [92, 0], sizes = [4, 64], strides = [1, 1]} : vector<128x64xbf16> to vector<4x64xbf16>
    %c2_131 = arith.constant 2 : index
    %c1_132 = arith.constant 1 : index
    %c4_133 = arith.constant 4 : index
    %c1_134 = arith.constant 1 : index
    %c0_135 = arith.constant 0 : index
    %127 = vector.load %arg10[%c2_131, %c1_132, %c4_133, %c1_134, %c0_135] : memref<4x2x6x6x64xbf16, #tpu.memory_space<vmem>>, vector<1x1x1x4x64xbf16>
    %128 = vector.shape_cast %127 : vector<1x1x1x4x64xbf16> to vector<4x64xbf16>
    %129 = vector.shape_cast %126 : vector<4x64xbf16> to vector<1x1x1x4x64xbf16>
    tpu.vector_store %arg10[%c2_131, %c1_132, %c4_133, %c1_134, %c0_135], %129 {strides = array<i32>} : memref<4x2x6x6x64xbf16, #tpu.memory_space<vmem>>, vector<1x1x1x4x64xbf16>,
    %130 = vector.extract_strided_slice %31 {offsets = [96, 0], sizes = [4, 64], strides = [1, 1]} : vector<128x64xbf16> to vector<4x64xbf16>
    %c3_136 = arith.constant 3 : index
    %c0_137 = arith.constant 0 : index
    %c1_138 = arith.constant 1 : index
    %c1_139 = arith.constant 1 : index
    %c0_140 = arith.constant 0 : index
    %131 = vector.load %arg10[%c3_136, %c0_137, %c1_138, %c1_139, %c0_140] : memref<4x2x6x6x64xbf16, #tpu.memory_space<vmem>>, vector<1x1x1x4x64xbf16>
    %132 = vector.shape_cast %131 : vector<1x1x1x4x64xbf16> to vector<4x64xbf16>
    %133 = vector.shape_cast %130 : vector<4x64xbf16> to vector<1x1x1x4x64xbf16>
    tpu.vector_store %arg10[%c3_136, %c0_137, %c1_138, %c1_139, %c0_140], %133 {strides = array<i32>} : memref<4x2x6x6x64xbf16, #tpu.memory_space<vmem>>, vector<1x1x1x4x64xbf16>,
    %134 = vector.extract_strided_slice %31 {offsets = [100, 0], sizes = [4, 64], strides = [1, 1]} : vector<128x64xbf16> to vector<4x64xbf16>
    %c3_141 = arith.constant 3 : index
    %c0_142 = arith.constant 0 : index
    %c2_143 = arith.constant 2 : index
    %c1_144 = arith.constant 1 : index
    %c0_145 = arith.constant 0 : index
    %135 = vector.load %arg10[%c3_141, %c0_142, %c2_143, %c1_144, %c0_145] : memref<4x2x6x6x64xbf16, #tpu.memory_space<vmem>>, vector<1x1x1x4x64xbf16>
    %136 = vector.shape_cast %135 : vector<1x1x1x4x64xbf16> to vector<4x64xbf16>
    %137 = vector.shape_cast %134 : vector<4x64xbf16> to vector<1x1x1x4x64xbf16>
    tpu.vector_store %arg10[%c3_141, %c0_142, %c2_143, %c1_144, %c0_145], %137 {strides = array<i32>} : memref<4x2x6x6x64xbf16, #tpu.memory_space<vmem>>, vector<1x1x1x4x64xbf16>,
    %138 = vector.extract_strided_slice %31 {offsets = [104, 0], sizes = [4, 64], strides = [1, 1]} : vector<128x64xbf16> to vector<4x64xbf16>
    %c3_146 = arith.constant 3 : index
    %c0_147 = arith.constant 0 : index
    %c3_148 = arith.constant 3 : index
    %c1_149 = arith.constant 1 : index
    %c0_150 = arith.constant 0 : index
    %139 = vector.load %arg10[%c3_146, %c0_147, %c3_148, %c1_149, %c0_150] : memref<4x2x6x6x64xbf16, #tpu.memory_space<vmem>>, vector<1x1x1x4x64xbf16>
    %140 = vector.shape_cast %139 : vector<1x1x1x4x64xbf16> to vector<4x64xbf16>
    %141 = vector.shape_cast %138 : vector<4x64xbf16> to vector<1x1x1x4x64xbf16>
    tpu.vector_store %arg10[%c3_146, %c0_147, %c3_148, %c1_149, %c0_150], %141 {strides = array<i32>} : memref<4x2x6x6x64xbf16, #tpu.memory_space<vmem>>, vector<1x1x1x4x64xbf16>,
    %142 = vector.extract_strided_slice %31 {offsets = [108, 0], sizes = [4, 64], strides = [1, 1]} : vector<128x64xbf16> to vector<4x64xbf16>
    %c3_151 = arith.constant 3 : index
    %c0_152 = arith.constant 0 : index
    %c4_153 = arith.constant 4 : index
    %c1_154 = arith.constant 1 : index
    %c0_155 = arith.constant 0 : index
    %143 = vector.load %arg10[%c3_151, %c0_152, %c4_153, %c1_154, %c0_155] : memref<4x2x6x6x64xbf16, #tpu.memory_space<vmem>>, vector<1x1x1x4x64xbf16>
    %144 = vector.shape_cast %143 : vector<1x1x1x4x64xbf16> to vector<4x64xbf16>
    %145 = vector.shape_cast %142 : vector<4x64xbf16> to vector<1x1x1x4x64xbf16>
    tpu.vector_store %arg10[%c3_151, %c0_152, %c4_153, %c1_154, %c0_155], %145 {strides = array<i32>} : memref<4x2x6x6x64xbf16, #tpu.memory_space<vmem>>, vector<1x1x1x4x64xbf16>,
    %146 = vector.extract_strided_slice %31 {offsets = [112, 0], sizes = [4, 64], strides = [1, 1]} : vector<128x64xbf16> to vector<4x64xbf16>
    %c3_156 = arith.constant 3 : index
    %c1_157 = arith.constant 1 : index
    %c1_158 = arith.constant 1 : index
    %c1_159 = arith.constant 1 : index
    %c0_160 = arith.constant 0 : index
    %147 = vector.load %arg10[%c3_156, %c1_157, %c1_158, %c1_159, %c0_160] : memref<4x2x6x6x64xbf16, #tpu.memory_space<vmem>>, vector<1x1x1x4x64xbf16>
    %148 = vector.shape_cast %147 : vector<1x1x1x4x64xbf16> to vector<4x64xbf16>
    %149 = vector.shape_cast %146 : vector<4x64xbf16> to vector<1x1x1x4x64xbf16>
    tpu.vector_store %arg10[%c3_156, %c1_157, %c1_158, %c1_159, %c0_160], %149 {strides = array<i32>} : memref<4x2x6x6x64xbf16, #tpu.memory_space<vmem>>, vector<1x1x1x4x64xbf16>,
    %150 = vector.extract_strided_slice %31 {offsets = [116, 0], sizes = [4, 64], strides = [1, 1]} : vector<128x64xbf16> to vector<4x64xbf16>
    %c3_161 = arith.constant 3 : index
    %c1_162 = arith.constant 1 : index
    %c2_163 = arith.constant 2 : index
    %c1_164 = arith.constant 1 : index
    %c0_165 = arith.constant 0 : index
    %151 = vector.load %arg10[%c3_161, %c1_162, %c2_163, %c1_164, %c0_165] : memref<4x2x6x6x64xbf16, #tpu.memory_space<vmem>>, vector<1x1x1x4x64xbf16>
    %152 = vector.shape_cast %151 : vector<1x1x1x4x64xbf16> to vector<4x64xbf16>
    %153 = vector.shape_cast %150 : vector<4x64xbf16> to vector<1x1x1x4x64xbf16>
    tpu.vector_store %arg10[%c3_161, %c1_162, %c2_163, %c1_164, %c0_165], %153 {strides = array<i32>} : memref<4x2x6x6x64xbf16, #tpu.memory_space<vmem>>, vector<1x1x1x4x64xbf16>,
    %154 = vector.extract_strided_slice %31 {offsets = [120, 0], sizes = [4, 64], strides = [1, 1]} : vector<128x64xbf16> to vector<4x64xbf16>
    %c3_166 = arith.constant 3 : index
    %c1_167 = arith.constant 1 : index
    %c3_168 = arith.constant 3 : index
    %c1_169 = arith.constant 1 : index
    %c0_170 = arith.constant 0 : index
    %155 = vector.load %arg10[%c3_166, %c1_167, %c3_168, %c1_169, %c0_170] : memref<4x2x6x6x64xbf16, #tpu.memory_space<vmem>>, vector<1x1x1x4x64xbf16>
    %156 = vector.shape_cast %155 : vector<1x1x1x4x64xbf16> to vector<4x64xbf16>
    %157 = vector.shape_cast %154 : vector<4x64xbf16> to vector<1x1x1x4x64xbf16>
    tpu.vector_store %arg10[%c3_166, %c1_167, %c3_168, %c1_169, %c0_170], %157 {strides = array<i32>} : memref<4x2x6x6x64xbf16, #tpu.memory_space<vmem>>, vector<1x1x1x4x64xbf16>,
    %158 = vector.extract_strided_slice %31 {offsets = [124, 0], sizes = [4, 64], strides = [1, 1]} : vector<128x64xbf16> to vector<4x64xbf16>
    %c3_171 = arith.constant 3 : index
    %c1_172 = arith.constant 1 : index
    %c4_173 = arith.constant 4 : index
    %c1_174 = arith.constant 1 : index
    %c0_175 = arith.constant 0 : index
    %159 = vector.load %arg10[%c3_171, %c1_172, %c4_173, %c1_174, %c0_175] : memref<4x2x6x6x64xbf16, #tpu.memory_space<vmem>>, vector<1x1x1x4x64xbf16>
    %160 = vector.shape_cast %159 : vector<1x1x1x4x64xbf16> to vector<4x64xbf16>
    %161 = vector.shape_cast %158 : vector<4x64xbf16> to vector<1x1x1x4x64xbf16>
    tpu.vector_store %arg10[%c3_171, %c1_172, %c4_173, %c1_174, %c0_175], %161 {strides = array<i32>} : memref<4x2x6x6x64xbf16, #tpu.memory_space<vmem>>, vector<1x1x1x4x64xbf16>,
    %cst_176 = arith.constant 0.000000e+00 : f32
    %162 = vector.broadcast %cst_176 : f32 to vector<32x128xf32>
    %c3_177 = arith.constant 3 : index
    %c0_178 = arith.constant 0 : index
    %c0_179 = arith.constant 0 : index
    %c0_180 = arith.constant 0 : index
    %c0_181 = arith.constant 0 : index
    %163 = vector.load %arg10[%c3_177, %c0_178, %c0_179, %c0_180, %c0_181] : memref<4x2x6x6x64xbf16, #tpu.memory_space<vmem>>, vector<1x1x1x4x64xbf16>
    %164 = vector.shape_cast %163 : vector<1x1x1x4x64xbf16> to vector<4x64xbf16>
    %c3_182 = arith.constant 3 : index
    %c0_183 = arith.constant 0 : index
    %c1_184 = arith.constant 1 : index
    %c0_185 = arith.constant 0 : index
    %c0_186 = arith.constant 0 : index
    %165 = vector.load %arg10[%c3_182, %c0_183, %c1_184, %c0_185, %c0_186] : memref<4x2x6x6x64xbf16, #tpu.memory_space<vmem>>, vector<1x1x1x4x64xbf16>
    %166 = vector.shape_cast %165 : vector<1x1x1x4x64xbf16> to vector<4x64xbf16>
    %c3_187 = arith.constant 3 : index
    %c0_188 = arith.constant 0 : index
    %c2_189 = arith.constant 2 : index
    %c0_190 = arith.constant 0 : index
    %c0_191 = arith.constant 0 : index
    %167 = vector.load %arg10[%c3_187, %c0_188, %c2_189, %c0_190, %c0_191] : memref<4x2x6x6x64xbf16, #tpu.memory_space<vmem>>, vector<1x1x1x4x64xbf16>
    %168 = vector.shape_cast %167 : vector<1x1x1x4x64xbf16> to vector<4x64xbf16>
    %c3_192 = arith.constant 3 : index
    %c0_193 = arith.constant 0 : index
    %c3_194 = arith.constant 3 : index
    %c0_195 = arith.constant 0 : index
    %c0_196 = arith.constant 0 : index
    %169 = vector.load %arg10[%c3_192, %c0_193, %c3_194, %c0_195, %c0_196] : memref<4x2x6x6x64xbf16, #tpu.memory_space<vmem>>, vector<1x1x1x4x64xbf16>
    %170 = vector.shape_cast %169 : vector<1x1x1x4x64xbf16> to vector<4x64xbf16>
    %c3_197 = arith.constant 3 : index
    %c1_198 = arith.constant 1 : index
    %c0_199 = arith.constant 0 : index
    %c0_200 = arith.constant 0 : index
    %c0_201 = arith.constant 0 : index
    %171 = vector.load %arg10[%c3_197, %c1_198, %c0_199, %c0_200, %c0_201] : memref<4x2x6x6x64xbf16, #tpu.memory_space<vmem>>, vector<1x1x1x4x64xbf16>
    %172 = vector.shape_cast %171 : vector<1x1x1x4x64xbf16> to vector<4x64xbf16>
    %c3_202 = arith.constant 3 : index
    %c1_203 = arith.constant 1 : index
    %c1_204 = arith.constant 1 : index
    %c0_205 = arith.constant 0 : index
    %c0_206 = arith.constant 0 : index
    %173 = vector.load %arg10[%c3_202, %c1_203, %c1_204, %c0_205, %c0_206] : memref<4x2x6x6x64xbf16, #tpu.memory_space<vmem>>, vector<1x1x1x4x64xbf16>
    %174 = vector.shape_cast %173 : vector<1x1x1x4x64xbf16> to vector<4x64xbf16>
    %c3_207 = arith.constant 3 : index
    %c1_208 = arith.constant 1 : index
    %c2_209 = arith.constant 2 : index
    %c0_210 = arith.constant 0 : index
    %c0_211 = arith.constant 0 : index
    %175 = vector.load %arg10[%c3_207, %c1_208, %c2_209, %c0_210, %c0_211] : memref<4x2x6x6x64xbf16, #tpu.memory_space<vmem>>, vector<1x1x1x4x64xbf16>
    %176 = vector.shape_cast %175 : vector<1x1x1x4x64xbf16> to vector<4x64xbf16>
    %c3_212 = arith.constant 3 : index
    %c1_213 = arith.constant 1 : index
    %c3_214 = arith.constant 3 : index
    %c0_215 = arith.constant 0 : index
    %c0_216 = arith.constant 0 : index
    %177 = vector.load %arg10[%c3_212, %c1_213, %c3_214, %c0_215, %c0_216] : memref<4x2x6x6x64xbf16, #tpu.memory_space<vmem>>, vector<1x1x1x4x64xbf16>
    %178 = vector.shape_cast %177 : vector<1x1x1x4x64xbf16> to vector<4x64xbf16>
    %179 = tpu.concatenate %164, %166, %168, %170, %172, %174, %176, %178 in 0 : vector<4x64xbf16>, vector<4x64xbf16>, vector<4x64xbf16>, vector<4x64xbf16>, vector<4x64xbf16>, vector<4x64xbf16>, vector<4x64xbf16>, vector<4x64xbf16> -> vector<32x64xbf16>
    %c0_217 = arith.constant 0 : index
    %c0_218 = arith.constant 0 : index
    %c0_219 = arith.constant 0 : index
    %180 = vector.load %arg5[%c0_217, %c0_218, %c0_219] : memref<16x64x128xbf16, #tpu.memory_space<vmem>>, vector<1x64x128xbf16>
    %181 = vector.shape_cast %180 : vector<1x64x128xbf16> to vector<64x128xbf16>
    %cst_220 = arith.constant dense<0.000000e+00> : vector<32x128xf32>
    %182 = tpu.matmul %179, %181, %cst_220 {dimension_numbers = #tpu.dot_dimension_numbers<[1], [0], [0], [1], [0, 0, 1, 1], [], []>} : vector<32x64xbf16>, vector<64x128xbf16>, vector<32x128xf32> -> vector<32x128xf32>
    %183 = arith.addf %162, %182 : vector<32x128xf32>
    %c2_221 = arith.constant 2 : index
    %c0_222 = arith.constant 0 : index
    %c0_223 = arith.constant 0 : index
    %c1_224 = arith.constant 1 : index
    %c0_225 = arith.constant 0 : index
    %184 = vector.load %arg10[%c2_221, %c0_222, %c0_223, %c1_224, %c0_225] : memref<4x2x6x6x64xbf16, #tpu.memory_space<vmem>>, vector<1x1x1x4x64xbf16>
    %185 = vector.shape_cast %184 : vector<1x1x1x4x64xbf16> to vector<4x64xbf16>
    %c2_226 = arith.constant 2 : index
    %c0_227 = arith.constant 0 : index
    %c1_228 = arith.constant 1 : index
    %c1_229 = arith.constant 1 : index
    %c0_230 = arith.constant 0 : index
    %186 = vector.load %arg10[%c2_226, %c0_227, %c1_228, %c1_229, %c0_230] : memref<4x2x6x6x64xbf16, #tpu.memory_space<vmem>>, vector<1x1x1x4x64xbf16>
    %187 = vector.shape_cast %186 : vector<1x1x1x4x64xbf16> to vector<4x64xbf16>
    %c2_231 = arith.constant 2 : index
    %c0_232 = arith.constant 0 : index
    %c2_233 = arith.constant 2 : index
    %c1_234 = arith.constant 1 : index
    %c0_235 = arith.constant 0 : index
    %188 = vector.load %arg10[%c2_231, %c0_232, %c2_233, %c1_234, %c0_235] : memref<4x2x6x6x64xbf16, #tpu.memory_space<vmem>>, vector<1x1x1x4x64xbf16>
    %189 = vector.shape_cast %188 : vector<1x1x1x4x64xbf16> to vector<4x64xbf16>
    %c2_236 = arith.constant 2 : index
    %c0_237 = arith.constant 0 : index
    %c3_238 = arith.constant 3 : index
    %c1_239 = arith.constant 1 : index
    %c0_240 = arith.constant 0 : index
    %190 = vector.load %arg10[%c2_236, %c0_237, %c3_238, %c1_239, %c0_240] : memref<4x2x6x6x64xbf16, #tpu.memory_space<vmem>>, vector<1x1x1x4x64xbf16>
    %191 = vector.shape_cast %190 : vector<1x1x1x4x64xbf16> to vector<4x64xbf16>
    %c2_241 = arith.constant 2 : index
    %c1_242 = arith.constant 1 : index
    %c0_243 = arith.constant 0 : index
    %c1_244 = arith.constant 1 : index
    %c0_245 = arith.constant 0 : index
    %192 = vector.load %arg10[%c2_241, %c1_242, %c0_243, %c1_244, %c0_245] : memref<4x2x6x6x64xbf16, #tpu.memory_space<vmem>>, vector<1x1x1x4x64xbf16>
    %193 = vector.shape_cast %192 : vector<1x1x1x4x64xbf16> to vector<4x64xbf16>
    %c2_246 = arith.constant 2 : index
    %c1_247 = arith.constant 1 : index
    %c1_248 = arith.constant 1 : index
    %c1_249 = arith.constant 1 : index
    %c0_250 = arith.constant 0 : index
    %194 = vector.load %arg10[%c2_246, %c1_247, %c1_248, %c1_249, %c0_250] : memref<4x2x6x6x64xbf16, #tpu.memory_space<vmem>>, vector<1x1x1x4x64xbf16>
    %195 = vector.shape_cast %194 : vector<1x1x1x4x64xbf16> to vector<4x64xbf16>
    %c2_251 = arith.constant 2 : index
    %c1_252 = arith.constant 1 : index
    %c2_253 = arith.constant 2 : index
    %c1_254 = arith.constant 1 : index
    %c0_255 = arith.constant 0 : index
    %196 = vector.load %arg10[%c2_251, %c1_252, %c2_253, %c1_254, %c0_255] : memref<4x2x6x6x64xbf16, #tpu.memory_space<vmem>>, vector<1x1x1x4x64xbf16>
    %197 = vector.shape_cast %196 : vector<1x1x1x4x64xbf16> to vector<4x64xbf16>
    %c2_256 = arith.constant 2 : index
    %c1_257 = arith.constant 1 : index
    %c3_258 = arith.constant 3 : index
    %c1_259 = arith.constant 1 : index
    %c0_260 = arith.constant 0 : index
    %198 = vector.load %arg10[%c2_256, %c1_257, %c3_258, %c1_259, %c0_260] : memref<4x2x6x6x64xbf16, #tpu.memory_space<vmem>>, vector<1x1x1x4x64xbf16>
    %199 = vector.shape_cast %198 : vector<1x1x1x4x64xbf16> to vector<4x64xbf16>
    %200 = tpu.concatenate %185, %187, %189, %191, %193, %195, %197, %199 in 0 : vector<4x64xbf16>, vector<4x64xbf16>, vector<4x64xbf16>, vector<4x64xbf16>, vector<4x64xbf16>, vector<4x64xbf16>, vector<4x64xbf16>, vector<4x64xbf16> -> vector<32x64xbf16>
    %c1_261 = arith.constant 1 : index
    %c0_262 = arith.constant 0 : index
    %c0_263 = arith.constant 0 : index
    %201 = vector.load %arg5[%c1_261, %c0_262, %c0_263] : memref<16x64x128xbf16, #tpu.memory_space<vmem>>, vector<1x64x128xbf16>
    %202 = vector.shape_cast %201 : vector<1x64x128xbf16> to vector<64x128xbf16>
    %cst_264 = arith.constant dense<0.000000e+00> : vector<32x128xf32>
    %203 = tpu.matmul %200, %202, %cst_264 {dimension_numbers = #tpu.dot_dimension_numbers<[1], [0], [0], [1], [0, 0, 1, 1], [], []>} : vector<32x64xbf16>, vector<64x128xbf16>, vector<32x128xf32> -> vector<32x128xf32>
    %204 = arith.addf %183, %203 : vector<32x128xf32>
    %c3_265 = arith.constant 3 : index
    %c0_266 = arith.constant 0 : index
    %c0_267 = arith.constant 0 : index
    %c1_268 = arith.constant 1 : index
    %c0_269 = arith.constant 0 : index
    %205 = vector.load %arg10[%c3_265, %c0_266, %c0_267, %c1_268, %c0_269] : memref<4x2x6x6x64xbf16, #tpu.memory_space<vmem>>, vector<1x1x1x4x64xbf16>
    %206 = vector.shape_cast %205 : vector<1x1x1x4x64xbf16> to vector<4x64xbf16>
    %c3_270 = arith.constant 3 : index
    %c0_271 = arith.constant 0 : index
    %c1_272 = arith.constant 1 : index
    %c1_273 = arith.constant 1 : index
    %c0_274 = arith.constant 0 : index
    %207 = vector.load %arg10[%c3_270, %c0_271, %c1_272, %c1_273, %c0_274] : memref<4x2x6x6x64xbf16, #tpu.memory_space<vmem>>, vector<1x1x1x4x64xbf16>
    %208 = vector.shape_cast %207 : vector<1x1x1x4x64xbf16> to vector<4x64xbf16>
    %c3_275 = arith.constant 3 : index
    %c0_276 = arith.constant 0 : index
    %c2_277 = arith.constant 2 : index
    %c1_278 = arith.constant 1 : index
    %c0_279 = arith.constant 0 : index
    %209 = vector.load %arg10[%c3_275, %c0_276, %c2_277, %c1_278, %c0_279] : memref<4x2x6x6x64xbf16, #tpu.memory_space<vmem>>, vector<1x1x1x4x64xbf16>
    %210 = vector.shape_cast %209 : vector<1x1x1x4x64xbf16> to vector<4x64xbf16>
    %c3_280 = arith.constant 3 : index
    %c0_281 = arith.constant 0 : index
    %c3_282 = arith.constant 3 : index
    %c1_283 = arith.constant 1 : index
    %c0_284 = arith.constant 0 : index
    %211 = vector.load %arg10[%c3_280, %c0_281, %c3_282, %c1_283, %c0_284] : memref<4x2x6x6x64xbf16, #tpu.memory_space<vmem>>, vector<1x1x1x4x64xbf16>
    %212 = vector.shape_cast %211 : vector<1x1x1x4x64xbf16> to vector<4x64xbf16>
    %c3_285 = arith.constant 3 : index
    %c1_286 = arith.constant 1 : index
    %c0_287 = arith.constant 0 : index
    %c1_288 = arith.constant 1 : index
    %c0_289 = arith.constant 0 : index
    %213 = vector.load %arg10[%c3_285, %c1_286, %c0_287, %c1_288, %c0_289] : memref<4x2x6x6x64xbf16, #tpu.memory_space<vmem>>, vector<1x1x1x4x64xbf16>
    %214 = vector.shape_cast %213 : vector<1x1x1x4x64xbf16> to vector<4x64xbf16>
    %c3_290 = arith.constant 3 : index
    %c1_291 = arith.constant 1 : index
    %c1_292 = arith.constant 1 : index
    %c1_293 = arith.constant 1 : index
    %c0_294 = arith.constant 0 : index
    %215 = vector.load %arg10[%c3_290, %c1_291, %c1_292, %c1_293, %c0_294] : memref<4x2x6x6x64xbf16, #tpu.memory_space<vmem>>, vector<1x1x1x4x64xbf16>
    %216 = vector.shape_cast %215 : vector<1x1x1x4x64xbf16> to vector<4x64xbf16>
    %c3_295 = arith.constant 3 : index
    %c1_296 = arith.constant 1 : index
    %c2_297 = arith.constant 2 : index
    %c1_298 = arith.constant 1 : index
    %c0_299 = arith.constant 0 : index
    %217 = vector.load %arg10[%c3_295, %c1_296, %c2_297, %c1_298, %c0_299] : memref<4x2x6x6x64xbf16, #tpu.memory_space<vmem>>, vector<1x1x1x4x64xbf16>
    %218 = vector.shape_cast %217 : vector<1x1x1x4x64xbf16> to vector<4x64xbf16>
    %c3_300 = arith.constant 3 : index
    %c1_301 = arith.constant 1 : index
    %c3_302 = arith.constant 3 : index
    %c1_303 = arith.constant 1 : index
    %c0_304 = arith.constant 0 : index
    %219 = vector.load %arg10[%c3_300, %c1_301, %c3_302, %c1_303, %c0_304] : memref<4x2x6x6x64xbf16, #tpu.memory_space<vmem>>, vector<1x1x1x4x64xbf16>
    %220 = vector.shape_cast %219 : vector<1x1x1x4x64xbf16> to vector<4x64xbf16>
    %221 = tpu.concatenate %206, %208, %210, %212, %214, %216, %218, %220 in 0 : vector<4x64xbf16>, vector<4x64xbf16>, vector<4x64xbf16>, vector<4x64xbf16>, vector<4x64xbf16>, vector<4x64xbf16>, vector<4x64xbf16>, vector<4x64xbf16> -> vector<32x64xbf16>
    %c2_305 = arith.constant 2 : index
    %c0_306 = arith.constant 0 : index
    %c0_307 = arith.constant 0 : index
    %222 = vector.load %arg5[%c2_305, %c0_306, %c0_307] : memref<16x64x128xbf16, #tpu.memory_space<vmem>>, vector<1x64x128xbf16>
    %223 = vector.shape_cast %222 : vector<1x64x128xbf16> to vector<64x128xbf16>
    %cst_308 = arith.constant dense<0.000000e+00> : vector<32x128xf32>
    %224 = tpu.matmul %221, %223, %cst_308 {dimension_numbers = #tpu.dot_dimension_numbers<[1], [0], [0], [1], [0, 0, 1, 1], [], []>} : vector<32x64xbf16>, vector<64x128xbf16>, vector<32x128xf32> -> vector<32x128xf32>
    %225 = arith.addf %204, %224 : vector<32x128xf32>
    %c2_309 = arith.constant 2 : index
    %c0_310 = arith.constant 0 : index
    %c0_311 = arith.constant 0 : index
    %c2_312 = arith.constant 2 : index
    %c0_313 = arith.constant 0 : index
    %226 = vector.load %arg10[%c2_309, %c0_310, %c0_311, %c2_312, %c0_313] : memref<4x2x6x6x64xbf16, #tpu.memory_space<vmem>>, vector<1x1x1x4x64xbf16>
    %227 = vector.shape_cast %226 : vector<1x1x1x4x64xbf16> to vector<4x64xbf16>
    %c2_314 = arith.constant 2 : index
    %c0_315 = arith.constant 0 : index
    %c1_316 = arith.constant 1 : index
    %c2_317 = arith.constant 2 : index
    %c0_318 = arith.constant 0 : index
    %228 = vector.load %arg10[%c2_314, %c0_315, %c1_316, %c2_317, %c0_318] : memref<4x2x6x6x64xbf16, #tpu.memory_space<vmem>>, vector<1x1x1x4x64xbf16>
    %229 = vector.shape_cast %228 : vector<1x1x1x4x64xbf16> to vector<4x64xbf16>
    %c2_319 = arith.constant 2 : index
    %c0_320 = arith.constant 0 : index
    %c2_321 = arith.constant 2 : index
    %c2_322 = arith.constant 2 : index
    %c0_323 = arith.constant 0 : index
    %230 = vector.load %arg10[%c2_319, %c0_320, %c2_321, %c2_322, %c0_323] : memref<4x2x6x6x64xbf16, #tpu.memory_space<vmem>>, vector<1x1x1x4x64xbf16>
    %231 = vector.shape_cast %230 : vector<1x1x1x4x64xbf16> to vector<4x64xbf16>
    %c2_324 = arith.constant 2 : index
    %c0_325 = arith.constant 0 : index
    %c3_326 = arith.constant 3 : index
    %c2_327 = arith.constant 2 : index
    %c0_328 = arith.constant 0 : index
    %232 = vector.load %arg10[%c2_324, %c0_325, %c3_326, %c2_327, %c0_328] : memref<4x2x6x6x64xbf16, #tpu.memory_space<vmem>>, vector<1x1x1x4x64xbf16>
    %233 = vector.shape_cast %232 : vector<1x1x1x4x64xbf16> to vector<4x64xbf16>
    %c2_329 = arith.constant 2 : index
    %c1_330 = arith.constant 1 : index
    %c0_331 = arith.constant 0 : index
    %c2_332 = arith.constant 2 : index
    %c0_333 = arith.constant 0 : index
    %234 = vector.load %arg10[%c2_329, %c1_330, %c0_331, %c2_332, %c0_333] : memref<4x2x6x6x64xbf16, #tpu.memory_space<vmem>>, vector<1x1x1x4x64xbf16>
    %235 = vector.shape_cast %234 : vector<1x1x1x4x64xbf16> to vector<4x64xbf16>
    %c2_334 = arith.constant 2 : index
    %c1_335 = arith.constant 1 : index
    %c1_336 = arith.constant 1 : index
    %c2_337 = arith.constant 2 : index
    %c0_338 = arith.constant 0 : index
    %236 = vector.load %arg10[%c2_334, %c1_335, %c1_336, %c2_337, %c0_338] : memref<4x2x6x6x64xbf16, #tpu.memory_space<vmem>>, vector<1x1x1x4x64xbf16>
    %237 = vector.shape_cast %236 : vector<1x1x1x4x64xbf16> to vector<4x64xbf16>
    %c2_339 = arith.constant 2 : index
    %c1_340 = arith.constant 1 : index
    %c2_341 = arith.constant 2 : index
    %c2_342 = arith.constant 2 : index
    %c0_343 = arith.constant 0 : index
    %238 = vector.load %arg10[%c2_339, %c1_340, %c2_341, %c2_342, %c0_343] : memref<4x2x6x6x64xbf16, #tpu.memory_space<vmem>>, vector<1x1x1x4x64xbf16>
    %239 = vector.shape_cast %238 : vector<1x1x1x4x64xbf16> to vector<4x64xbf16>
    %c2_344 = arith.constant 2 : index
    %c1_345 = arith.constant 1 : index
    %c3_346 = arith.constant 3 : index
    %c2_347 = arith.constant 2 : index
    %c0_348 = arith.constant 0 : index
    %240 = vector.load %arg10[%c2_344, %c1_345, %c3_346, %c2_347, %c0_348] : memref<4x2x6x6x64xbf16, #tpu.memory_space<vmem>>, vector<1x1x1x4x64xbf16>
    %241 = vector.shape_cast %240 : vector<1x1x1x4x64xbf16> to vector<4x64xbf16>
    %242 = tpu.concatenate %227, %229, %231, %233, %235, %237, %239, %241 in 0 : vector<4x64xbf16>, vector<4x64xbf16>, vector<4x64xbf16>, vector<4x64xbf16>, vector<4x64xbf16>, vector<4x64xbf16>, vector<4x64xbf16>, vector<4x64xbf16> -> vector<32x64xbf16>
    %c3_349 = arith.constant 3 : index
    %c0_350 = arith.constant 0 : index
    %c0_351 = arith.constant 0 : index
    %243 = vector.load %arg5[%c3_349, %c0_350, %c0_351] : memref<16x64x128xbf16, #tpu.memory_space<vmem>>, vector<1x64x128xbf16>
    %244 = vector.shape_cast %243 : vector<1x64x128xbf16> to vector<64x128xbf16>
    %cst_352 = arith.constant dense<0.000000e+00> : vector<32x128xf32>
    %245 = tpu.matmul %242, %244, %cst_352 {dimension_numbers = #tpu.dot_dimension_numbers<[1], [0], [0], [1], [0, 0, 1, 1], [], []>} : vector<32x64xbf16>, vector<64x128xbf16>, vector<32x128xf32> -> vector<32x128xf32>
    %246 = arith.addf %225, %245 : vector<32x128xf32>
    %c1_353 = arith.constant 1 : index
    %c0_354 = arith.constant 0 : index
    %c1_355 = arith.constant 1 : index
    %c0_356 = arith.constant 0 : index
    %c0_357 = arith.constant 0 : index
    %247 = vector.load %arg10[%c1_353, %c0_354, %c1_355, %c0_356, %c0_357] : memref<4x2x6x6x64xbf16, #tpu.memory_space<vmem>>, vector<1x1x1x4x64xbf16>
    %248 = vector.shape_cast %247 : vector<1x1x1x4x64xbf16> to vector<4x64xbf16>
    %c1_358 = arith.constant 1 : index
    %c0_359 = arith.constant 0 : index
    %c2_360 = arith.constant 2 : index
    %c0_361 = arith.constant 0 : index
    %c0_362 = arith.constant 0 : index
    %249 = vector.load %arg10[%c1_358, %c0_359, %c2_360, %c0_361, %c0_362] : memref<4x2x6x6x64xbf16, #tpu.memory_space<vmem>>, vector<1x1x1x4x64xbf16>
    %250 = vector.shape_cast %249 : vector<1x1x1x4x64xbf16> to vector<4x64xbf16>
    %c1_363 = arith.constant 1 : index
    %c0_364 = arith.constant 0 : index
    %c3_365 = arith.constant 3 : index
    %c0_366 = arith.constant 0 : index
    %c0_367 = arith.constant 0 : index
    %251 = vector.load %arg10[%c1_363, %c0_364, %c3_365, %c0_366, %c0_367] : memref<4x2x6x6x64xbf16, #tpu.memory_space<vmem>>, vector<1x1x1x4x64xbf16>
    %252 = vector.shape_cast %251 : vector<1x1x1x4x64xbf16> to vector<4x64xbf16>
    %c1_368 = arith.constant 1 : index
    %c0_369 = arith.constant 0 : index
    %c4_370 = arith.constant 4 : index
    %c0_371 = arith.constant 0 : index
    %c0_372 = arith.constant 0 : index
    %253 = vector.load %arg10[%c1_368, %c0_369, %c4_370, %c0_371, %c0_372] : memref<4x2x6x6x64xbf16, #tpu.memory_space<vmem>>, vector<1x1x1x4x64xbf16>
    %254 = vector.shape_cast %253 : vector<1x1x1x4x64xbf16> to vector<4x64xbf16>
    %c1_373 = arith.constant 1 : index
    %c1_374 = arith.constant 1 : index
    %c1_375 = arith.constant 1 : index
    %c0_376 = arith.constant 0 : index
    %c0_377 = arith.constant 0 : index
    %255 = vector.load %arg10[%c1_373, %c1_374, %c1_375, %c0_376, %c0_377] : memref<4x2x6x6x64xbf16, #tpu.memory_space<vmem>>, vector<1x1x1x4x64xbf16>
    %256 = vector.shape_cast %255 : vector<1x1x1x4x64xbf16> to vector<4x64xbf16>
    %c1_378 = arith.constant 1 : index
    %c1_379 = arith.constant 1 : index
    %c2_380 = arith.constant 2 : index
    %c0_381 = arith.constant 0 : index
    %c0_382 = arith.constant 0 : index
    %257 = vector.load %arg10[%c1_378, %c1_379, %c2_380, %c0_381, %c0_382] : memref<4x2x6x6x64xbf16, #tpu.memory_space<vmem>>, vector<1x1x1x4x64xbf16>
    %258 = vector.shape_cast %257 : vector<1x1x1x4x64xbf16> to vector<4x64xbf16>
    %c1_383 = arith.constant 1 : index
    %c1_384 = arith.constant 1 : index
    %c3_385 = arith.constant 3 : index
    %c0_386 = arith.constant 0 : index
    %c0_387 = arith.constant 0 : index
    %259 = vector.load %arg10[%c1_383, %c1_384, %c3_385, %c0_386, %c0_387] : memref<4x2x6x6x64xbf16, #tpu.memory_space<vmem>>, vector<1x1x1x4x64xbf16>
    %260 = vector.shape_cast %259 : vector<1x1x1x4x64xbf16> to vector<4x64xbf16>
    %c1_388 = arith.constant 1 : index
    %c1_389 = arith.constant 1 : index
    %c4_390 = arith.constant 4 : index
    %c0_391 = arith.constant 0 : index
    %c0_392 = arith.constant 0 : index
    %261 = vector.load %arg10[%c1_388, %c1_389, %c4_390, %c0_391, %c0_392] : memref<4x2x6x6x64xbf16, #tpu.memory_space<vmem>>, vector<1x1x1x4x64xbf16>
    %262 = vector.shape_cast %261 : vector<1x1x1x4x64xbf16> to vector<4x64xbf16>
    %263 = tpu.concatenate %248, %250, %252, %254, %256, %258, %260, %262 in 0 : vector<4x64xbf16>, vector<4x64xbf16>, vector<4x64xbf16>, vector<4x64xbf16>, vector<4x64xbf16>, vector<4x64xbf16>, vector<4x64xbf16>, vector<4x64xbf16> -> vector<32x64xbf16>
    %c4_393 = arith.constant 4 : index
    %c0_394 = arith.constant 0 : index
    %c0_395 = arith.constant 0 : index
    %264 = vector.load %arg5[%c4_393, %c0_394, %c0_395] : memref<16x64x128xbf16, #tpu.memory_space<vmem>>, vector<1x64x128xbf16>
    %265 = vector.shape_cast %264 : vector<1x64x128xbf16> to vector<64x128xbf16>
    %cst_396 = arith.constant dense<0.000000e+00> : vector<32x128xf32>
    %266 = tpu.matmul %263, %265, %cst_396 {dimension_numbers = #tpu.dot_dimension_numbers<[1], [0], [0], [1], [0, 0, 1, 1], [], []>} : vector<32x64xbf16>, vector<64x128xbf16>, vector<32x128xf32> -> vector<32x128xf32>
    %267 = arith.addf %246, %266 : vector<32x128xf32>
    %c0_397 = arith.constant 0 : index
    %c0_398 = arith.constant 0 : index
    %c1_399 = arith.constant 1 : index
    %c1_400 = arith.constant 1 : index
    %c0_401 = arith.constant 0 : index
    %268 = vector.load %arg10[%c0_397, %c0_398, %c1_399, %c1_400, %c0_401] : memref<4x2x6x6x64xbf16, #tpu.memory_space<vmem>>, vector<1x1x1x4x64xbf16>
    %269 = vector.shape_cast %268 : vector<1x1x1x4x64xbf16> to vector<4x64xbf16>
    %c0_402 = arith.constant 0 : index
    %c0_403 = arith.constant 0 : index
    %c2_404 = arith.constant 2 : index
    %c1_405 = arith.constant 1 : index
    %c0_406 = arith.constant 0 : index
    %270 = vector.load %arg10[%c0_402, %c0_403, %c2_404, %c1_405, %c0_406] : memref<4x2x6x6x64xbf16, #tpu.memory_space<vmem>>, vector<1x1x1x4x64xbf16>
    %271 = vector.shape_cast %270 : vector<1x1x1x4x64xbf16> to vector<4x64xbf16>
    %c0_407 = arith.constant 0 : index
    %c0_408 = arith.constant 0 : index
    %c3_409 = arith.constant 3 : index
    %c1_410 = arith.constant 1 : index
    %c0_411 = arith.constant 0 : index
    %272 = vector.load %arg10[%c0_407, %c0_408, %c3_409, %c1_410, %c0_411] : memref<4x2x6x6x64xbf16, #tpu.memory_space<vmem>>, vector<1x1x1x4x64xbf16>
    %273 = vector.shape_cast %272 : vector<1x1x1x4x64xbf16> to vector<4x64xbf16>
    %c0_412 = arith.constant 0 : index
    %c0_413 = arith.constant 0 : index
    %c4_414 = arith.constant 4 : index
    %c1_415 = arith.constant 1 : index
    %c0_416 = arith.constant 0 : index
    %274 = vector.load %arg10[%c0_412, %c0_413, %c4_414, %c1_415, %c0_416] : memref<4x2x6x6x64xbf16, #tpu.memory_space<vmem>>, vector<1x1x1x4x64xbf16>
    %275 = vector.shape_cast %274 : vector<1x1x1x4x64xbf16> to vector<4x64xbf16>
    %c0_417 = arith.constant 0 : index
    %c1_418 = arith.constant 1 : index
    %c1_419 = arith.constant 1 : index
    %c1_420 = arith.constant 1 : index
    %c0_421 = arith.constant 0 : index
    %276 = vector.load %arg10[%c0_417, %c1_418, %c1_419, %c1_420, %c0_421] : memref<4x2x6x6x64xbf16, #tpu.memory_space<vmem>>, vector<1x1x1x4x64xbf16>
    %277 = vector.shape_cast %276 : vector<1x1x1x4x64xbf16> to vector<4x64xbf16>
    %c0_422 = arith.constant 0 : index
    %c1_423 = arith.constant 1 : index
    %c2_424 = arith.constant 2 : index
    %c1_425 = arith.constant 1 : index
    %c0_426 = arith.constant 0 : index
    %278 = vector.load %arg10[%c0_422, %c1_423, %c2_424, %c1_425, %c0_426] : memref<4x2x6x6x64xbf16, #tpu.memory_space<vmem>>, vector<1x1x1x4x64xbf16>
    %279 = vector.shape_cast %278 : vector<1x1x1x4x64xbf16> to vector<4x64xbf16>
    %c0_427 = arith.constant 0 : index
    %c1_428 = arith.constant 1 : index
    %c3_429 = arith.constant 3 : index
    %c1_430 = arith.constant 1 : index
    %c0_431 = arith.constant 0 : index
    %280 = vector.load %arg10[%c0_427, %c1_428, %c3_429, %c1_430, %c0_431] : memref<4x2x6x6x64xbf16, #tpu.memory_space<vmem>>, vector<1x1x1x4x64xbf16>
    %281 = vector.shape_cast %280 : vector<1x1x1x4x64xbf16> to vector<4x64xbf16>
    %c0_432 = arith.constant 0 : index
    %c1_433 = arith.constant 1 : index
    %c4_434 = arith.constant 4 : index
    %c1_435 = arith.constant 1 : index
    %c0_436 = arith.constant 0 : index
    %282 = vector.load %arg10[%c0_432, %c1_433, %c4_434, %c1_435, %c0_436] : memref<4x2x6x6x64xbf16, #tpu.memory_space<vmem>>, vector<1x1x1x4x64xbf16>
    %283 = vector.shape_cast %282 : vector<1x1x1x4x64xbf16> to vector<4x64xbf16>
    %284 = tpu.concatenate %269, %271, %273, %275, %277, %279, %281, %283 in 0 : vector<4x64xbf16>, vector<4x64xbf16>, vector<4x64xbf16>, vector<4x64xbf16>, vector<4x64xbf16>, vector<4x64xbf16>, vector<4x64xbf16>, vector<4x64xbf16> -> vector<32x64xbf16>
    %c5 = arith.constant 5 : index
    %c0_437 = arith.constant 0 : index
    %c0_438 = arith.constant 0 : index
    %285 = vector.load %arg5[%c5, %c0_437, %c0_438] : memref<16x64x128xbf16, #tpu.memory_space<vmem>>, vector<1x64x128xbf16>
    %286 = vector.shape_cast %285 : vector<1x64x128xbf16> to vector<64x128xbf16>
    %cst_439 = arith.constant dense<0.000000e+00> : vector<32x128xf32>
    %287 = tpu.matmul %284, %286, %cst_439 {dimension_numbers = #tpu.dot_dimension_numbers<[1], [0], [0], [1], [0, 0, 1, 1], [], []>} : vector<32x64xbf16>, vector<64x128xbf16>, vector<32x128xf32> -> vector<32x128xf32>
    %288 = arith.addf %267, %287 : vector<32x128xf32>
    %c1_440 = arith.constant 1 : index
    %c0_441 = arith.constant 0 : index
    %c1_442 = arith.constant 1 : index
    %c1_443 = arith.constant 1 : index
    %c0_444 = arith.constant 0 : index
    %289 = vector.load %arg10[%c1_440, %c0_441, %c1_442, %c1_443, %c0_444] : memref<4x2x6x6x64xbf16, #tpu.memory_space<vmem>>, vector<1x1x1x4x64xbf16>
    %290 = vector.shape_cast %289 : vector<1x1x1x4x64xbf16> to vector<4x64xbf16>
    %c1_445 = arith.constant 1 : index
    %c0_446 = arith.constant 0 : index
    %c2_447 = arith.constant 2 : index
    %c1_448 = arith.constant 1 : index
    %c0_449 = arith.constant 0 : index
    %291 = vector.load %arg10[%c1_445, %c0_446, %c2_447, %c1_448, %c0_449] : memref<4x2x6x6x64xbf16, #tpu.memory_space<vmem>>, vector<1x1x1x4x64xbf16>
    %292 = vector.shape_cast %291 : vector<1x1x1x4x64xbf16> to vector<4x64xbf16>
    %c1_450 = arith.constant 1 : index
    %c0_451 = arith.constant 0 : index
    %c3_452 = arith.constant 3 : index
    %c1_453 = arith.constant 1 : index
    %c0_454 = arith.constant 0 : index
    %293 = vector.load %arg10[%c1_450, %c0_451, %c3_452, %c1_453, %c0_454] : memref<4x2x6x6x64xbf16, #tpu.memory_space<vmem>>, vector<1x1x1x4x64xbf16>
    %294 = vector.shape_cast %293 : vector<1x1x1x4x64xbf16> to vector<4x64xbf16>
    %c1_455 = arith.constant 1 : index
    %c0_456 = arith.constant 0 : index
    %c4_457 = arith.constant 4 : index
    %c1_458 = arith.constant 1 : index
    %c0_459 = arith.constant 0 : index
    %295 = vector.load %arg10[%c1_455, %c0_456, %c4_457, %c1_458, %c0_459] : memref<4x2x6x6x64xbf16, #tpu.memory_space<vmem>>, vector<1x1x1x4x64xbf16>
    %296 = vector.shape_cast %295 : vector<1x1x1x4x64xbf16> to vector<4x64xbf16>
    %c1_460 = arith.constant 1 : index
    %c1_461 = arith.constant 1 : index
    %c1_462 = arith.constant 1 : index
    %c1_463 = arith.constant 1 : index
    %c0_464 = arith.constant 0 : index
    %297 = vector.load %arg10[%c1_460, %c1_461, %c1_462, %c1_463, %c0_464] : memref<4x2x6x6x64xbf16, #tpu.memory_space<vmem>>, vector<1x1x1x4x64xbf16>
    %298 = vector.shape_cast %297 : vector<1x1x1x4x64xbf16> to vector<4x64xbf16>
    %c1_465 = arith.constant 1 : index
    %c1_466 = arith.constant 1 : index
    %c2_467 = arith.constant 2 : index
    %c1_468 = arith.constant 1 : index
    %c0_469 = arith.constant 0 : index
    %299 = vector.load %arg10[%c1_465, %c1_466, %c2_467, %c1_468, %c0_469] : memref<4x2x6x6x64xbf16, #tpu.memory_space<vmem>>, vector<1x1x1x4x64xbf16>
    %300 = vector.shape_cast %299 : vector<1x1x1x4x64xbf16> to vector<4x64xbf16>
    %c1_470 = arith.constant 1 : index
    %c1_471 = arith.constant 1 : index
    %c3_472 = arith.constant 3 : index
    %c1_473 = arith.constant 1 : index
    %c0_474 = arith.constant 0 : index
    %301 = vector.load %arg10[%c1_470, %c1_471, %c3_472, %c1_473, %c0_474] : memref<4x2x6x6x64xbf16, #tpu.memory_space<vmem>>, vector<1x1x1x4x64xbf16>
    %302 = vector.shape_cast %301 : vector<1x1x1x4x64xbf16> to vector<4x64xbf16>
    %c1_475 = arith.constant 1 : index
    %c1_476 = arith.constant 1 : index
    %c4_477 = arith.constant 4 : index
    %c1_478 = arith.constant 1 : index
    %c0_479 = arith.constant 0 : index
    %303 = vector.load %arg10[%c1_475, %c1_476, %c4_477, %c1_478, %c0_479] : memref<4x2x6x6x64xbf16, #tpu.memory_space<vmem>>, vector<1x1x1x4x64xbf16>
    %304 = vector.shape_cast %303 : vector<1x1x1x4x64xbf16> to vector<4x64xbf16>
    %305 = tpu.concatenate %290, %292, %294, %296, %298, %300, %302, %304 in 0 : vector<4x64xbf16>, vector<4x64xbf16>, vector<4x64xbf16>, vector<4x64xbf16>, vector<4x64xbf16>, vector<4x64xbf16>, vector<4x64xbf16>, vector<4x64xbf16> -> vector<32x64xbf16>
    %c6 = arith.constant 6 : index
    %c0_480 = arith.constant 0 : index
    %c0_481 = arith.constant 0 : index
    %306 = vector.load %arg5[%c6, %c0_480, %c0_481] : memref<16x64x128xbf16, #tpu.memory_space<vmem>>, vector<1x64x128xbf16>
    %307 = vector.shape_cast %306 : vector<1x64x128xbf16> to vector<64x128xbf16>
    %cst_482 = arith.constant dense<0.000000e+00> : vector<32x128xf32>
    %308 = tpu.matmul %305, %307, %cst_482 {dimension_numbers = #tpu.dot_dimension_numbers<[1], [0], [0], [1], [0, 0, 1, 1], [], []>} : vector<32x64xbf16>, vector<64x128xbf16>, vector<32x128xf32> -> vector<32x128xf32>
    %309 = arith.addf %288, %308 : vector<32x128xf32>
    %c0_483 = arith.constant 0 : index
    %c0_484 = arith.constant 0 : index
    %c1_485 = arith.constant 1 : index
    %c2_486 = arith.constant 2 : index
    %c0_487 = arith.constant 0 : index
    %310 = vector.load %arg10[%c0_483, %c0_484, %c1_485, %c2_486, %c0_487] : memref<4x2x6x6x64xbf16, #tpu.memory_space<vmem>>, vector<1x1x1x4x64xbf16>
    %311 = vector.shape_cast %310 : vector<1x1x1x4x64xbf16> to vector<4x64xbf16>
    %c0_488 = arith.constant 0 : index
    %c0_489 = arith.constant 0 : index
    %c2_490 = arith.constant 2 : index
    %c2_491 = arith.constant 2 : index
    %c0_492 = arith.constant 0 : index
    %312 = vector.load %arg10[%c0_488, %c0_489, %c2_490, %c2_491, %c0_492] : memref<4x2x6x6x64xbf16, #tpu.memory_space<vmem>>, vector<1x1x1x4x64xbf16>
    %313 = vector.shape_cast %312 : vector<1x1x1x4x64xbf16> to vector<4x64xbf16>
    %c0_493 = arith.constant 0 : index
    %c0_494 = arith.constant 0 : index
    %c3_495 = arith.constant 3 : index
    %c2_496 = arith.constant 2 : index
    %c0_497 = arith.constant 0 : index
    %314 = vector.load %arg10[%c0_493, %c0_494, %c3_495, %c2_496, %c0_497] : memref<4x2x6x6x64xbf16, #tpu.memory_space<vmem>>, vector<1x1x1x4x64xbf16>
    %315 = vector.shape_cast %314 : vector<1x1x1x4x64xbf16> to vector<4x64xbf16>
    %c0_498 = arith.constant 0 : index
    %c0_499 = arith.constant 0 : index
    %c4_500 = arith.constant 4 : index
    %c2_501 = arith.constant 2 : index
    %c0_502 = arith.constant 0 : index
    %316 = vector.load %arg10[%c0_498, %c0_499, %c4_500, %c2_501, %c0_502] : memref<4x2x6x6x64xbf16, #tpu.memory_space<vmem>>, vector<1x1x1x4x64xbf16>
    %317 = vector.shape_cast %316 : vector<1x1x1x4x64xbf16> to vector<4x64xbf16>
    %c0_503 = arith.constant 0 : index
    %c1_504 = arith.constant 1 : index
    %c1_505 = arith.constant 1 : index
    %c2_506 = arith.constant 2 : index
    %c0_507 = arith.constant 0 : index
    %318 = vector.load %arg10[%c0_503, %c1_504, %c1_505, %c2_506, %c0_507] : memref<4x2x6x6x64xbf16, #tpu.memory_space<vmem>>, vector<1x1x1x4x64xbf16>
    %319 = vector.shape_cast %318 : vector<1x1x1x4x64xbf16> to vector<4x64xbf16>
    %c0_508 = arith.constant 0 : index
    %c1_509 = arith.constant 1 : index
    %c2_510 = arith.constant 2 : index
    %c2_511 = arith.constant 2 : index
    %c0_512 = arith.constant 0 : index
    %320 = vector.load %arg10[%c0_508, %c1_509, %c2_510, %c2_511, %c0_512] : memref<4x2x6x6x64xbf16, #tpu.memory_space<vmem>>, vector<1x1x1x4x64xbf16>
    %321 = vector.shape_cast %320 : vector<1x1x1x4x64xbf16> to vector<4x64xbf16>
    %c0_513 = arith.constant 0 : index
    %c1_514 = arith.constant 1 : index
    %c3_515 = arith.constant 3 : index
    %c2_516 = arith.constant 2 : index
    %c0_517 = arith.constant 0 : index
    %322 = vector.load %arg10[%c0_513, %c1_514, %c3_515, %c2_516, %c0_517] : memref<4x2x6x6x64xbf16, #tpu.memory_space<vmem>>, vector<1x1x1x4x64xbf16>
    %323 = vector.shape_cast %322 : vector<1x1x1x4x64xbf16> to vector<4x64xbf16>
    %c0_518 = arith.constant 0 : index
    %c1_519 = arith.constant 1 : index
    %c4_520 = arith.constant 4 : index
    %c2_521 = arith.constant 2 : index
    %c0_522 = arith.constant 0 : index
    %324 = vector.load %arg10[%c0_518, %c1_519, %c4_520, %c2_521, %c0_522] : memref<4x2x6x6x64xbf16, #tpu.memory_space<vmem>>, vector<1x1x1x4x64xbf16>
    %325 = vector.shape_cast %324 : vector<1x1x1x4x64xbf16> to vector<4x64xbf16>
    %326 = tpu.concatenate %311, %313, %315, %317, %319, %321, %323, %325 in 0 : vector<4x64xbf16>, vector<4x64xbf16>, vector<4x64xbf16>, vector<4x64xbf16>, vector<4x64xbf16>, vector<4x64xbf16>, vector<4x64xbf16>, vector<4x64xbf16> -> vector<32x64xbf16>
    %c7 = arith.constant 7 : index
    %c0_523 = arith.constant 0 : index
    %c0_524 = arith.constant 0 : index
    %327 = vector.load %arg5[%c7, %c0_523, %c0_524] : memref<16x64x128xbf16, #tpu.memory_space<vmem>>, vector<1x64x128xbf16>
    %328 = vector.shape_cast %327 : vector<1x64x128xbf16> to vector<64x128xbf16>
    %cst_525 = arith.constant dense<0.000000e+00> : vector<32x128xf32>
    %329 = tpu.matmul %326, %328, %cst_525 {dimension_numbers = #tpu.dot_dimension_numbers<[1], [0], [0], [1], [0, 0, 1, 1], [], []>} : vector<32x64xbf16>, vector<64x128xbf16>, vector<32x128xf32> -> vector<32x128xf32>
    %330 = arith.addf %309, %329 : vector<32x128xf32>
    %c3_526 = arith.constant 3 : index
    %c0_527 = arith.constant 0 : index
    %c1_528 = arith.constant 1 : index
    %c0_529 = arith.constant 0 : index
    %c0_530 = arith.constant 0 : index
    %331 = vector.load %arg10[%c3_526, %c0_527, %c1_528, %c0_529, %c0_530] : memref<4x2x6x6x64xbf16, #tpu.memory_space<vmem>>, vector<1x1x1x4x64xbf16>
    %332 = vector.shape_cast %331 : vector<1x1x1x4x64xbf16> to vector<4x64xbf16>
    %c3_531 = arith.constant 3 : index
    %c0_532 = arith.constant 0 : index
    %c2_533 = arith.constant 2 : index
    %c0_534 = arith.constant 0 : index
    %c0_535 = arith.constant 0 : index
    %333 = vector.load %arg10[%c3_531, %c0_532, %c2_533, %c0_534, %c0_535] : memref<4x2x6x6x64xbf16, #tpu.memory_space<vmem>>, vector<1x1x1x4x64xbf16>
    %334 = vector.shape_cast %333 : vector<1x1x1x4x64xbf16> to vector<4x64xbf16>
    %c3_536 = arith.constant 3 : index
    %c0_537 = arith.constant 0 : index
    %c3_538 = arith.constant 3 : index
    %c0_539 = arith.constant 0 : index
    %c0_540 = arith.constant 0 : index
    %335 = vector.load %arg10[%c3_536, %c0_537, %c3_538, %c0_539, %c0_540] : memref<4x2x6x6x64xbf16, #tpu.memory_space<vmem>>, vector<1x1x1x4x64xbf16>
    %336 = vector.shape_cast %335 : vector<1x1x1x4x64xbf16> to vector<4x64xbf16>
    %c3_541 = arith.constant 3 : index
    %c0_542 = arith.constant 0 : index
    %c4_543 = arith.constant 4 : index
    %c0_544 = arith.constant 0 : index
    %c0_545 = arith.constant 0 : index
    %337 = vector.load %arg10[%c3_541, %c0_542, %c4_543, %c0_544, %c0_545] : memref<4x2x6x6x64xbf16, #tpu.memory_space<vmem>>, vector<1x1x1x4x64xbf16>
    %338 = vector.shape_cast %337 : vector<1x1x1x4x64xbf16> to vector<4x64xbf16>
    %c3_546 = arith.constant 3 : index
    %c1_547 = arith.constant 1 : index
    %c1_548 = arith.constant 1 : index
    %c0_549 = arith.constant 0 : index
    %c0_550 = arith.constant 0 : index
    %339 = vector.load %arg10[%c3_546, %c1_547, %c1_548, %c0_549, %c0_550] : memref<4x2x6x6x64xbf16, #tpu.memory_space<vmem>>, vector<1x1x1x4x64xbf16>
    %340 = vector.shape_cast %339 : vector<1x1x1x4x64xbf16> to vector<4x64xbf16>
    %c3_551 = arith.constant 3 : index
    %c1_552 = arith.constant 1 : index
    %c2_553 = arith.constant 2 : index
    %c0_554 = arith.constant 0 : index
    %c0_555 = arith.constant 0 : index
    %341 = vector.load %arg10[%c3_551, %c1_552, %c2_553, %c0_554, %c0_555] : memref<4x2x6x6x64xbf16, #tpu.memory_space<vmem>>, vector<1x1x1x4x64xbf16>
    %342 = vector.shape_cast %341 : vector<1x1x1x4x64xbf16> to vector<4x64xbf16>
    %c3_556 = arith.constant 3 : index
    %c1_557 = arith.constant 1 : index
    %c3_558 = arith.constant 3 : index
    %c0_559 = arith.constant 0 : index
    %c0_560 = arith.constant 0 : index
    %343 = vector.load %arg10[%c3_556, %c1_557, %c3_558, %c0_559, %c0_560] : memref<4x2x6x6x64xbf16, #tpu.memory_space<vmem>>, vector<1x1x1x4x64xbf16>
    %344 = vector.shape_cast %343 : vector<1x1x1x4x64xbf16> to vector<4x64xbf16>
    %c3_561 = arith.constant 3 : index
    %c1_562 = arith.constant 1 : index
    %c4_563 = arith.constant 4 : index
    %c0_564 = arith.constant 0 : index
    %c0_565 = arith.constant 0 : index
    %345 = vector.load %arg10[%c3_561, %c1_562, %c4_563, %c0_564, %c0_565] : memref<4x2x6x6x64xbf16, #tpu.memory_space<vmem>>, vector<1x1x1x4x64xbf16>
    %346 = vector.shape_cast %345 : vector<1x1x1x4x64xbf16> to vector<4x64xbf16>
    %347 = tpu.concatenate %332, %334, %336, %338, %340, %342, %344, %346 in 0 : vector<4x64xbf16>, vector<4x64xbf16>, vector<4x64xbf16>, vector<4x64xbf16>, vector<4x64xbf16>, vector<4x64xbf16>, vector<4x64xbf16>, vector<4x64xbf16> -> vector<32x64xbf16>
    %c8 = arith.constant 8 : index
    %c0_566 = arith.constant 0 : index
    %c0_567 = arith.constant 0 : index
    %348 = vector.load %arg5[%c8, %c0_566, %c0_567] : memref<16x64x128xbf16, #tpu.memory_space<vmem>>, vector<1x64x128xbf16>
    %349 = vector.shape_cast %348 : vector<1x64x128xbf16> to vector<64x128xbf16>
    %cst_568 = arith.constant dense<0.000000e+00> : vector<32x128xf32>
    %350 = tpu.matmul %347, %349, %cst_568 {dimension_numbers = #tpu.dot_dimension_numbers<[1], [0], [0], [1], [0, 0, 1, 1], [], []>} : vector<32x64xbf16>, vector<64x128xbf16>, vector<32x128xf32> -> vector<32x128xf32>
    %351 = arith.addf %330, %350 : vector<32x128xf32>
    %c2_569 = arith.constant 2 : index
    %c0_570 = arith.constant 0 : index
    %c1_571 = arith.constant 1 : index
    %c1_572 = arith.constant 1 : index
    %c0_573 = arith.constant 0 : index
    %352 = vector.load %arg10[%c2_569, %c0_570, %c1_571, %c1_572, %c0_573] : memref<4x2x6x6x64xbf16, #tpu.memory_space<vmem>>, vector<1x1x1x4x64xbf16>
    %353 = vector.shape_cast %352 : vector<1x1x1x4x64xbf16> to vector<4x64xbf16>
    %c2_574 = arith.constant 2 : index
    %c0_575 = arith.constant 0 : index
    %c2_576 = arith.constant 2 : index
    %c1_577 = arith.constant 1 : index
    %c0_578 = arith.constant 0 : index
    %354 = vector.load %arg10[%c2_574, %c0_575, %c2_576, %c1_577, %c0_578] : memref<4x2x6x6x64xbf16, #tpu.memory_space<vmem>>, vector<1x1x1x4x64xbf16>
    %355 = vector.shape_cast %354 : vector<1x1x1x4x64xbf16> to vector<4x64xbf16>
    %c2_579 = arith.constant 2 : index
    %c0_580 = arith.constant 0 : index
    %c3_581 = arith.constant 3 : index
    %c1_582 = arith.constant 1 : index
    %c0_583 = arith.constant 0 : index
    %356 = vector.load %arg10[%c2_579, %c0_580, %c3_581, %c1_582, %c0_583] : memref<4x2x6x6x64xbf16, #tpu.memory_space<vmem>>, vector<1x1x1x4x64xbf16>
    %357 = vector.shape_cast %356 : vector<1x1x1x4x64xbf16> to vector<4x64xbf16>
    %c2_584 = arith.constant 2 : index
    %c0_585 = arith.constant 0 : index
    %c4_586 = arith.constant 4 : index
    %c1_587 = arith.constant 1 : index
    %c0_588 = arith.constant 0 : index
    %358 = vector.load %arg10[%c2_584, %c0_585, %c4_586, %c1_587, %c0_588] : memref<4x2x6x6x64xbf16, #tpu.memory_space<vmem>>, vector<1x1x1x4x64xbf16>
    %359 = vector.shape_cast %358 : vector<1x1x1x4x64xbf16> to vector<4x64xbf16>
    %c2_589 = arith.constant 2 : index
    %c1_590 = arith.constant 1 : index
    %c1_591 = arith.constant 1 : index
    %c1_592 = arith.constant 1 : index
    %c0_593 = arith.constant 0 : index
    %360 = vector.load %arg10[%c2_589, %c1_590, %c1_591, %c1_592, %c0_593] : memref<4x2x6x6x64xbf16, #tpu.memory_space<vmem>>, vector<1x1x1x4x64xbf16>
    %361 = vector.shape_cast %360 : vector<1x1x1x4x64xbf16> to vector<4x64xbf16>
    %c2_594 = arith.constant 2 : index
    %c1_595 = arith.constant 1 : index
    %c2_596 = arith.constant 2 : index
    %c1_597 = arith.constant 1 : index
    %c0_598 = arith.constant 0 : index
    %362 = vector.load %arg10[%c2_594, %c1_595, %c2_596, %c1_597, %c0_598] : memref<4x2x6x6x64xbf16, #tpu.memory_space<vmem>>, vector<1x1x1x4x64xbf16>
    %363 = vector.shape_cast %362 : vector<1x1x1x4x64xbf16> to vector<4x64xbf16>
    %c2_599 = arith.constant 2 : index
    %c1_600 = arith.constant 1 : index
    %c3_601 = arith.constant 3 : index
    %c1_602 = arith.constant 1 : index
    %c0_603 = arith.constant 0 : index
    %364 = vector.load %arg10[%c2_599, %c1_600, %c3_601, %c1_602, %c0_603] : memref<4x2x6x6x64xbf16, #tpu.memory_space<vmem>>, vector<1x1x1x4x64xbf16>
    %365 = vector.shape_cast %364 : vector<1x1x1x4x64xbf16> to vector<4x64xbf16>
    %c2_604 = arith.constant 2 : index
    %c1_605 = arith.constant 1 : index
    %c4_606 = arith.constant 4 : index
    %c1_607 = arith.constant 1 : index
    %c0_608 = arith.constant 0 : index
    %366 = vector.load %arg10[%c2_604, %c1_605, %c4_606, %c1_607, %c0_608] : memref<4x2x6x6x64xbf16, #tpu.memory_space<vmem>>, vector<1x1x1x4x64xbf16>
    %367 = vector.shape_cast %366 : vector<1x1x1x4x64xbf16> to vector<4x64xbf16>
    %368 = tpu.concatenate %353, %355, %357, %359, %361, %363, %365, %367 in 0 : vector<4x64xbf16>, vector<4x64xbf16>, vector<4x64xbf16>, vector<4x64xbf16>, vector<4x64xbf16>, vector<4x64xbf16>, vector<4x64xbf16>, vector<4x64xbf16> -> vector<32x64xbf16>
    %c9 = arith.constant 9 : index
    %c0_609 = arith.constant 0 : index
    %c0_610 = arith.constant 0 : index
    %369 = vector.load %arg5[%c9, %c0_609, %c0_610] : memref<16x64x128xbf16, #tpu.memory_space<vmem>>, vector<1x64x128xbf16>
    %370 = vector.shape_cast %369 : vector<1x64x128xbf16> to vector<64x128xbf16>
    %cst_611 = arith.constant dense<0.000000e+00> : vector<32x128xf32>
    %371 = tpu.matmul %368, %370, %cst_611 {dimension_numbers = #tpu.dot_dimension_numbers<[1], [0], [0], [1], [0, 0, 1, 1], [], []>} : vector<32x64xbf16>, vector<64x128xbf16>, vector<32x128xf32> -> vector<32x128xf32>
    %372 = arith.addf %351, %371 : vector<32x128xf32>
    %c3_612 = arith.constant 3 : index
    %c0_613 = arith.constant 0 : index
    %c1_614 = arith.constant 1 : index
    %c1_615 = arith.constant 1 : index
    %c0_616 = arith.constant 0 : index
    %373 = vector.load %arg10[%c3_612, %c0_613, %c1_614, %c1_615, %c0_616] : memref<4x2x6x6x64xbf16, #tpu.memory_space<vmem>>, vector<1x1x1x4x64xbf16>
    %374 = vector.shape_cast %373 : vector<1x1x1x4x64xbf16> to vector<4x64xbf16>
    %c3_617 = arith.constant 3 : index
    %c0_618 = arith.constant 0 : index
    %c2_619 = arith.constant 2 : index
    %c1_620 = arith.constant 1 : index
    %c0_621 = arith.constant 0 : index
    %375 = vector.load %arg10[%c3_617, %c0_618, %c2_619, %c1_620, %c0_621] : memref<4x2x6x6x64xbf16, #tpu.memory_space<vmem>>, vector<1x1x1x4x64xbf16>
    %376 = vector.shape_cast %375 : vector<1x1x1x4x64xbf16> to vector<4x64xbf16>
    %c3_622 = arith.constant 3 : index
    %c0_623 = arith.constant 0 : index
    %c3_624 = arith.constant 3 : index
    %c1_625 = arith.constant 1 : index
    %c0_626 = arith.constant 0 : index
    %377 = vector.load %arg10[%c3_622, %c0_623, %c3_624, %c1_625, %c0_626] : memref<4x2x6x6x64xbf16, #tpu.memory_space<vmem>>, vector<1x1x1x4x64xbf16>
    %378 = vector.shape_cast %377 : vector<1x1x1x4x64xbf16> to vector<4x64xbf16>
    %c3_627 = arith.constant 3 : index
    %c0_628 = arith.constant 0 : index
    %c4_629 = arith.constant 4 : index
    %c1_630 = arith.constant 1 : index
    %c0_631 = arith.constant 0 : index
    %379 = vector.load %arg10[%c3_627, %c0_628, %c4_629, %c1_630, %c0_631] : memref<4x2x6x6x64xbf16, #tpu.memory_space<vmem>>, vector<1x1x1x4x64xbf16>
    %380 = vector.shape_cast %379 : vector<1x1x1x4x64xbf16> to vector<4x64xbf16>
    %c3_632 = arith.constant 3 : index
    %c1_633 = arith.constant 1 : index
    %c1_634 = arith.constant 1 : index
    %c1_635 = arith.constant 1 : index
    %c0_636 = arith.constant 0 : index
    %381 = vector.load %arg10[%c3_632, %c1_633, %c1_634, %c1_635, %c0_636] : memref<4x2x6x6x64xbf16, #tpu.memory_space<vmem>>, vector<1x1x1x4x64xbf16>
    %382 = vector.shape_cast %381 : vector<1x1x1x4x64xbf16> to vector<4x64xbf16>
    %c3_637 = arith.constant 3 : index
    %c1_638 = arith.constant 1 : index
    %c2_639 = arith.constant 2 : index
    %c1_640 = arith.constant 1 : index
    %c0_641 = arith.constant 0 : index
    %383 = vector.load %arg10[%c3_637, %c1_638, %c2_639, %c1_640, %c0_641] : memref<4x2x6x6x64xbf16, #tpu.memory_space<vmem>>, vector<1x1x1x4x64xbf16>
    %384 = vector.shape_cast %383 : vector<1x1x1x4x64xbf16> to vector<4x64xbf16>
    %c3_642 = arith.constant 3 : index
    %c1_643 = arith.constant 1 : index
    %c3_644 = arith.constant 3 : index
    %c1_645 = arith.constant 1 : index
    %c0_646 = arith.constant 0 : index
    %385 = vector.load %arg10[%c3_642, %c1_643, %c3_644, %c1_645, %c0_646] : memref<4x2x6x6x64xbf16, #tpu.memory_space<vmem>>, vector<1x1x1x4x64xbf16>
    %386 = vector.shape_cast %385 : vector<1x1x1x4x64xbf16> to vector<4x64xbf16>
    %c3_647 = arith.constant 3 : index
    %c1_648 = arith.constant 1 : index
    %c4_649 = arith.constant 4 : index
    %c1_650 = arith.constant 1 : index
    %c0_651 = arith.constant 0 : index
    %387 = vector.load %arg10[%c3_647, %c1_648, %c4_649, %c1_650, %c0_651] : memref<4x2x6x6x64xbf16, #tpu.memory_space<vmem>>, vector<1x1x1x4x64xbf16>
    %388 = vector.shape_cast %387 : vector<1x1x1x4x64xbf16> to vector<4x64xbf16>
    %389 = tpu.concatenate %374, %376, %378, %380, %382, %384, %386, %388 in 0 : vector<4x64xbf16>, vector<4x64xbf16>, vector<4x64xbf16>, vector<4x64xbf16>, vector<4x64xbf16>, vector<4x64xbf16>, vector<4x64xbf16>, vector<4x64xbf16> -> vector<32x64xbf16>
    %c10 = arith.constant 10 : index
    %c0_652 = arith.constant 0 : index
    %c0_653 = arith.constant 0 : index
    %390 = vector.load %arg5[%c10, %c0_652, %c0_653] : memref<16x64x128xbf16, #tpu.memory_space<vmem>>, vector<1x64x128xbf16>
    %391 = vector.shape_cast %390 : vector<1x64x128xbf16> to vector<64x128xbf16>
    %cst_654 = arith.constant dense<0.000000e+00> : vector<32x128xf32>
    %392 = tpu.matmul %389, %391, %cst_654 {dimension_numbers = #tpu.dot_dimension_numbers<[1], [0], [0], [1], [0, 0, 1, 1], [], []>} : vector<32x64xbf16>, vector<64x128xbf16>, vector<32x128xf32> -> vector<32x128xf32>
    %393 = arith.addf %372, %392 : vector<32x128xf32>
    %c2_655 = arith.constant 2 : index
    %c0_656 = arith.constant 0 : index
    %c1_657 = arith.constant 1 : index
    %c2_658 = arith.constant 2 : index
    %c0_659 = arith.constant 0 : index
    %394 = vector.load %arg10[%c2_655, %c0_656, %c1_657, %c2_658, %c0_659] : memref<4x2x6x6x64xbf16, #tpu.memory_space<vmem>>, vector<1x1x1x4x64xbf16>
    %395 = vector.shape_cast %394 : vector<1x1x1x4x64xbf16> to vector<4x64xbf16>
    %c2_660 = arith.constant 2 : index
    %c0_661 = arith.constant 0 : index
    %c2_662 = arith.constant 2 : index
    %c2_663 = arith.constant 2 : index
    %c0_664 = arith.constant 0 : index
    %396 = vector.load %arg10[%c2_660, %c0_661, %c2_662, %c2_663, %c0_664] : memref<4x2x6x6x64xbf16, #tpu.memory_space<vmem>>, vector<1x1x1x4x64xbf16>
    %397 = vector.shape_cast %396 : vector<1x1x1x4x64xbf16> to vector<4x64xbf16>
    %c2_665 = arith.constant 2 : index
    %c0_666 = arith.constant 0 : index
    %c3_667 = arith.constant 3 : index
    %c2_668 = arith.constant 2 : index
    %c0_669 = arith.constant 0 : index
    %398 = vector.load %arg10[%c2_665, %c0_666, %c3_667, %c2_668, %c0_669] : memref<4x2x6x6x64xbf16, #tpu.memory_space<vmem>>, vector<1x1x1x4x64xbf16>
    %399 = vector.shape_cast %398 : vector<1x1x1x4x64xbf16> to vector<4x64xbf16>
    %c2_670 = arith.constant 2 : index
    %c0_671 = arith.constant 0 : index
    %c4_672 = arith.constant 4 : index
    %c2_673 = arith.constant 2 : index
    %c0_674 = arith.constant 0 : index
    %400 = vector.load %arg10[%c2_670, %c0_671, %c4_672, %c2_673, %c0_674] : memref<4x2x6x6x64xbf16, #tpu.memory_space<vmem>>, vector<1x1x1x4x64xbf16>
    %401 = vector.shape_cast %400 : vector<1x1x1x4x64xbf16> to vector<4x64xbf16>
    %c2_675 = arith.constant 2 : index
    %c1_676 = arith.constant 1 : index
    %c1_677 = arith.constant 1 : index
    %c2_678 = arith.constant 2 : index
    %c0_679 = arith.constant 0 : index
    %402 = vector.load %arg10[%c2_675, %c1_676, %c1_677, %c2_678, %c0_679] : memref<4x2x6x6x64xbf16, #tpu.memory_space<vmem>>, vector<1x1x1x4x64xbf16>
    %403 = vector.shape_cast %402 : vector<1x1x1x4x64xbf16> to vector<4x64xbf16>
    %c2_680 = arith.constant 2 : index
    %c1_681 = arith.constant 1 : index
    %c2_682 = arith.constant 2 : index
    %c2_683 = arith.constant 2 : index
    %c0_684 = arith.constant 0 : index
    %404 = vector.load %arg10[%c2_680, %c1_681, %c2_682, %c2_683, %c0_684] : memref<4x2x6x6x64xbf16, #tpu.memory_space<vmem>>, vector<1x1x1x4x64xbf16>
    %405 = vector.shape_cast %404 : vector<1x1x1x4x64xbf16> to vector<4x64xbf16>
    %c2_685 = arith.constant 2 : index
    %c1_686 = arith.constant 1 : index
    %c3_687 = arith.constant 3 : index
    %c2_688 = arith.constant 2 : index
    %c0_689 = arith.constant 0 : index
    %406 = vector.load %arg10[%c2_685, %c1_686, %c3_687, %c2_688, %c0_689] : memref<4x2x6x6x64xbf16, #tpu.memory_space<vmem>>, vector<1x1x1x4x64xbf16>
    %407 = vector.shape_cast %406 : vector<1x1x1x4x64xbf16> to vector<4x64xbf16>
    %c2_690 = arith.constant 2 : index
    %c1_691 = arith.constant 1 : index
    %c4_692 = arith.constant 4 : index
    %c2_693 = arith.constant 2 : index
    %c0_694 = arith.constant 0 : index
    %408 = vector.load %arg10[%c2_690, %c1_691, %c4_692, %c2_693, %c0_694] : memref<4x2x6x6x64xbf16, #tpu.memory_space<vmem>>, vector<1x1x1x4x64xbf16>
    %409 = vector.shape_cast %408 : vector<1x1x1x4x64xbf16> to vector<4x64xbf16>
    %410 = tpu.concatenate %395, %397, %399, %401, %403, %405, %407, %409 in 0 : vector<4x64xbf16>, vector<4x64xbf16>, vector<4x64xbf16>, vector<4x64xbf16>, vector<4x64xbf16>, vector<4x64xbf16>, vector<4x64xbf16>, vector<4x64xbf16> -> vector<32x64xbf16>
    %c11 = arith.constant 11 : index
    %c0_695 = arith.constant 0 : index
    %c0_696 = arith.constant 0 : index
    %411 = vector.load %arg5[%c11, %c0_695, %c0_696] : memref<16x64x128xbf16, #tpu.memory_space<vmem>>, vector<1x64x128xbf16>
    %412 = vector.shape_cast %411 : vector<1x64x128xbf16> to vector<64x128xbf16>
    %cst_697 = arith.constant dense<0.000000e+00> : vector<32x128xf32>
    %413 = tpu.matmul %410, %412, %cst_697 {dimension_numbers = #tpu.dot_dimension_numbers<[1], [0], [0], [1], [0, 0, 1, 1], [], []>} : vector<32x64xbf16>, vector<64x128xbf16>, vector<32x128xf32> -> vector<32x128xf32>
    %414 = arith.addf %393, %413 : vector<32x128xf32>
    %c1_698 = arith.constant 1 : index
    %c0_699 = arith.constant 0 : index
    %c2_700 = arith.constant 2 : index
    %c0_701 = arith.constant 0 : index
    %c0_702 = arith.constant 0 : index
    %415 = vector.load %arg10[%c1_698, %c0_699, %c2_700, %c0_701, %c0_702] : memref<4x2x6x6x64xbf16, #tpu.memory_space<vmem>>, vector<1x1x1x4x64xbf16>
    %416 = vector.shape_cast %415 : vector<1x1x1x4x64xbf16> to vector<4x64xbf16>
    %c1_703 = arith.constant 1 : index
    %c0_704 = arith.constant 0 : index
    %c3_705 = arith.constant 3 : index
    %c0_706 = arith.constant 0 : index
    %c0_707 = arith.constant 0 : index
    %417 = vector.load %arg10[%c1_703, %c0_704, %c3_705, %c0_706, %c0_707] : memref<4x2x6x6x64xbf16, #tpu.memory_space<vmem>>, vector<1x1x1x4x64xbf16>
    %418 = vector.shape_cast %417 : vector<1x1x1x4x64xbf16> to vector<4x64xbf16>
    %c1_708 = arith.constant 1 : index
    %c0_709 = arith.constant 0 : index
    %c4_710 = arith.constant 4 : index
    %c0_711 = arith.constant 0 : index
    %c0_712 = arith.constant 0 : index
    %419 = vector.load %arg10[%c1_708, %c0_709, %c4_710, %c0_711, %c0_712] : memref<4x2x6x6x64xbf16, #tpu.memory_space<vmem>>, vector<1x1x1x4x64xbf16>
    %420 = vector.shape_cast %419 : vector<1x1x1x4x64xbf16> to vector<4x64xbf16>
    %c1_713 = arith.constant 1 : index
    %c0_714 = arith.constant 0 : index
    %c5_715 = arith.constant 5 : index
    %c0_716 = arith.constant 0 : index
    %c0_717 = arith.constant 0 : index
    %421 = vector.load %arg10[%c1_713, %c0_714, %c5_715, %c0_716, %c0_717] : memref<4x2x6x6x64xbf16, #tpu.memory_space<vmem>>, vector<1x1x1x4x64xbf16>
    %422 = vector.shape_cast %421 : vector<1x1x1x4x64xbf16> to vector<4x64xbf16>
    %c1_718 = arith.constant 1 : index
    %c1_719 = arith.constant 1 : index
    %c2_720 = arith.constant 2 : index
    %c0_721 = arith.constant 0 : index
    %c0_722 = arith.constant 0 : index
    %423 = vector.load %arg10[%c1_718, %c1_719, %c2_720, %c0_721, %c0_722] : memref<4x2x6x6x64xbf16, #tpu.memory_space<vmem>>, vector<1x1x1x4x64xbf16>
    %424 = vector.shape_cast %423 : vector<1x1x1x4x64xbf16> to vector<4x64xbf16>
    %c1_723 = arith.constant 1 : index
    %c1_724 = arith.constant 1 : index
    %c3_725 = arith.constant 3 : index
    %c0_726 = arith.constant 0 : index
    %c0_727 = arith.constant 0 : index
    %425 = vector.load %arg10[%c1_723, %c1_724, %c3_725, %c0_726, %c0_727] : memref<4x2x6x6x64xbf16, #tpu.memory_space<vmem>>, vector<1x1x1x4x64xbf16>
    %426 = vector.shape_cast %425 : vector<1x1x1x4x64xbf16> to vector<4x64xbf16>
    %c1_728 = arith.constant 1 : index
    %c1_729 = arith.constant 1 : index
    %c4_730 = arith.constant 4 : index
    %c0_731 = arith.constant 0 : index
    %c0_732 = arith.constant 0 : index
    %427 = vector.load %arg10[%c1_728, %c1_729, %c4_730, %c0_731, %c0_732] : memref<4x2x6x6x64xbf16, #tpu.memory_space<vmem>>, vector<1x1x1x4x64xbf16>
    %428 = vector.shape_cast %427 : vector<1x1x1x4x64xbf16> to vector<4x64xbf16>
    %c1_733 = arith.constant 1 : index
    %c1_734 = arith.constant 1 : index
    %c5_735 = arith.constant 5 : index
    %c0_736 = arith.constant 0 : index
    %c0_737 = arith.constant 0 : index
    %429 = vector.load %arg10[%c1_733, %c1_734, %c5_735, %c0_736, %c0_737] : memref<4x2x6x6x64xbf16, #tpu.memory_space<vmem>>, vector<1x1x1x4x64xbf16>
    %430 = vector.shape_cast %429 : vector<1x1x1x4x64xbf16> to vector<4x64xbf16>
    %431 = tpu.concatenate %416, %418, %420, %422, %424, %426, %428, %430 in 0 : vector<4x64xbf16>, vector<4x64xbf16>, vector<4x64xbf16>, vector<4x64xbf16>, vector<4x64xbf16>, vector<4x64xbf16>, vector<4x64xbf16>, vector<4x64xbf16> -> vector<32x64xbf16>
    %c12 = arith.constant 12 : index
    %c0_738 = arith.constant 0 : index
    %c0_739 = arith.constant 0 : index
    %432 = vector.load %arg5[%c12, %c0_738, %c0_739] : memref<16x64x128xbf16, #tpu.memory_space<vmem>>, vector<1x64x128xbf16>
    %433 = vector.shape_cast %432 : vector<1x64x128xbf16> to vector<64x128xbf16>
    %cst_740 = arith.constant dense<0.000000e+00> : vector<32x128xf32>
    %434 = tpu.matmul %431, %433, %cst_740 {dimension_numbers = #tpu.dot_dimension_numbers<[1], [0], [0], [1], [0, 0, 1, 1], [], []>} : vector<32x64xbf16>, vector<64x128xbf16>, vector<32x128xf32> -> vector<32x128xf32>
    %435 = arith.addf %414, %434 : vector<32x128xf32>
    %c0_741 = arith.constant 0 : index
    %c0_742 = arith.constant 0 : index
    %c2_743 = arith.constant 2 : index
    %c1_744 = arith.constant 1 : index
    %c0_745 = arith.constant 0 : index
    %436 = vector.load %arg10[%c0_741, %c0_742, %c2_743, %c1_744, %c0_745] : memref<4x2x6x6x64xbf16, #tpu.memory_space<vmem>>, vector<1x1x1x4x64xbf16>
    %437 = vector.shape_cast %436 : vector<1x1x1x4x64xbf16> to vector<4x64xbf16>
    %c0_746 = arith.constant 0 : index
    %c0_747 = arith.constant 0 : index
    %c3_748 = arith.constant 3 : index
    %c1_749 = arith.constant 1 : index
    %c0_750 = arith.constant 0 : index
    %438 = vector.load %arg10[%c0_746, %c0_747, %c3_748, %c1_749, %c0_750] : memref<4x2x6x6x64xbf16, #tpu.memory_space<vmem>>, vector<1x1x1x4x64xbf16>
    %439 = vector.shape_cast %438 : vector<1x1x1x4x64xbf16> to vector<4x64xbf16>
    %c0_751 = arith.constant 0 : index
    %c0_752 = arith.constant 0 : index
    %c4_753 = arith.constant 4 : index
    %c1_754 = arith.constant 1 : index
    %c0_755 = arith.constant 0 : index
    %440 = vector.load %arg10[%c0_751, %c0_752, %c4_753, %c1_754, %c0_755] : memref<4x2x6x6x64xbf16, #tpu.memory_space<vmem>>, vector<1x1x1x4x64xbf16>
    %441 = vector.shape_cast %440 : vector<1x1x1x4x64xbf16> to vector<4x64xbf16>
    %c0_756 = arith.constant 0 : index
    %c0_757 = arith.constant 0 : index
    %c5_758 = arith.constant 5 : index
    %c1_759 = arith.constant 1 : index
    %c0_760 = arith.constant 0 : index
    %442 = vector.load %arg10[%c0_756, %c0_757, %c5_758, %c1_759, %c0_760] : memref<4x2x6x6x64xbf16, #tpu.memory_space<vmem>>, vector<1x1x1x4x64xbf16>
    %443 = vector.shape_cast %442 : vector<1x1x1x4x64xbf16> to vector<4x64xbf16>
    %c0_761 = arith.constant 0 : index
    %c1_762 = arith.constant 1 : index
    %c2_763 = arith.constant 2 : index
    %c1_764 = arith.constant 1 : index
    %c0_765 = arith.constant 0 : index
    %444 = vector.load %arg10[%c0_761, %c1_762, %c2_763, %c1_764, %c0_765] : memref<4x2x6x6x64xbf16, #tpu.memory_space<vmem>>, vector<1x1x1x4x64xbf16>
    %445 = vector.shape_cast %444 : vector<1x1x1x4x64xbf16> to vector<4x64xbf16>
    %c0_766 = arith.constant 0 : index
    %c1_767 = arith.constant 1 : index
    %c3_768 = arith.constant 3 : index
    %c1_769 = arith.constant 1 : index
    %c0_770 = arith.constant 0 : index
    %446 = vector.load %arg10[%c0_766, %c1_767, %c3_768, %c1_769, %c0_770] : memref<4x2x6x6x64xbf16, #tpu.memory_space<vmem>>, vector<1x1x1x4x64xbf16>
    %447 = vector.shape_cast %446 : vector<1x1x1x4x64xbf16> to vector<4x64xbf16>
    %c0_771 = arith.constant 0 : index
    %c1_772 = arith.constant 1 : index
    %c4_773 = arith.constant 4 : index
    %c1_774 = arith.constant 1 : index
    %c0_775 = arith.constant 0 : index
    %448 = vector.load %arg10[%c0_771, %c1_772, %c4_773, %c1_774, %c0_775] : memref<4x2x6x6x64xbf16, #tpu.memory_space<vmem>>, vector<1x1x1x4x64xbf16>
    %449 = vector.shape_cast %448 : vector<1x1x1x4x64xbf16> to vector<4x64xbf16>
    %c0_776 = arith.constant 0 : index
    %c1_777 = arith.constant 1 : index
    %c5_778 = arith.constant 5 : index
    %c1_779 = arith.constant 1 : index
    %c0_780 = arith.constant 0 : index
    %450 = vector.load %arg10[%c0_776, %c1_777, %c5_778, %c1_779, %c0_780] : memref<4x2x6x6x64xbf16, #tpu.memory_space<vmem>>, vector<1x1x1x4x64xbf16>
    %451 = vector.shape_cast %450 : vector<1x1x1x4x64xbf16> to vector<4x64xbf16>
    %452 = tpu.concatenate %437, %439, %441, %443, %445, %447, %449, %451 in 0 : vector<4x64xbf16>, vector<4x64xbf16>, vector<4x64xbf16>, vector<4x64xbf16>, vector<4x64xbf16>, vector<4x64xbf16>, vector<4x64xbf16>, vector<4x64xbf16> -> vector<32x64xbf16>
    %c13 = arith.constant 13 : index
    %c0_781 = arith.constant 0 : index
    %c0_782 = arith.constant 0 : index
    %453 = vector.load %arg5[%c13, %c0_781, %c0_782] : memref<16x64x128xbf16, #tpu.memory_space<vmem>>, vector<1x64x128xbf16>
    %454 = vector.shape_cast %453 : vector<1x64x128xbf16> to vector<64x128xbf16>
    %cst_783 = arith.constant dense<0.000000e+00> : vector<32x128xf32>
    %455 = tpu.matmul %452, %454, %cst_783 {dimension_numbers = #tpu.dot_dimension_numbers<[1], [0], [0], [1], [0, 0, 1, 1], [], []>} : vector<32x64xbf16>, vector<64x128xbf16>, vector<32x128xf32> -> vector<32x128xf32>
    %456 = arith.addf %435, %455 : vector<32x128xf32>
    %c1_784 = arith.constant 1 : index
    %c0_785 = arith.constant 0 : index
    %c2_786 = arith.constant 2 : index
    %c1_787 = arith.constant 1 : index
    %c0_788 = arith.constant 0 : index
    %457 = vector.load %arg10[%c1_784, %c0_785, %c2_786, %c1_787, %c0_788] : memref<4x2x6x6x64xbf16, #tpu.memory_space<vmem>>, vector<1x1x1x4x64xbf16>
    %458 = vector.shape_cast %457 : vector<1x1x1x4x64xbf16> to vector<4x64xbf16>
    %c1_789 = arith.constant 1 : index
    %c0_790 = arith.constant 0 : index
    %c3_791 = arith.constant 3 : index
    %c1_792 = arith.constant 1 : index
    %c0_793 = arith.constant 0 : index
    %459 = vector.load %arg10[%c1_789, %c0_790, %c3_791, %c1_792, %c0_793] : memref<4x2x6x6x64xbf16, #tpu.memory_space<vmem>>, vector<1x1x1x4x64xbf16>
    %460 = vector.shape_cast %459 : vector<1x1x1x4x64xbf16> to vector<4x64xbf16>
    %c1_794 = arith.constant 1 : index
    %c0_795 = arith.constant 0 : index
    %c4_796 = arith.constant 4 : index
    %c1_797 = arith.constant 1 : index
    %c0_798 = arith.constant 0 : index
    %461 = vector.load %arg10[%c1_794, %c0_795, %c4_796, %c1_797, %c0_798] : memref<4x2x6x6x64xbf16, #tpu.memory_space<vmem>>, vector<1x1x1x4x64xbf16>
    %462 = vector.shape_cast %461 : vector<1x1x1x4x64xbf16> to vector<4x64xbf16>
    %c1_799 = arith.constant 1 : index
    %c0_800 = arith.constant 0 : index
    %c5_801 = arith.constant 5 : index
    %c1_802 = arith.constant 1 : index
    %c0_803 = arith.constant 0 : index
    %463 = vector.load %arg10[%c1_799, %c0_800, %c5_801, %c1_802, %c0_803] : memref<4x2x6x6x64xbf16, #tpu.memory_space<vmem>>, vector<1x1x1x4x64xbf16>
    %464 = vector.shape_cast %463 : vector<1x1x1x4x64xbf16> to vector<4x64xbf16>
    %c1_804 = arith.constant 1 : index
    %c1_805 = arith.constant 1 : index
    %c2_806 = arith.constant 2 : index
    %c1_807 = arith.constant 1 : index
    %c0_808 = arith.constant 0 : index
    %465 = vector.load %arg10[%c1_804, %c1_805, %c2_806, %c1_807, %c0_808] : memref<4x2x6x6x64xbf16, #tpu.memory_space<vmem>>, vector<1x1x1x4x64xbf16>
    %466 = vector.shape_cast %465 : vector<1x1x1x4x64xbf16> to vector<4x64xbf16>
    %c1_809 = arith.constant 1 : index
    %c1_810 = arith.constant 1 : index
    %c3_811 = arith.constant 3 : index
    %c1_812 = arith.constant 1 : index
    %c0_813 = arith.constant 0 : index
    %467 = vector.load %arg10[%c1_809, %c1_810, %c3_811, %c1_812, %c0_813] : memref<4x2x6x6x64xbf16, #tpu.memory_space<vmem>>, vector<1x1x1x4x64xbf16>
    %468 = vector.shape_cast %467 : vector<1x1x1x4x64xbf16> to vector<4x64xbf16>
    %c1_814 = arith.constant 1 : index
    %c1_815 = arith.constant 1 : index
    %c4_816 = arith.constant 4 : index
    %c1_817 = arith.constant 1 : index
    %c0_818 = arith.constant 0 : index
    %469 = vector.load %arg10[%c1_814, %c1_815, %c4_816, %c1_817, %c0_818] : memref<4x2x6x6x64xbf16, #tpu.memory_space<vmem>>, vector<1x1x1x4x64xbf16>
    %470 = vector.shape_cast %469 : vector<1x1x1x4x64xbf16> to vector<4x64xbf16>
    %c1_819 = arith.constant 1 : index
    %c1_820 = arith.constant 1 : index
    %c5_821 = arith.constant 5 : index
    %c1_822 = arith.constant 1 : index
    %c0_823 = arith.constant 0 : index
    %471 = vector.load %arg10[%c1_819, %c1_820, %c5_821, %c1_822, %c0_823] : memref<4x2x6x6x64xbf16, #tpu.memory_space<vmem>>, vector<1x1x1x4x64xbf16>
    %472 = vector.shape_cast %471 : vector<1x1x1x4x64xbf16> to vector<4x64xbf16>
    %473 = tpu.concatenate %458, %460, %462, %464, %466, %468, %470, %472 in 0 : vector<4x64xbf16>, vector<4x64xbf16>, vector<4x64xbf16>, vector<4x64xbf16>, vector<4x64xbf16>, vector<4x64xbf16>, vector<4x64xbf16>, vector<4x64xbf16> -> vector<32x64xbf16>
    %c14 = arith.constant 14 : index
    %c0_824 = arith.constant 0 : index
    %c0_825 = arith.constant 0 : index
    %474 = vector.load %arg5[%c14, %c0_824, %c0_825] : memref<16x64x128xbf16, #tpu.memory_space<vmem>>, vector<1x64x128xbf16>
    %475 = vector.shape_cast %474 : vector<1x64x128xbf16> to vector<64x128xbf16>
    %cst_826 = arith.constant dense<0.000000e+00> : vector<32x128xf32>
    %476 = tpu.matmul %473, %475, %cst_826 {dimension_numbers = #tpu.dot_dimension_numbers<[1], [0], [0], [1], [0, 0, 1, 1], [], []>} : vector<32x64xbf16>, vector<64x128xbf16>, vector<32x128xf32> -> vector<32x128xf32>
    %477 = arith.addf %456, %476 : vector<32x128xf32>
    %c0_827 = arith.constant 0 : index
    %c0_828 = arith.constant 0 : index
    %c2_829 = arith.constant 2 : index
    %c2_830 = arith.constant 2 : index
    %c0_831 = arith.constant 0 : index
    %478 = vector.load %arg10[%c0_827, %c0_828, %c2_829, %c2_830, %c0_831] : memref<4x2x6x6x64xbf16, #tpu.memory_space<vmem>>, vector<1x1x1x4x64xbf16>
    %479 = vector.shape_cast %478 : vector<1x1x1x4x64xbf16> to vector<4x64xbf16>
    %c0_832 = arith.constant 0 : index
    %c0_833 = arith.constant 0 : index
    %c3_834 = arith.constant 3 : index
    %c2_835 = arith.constant 2 : index
    %c0_836 = arith.constant 0 : index
    %480 = vector.load %arg10[%c0_832, %c0_833, %c3_834, %c2_835, %c0_836] : memref<4x2x6x6x64xbf16, #tpu.memory_space<vmem>>, vector<1x1x1x4x64xbf16>
    %481 = vector.shape_cast %480 : vector<1x1x1x4x64xbf16> to vector<4x64xbf16>
    %c0_837 = arith.constant 0 : index
    %c0_838 = arith.constant 0 : index
    %c4_839 = arith.constant 4 : index
    %c2_840 = arith.constant 2 : index
    %c0_841 = arith.constant 0 : index
    %482 = vector.load %arg10[%c0_837, %c0_838, %c4_839, %c2_840, %c0_841] : memref<4x2x6x6x64xbf16, #tpu.memory_space<vmem>>, vector<1x1x1x4x64xbf16>
    %483 = vector.shape_cast %482 : vector<1x1x1x4x64xbf16> to vector<4x64xbf16>
    %c0_842 = arith.constant 0 : index
    %c0_843 = arith.constant 0 : index
    %c5_844 = arith.constant 5 : index
    %c2_845 = arith.constant 2 : index
    %c0_846 = arith.constant 0 : index
    %484 = vector.load %arg10[%c0_842, %c0_843, %c5_844, %c2_845, %c0_846] : memref<4x2x6x6x64xbf16, #tpu.memory_space<vmem>>, vector<1x1x1x4x64xbf16>
    %485 = vector.shape_cast %484 : vector<1x1x1x4x64xbf16> to vector<4x64xbf16>
    %c0_847 = arith.constant 0 : index
    %c1_848 = arith.constant 1 : index
    %c2_849 = arith.constant 2 : index
    %c2_850 = arith.constant 2 : index
    %c0_851 = arith.constant 0 : index
    %486 = vector.load %arg10[%c0_847, %c1_848, %c2_849, %c2_850, %c0_851] : memref<4x2x6x6x64xbf16, #tpu.memory_space<vmem>>, vector<1x1x1x4x64xbf16>
    %487 = vector.shape_cast %486 : vector<1x1x1x4x64xbf16> to vector<4x64xbf16>
    %c0_852 = arith.constant 0 : index
    %c1_853 = arith.constant 1 : index
    %c3_854 = arith.constant 3 : index
    %c2_855 = arith.constant 2 : index
    %c0_856 = arith.constant 0 : index
    %488 = vector.load %arg10[%c0_852, %c1_853, %c3_854, %c2_855, %c0_856] : memref<4x2x6x6x64xbf16, #tpu.memory_space<vmem>>, vector<1x1x1x4x64xbf16>
    %489 = vector.shape_cast %488 : vector<1x1x1x4x64xbf16> to vector<4x64xbf16>
    %c0_857 = arith.constant 0 : index
    %c1_858 = arith.constant 1 : index
    %c4_859 = arith.constant 4 : index
    %c2_860 = arith.constant 2 : index
    %c0_861 = arith.constant 0 : index
    %490 = vector.load %arg10[%c0_857, %c1_858, %c4_859, %c2_860, %c0_861] : memref<4x2x6x6x64xbf16, #tpu.memory_space<vmem>>, vector<1x1x1x4x64xbf16>
    %491 = vector.shape_cast %490 : vector<1x1x1x4x64xbf16> to vector<4x64xbf16>
    %c0_862 = arith.constant 0 : index
    %c1_863 = arith.constant 1 : index
    %c5_864 = arith.constant 5 : index
    %c2_865 = arith.constant 2 : index
    %c0_866 = arith.constant 0 : index
    %492 = vector.load %arg10[%c0_862, %c1_863, %c5_864, %c2_865, %c0_866] : memref<4x2x6x6x64xbf16, #tpu.memory_space<vmem>>, vector<1x1x1x4x64xbf16>
    %493 = vector.shape_cast %492 : vector<1x1x1x4x64xbf16> to vector<4x64xbf16>
    %494 = tpu.concatenate %479, %481, %483, %485, %487, %489, %491, %493 in 0 : vector<4x64xbf16>, vector<4x64xbf16>, vector<4x64xbf16>, vector<4x64xbf16>, vector<4x64xbf16>, vector<4x64xbf16>, vector<4x64xbf16>, vector<4x64xbf16> -> vector<32x64xbf16>
    %c15 = arith.constant 15 : index
    %c0_867 = arith.constant 0 : index
    %c0_868 = arith.constant 0 : index
    %495 = vector.load %arg5[%c15, %c0_867, %c0_868] : memref<16x64x128xbf16, #tpu.memory_space<vmem>>, vector<1x64x128xbf16>
    %496 = vector.shape_cast %495 : vector<1x64x128xbf16> to vector<64x128xbf16>
    %cst_869 = arith.constant dense<0.000000e+00> : vector<32x128xf32>
    %497 = tpu.matmul %494, %496, %cst_869 {dimension_numbers = #tpu.dot_dimension_numbers<[1], [0], [0], [1], [0, 0, 1, 1], [], []>} : vector<32x64xbf16>, vector<64x128xbf16>, vector<32x128xf32> -> vector<32x128xf32>
    %498 = arith.addf %477, %497 : vector<32x128xf32>
    %c0_870 = arith.constant 0 : index
    %c0_871 = arith.constant 0 : index
    %499 = vector.load %arg6[%c0_870, %c0_871] : memref<1x128xf32, #tpu.memory_space<vmem>>, vector<1x128xf32>
    %c0_872 = arith.constant 0 : index
    %c0_873 = arith.constant 0 : index
    %500 = vector.load %arg7[%c0_872, %c0_873] : memref<1x128xf32, #tpu.memory_space<vmem>>, vector<1x128xf32>
    %cst_874 = arith.constant dense<0.000000e+00> : vector<128xf32>
    %501 = vector.multi_reduction <add>, %498, %cst_874 [0] : vector<32x128xf32> to vector<128xf32>
    %502 = vector.shape_cast %501 : vector<128xf32> to vector<1x128xf32>
    %503 = arith.mulf %498, %498 : vector<32x128xf32>
    %cst_875 = arith.constant dense<0.000000e+00> : vector<128xf32>
    %504 = vector.multi_reduction <add>, %503, %cst_875 [0] : vector<32x128xf32> to vector<128xf32>
    %505 = vector.shape_cast %504 : vector<128xf32> to vector<1x128xf32>
    %cst_876 = arith.constant 3.125000e-02 : f32
    %506 = vector.broadcast %cst_876 : f32 to vector<1x128xf32>
    %507 = arith.mulf %502, %506 : vector<1x128xf32>
    %cst_877 = arith.constant 3.125000e-02 : f32
    %508 = vector.broadcast %cst_877 : f32 to vector<1x128xf32>
    %509 = arith.mulf %505, %508 : vector<1x128xf32>
    %510 = arith.mulf %507, %507 : vector<1x128xf32>
    %511 = arith.subf %509, %510 : vector<1x128xf32>
    %cst_878 = arith.constant 9.99999974E-6 : f32
    %512 = vector.broadcast %cst_878 : f32 to vector<1x128xf32>
    %513 = arith.addf %511, %512 : vector<1x128xf32>
    %514 = math.rsqrt %513 : vector<1x128xf32>
    %515 = vector.broadcast %507 : vector<1x128xf32> to vector<32x128xf32>
    %516 = arith.subf %498, %515 : vector<32x128xf32>
    %517 = arith.mulf %514, %499 : vector<1x128xf32>
    %518 = vector.broadcast %517 : vector<1x128xf32> to vector<32x128xf32>
    %519 = arith.mulf %516, %518 : vector<32x128xf32>
    %520 = vector.broadcast %500 : vector<1x128xf32> to vector<32x128xf32>
    %521 = arith.addf %519, %520 : vector<32x128xf32>
    %cst_879 = arith.constant 0.000000e+00 : f32
    %522 = vector.broadcast %cst_879 : f32 to vector<32x128xf32>
    %523 = arith.cmpf ogt, %521, %522 : vector<32x128xf32>
    %cst_880 = arith.constant 2.000000e-01 : f32
    %524 = vector.broadcast %cst_880 : f32 to vector<32x128xf32>
    %525 = arith.mulf %524, %521 : vector<32x128xf32>
    %526 = arith.select %523, %521, %525 : vector<32x128xi1>, vector<32x128xf32>
    %527 = arith.truncf %526 : vector<32x128xf32> to vector<32x128xbf16>
    %528 = arith.extf %527 : vector<32x128xbf16> to vector<32x128xf32>
    %c0_881 = arith.constant 0 : index
    %c0_882 = arith.constant 0 : index
    %529 = vector.load %arg8[%c0_881, %c0_882] : memref<16x128xbf16, #tpu.memory_space<vmem>>, vector<16x128xbf16>
    %530 = arith.extf %529 : vector<16x128xbf16> to vector<16x128xf32>
    %531 = vector.extract_strided_slice %528 {offsets = [0, 0], sizes = [16, 128], strides = [1, 1]} : vector<32x128xf32> to vector<16x128xf32>
    %532 = arith.mulf %531, %530 : vector<16x128xf32>
    %cst_883 = arith.constant dense<0.000000e+00> : vector<16xf32>
    %533 = vector.multi_reduction <add>, %532, %cst_883 [1] : vector<16x128xf32> to vector<16xf32>
    %534 = vector.shape_cast %533 : vector<16xf32> to vector<16x1xf32>
    %cst_884 = arith.constant dense<0.000000e+00> : vector<1xf32>
    %535 = vector.multi_reduction <add>, %534, %cst_884 [0] : vector<16x1xf32> to vector<1xf32>
    %536 = vector.shape_cast %535 : vector<1xf32> to vector<1x1xf32>
    %537 = vector.extract_strided_slice %528 {offsets = [16, 0], sizes = [16, 128], strides = [1, 1]} : vector<32x128xf32> to vector<16x128xf32>
    %538 = arith.mulf %537, %530 : vector<16x128xf32>
    %cst_885 = arith.constant dense<0.000000e+00> : vector<16xf32>
    %539 = vector.multi_reduction <add>, %538, %cst_885 [1] : vector<16x128xf32> to vector<16xf32>
    %540 = vector.shape_cast %539 : vector<16xf32> to vector<16x1xf32>
    %cst_886 = arith.constant dense<0.000000e+00> : vector<1xf32>
    %541 = vector.multi_reduction <add>, %540, %cst_886 [0] : vector<16x1xf32> to vector<1xf32>
    %542 = vector.shape_cast %541 : vector<1xf32> to vector<1x1xf32>
    %543 = tpu.concatenate %536, %542 in 0 : vector<1x1xf32>, vector<1x1xf32> -> vector<2x1xf32>
    %cst_887 = arith.constant 0.000000e+00 : f32
    %544 = vector.broadcast %cst_887 : f32 to vector<2x1xf32>
    %545 = arith.subf %544, %543 : vector<2x1xf32>
    %546 = math.exp %545 : vector<2x1xf32>
    %cst_888 = arith.constant 1.000000e+00 : f32
    %547 = vector.broadcast %cst_888 : f32 to vector<2x1xf32>
    %548 = arith.addf %547, %546 : vector<2x1xf32>
    %cst_889 = arith.constant 1.000000e+00 : f32
    %549 = vector.broadcast %cst_889 : f32 to vector<2x1xf32>
    %550 = arith.divf %549, %548 : vector<2x1xf32>
    %c0_890 = arith.constant 0 : index
    %c0_891 = arith.constant 0 : index
    %551 = vector.load %arg9[%c0_890, %c0_891] : memref<2x1xf32, #tpu.memory_space<vmem>>, vector<2x1xf32>
    tpu.vector_store %arg9[%c0_890, %c0_891], %550 {strides = array<i32>} : memref<2x1xf32, #tpu.memory_space<vmem>>, vector<2x1xf32>,
    return
  }
  func.func @transform_0(%arg0: i32) -> (i32, i32) {
    %c0_i32 = arith.constant 0 : i32
    %c0_i32_0 = arith.constant 0 : i32
    %c0_i32_1 = arith.constant 0 : i32
    return %c0_i32, %c0_i32_0 : i32, i32
  }
  func.func @transform_1(%arg0: i32) -> (i32, i32) {
    %c0_i32 = arith.constant 0 : i32
    %c0_i32_0 = arith.constant 0 : i32
    %c0_i32_1 = arith.constant 0 : i32
    return %c0_i32, %c0_i32_0 : i32, i32
  }
  func.func @transform_2(%arg0: i32) -> (i32, i32) {
    %c0_i32 = arith.constant 0 : i32
    %c0_i32_0 = arith.constant 0 : i32
    %c0_i32_1 = arith.constant 0 : i32
    return %c0_i32, %c0_i32_0 : i32, i32
  }
  func.func @transform_3(%arg0: i32) -> (i32, i32) {
    %c0_i32 = arith.constant 0 : i32
    %c0_i32_0 = arith.constant 0 : i32
    %c0_i32_1 = arith.constant 0 : i32
    return %c0_i32, %c0_i32_0 : i32, i32
  }
  func.func @transform_4(%arg0: i32) -> (i32, i32, i32) {
    %c0_i32 = arith.constant 0 : i32
    %c0_i32_0 = arith.constant 0 : i32
    %c0_i32_1 = arith.constant 0 : i32
    %c0_i32_2 = arith.constant 0 : i32
    return %c0_i32, %c0_i32_0, %c0_i32_1 : i32, i32, i32
  }
  func.func @transform_5(%arg0: i32) -> (i32, i32) {
    %c0_i32 = arith.constant 0 : i32
    %c0_i32_0 = arith.constant 0 : i32
    %c0_i32_1 = arith.constant 0 : i32
    return %c0_i32, %c0_i32_0 : i32, i32
  }
  func.func @transform_6(%arg0: i32) -> (i32, i32) {
    %c0_i32 = arith.constant 0 : i32
    %c0_i32_0 = arith.constant 0 : i32
    %c0_i32_1 = arith.constant 0 : i32
    return %c0_i32, %c0_i32_0 : i32, i32
  }
  func.func @transform_7(%arg0: i32) -> (i32, i32) {
    %c0_i32 = arith.constant 0 : i32
    %c0_i32_0 = arith.constant 0 : i32
    %c0_i32_1 = arith.constant 0 : i32
    return %c0_i32, %c0_i32_0 : i32, i32
  }
  func.func @transform_8(%arg0: i32) -> (i32, i32) {
    %c0_i32 = arith.constant 0 : i32
    %c0_i32_0 = arith.constant 0 : i32
    %c0_i32_1 = arith.constant 0 : i32
    return %c0_i32, %c0_i32_0 : i32, i32
  }
}

</mosaic_0001>

<bundles_post_ra>
// kernel: discriminator_forward.3
= control target key start
LH: loop header
LB: loop body
LE: loop exit
PB: predicated region body
PF: predicated region fallthrough
CT: control target
= control target key end

     0   :  { %s859_s9 = smov 0   ;;  %s984_s0 = inlined_call_operand.vmem [shape: bf16[256,384], index: 0, kind: input, shape index: {}]   ;;  %s985_s1 = inlined_call_operand.vmem [shape: bf16[384,128], index: 1, kind: input, shape index: {}]   ;;  %s986_s2 = inlined_call_operand.vmem [shape: bf16[256,128], index: 2, kind: output, shape index: {}]  }
   0x1 LB: > { %s605_s10 = sadd.s32 4294967295, %s842_s9   ;;  %p609_p0 = scmp.ge.s32.totalorder %s842_s9, 1  ;;  %s842_s9 = sphi %s859_s9, %s12_s9  }
   0x2   : > { %p114_p1 = scmp.lt.s32.totalorder %s842_s9, 5 }
   0x4   : > { %p115_p2 = pnand %p609_p0, %p114_p1 }
   0x5   : > { %s610_s29 = sshll.u32 (!%p115_p2), %s605_s10, 3 }
   0x6   : > { %118 = sbr.rel (%p115_p2) target bundleno = 241 (0xf1), region = 28  ;;  %p138_p3 = scmp.lt.s32.totalorder (!%p115_p2), %s610_s29, 31 }
   0xb   : > { %v779_v0 = vld [vmem:[%s985_s1 + $0x38] sm:$0xff]  ;;  %v778_v3 = vld [vmem:[%s985_s1 + $0x30] sm:$0xff]  ;;  %v777_v6 = vld [vmem:[%s985_s1 + $0x28] sm:$0xff]  ;;  %s988_s29 = smov (!%p138_p3, %s610_s29), 31 }
   0xc   : > { %v787_v1 = vld [vmem:[%s985_s1 + $0x78] sm:$0xff]  ;;  %422 = vmatpush.bf16.msra.mxu0 %v779_v0  ;;  %v786_v4 = vld [vmem:[%s985_s1 + $0x70] sm:$0xff]  ;;  %819 = vmatpush.bf16.msra.mxu3 %v779_v0  ;;  %v785_v7 = vld [vmem:[%s985_s1 + $0x68] sm:$0xff]  ;;  %s827_s19 = smul.u32 12, %s988_s29  ;;  %s613_s11 = sshll.u32 %s988_s29, 2 }
   0xd   : > { %v795_v2 = vld [vmem:[%s985_s1 + $0xb8] sm:$0xff]  ;;  %451 = vmatpush.bf16.msra.mxu1 %v787_v1  ;;  %v794_v5 = vld [vmem:[%s985_s1 + $0xb0] sm:$0xff]  ;;  %v793_v8 = vld [vmem:[%s985_s1 + $0xa8] sm:$0xff]  ;;  %s975_s14 = scalar_lea.vmem %s986_s2, %s613_s11 }
   0xe   : > { %480 = vmatpush.bf16.msra.mxu2 %v795_v2  ;;  %v776_v9 = vld [vmem:[%s985_s1 + $0x20] sm:$0xff]  ;;  %v775_v12 = vld [vmem:[%s985_s1 + $0x18] sm:$0xff]  ;;  %v774_v15 = vld [vmem:[%s985_s1 + $0x10] sm:$0xff]  ;;  %s933_s28 = scalar_lea.vmem %s984_s0, %s827_s19 }
   0xf   : > { %v784_v10 = vld [vmem:[%s985_s1 + $0x60] sm:$0xff]  ;;  %v783_v13 = vld [vmem:[%s985_s1 + $0x58] sm:$0xff]  ;;  %v782_v16 = vld [vmem:[%s985_s1 + $0x50] sm:$0xff] }
  0x10   : > { %423 = vmatpush.bf16.msra.mxu0 %v778_v3  ;;  %820 = vmatpush.bf16.msra.mxu3 %v778_v3  ;;  %v792_v11 = vld [vmem:[%s985_s1 + $0xa0] sm:$0xff]  ;;  %v791_v14 = vld [vmem:[%s985_s1 + $0x98] sm:$0xff]  ;;  %v790_v17 = vld [vmem:[%s985_s1 + $0x90] sm:$0xff] }
  0x11   : > { %452 = vmatpush.bf16.msra.mxu1 %v786_v4  ;;  %v773_v18 = vld [vmem:[%s985_s1 + $0x8] sm:$0xff]  ;;  %v772_v21 = vld [vmem:[%s985_s1] sm:$0xff]  ;;  %v618_v27 = vld [vmem:[%s933_s28 + $0xc] sm:$0xf0] }
  0x12   : > { %481 = vmatpush.bf16.msra.mxu2 %v794_v5  ;;  %v781_v19 = vld [vmem:[%s985_s1 + $0x48] sm:$0xff]  ;;  %v780_v22 = vld [vmem:[%s985_s1 + $0x40] sm:$0xff]  ;;  %v762_v29 = vld [vmem:[%s933_s28 + $0x10] sm:$0xf0] }
  0x13   : > { %v789_v20 = vld [vmem:[%s985_s1 + $0x88] sm:$0xff]  ;;  %v788_v23 = vld [vmem:[%s985_s1 + $0x80] sm:$0xff]  ;;  %v628_v30 = vld [vmem:[%s933_s28 + $0x18] sm:$0xf] }
  0x14   : > { %424 = vmatpush.bf16.msra.mxu0 %v777_v6  ;;  %821 = vmatpush.bf16.msra.mxu3 %v777_v6  ;;  %v616_v24 = vld [vmem:[%s933_s28] sm:$0xf]  ;;  %v761_v25 = vld [vmem:[%s933_s28 + $0x8] sm:$0xf0]  ;;  %v760_v26 = vld [vmem:[%s933_s28 + $0x4] sm:$0xf] }
  0x15   : > { %453 = vmatpush.bf16.msra.mxu1 %v785_v7  ;;  %v624_v28 = vld [vmem:[%s933_s28 + $0x8] sm:$0xf]  ;;  %v764_v31 = vld [vmem:[%s933_s28 + $0x20] sm:$0xf0]  ;;  %v617_v32 = vor.u32 %v761_v25, %v616_v24  ;;  %v621_v33 = vor.u32 %v760_v26, %v618_v27  ;;  %v763_v36 = vld [vmem:[%s933_s28 + $0x1c] sm:$0xf] }
  0x16   : > { %482 = vmatpush.bf16.msra.mxu2 %v793_v8  ;;  %v625_v34 = vor.u32 %v762_v29, %v624_v28  ;;  %v629_v35 = vor.u32 %v764_v31, %v628_v30  ;;  %v630_v37 = vld [vmem:[%s933_s28 + $0x24] sm:$0xf0]  ;;  %v636_v38 = vld [vmem:[%s933_s28 + $0x20] sm:$0xf]  ;;  %v765_v39 = vld [vmem:[%s933_s28 + $0x28] sm:$0xf0] }
  0x17   : > { %v640_v40 = vld [vmem:[%s933_s28 + $0x30] sm:$0xf]  ;;  %v767_v41 = vld [vmem:[%s933_s28 + $0x38] sm:$0xf0]  ;;  %v633_v42 = vor.u32 %v763_v36, %v630_v37  ;;  %v637_v43 = vor.u32 %v765_v39, %v636_v38  ;;  %v766_v45 = vld [vmem:[%s933_s28 + $0x34] sm:$0xf] }
  0x18   : > { %425 = vmatpush.bf16.msra.mxu0 %v776_v9  ;;  %822 = vmatpush.bf16.msra.mxu3 %v776_v9  ;;  %v641_v44 = vor.u32 %v767_v41, %v640_v40  ;;  %v642_v46 = vld [vmem:[%s933_s28 + $0x3c] sm:$0xf0]  ;;  %v648_v47 = vld [vmem:[%s933_s28 + $0x38] sm:$0xf]  ;;  %v768_v48 = vld [vmem:[%s933_s28 + $0x40] sm:$0xf0] }
  0x19   : > { %454 = vmatpush.bf16.msra.mxu1 %v784_v10  ;;  %v652_v49 = vld [vmem:[%s933_s28 + $0x48] sm:$0xf]  ;;  %v770_v50 = vld [vmem:[%s933_s28 + $0x50] sm:$0xf0]  ;;  %v645_v51 = vor.u32 %v766_v45, %v642_v46  ;;  %v649_v52 = vor.u32 %v768_v48, %v648_v47  ;;  %v769_v54 = vld [vmem:[%s933_s28 + $0x4c] sm:$0xf] }
  0x1a   : > { %483 = vmatpush.bf16.msra.mxu2 %v792_v11  ;;  %v653_v53 = vor.u32 %v770_v50, %v652_v49  ;;  %v654_v55 = vld [vmem:[%s933_s28 + $0x54] sm:$0xf0]  ;;  %v660_v56 = vld [vmem:[%s933_s28 + $0x50] sm:$0xf]  ;;  %v771_v57 = vld [vmem:[%s933_s28 + $0x58] sm:$0xf0] }
  0x1b   : > { %v657_v58 = vor.u32 %v769_v54, %v654_v55  ;;  %v661_v59 = vor.u32 %v771_v57, %v660_v56 }
  0x1c   : > { %426 = vmatpush.bf16.msra.mxu0 %v775_v12  ;;  %823 = vmatpush.bf16.msra.mxu3 %v775_v12 }
  0x1d   : > { %455 = vmatpush.bf16.msra.mxu1 %v783_v13 }
  0x1e   : > { %484 = vmatpush.bf16.msra.mxu2 %v791_v14 }
  0x20   : > { %427 = vmatpush.bf16.msra.mxu0 %v774_v15  ;;  %824 = vmatpush.bf16.msra.mxu3 %v774_v15 }
  0x21   : > { %456 = vmatpush.bf16.msra.mxu1 %v782_v16 }
  0x22   : > { %485 = vmatpush.bf16.msra.mxu2 %v790_v17 }
  0x24   : > { %428 = vmatpush.bf16.msra.mxu0 %v773_v18  ;;  %825 = vmatpush.bf16.msra.mxu3 %v773_v18 }
  0x25   : > { %457 = vmatpush.bf16.msra.mxu1 %v781_v19 }
  0x26   : > { %486 = vmatpush.bf16.msra.mxu2 %v789_v20 }
  0x28   : > { %429 = vmatpush.bf16.msra.mxu0 %v772_v21  ;;  %826 = vmatpush.bf16.msra.mxu3 %v772_v21 }
  0x29   : > { %458 = vmatpush.bf16.msra.mxu1 %v780_v22 }
  0x2a   : > { %487 = vmatpush.bf16.msra.mxu2 %v788_v23 }
  0x2b   : > { %430 = vmatmul.bf16.vlgmr.msra.gmra.mxu0 %v617_v32  ;;  %435 = vmatmul.bf16.vlgmr.msra.gmra.mxu3 %v629_v35 }
  0x2c   : > { %459 = vmatmul.bf16.vlgmr.msra.gmra.mxu1 %v621_v33 }
  0x2d   : > { %488 = vmatmul.bf16.vlgmr.msra.gmra.mxu2 %v625_v34 }
  0x3b   : > { %440 = vmatmul.bf16.gmra.mxu3 %v641_v44 }
  0x3c   : > { %464 = vmatmul.bf16.gmra.mxu1 %v633_v42 }
  0x3d   : > { %493 = vmatmul.bf16.gmra.mxu2 %v637_v43 }
  0x4b   : > { %445 = vmatmul.bf16.gmra.mxu3 %v653_v53 }
  0x4c   : > { %469 = vmatmul.bf16.gmra.mxu1 %v645_v51 }
  0x4d   : > { %498 = vmatmul.bf16.gmra.mxu2 %v649_v52 }
  0x5c   : > { %474 = vmatmul.bf16.gmra.mxu1 %v657_v58 }
  0x5d   : > { %503 = vmatmul.bf16.gmra.mxu2 %v661_v59 }
  0xa8   : > { %v431_v61 = vpop.f32.mrf.mxu0 }
  0xa9   : > { %v460_v60 = vpop.f32.mrf.mxu1 }
  0xaa   : > { %v461_v63 = vadd.f32 %v460_v60, %v431_v61 }
  0xae   : > { %v436_v2 = vpop.f32.mrf.mxu3 }
  0xb0   : > { %v489_v62 = vpop.f32.mrf.mxu2  ;;  %v433_v1 = vpop.f32.mrf.mxu0 }
  0xb1   : > { %v462_v0 = vpop.f32.mrf.mxu1  ;;  %v490_v3 = vadd.f32 %v489_v62, %v461_v63 }
  0xb2   : > { %v463_v4 = vadd.f32 %v462_v0, %v433_v1 }
  0xb3   : > { %v517_v6 = vmul.f32 0.2, %v490_v3  ;;  %vm509_vm0 = vcmp.gt.f32.partialorder %v490_v3, 0.0 }
  0xb5   : > { %v525_v10 = vsel %vm509_vm0, %v490_v3, %v517_v6 }
  0xb6   : > { %v438_v13 = vpop.f32.mrf.mxu3 }
  0xb8   : > { %v491_v5 = vpop.f32.mrf.mxu2 }
  0xb9   : > { %v492_v7 = vadd.f32 %v491_v5, %v463_v4  ;;  %v465_v8 = vpop.f32.mrf.mxu1 }
  0xba   : > { %v466_v15 = vadd.f32 %v465_v8, %v436_v2 }
  0xbb   : > { %vm510_vm1 = vcmp.gt.f32.partialorder %v492_v7, 0.0  ;;  %v518_v9 = vmul.f32 0.2, %v492_v7 }
  0xbd   : > { %v526_v11 = vsel %vm510_vm1, %v492_v7, %v518_v9 }
  0xbe   : > { %v799_v12 = vpack.c.bf16 %v526_v11, %v525_v10  ;;  %v441_v19 = vpop.f32.mrf.mxu3 }
  0xc0   : > { %800 = vst [vmem:[%s975_s14] sm:$0xff] %v799_v12   ;;  %v494_v14 = vpop.f32.mrf.mxu2 }
  0xc1   : > { %v467_v16 = vpop.f32.mrf.mxu1  ;;  %v495_v17 = vadd.f32 %v494_v14, %v466_v15 }
  0xc2   : > { %v468_v18 = vadd.f32 %v467_v16, %v438_v13 }
  0xc3   : > { %v519_v21 = vmul.f32 0.2, %v495_v17  ;;  %vm511_vm2 = vcmp.gt.f32.partialorder %v495_v17, 0.0 }
  0xc5   : > { %v527_v25 = vsel %vm511_vm2, %v495_v17, %v519_v21 }
  0xc6   : > { %v443_v31 = vpop.f32.mrf.mxu3 }
  0xc8   : > { %v496_v20 = vpop.f32.mrf.mxu2 }
  0xc9   : > { %v497_v22 = vadd.f32 %v496_v20, %v468_v18  ;;  %v470_v23 = vpop.f32.mrf.mxu1 }
  0xca   : > { %v471_v29 = vadd.f32 %v470_v23, %v441_v19 }
  0xcb   : > { %vm512_vm3 = vcmp.gt.f32.partialorder %v497_v22, 0.0  ;;  %v520_v24 = vmul.f32 0.2, %v497_v22 }
  0xcd   : > { %v528_v26 = vsel %vm512_vm3, %v497_v22, %v520_v24 }
  0xce   : > { %v804_v27 = vpack.c.bf16 %v528_v26, %v527_v25  ;;  %v446_v39 = vpop.f32.mrf.mxu3 }
  0xd0   : > { %816 = vst [vmem:[%s975_s14 + $0x8] sm:$0xff] %v804_v27   ;;  %v499_v28 = vpop.f32.mrf.mxu2 }
  0xd1   : > { %v472_v30 = vpop.f32.mrf.mxu1  ;;  %v500_v32 = vadd.f32 %v499_v28, %v471_v29 }
  0xd2   : > { %v473_v33 = vadd.f32 %v472_v30, %v443_v31 }
  0xd3   : > { %v521_v35 = vmul.f32 0.2, %v500_v32  ;;  %vm513_vm4 = vcmp.gt.f32.partialorder %v500_v32, 0.0 }
  0xd5   : > { %v529_v40 = vsel %vm513_vm4, %v500_v32, %v521_v35 }
  0xd6   : > { %v448_v47 = vpop.f32.mrf.mxu3 }
  0xd8   : > { %v501_v34 = vpop.f32.mrf.mxu2 }
  0xd9   : > { %v502_v36 = vadd.f32 %v501_v34, %v473_v33  ;;  %v475_v37 = vpop.f32.mrf.mxu1 }
  0xda   : > { %v476_v44 = vadd.f32 %v475_v37, %v446_v39 }
  0xdb   : > { %vm514_vm5 = vcmp.gt.f32.partialorder %v502_v36, 0.0  ;;  %v522_v38 = vmul.f32 0.2, %v502_v36 }
  0xdd   : > { %v530_v41 = vsel %vm514_vm5, %v502_v36, %v522_v38 }
  0xde   : > { %v809_v42 = vpack.c.bf16 %v530_v41, %v529_v40 }
  0xe0   : > { %817 = vst [vmem:[%s975_s14 + $0x10] sm:$0xff] %v809_v42   ;;  %v504_v43 = vpop.f32.mrf.mxu2 }
  0xe1   : > { %v477_v45 = vpop.f32.mrf.mxu1  ;;  %v505_v46 = vadd.f32 %v504_v43, %v476_v44 }
  0xe2   : > { %v478_v48 = vadd.f32 %v477_v45, %v448_v47 }
  0xe3   : > { %v523_v50 = vmul.f32 0.2, %v505_v46  ;;  %vm515_vm6 = vcmp.gt.f32.partialorder %v505_v46, 0.0 }
  0xe5   : > { %v531_v53 = vsel %vm515_vm6, %v505_v46, %v523_v50 }
  0xe8   : > { %v506_v49 = vpop.f32.mrf.mxu2 }
  0xe9   : > { %v507_v51 = vadd.f32 %v506_v49, %v478_v48 }
  0xeb   : > { %vm516_vm7 = vcmp.gt.f32.partialorder %v507_v51, 0.0  ;;  %v524_v52 = vmul.f32 0.2, %v507_v51 }
  0xed   : > { %v532_v54 = vsel %vm516_vm7, %v507_v51, %v524_v52 }
  0xee   : > { %v814_v55 = vpack.c.bf16 %v532_v54, %v531_v53 }
  0xf0   : > { %818 = vst [vmem:[%s975_s14 + $0x18] sm:$0xff] %v814_v55  }
  0xf1 PF: > { %s12_s9 = sadd.s32 1, %s842_s9  }
  0xf2   : > { %p9_p4 = scmp.ge.s32.totalorder %s12_s9, 6  }
  0xf4   :  { %11 = sbr.rel (!%p9_p4) target bundleno = 1 (0x1), region = 58 }

// kernel: discriminator_forward.4
= control target key start
LH: loop header
LB: loop body
LE: loop exit
PB: predicated region body
PF: predicated region fallthrough
CT: control target
= control target key end

     0   :  { %s4269_s1 = inlined_call_operand.vmem [shape: bf16[1024,128], index: 1, kind: input, shape index: {}]   ;;  %s4270_s0 = inlined_call_operand.vmem [shape: bf16[128,1024], index: 0, kind: input, shape index: {}]   ;;  %s4271_s2 = inlined_call_operand.vmem [shape: f32[128,128], index: 2, kind: input, shape index: {}]   ;;  %s4272_s4 = inlined_call_operand.vmem [shape: f32[1,128], index: 4, kind: input, shape index: {}]   ;;  %s4273_s3 = inlined_call_operand.vmem [shape: f32[1,128], index: 3, kind: input, shape index: {}]   ;;  %s4274_s5 = inlined_call_operand.vmem [shape: bf16[128,128], index: 5, kind: output, shape index: {}]  }
   0x1   :  { %v2802_v0 = vld [vmem:[%s4269_s1 + $0x38] sm:$0xff]  ;;  %v2801_v4 = vld [vmem:[%s4269_s1 + $0x30] sm:$0xff]  ;;  %v2800_v8 = vld [vmem:[%s4269_s1 + $0x28] sm:$0xff] }
   0x2   :  { %v2810_v1 = vld [vmem:[%s4269_s1 + $0x78] sm:$0xff]  ;;  %916 = vmatpush.bf16.msra.mxu0 %v2802_v0  ;;  %v2809_v5 = vld [vmem:[%s4269_s1 + $0x70] sm:$0xff]  ;;  %v2808_v9 = vld [vmem:[%s4269_s1 + $0x68] sm:$0xff] }
   0x3   :  { %v2818_v2 = vld [vmem:[%s4269_s1 + $0xb8] sm:$0xff]  ;;  %965 = vmatpush.bf16.msra.mxu1 %v2810_v1  ;;  %v2817_v6 = vld [vmem:[%s4269_s1 + $0xb0] sm:$0xff]  ;;  %v2816_v10 = vld [vmem:[%s4269_s1 + $0xa8] sm:$0xff] }
   0x4   :  { %v2826_v3 = vld [vmem:[%s4269_s1 + $0xf8] sm:$0xff]  ;;  %1014 = vmatpush.bf16.msra.mxu2 %v2818_v2  ;;  %v2825_v7 = vld [vmem:[%s4269_s1 + $0xf0] sm:$0xff]  ;;  %v2824_v11 = vld [vmem:[%s4269_s1 + $0xe8] sm:$0xff] }
   0x5   :  { %1063 = vmatpush.bf16.msra.mxu3 %v2826_v3  ;;  %v2799_v12 = vld [vmem:[%s4269_s1 + $0x20] sm:$0xff]  ;;  %v2798_v16 = vld [vmem:[%s4269_s1 + $0x18] sm:$0xff]  ;;  %v2797_v20 = vld [vmem:[%s4269_s1 + $0x10] sm:$0xff] }
   0x6   :  { %917 = vmatpush.bf16.msra.mxu0 %v2801_v4  ;;  %v2807_v13 = vld [vmem:[%s4269_s1 + $0x60] sm:$0xff]  ;;  %v2806_v17 = vld [vmem:[%s4269_s1 + $0x58] sm:$0xff]  ;;  %v2805_v21 = vld [vmem:[%s4269_s1 + $0x50] sm:$0xff] }
   0x7   :  { %966 = vmatpush.bf16.msra.mxu1 %v2809_v5  ;;  %v2815_v14 = vld [vmem:[%s4269_s1 + $0xa0] sm:$0xff]  ;;  %v2814_v18 = vld [vmem:[%s4269_s1 + $0x98] sm:$0xff]  ;;  %v2813_v22 = vld [vmem:[%s4269_s1 + $0x90] sm:$0xff] }
   0x8   :  { %1015 = vmatpush.bf16.msra.mxu2 %v2817_v6  ;;  %v2823_v15 = vld [vmem:[%s4269_s1 + $0xe0] sm:$0xff]  ;;  %v2822_v19 = vld [vmem:[%s4269_s1 + $0xd8] sm:$0xff]  ;;  %v2821_v23 = vld [vmem:[%s4269_s1 + $0xd0] sm:$0xff] }
   0x9   :  { %1064 = vmatpush.bf16.msra.mxu3 %v2825_v7  ;;  %v2796_v24 = vld [vmem:[%s4269_s1 + $0x8] sm:$0xff]  ;;  %v2795_v28 = vld [vmem:[%s4269_s1] sm:$0xff]  ;;  %v2850_v40 = vld [vmem:[%s4269_s1 + $0x1b8] sm:$0xff] }
   0xa   :  { %918 = vmatpush.bf16.msra.mxu0 %v2800_v8  ;;  %v2804_v25 = vld [vmem:[%s4269_s1 + $0x48] sm:$0xff]  ;;  %v2803_v29 = vld [vmem:[%s4269_s1 + $0x40] sm:$0xff]  ;;  %v2834_v41 = vld [vmem:[%s4269_s1 + $0x138] sm:$0xff] }
   0xb   :  { %967 = vmatpush.bf16.msra.mxu1 %v2808_v9  ;;  %v2812_v26 = vld [vmem:[%s4269_s1 + $0x88] sm:$0xff]  ;;  %v2811_v30 = vld [vmem:[%s4269_s1 + $0x80] sm:$0xff]  ;;  %v2858_v46 = vld [vmem:[%s4269_s1 + $0x1f8] sm:$0xff] }
   0xc   :  { %1016 = vmatpush.bf16.msra.mxu2 %v2816_v10  ;;  %v2820_v27 = vld [vmem:[%s4269_s1 + $0xc8] sm:$0xff]  ;;  %v2819_v31 = vld [vmem:[%s4269_s1 + $0xc0] sm:$0xff]  ;;  %v2842_v47 = vld [vmem:[%s4269_s1 + $0x178] sm:$0xff] }
   0xd   :  { %1065 = vmatpush.bf16.msra.mxu3 %v2824_v11  ;;  %v2221_v32 = vld [vmem:[%s4270_s0] sm:$0xf]  ;;  %v2731_v34 = vld [vmem:[%s4270_s0 + $0x4] sm:$0xf]  ;;  %v2229_v36 = vld [vmem:[%s4270_s0 + $0x8] sm:$0xf] }
   0xe   :  { %919 = vmatpush.bf16.msra.mxu0 %v2799_v12  ;;  %v2735_v33 = vld [vmem:[%s4270_s0 + $0x1c] sm:$0xf0]  ;;  %v2223_v35 = vld [vmem:[%s4270_s0 + $0x20] sm:$0xf0]  ;;  %v2736_v37 = vld [vmem:[%s4270_s0 + $0x24] sm:$0xf0] }
   0xf   :  { %968 = vmatpush.bf16.msra.mxu1 %v2807_v13  ;;  %v2732_v38 = vld [vmem:[%s4270_s0 + $0xc] sm:$0xf]  ;;  %v2222_v42 = vor.u32 %v2735_v33, %v2221_v32  ;;  %v2226_v43 = vor.u32 %v2731_v34, %v2223_v35  ;;  %v2230_v44 = vor.u32 %v2736_v37, %v2229_v36  ;;  %v2849_v48 = vld [vmem:[%s4269_s1 + $0x1b0] sm:$0xff]  ;;  %v2253_v56 = vld [vmem:[%s4270_s0 + $0x40] sm:$0xf] }
  0x10   :  { %1017 = vmatpush.bf16.msra.mxu2 %v2815_v14  ;;  %v2231_v39 = vld [vmem:[%s4270_s0 + $0x28] sm:$0xf0]  ;;  %v2833_v49 = vld [vmem:[%s4269_s1 + $0x130] sm:$0xff]  ;;  %v2743_v57 = vld [vmem:[%s4270_s0 + $0x5c] sm:$0xf0] }
  0x11   :  { %1066 = vmatpush.bf16.msra.mxu3 %v2823_v15  ;;  %v2234_v45 = vor.u32 %v2732_v38, %v2231_v39  ;;  %v2857_v50 = vld [vmem:[%s4269_s1 + $0x1f0] sm:$0xff]  ;;  %v2848_v52 = vld [vmem:[%s4269_s1 + $0x1a8] sm:$0xff]  ;;  %v2739_v58 = vld [vmem:[%s4270_s0 + $0x44] sm:$0xf]  ;;  %v2254_v0 = vor.u32 %v2743_v57, %v2253_v56 }
  0x12   :  { %920 = vmatpush.bf16.msra.mxu0 %v2798_v16  ;;  %v2841_v51 = vld [vmem:[%s4269_s1 + $0x170] sm:$0xff]  ;;  %v2832_v53 = vld [vmem:[%s4269_s1 + $0x128] sm:$0xff]  ;;  %v2255_v59 = vld [vmem:[%s4270_s0 + $0x60] sm:$0xf0] }
  0x13   :  { %969 = vmatpush.bf16.msra.mxu1 %v2806_v17  ;;  %v2856_v54 = vld [vmem:[%s4269_s1 + $0x1e8] sm:$0xff]  ;;  %v2258_v1 = vor.u32 %v2739_v58, %v2255_v59  ;;  %v2847_v4 = vld [vmem:[%s4269_s1 + $0x1a0] sm:$0xff]  ;;  %v2845_v36 = vld [vmem:[%s4269_s1 + $0x190] sm:$0xff] }
  0x14   :  { %1018 = vmatpush.bf16.msra.mxu2 %v2814_v18  ;;  %v2840_v55 = vld [vmem:[%s4269_s1 + $0x168] sm:$0xff]  ;;  %v2831_v5 = vld [vmem:[%s4269_s1 + $0x120] sm:$0xff]  ;;  %v2829_v37 = vld [vmem:[%s4269_s1 + $0x110] sm:$0xff] }
  0x15   :  { %1067 = vmatpush.bf16.msra.mxu3 %v2822_v19  ;;  %v2261_v60 = vld [vmem:[%s4270_s0 + $0x48] sm:$0xf]  ;;  %v2740_v62 = vld [vmem:[%s4270_s0 + $0x4c] sm:$0xf]  ;;  %v2855_v6 = vld [vmem:[%s4269_s1 + $0x1e0] sm:$0xff] }
  0x16   :  { %921 = vmatpush.bf16.msra.mxu0 %v2797_v20  ;;  %v2744_v61 = vld [vmem:[%s4270_s0 + $0x64] sm:$0xf0]  ;;  %v2263_v63 = vld [vmem:[%s4270_s0 + $0x68] sm:$0xf0]  ;;  %v2839_v7 = vld [vmem:[%s4269_s1 + $0x160] sm:$0xff] }
  0x17   :  { %970 = vmatpush.bf16.msra.mxu1 %v2805_v21  ;;  %v2262_v2 = vor.u32 %v2744_v61, %v2261_v60  ;;  %v2266_v3 = vor.u32 %v2740_v62, %v2263_v63  ;;  %v2285_v8 = vld [vmem:[%s4270_s0 + $0x80] sm:$0xf]  ;;  %v2747_v10 = vld [vmem:[%s4270_s0 + $0x84] sm:$0xf]  ;;  %v2293_v12 = vld [vmem:[%s4270_s0 + $0x88] sm:$0xf] }
  0x18   :  { %1019 = vmatpush.bf16.msra.mxu2 %v2813_v22  ;;  %v2751_v9 = vld [vmem:[%s4270_s0 + $0x9c] sm:$0xf0]  ;;  %v2287_v11 = vld [vmem:[%s4270_s0 + $0xa0] sm:$0xf0]  ;;  %v2752_v13 = vld [vmem:[%s4270_s0 + $0xa4] sm:$0xf0] }
  0x19   :  { %1068 = vmatpush.bf16.msra.mxu3 %v2821_v23  ;;  %v2748_v14 = vld [vmem:[%s4270_s0 + $0x8c] sm:$0xf]  ;;  %v2286_v16 = vor.u32 %v2751_v9, %v2285_v8  ;;  %v2290_v17 = vor.u32 %v2747_v10, %v2287_v11  ;;  %v2294_v18 = vor.u32 %v2752_v13, %v2293_v12  ;;  %v2846_v20 = vld [vmem:[%s4269_s1 + $0x198] sm:$0xff]  ;;  %v2853_v38 = vld [vmem:[%s4269_s1 + $0x1d0] sm:$0xff] }
  0x1a   :  { %922 = vmatpush.bf16.msra.mxu0 %v2796_v24  ;;  %v2295_v15 = vld [vmem:[%s4270_s0 + $0xa8] sm:$0xf0]  ;;  %v2830_v21 = vld [vmem:[%s4269_s1 + $0x118] sm:$0xff]  ;;  %v2317_v24 = vld [vmem:[%s4270_s0 + $0xc0] sm:$0xf] }
  0x1b   :  { %971 = vmatpush.bf16.msra.mxu1 %v2804_v25  ;;  %v2298_v19 = vor.u32 %v2748_v14, %v2295_v15  ;;  %v2854_v22 = vld [vmem:[%s4269_s1 + $0x1d8] sm:$0xff]  ;;  %v2759_v25 = vld [vmem:[%s4270_s0 + $0xdc] sm:$0xf0]  ;;  %v2837_v39 = vld [vmem:[%s4269_s1 + $0x150] sm:$0xff] }
  0x1c   :  { %1020 = vmatpush.bf16.msra.mxu2 %v2812_v26  ;;  %v2838_v23 = vld [vmem:[%s4269_s1 + $0x158] sm:$0xff]  ;;  %v2755_v26 = vld [vmem:[%s4270_s0 + $0xc4] sm:$0xf]  ;;  %v2318_v32 = vor.u32 %v2759_v25, %v2317_v24  ;;  %v2381_v56 = vld [vmem:[%s4270_s0 + $0x140] sm:$0xf] }
  0x1d   :  { %1069 = vmatpush.bf16.msra.mxu3 %v2820_v27  ;;  %v2319_v27 = vld [vmem:[%s4270_s0 + $0xe0] sm:$0xf0]  ;;  %v2775_v57 = vld [vmem:[%s4270_s0 + $0x15c] sm:$0xf0]  ;;  %v2389_v60 = vld [vmem:[%s4270_s0 + $0x148] sm:$0xf] }
  0x1e   :  { %923 = vmatpush.bf16.msra.mxu0 %v2795_v28  ;;  %v2325_v28 = vld [vmem:[%s4270_s0 + $0xc8] sm:$0xf]  ;;  %v2322_v33 = vor.u32 %v2755_v26, %v2319_v27  ;;  %v2771_v58 = vld [vmem:[%s4270_s0 + $0x144] sm:$0xf]  ;;  %v2772_v62 = vld [vmem:[%s4270_s0 + $0x14c] sm:$0xf] }
  0x1f   :  { %972 = vmatpush.bf16.msra.mxu1 %v2803_v29  ;;  %v2760_v29 = vld [vmem:[%s4270_s0 + $0xe4] sm:$0xf0]  ;;  %v2383_v59 = vld [vmem:[%s4270_s0 + $0x160] sm:$0xf0]  ;;  %v2391_v63 = vld [vmem:[%s4270_s0 + $0x168] sm:$0xf0] }
  0x20   :  { %1021 = vmatpush.bf16.msra.mxu2 %v2811_v30  ;;  %v2756_v30 = vld [vmem:[%s4270_s0 + $0xcc] sm:$0xf]  ;;  %v2326_v34 = vor.u32 %v2760_v29, %v2325_v28  ;;  %v2776_v61 = vld [vmem:[%s4270_s0 + $0x164] sm:$0xf0]  ;;  %v2413_v8 = vld [vmem:[%s4270_s0 + $0x180] sm:$0xf] }
  0x21   :  { %1070 = vmatpush.bf16.msra.mxu3 %v2819_v31  ;;  %924 = vmatmul.bf16.vlgmr.msra.gmra.mxu0 %v2222_v42  ;;  %v2327_v31 = vld [vmem:[%s4270_s0 + $0xe8] sm:$0xf0]  ;;  %v2763_v42 = vld [vmem:[%s4270_s0 + $0x104] sm:$0xf]  ;;  %v2783_v9 = vld [vmem:[%s4270_s0 + $0x19c] sm:$0xf0] }
  0x22   :  { %1112 = vmatpush.bf16.msrb.mxu0 %v2834_v41  ;;  %973 = vmatmul.bf16.vlgmr.msra.gmra.mxu1 %v2226_v43  ;;  %v2330_v35 = vor.u32 %v2756_v30, %v2327_v31  ;;  %v2767_v41 = vld [vmem:[%s4270_s0 + $0x11c] sm:$0xf0]  ;;  %v2351_v43 = vld [vmem:[%s4270_s0 + $0x120] sm:$0xf0]  ;;  %v2421_v12 = vld [vmem:[%s4270_s0 + $0x188] sm:$0xf] }
  0x23   :  { %1022 = vmatmul.bf16.vlgmr.msra.gmra.mxu2 %v2230_v44  ;;  %1161 = vmatpush.bf16.msrb.mxu1 %v2842_v47  ;;  %v2357_v44 = vld [vmem:[%s4270_s0 + $0x108] sm:$0xf]  ;;  %v2359_v47 = vld [vmem:[%s4270_s0 + $0x128] sm:$0xf0]  ;;  %v2779_v10 = vld [vmem:[%s4270_s0 + $0x184] sm:$0xf] }
  0x24   :  { %1210 = vmatpush.bf16.msrb.mxu2 %v2850_v40  ;;  %1071 = vmatmul.bf16.vlgmr.msra.gmra.mxu3 %v2234_v45  ;;  %v2349_v40 = vld [vmem:[%s4270_s0 + $0x100] sm:$0xf]  ;;  %v2768_v45 = vld [vmem:[%s4270_s0 + $0x124] sm:$0xf0]  ;;  %v2415_v11 = vld [vmem:[%s4270_s0 + $0x1a0] sm:$0xf0] }
  0x25   :  { %1259 = vmatpush.bf16.msrb.mxu3 %v2858_v46  ;;  %v2764_v46 = vld [vmem:[%s4270_s0 + $0x10c] sm:$0xf]  ;;  %v2784_v13 = vld [vmem:[%s4270_s0 + $0x1a4] sm:$0xf0] }
  0x26   :  { %1113 = vmatpush.bf16.msrb.mxu0 %v2833_v49  ;;  %v2354_v49 = vor.u32 %v2763_v42, %v2351_v43  ;;  %v2780_v14 = vld [vmem:[%s4270_s0 + $0x18c] sm:$0xf]  ;;  %v2453_v24 = vld [vmem:[%s4270_s0 + $0x1c8] sm:$0xf] }
  0x27   :  { %1162 = vmatpush.bf16.msrb.mxu1 %v2841_v51  ;;  %v2362_v51 = vor.u32 %v2764_v46, %v2359_v47  ;;  %v2423_v15 = vld [vmem:[%s4270_s0 + $0x1a8] sm:$0xf0]  ;;  %v2792_v25 = vld [vmem:[%s4270_s0 + $0x1e4] sm:$0xf0] }
  0x28   :  { %1211 = vmatpush.bf16.msrb.mxu2 %v2849_v48  ;;  %v2350_v48 = vor.u32 %v2767_v41, %v2349_v40  ;;  %v2788_v26 = vld [vmem:[%s4270_s0 + $0x1cc] sm:$0xf]  ;;  %v2454_v30 = vor.u32 %v2792_v25, %v2453_v24 }
  0x29   :  { %1260 = vmatpush.bf16.msrb.mxu3 %v2857_v50  ;;  %v2358_v50 = vor.u32 %v2768_v45, %v2357_v44  ;;  %v2455_v27 = vld [vmem:[%s4270_s0 + $0x1e8] sm:$0xf0] }
  0x2a   :  { %1114 = vmatpush.bf16.msrb.mxu0 %v2832_v53  ;;  %v2828_v53 = vld [vmem:[%s4269_s1 + $0x108] sm:$0xff]  ;;  %v2458_v31 = vor.u32 %v2788_v26, %v2455_v27 }
  0x2b   :  { %1163 = vmatpush.bf16.msrb.mxu1 %v2840_v55  ;;  %v2836_v55 = vld [vmem:[%s4269_s1 + $0x148] sm:$0xff] }
  0x2c   :  { %1212 = vmatpush.bf16.msrb.mxu2 %v2848_v52  ;;  %v2844_v52 = vld [vmem:[%s4269_s1 + $0x188] sm:$0xff] }
  0x2d   :  { %1261 = vmatpush.bf16.msrb.mxu3 %v2856_v54  ;;  %v2852_v54 = vld [vmem:[%s4269_s1 + $0x1c8] sm:$0xff] }
  0x2e   :  { %1115 = vmatpush.bf16.msrb.mxu0 %v2831_v5  ;;  %v2827_v5 = vld [vmem:[%s4269_s1 + $0x100] sm:$0xff] }
  0x2f   :  { %1164 = vmatpush.bf16.msrb.mxu1 %v2839_v7  ;;  %v2835_v7 = vld [vmem:[%s4269_s1 + $0x140] sm:$0xff] }
  0x30   :  { %1213 = vmatpush.bf16.msrb.mxu2 %v2847_v4  ;;  %v2843_v4 = vld [vmem:[%s4269_s1 + $0x180] sm:$0xff] }
  0x31   :  { %929 = vmatmul.bf16.gmra.mxu0 %v2254_v0  ;;  %1262 = vmatpush.bf16.msrb.mxu3 %v2855_v6  ;;  %v2382_v0 = vor.u32 %v2775_v57, %v2381_v56  ;;  %v2851_v6 = vld [vmem:[%s4269_s1 + $0x1c0] sm:$0xff]  ;;  %v2741_v56 = vld [vmem:[%s4270_s0 + $0x54] sm:$0xf] }
  0x32   :  { %978 = vmatmul.bf16.gmra.mxu1 %v2258_v1  ;;  %1116 = vmatpush.bf16.msrb.mxu0 %v2830_v21  ;;  %v2386_v1 = vor.u32 %v2771_v58, %v2383_v59  ;;  %v2791_v21 = vld [vmem:[%s4270_s0 + $0x1dc] sm:$0xf0]  ;;  %v2271_v57 = vld [vmem:[%s4270_s0 + $0x70] sm:$0xf0]  ;;  %v2277_v58 = vld [vmem:[%s4270_s0 + $0x58] sm:$0xf] }
  0x33   :  { %1027 = vmatmul.bf16.gmra.mxu2 %v2262_v2  ;;  %1165 = vmatpush.bf16.msrb.mxu1 %v2838_v23  ;;  %v2390_v2 = vor.u32 %v2776_v61, %v2389_v60  ;;  %v2447_v23 = vld [vmem:[%s4270_s0 + $0x1e0] sm:$0xf0]  ;;  %v2746_v59 = vld [vmem:[%s4270_s0 + $0x74] sm:$0xf0]  ;;  %v2742_v60 = vld [vmem:[%s4270_s0 + $0x5c] sm:$0xf] }
  0x34   :  { %1076 = vmatmul.bf16.gmra.mxu3 %v2266_v3  ;;  %1214 = vmatpush.bf16.msrb.mxu2 %v2846_v20  ;;  %v2394_v3 = vor.u32 %v2772_v62, %v2391_v63  ;;  %v2445_v20 = vld [vmem:[%s4270_s0 + $0x1c0] sm:$0xf]  ;;  %v2279_v61 = vld [vmem:[%s4270_s0 + $0x78] sm:$0xf0] }
  0x35   :  { %1263 = vmatpush.bf16.msrb.mxu3 %v2854_v22  ;;  %v2787_v22 = vld [vmem:[%s4270_s0 + $0x1c4] sm:$0xf]  ;;  %v2446_v28 = vor.u32 %v2791_v21, %v2445_v20  ;;  %v2309_v20 = vld [vmem:[%s4270_s0 + $0x98] sm:$0xf] }
  0x36   :  { %1117 = vmatpush.bf16.msrb.mxu0 %v2829_v37  ;;  %v2450_v29 = vor.u32 %v2787_v22, %v2447_v23  ;;  %v2738_v37 = vld [vmem:[%s4270_s0 + $0x34] sm:$0xf0]  ;;  %v2750_v22 = vld [vmem:[%s4270_s0 + $0x9c] sm:$0xf] }
  0x37   :  { %1166 = vmatpush.bf16.msrb.mxu1 %v2837_v39  ;;  %v2247_v39 = vld [vmem:[%s4270_s0 + $0x38] sm:$0xf0]  ;;  %v2754_v21 = vld [vmem:[%s4270_s0 + $0xb4] sm:$0xf0] }
  0x38   :  { %1215 = vmatpush.bf16.msrb.mxu2 %v2845_v36  ;;  %v2245_v36 = vld [vmem:[%s4270_s0 + $0x18] sm:$0xf]  ;;  %v2311_v23 = vld [vmem:[%s4270_s0 + $0xb8] sm:$0xf0] }
  0x39   :  { %1264 = vmatpush.bf16.msrb.mxu3 %v2853_v38  ;;  %v2734_v38 = vld [vmem:[%s4270_s0 + $0x1c] sm:$0xf]  ;;  %v2246_v44 = vor.u32 %v2738_v37, %v2245_v36 }
  0x3a   :  { %1118 = vmatpush.bf16.msrb.mxu0 %v2828_v53  ;;  %v2250_v45 = vor.u32 %v2734_v38, %v2247_v39 }
  0x3b   :  { %1167 = vmatpush.bf16.msrb.mxu1 %v2836_v55  ;;  %v2745_v55 = vld [vmem:[%s4270_s0 + $0x6c] sm:$0xf0] }
  0x3c   :  { %1216 = vmatpush.bf16.msrb.mxu2 %v2844_v52 }
  0x3d   :  { %1265 = vmatpush.bf16.msrb.mxu3 %v2852_v54  ;;  %v2269_v54 = vld [vmem:[%s4270_s0 + $0x50] sm:$0xf] }
  0x3e   :  { %1119 = vmatpush.bf16.msrb.mxu0 %v2827_v5  ;;  %v2278_v5 = vor.u32 %v2746_v59, %v2277_v58 }
  0x3f   :  { %1168 = vmatpush.bf16.msrb.mxu1 %v2835_v7 }
  0x40   :  { %1217 = vmatpush.bf16.msrb.mxu2 %v2843_v4 }
  0x41   :  { %934 = vmatmul.bf16.gmra.mxu0 %v2286_v16  ;;  %1266 = vmatpush.bf16.msrb.mxu3 %v2851_v6  ;;  %v2414_v16 = vor.u32 %v2783_v9, %v2413_v8  ;;  %v2282_v6 = vor.u32 %v2742_v60, %v2279_v61 }
  0x42   :  { %983 = vmatmul.bf16.gmra.mxu1 %v2290_v17  ;;  %v2418_v17 = vor.u32 %v2779_v10, %v2415_v11 }
  0x43   :  { %1032 = vmatmul.bf16.gmra.mxu2 %v2294_v18  ;;  %v2422_v18 = vor.u32 %v2784_v13, %v2421_v12 }
  0x44   :  { %1081 = vmatmul.bf16.gmra.mxu3 %v2298_v19  ;;  %v2426_v19 = vor.u32 %v2780_v14, %v2423_v15 }
  0x51   :  { %939 = vmatmul.bf16.gmra.mxu0 %v2318_v32  ;;  %v2237_v32 = vld [vmem:[%s4270_s0 + $0x10] sm:$0xf] }
  0x52   :  { %988 = vmatmul.bf16.gmra.mxu1 %v2322_v33  ;;  %v2737_v33 = vld [vmem:[%s4270_s0 + $0x2c] sm:$0xf0] }
  0x53   :  { %1037 = vmatmul.bf16.gmra.mxu2 %v2326_v34  ;;  %v2733_v34 = vld [vmem:[%s4270_s0 + $0x14] sm:$0xf]  ;;  %v2238_v40 = vor.u32 %v2737_v33, %v2237_v32  ;;  %v2314_v32 = vor.u32 %v2750_v22, %v2311_v23 }
  0x54   :  { %1086 = vmatmul.bf16.gmra.mxu3 %v2330_v35  ;;  %v2239_v35 = vld [vmem:[%s4270_s0 + $0x30] sm:$0xf0] }
  0x55   :  { %v2242_v41 = vor.u32 %v2733_v34, %v2239_v35 }
  0x61   :  { %944 = vmatmul.bf16.gmra.mxu0 %v2350_v48 }
  0x62   :  { %993 = vmatmul.bf16.gmra.mxu1 %v2354_v49 }
  0x63   :  { %1042 = vmatmul.bf16.gmra.mxu2 %v2358_v50 }
  0x64   :  { %1091 = vmatmul.bf16.gmra.mxu3 %v2362_v51 }
  0x71   :  { %949 = vmatmul.bf16.gmra.mxu0 %v2382_v0  ;;  %v2270_v0 = vor.u32 %v2745_v55, %v2269_v54 }
  0x72   :  { %998 = vmatmul.bf16.gmra.mxu1 %v2386_v1  ;;  %v2274_v1 = vor.u32 %v2741_v56, %v2271_v57 }
  0x73   :  { %1047 = vmatmul.bf16.gmra.mxu2 %v2390_v2 }
  0x74   :  { %1096 = vmatmul.bf16.gmra.mxu3 %v2394_v3 }
  0x81   :  { %954 = vmatmul.bf16.gmra.mxu0 %v2414_v16  ;;  %v2301_v16 = vld [vmem:[%s4270_s0 + $0x90] sm:$0xf] }
  0x82   :  { %1003 = vmatmul.bf16.gmra.mxu1 %v2418_v17  ;;  %v2753_v17 = vld [vmem:[%s4270_s0 + $0xac] sm:$0xf0] }
  0x83   :  { %1052 = vmatmul.bf16.gmra.mxu2 %v2422_v18  ;;  %v2749_v18 = vld [vmem:[%s4270_s0 + $0x94] sm:$0xf]  ;;  %v2302_v26 = vor.u32 %v2753_v17, %v2301_v16 }
  0x84   :  { %1101 = vmatmul.bf16.gmra.mxu3 %v2426_v19  ;;  %v2303_v19 = vld [vmem:[%s4270_s0 + $0xb0] sm:$0xf0] }
  0x85   :  { %v2306_v27 = vor.u32 %v2749_v18, %v2303_v19 }
  0x91   :  { %959 = vmatmul.bf16.gmra.mxu0 %v2446_v28 }
  0x92   :  { %1008 = vmatmul.bf16.gmra.mxu1 %v2450_v29 }
  0x93   :  { %1057 = vmatmul.bf16.gmra.mxu2 %v2454_v30 }
  0x94   :  { %1106 = vmatmul.bf16.gmra.mxu3 %v2458_v31  ;;  %v2310_v31 = vor.u32 %v2754_v21, %v2309_v20 }
  0x9e   :  { %v925_v42 = vpop.f32.mrf.mxu0 }
  0x9f   :  { %v974_v43 = vpop.f32.mrf.mxu1 }
  0xa0   :  { %v975_v46 = vadd.f32 %v974_v43, %v925_v42  ;;  %v2333_v42 = vld [vmem:[%s4270_s0 + $0xd0] sm:$0xf] }
  0xa1   :  { %1120 = vmatmul.bf16.vlgmr.msrb.gmra.mxu0 %v2238_v40  ;;  %v2761_v43 = vld [vmem:[%s4270_s0 + $0xec] sm:$0xf0] }
  0xa2   :  { %1169 = vmatmul.bf16.vlgmr.msrb.gmra.mxu1 %v2242_v41 }
  0xa3   :  { %1218 = vmatmul.bf16.vlgmr.msrb.gmra.mxu2 %v2246_v44  ;;  %v2757_v44 = vld [vmem:[%s4270_s0 + $0xd4] sm:$0xf] }
  0xa4   :  { %1267 = vmatmul.bf16.vlgmr.msrb.gmra.mxu3 %v2250_v45  ;;  %v2335_v45 = vld [vmem:[%s4270_s0 + $0xf0] sm:$0xf0] }
  0xa5   :  { %v2338_v54 = vor.u32 %v2757_v44, %v2335_v45 }
  0xa6   :  { %v1023_v47 = vpop.f32.mrf.mxu2  ;;  %v927_v50 = vpop.f32.mrf.mxu0 }
  0xa7   :  { %v1072_v48 = vpop.f32.mrf.mxu3  ;;  %v1024_v49 = vadd.f32 %v1023_v47, %v975_v46  ;;  %v976_v51 = vpop.f32.mrf.mxu1  ;;  %v2341_v46 = vld [vmem:[%s4270_s0 + $0xd8] sm:$0xf] }
  0xa8   :  { %v977_v52 = vadd.f32 %v976_v51, %v927_v50  ;;  %v2762_v47 = vld [vmem:[%s4270_s0 + $0xf4] sm:$0xf0] }
  0xa9   :  { %v3347_v53 = vadd.f32 %v1072_v48, %v1024_v49  ;;  %v2758_v48 = vld [vmem:[%s4270_s0 + $0xdc] sm:$0xf]  ;;  %v2342_v58 = vor.u32 %v2762_v47, %v2341_v46 }
  0xaa   :  { %v2343_v49 = vld [vmem:[%s4270_s0 + $0xf8] sm:$0xf0] }
  0xab   :  { %v2346_v59 = vor.u32 %v2758_v48, %v2343_v49 }
  0xae   :  { %v1025_v62 = vpop.f32.mrf.mxu2  ;;  %v930_v3 = vpop.f32.mrf.mxu0 }
  0xaf   :  { %v1074_v63 = vpop.f32.mrf.mxu3  ;;  %v1026_v2 = vadd.f32 %v1025_v62, %v977_v52  ;;  %v979_v4 = vpop.f32.mrf.mxu1  ;;  %v2334_v52 = vor.u32 %v2761_v43, %v2333_v42 }
  0xb0   :  { %v980_v7 = vadd.f32 %v979_v4, %v930_v3 }
  0xb1   :  { %v3373_v8 = vadd.f32 %v1074_v63, %v1026_v2  ;;  %1125 = vmatmul.bf16.gmra.mxu0 %v2270_v0 }
  0xb2   :  { %1174 = vmatmul.bf16.gmra.mxu1 %v2274_v1 }
  0xb3   :  { %1223 = vmatmul.bf16.gmra.mxu2 %v2278_v5  ;;  %v2365_v5 = vld [vmem:[%s4270_s0 + $0x110] sm:$0xf] }
  0xb4   :  { %1272 = vmatmul.bf16.gmra.mxu3 %v2282_v6  ;;  %v2769_v6 = vld [vmem:[%s4270_s0 + $0x12c] sm:$0xf0] }
  0xb5   :  { %v2366_v17 = vor.u32 %v2769_v6, %v2365_v5 }
  0xb6   :  { %v1028_v9 = vpop.f32.mrf.mxu2  ;;  %v932_v12 = vpop.f32.mrf.mxu0 }
  0xb7   :  { %v1077_v10 = vpop.f32.mrf.mxu3  ;;  %v1029_v11 = vadd.f32 %v1028_v9, %v980_v7  ;;  %v981_v13 = vpop.f32.mrf.mxu1  ;;  %v2765_v7 = vld [vmem:[%s4270_s0 + $0x114] sm:$0xf] }
  0xb8   :  { %v982_v14 = vadd.f32 %v981_v13, %v932_v12  ;;  %v2367_v9 = vld [vmem:[%s4270_s0 + $0x130] sm:$0xf0]  ;;  %v2766_v12 = vld [vmem:[%s4270_s0 + $0x11c] sm:$0xf] }
  0xb9   :  { %v3375_v15 = vadd.f32 %v1077_v10, %v1029_v11  ;;  %v2373_v10 = vld [vmem:[%s4270_s0 + $0x118] sm:$0xf]  ;;  %v2375_v13 = vld [vmem:[%s4270_s0 + $0x138] sm:$0xf0]  ;;  %v2370_v18 = vor.u32 %v2765_v7, %v2367_v9 }
  0xba   :  { %v2770_v11 = vld [vmem:[%s4270_s0 + $0x134] sm:$0xf0]  ;;  %v2378_v23 = vor.u32 %v2766_v12, %v2375_v13 }
  0xbb   :  { %v2374_v22 = vor.u32 %v2770_v11, %v2373_v10 }
  0xbe   :  { %v1030_v24 = vpop.f32.mrf.mxu2  ;;  %v935_v29 = vpop.f32.mrf.mxu0 }
  0xbf   :  { %v1079_v25 = vpop.f32.mrf.mxu3  ;;  %v1031_v28 = vadd.f32 %v1030_v24, %v982_v14  ;;  %v984_v30 = vpop.f32.mrf.mxu1 }
  0xc0   :  { %v985_v33 = vadd.f32 %v984_v30, %v935_v29  ;;  %v2397_v29 = vld [vmem:[%s4270_s0 + $0x150] sm:$0xf] }
  0xc1   :  { %v3401_v34 = vadd.f32 %v1079_v25, %v1031_v28  ;;  %1130 = vmatmul.bf16.gmra.mxu0 %v2302_v26  ;;  %v2777_v30 = vld [vmem:[%s4270_s0 + $0x16c] sm:$0xf0] }
  0xc2   :  { %1179 = vmatmul.bf16.gmra.mxu1 %v2306_v27 }
  0xc3   :  { %1228 = vmatmul.bf16.gmra.mxu2 %v2310_v31  ;;  %v2773_v31 = vld [vmem:[%s4270_s0 + $0x154] sm:$0xf] }
  0xc4   :  { %1277 = vmatmul.bf16.gmra.mxu3 %v2314_v32  ;;  %v2399_v32 = vld [vmem:[%s4270_s0 + $0x170] sm:$0xf0] }
  0xc5   :  { %v2402_v42 = vor.u32 %v2773_v31, %v2399_v32  ;;  %v2794_v31 = vld [vmem:[%s4270_s0 + $0x1f4] sm:$0xf0]  ;;  %v2790_v32 = vld [vmem:[%s4270_s0 + $0x1dc] sm:$0xf] }
  0xc6   :  { %v1033_v35 = vpop.f32.mrf.mxu2  ;;  %v937_v38 = vpop.f32.mrf.mxu0 }
  0xc7   :  { %v1082_v36 = vpop.f32.mrf.mxu3  ;;  %v1034_v37 = vadd.f32 %v1033_v35, %v985_v33  ;;  %v986_v39 = vpop.f32.mrf.mxu1  ;;  %v2405_v33 = vld [vmem:[%s4270_s0 + $0x158] sm:$0xf] }
  0xc8   :  { %v987_v40 = vadd.f32 %v986_v39, %v937_v38  ;;  %v2778_v35 = vld [vmem:[%s4270_s0 + $0x174] sm:$0xf0] }
  0xc9   :  { %v3403_v41 = vadd.f32 %v1082_v36, %v1034_v37  ;;  %v2774_v36 = vld [vmem:[%s4270_s0 + $0x15c] sm:$0xf]  ;;  %v2406_v45 = vor.u32 %v2778_v35, %v2405_v33 }
  0xca   :  { %v2407_v37 = vld [vmem:[%s4270_s0 + $0x178] sm:$0xf0] }
  0xcb   :  { %v2410_v46 = vor.u32 %v2774_v36, %v2407_v37  ;;  %v2471_v33 = vld [vmem:[%s4270_s0 + $0x1f8] sm:$0xf0] }
  0xce   :  { %v1035_v50 = vpop.f32.mrf.mxu2  ;;  %v940_v56 = vpop.f32.mrf.mxu0 }
  0xcf   :  { %v1084_v51 = vpop.f32.mrf.mxu3  ;;  %v1036_v55 = vadd.f32 %v1035_v50, %v987_v40  ;;  %v989_v57 = vpop.f32.mrf.mxu1  ;;  %v2398_v40 = vor.u32 %v2777_v30, %v2397_v29  ;;  %v2463_v29 = vld [vmem:[%s4270_s0 + $0x1f0] sm:$0xf0]  ;;  %v2469_v30 = vld [vmem:[%s4270_s0 + $0x1d8] sm:$0xf] }
  0xd0   :  { %v990_v60 = vadd.f32 %v989_v57, %v940_v56  ;;  %v2431_v56 = vld [vmem:[%s4270_s0 + $0x1b0] sm:$0xf0]  ;;  %v2437_v57 = vld [vmem:[%s4270_s0 + $0x198] sm:$0xf] }
  0xd1   :  { %v3429_v61 = vadd.f32 %v1084_v51, %v1036_v55  ;;  %1135 = vmatmul.bf16.gmra.mxu0 %v2334_v52  ;;  %v2429_v52 = vld [vmem:[%s4270_s0 + $0x190] sm:$0xf]  ;;  %v2781_v55 = vld [vmem:[%s4270_s0 + $0x194] sm:$0xf] }
  0xd2   :  { %1184 = vmatmul.bf16.gmra.mxu1 %v2338_v54  ;;  %v2785_v54 = vld [vmem:[%s4270_s0 + $0x1ac] sm:$0xf0] }
  0xd3   :  { %1233 = vmatmul.bf16.gmra.mxu2 %v2342_v58  ;;  %v2786_v58 = vld [vmem:[%s4270_s0 + $0x1b4] sm:$0xf0] }
  0xd4   :  { %1282 = vmatmul.bf16.gmra.mxu3 %v2346_v59  ;;  %v2782_v59 = vld [vmem:[%s4270_s0 + $0x19c] sm:$0xf]  ;;  %v2438_v6 = vor.u32 %v2786_v58, %v2437_v57 }
  0xd6   :  { %v1038_v62 = vpop.f32.mrf.mxu2  ;;  %v942_v1 = vpop.f32.mrf.mxu0 }
  0xd7   :  { %v1087_v63 = vpop.f32.mrf.mxu3  ;;  %v1039_v0 = vadd.f32 %v1038_v62, %v990_v60  ;;  %v991_v2 = vpop.f32.mrf.mxu1  ;;  %v2439_v60 = vld [vmem:[%s4270_s0 + $0x1b8] sm:$0xf0] }
  0xd8   :  { %v992_v3 = vadd.f32 %v991_v2, %v942_v1  ;;  %v2434_v1 = vor.u32 %v2781_v55, %v2431_v56  ;;  %v2442_v7 = vor.u32 %v2782_v59, %v2439_v60 }
  0xd9   :  { %v3431_v4 = vadd.f32 %v1087_v63, %v1039_v0  ;;  %v2430_v0 = vor.u32 %v2785_v54, %v2429_v52 }
  0xde   :  { %v1040_v14 = vpop.f32.mrf.mxu2  ;;  %v3457_v20 = vpop.f32.mrf.mxu0 }
  0xdf   :  { %v1089_v16 = vpop.f32.mrf.mxu3  ;;  %v1041_v19 = vadd.f32 %v1040_v14, %v992_v3  ;;  %v3459_v21 = vpop.f32.mrf.mxu1 }
  0xe1   :  { %v3461_v24 = vadd.f32 %v1089_v16, %v1041_v19  ;;  %1140 = vmatmul.bf16.gmra.mxu0 %v2366_v17  ;;  %v2461_v19 = vld [vmem:[%s4270_s0 + $0x1d0] sm:$0xf] }
  0xe2   :  { %1189 = vmatmul.bf16.gmra.mxu1 %v2370_v18 }
  0xe3   :  { %1238 = vmatmul.bf16.gmra.mxu2 %v2374_v22  ;;  %v2793_v22 = vld [vmem:[%s4270_s0 + $0x1ec] sm:$0xf0] }
  0xe4   :  { %1287 = vmatmul.bf16.gmra.mxu3 %v2378_v23  ;;  %v2789_v23 = vld [vmem:[%s4270_s0 + $0x1d4] sm:$0xf]  ;;  %v2462_v37 = vor.u32 %v2793_v22, %v2461_v19 }
  0xe6   :  { %v3463_v25 = vpop.f32.mrf.mxu2  ;;  %v3467_v27 = vpop.f32.mrf.mxu0 }
  0xe7   :  { %v3465_v26 = vpop.f32.mrf.mxu3  ;;  %v3469_v28 = vpop.f32.mrf.mxu1 }
  0xee   :  { %v3495_v38 = vpop.f32.mrf.mxu2  ;;  %v3499_v43 = vpop.f32.mrf.mxu0 }
  0xef   :  { %v3497_v39 = vpop.f32.mrf.mxu3  ;;  %v3501_v44 = vpop.f32.mrf.mxu1 }
  0xf1   :  { %1145 = vmatmul.bf16.gmra.mxu0 %v2398_v40  ;;  %v2466_v40 = vor.u32 %v2789_v23, %v2463_v29 }
  0xf2   :  { %1194 = vmatmul.bf16.gmra.mxu1 %v2402_v42 }
  0xf3   :  { %1243 = vmatmul.bf16.gmra.mxu2 %v2406_v45 }
  0xf4   :  { %1292 = vmatmul.bf16.gmra.mxu3 %v2410_v46 }
  0xf6   :  { %v3503_v47 = vpop.f32.mrf.mxu2  ;;  %v952_v49 = vpop.f32.mrf.mxu0 }
  0xf7   :  { %v3505_v48 = vpop.f32.mrf.mxu3  ;;  %v1001_v50 = vpop.f32.mrf.mxu1 }
  0xf8   :  { %4321 = vst [vmem:[#allocation2_spill] sm:$0xff] %v3505_v48  ;;  %v1002_v51 = vadd.f32 %v1001_v50, %v952_v49  ;;  %v2470_v49 = vor.u32 %v2794_v31, %v2469_v30  ;;  %v2474_v50 = vor.u32 %v2790_v32, %v2471_v33 }
  0xfe   :  { %v1050_v62 = vpop.f32.mrf.mxu2  ;;  %v955_v3 = vpop.f32.mrf.mxu0 }
  0xff   :  { %v1099_v63 = vpop.f32.mrf.mxu3  ;;  %v1051_v2 = vadd.f32 %v1050_v62, %v1002_v51  ;;  %v1004_v5 = vpop.f32.mrf.mxu1  ;;  %v1381_v62 = vld [vmem:[%s4271_s2 + $0x78] sm:$0xff] }
 0x100   :  { %v1005_v9 = vadd.f32 %v1004_v5, %v955_v3 }
 0x101   :  { %v3531_v10 = vadd.f32 %v1099_v63, %v1051_v2  ;;  %1150 = vmatmul.bf16.gmra.mxu0 %v2430_v0 }
 0x102   :  { %1199 = vmatmul.bf16.gmra.mxu1 %v2434_v1  ;;  %v3566_v1 = vand.u32 4294901760, %v1381_v62 }
 0x103   :  { %4322 = vst [vmem:[#allocation3_spill] sm:$0xff] %v3531_v10  ;;  %1248 = vmatmul.bf16.gmra.mxu2 %v2438_v6 }
 0x104   :  { %1297 = vmatmul.bf16.gmra.mxu3 %v2442_v7  ;;  %v3570_v7 = vsub.f32 %v1381_v62, %v3566_v1  ;;  %1383 = vmatpush.msra.mxu0 %v3566_v1 }
 0x105   :  { %1579 = vmatpush.msra.mxu3 %v3566_v1 }
 0x106   :  { %v1053_v11 = vpop.f32.mrf.mxu2  ;;  %v957_v14 = vpop.f32.mrf.mxu0  ;;  %4326 = vst [vmem:[#allocation7_spill] sm:$0xff] %v3570_v7  ;;  %1526 = vmatpush.msra.mxu2 %v3570_v7 }
 0x107   :  { %v1102_v12 = vpop.f32.mrf.mxu3  ;;  %v1054_v13 = vadd.f32 %v1053_v11, %v1005_v9  ;;  %v1006_v16 = vpop.f32.mrf.mxu1 }
 0x108   :  { %v1007_v17 = vadd.f32 %v1006_v16, %v957_v14 }
 0x109   :  { %v3533_v18 = vadd.f32 %v1102_v12, %v1054_v13  ;;  %v3578_v12 = vand.u32 4294901760, %v3570_v7 }
 0x10b   :  { %4323 = vst [vmem:[#allocation4_spill] sm:$0xff] %v3533_v18  ;;  %v1426_v13 = vsub.f32 %v3570_v7, %v3578_v12 }
 0x10e   :  { %v1055_v35 = vpop.f32.mrf.mxu2  ;;  %v960_v45 = vpop.f32.mrf.mxu0 }
 0x10f   :  { %v1104_v36 = vpop.f32.mrf.mxu3  ;;  %v1056_v42 = vadd.f32 %v1055_v35, %v1007_v17  ;;  %v1009_v46 = vpop.f32.mrf.mxu1  ;;  %v3585_v17 = vand.u32 4294901760, %v1426_v13 }
 0x110   :  { %v1010_v51 = vadd.f32 %v1009_v46, %v960_v45 }
 0x111   :  { %v3559_v52 = vadd.f32 %v1104_v36, %v1056_v42  ;;  %1155 = vmatmul.bf16.gmra.mxu0 %v2462_v37  ;;  %1428 = vmatpush.msra.mxu1 %v3585_v17  ;;  %v1379_v36 = vld [vmem:[%s4271_s2 + $0x68] sm:$0xff] }
 0x112   :  { %1204 = vmatmul.bf16.gmra.mxu1 %v2466_v40  ;;  %v3609_v45 = vand.u32 4294901760, %v1379_v36 }
 0x113   :  { %4324 = vst [vmem:[#allocation5_spill] sm:$0xff] %v3559_v52  ;;  %1253 = vmatmul.bf16.gmra.mxu2 %v2470_v49 }
 0x114   :  { %1302 = vmatmul.bf16.gmra.mxu3 %v2474_v50 }
 0x116   :  { %v1058_v54 = vpop.f32.mrf.mxu2  ;;  %v962_v57 = vpop.f32.mrf.mxu0 }
 0x117   :  { %v1107_v55 = vpop.f32.mrf.mxu3  ;;  %v1059_v56 = vadd.f32 %v1058_v54, %v1010_v51  ;;  %v1011_v58 = vpop.f32.mrf.mxu1  ;;  %v3614_v54 = vsub.f32 %v1379_v36, %v3609_v45 }
 0x118   :  { %v1012_v59 = vadd.f32 %v1011_v58, %v962_v57  ;;  %v1378_v58 = vld [vmem:[%s4271_s2 + $0x60] sm:$0xff] }
 0x119   :  { %v3561_v60 = vadd.f32 %v1107_v55, %v1059_v56  ;;  %4330 = vst [vmem:[#allocation11_spill] sm:$0xff] %v3614_v54  ;;  %v3622_v57 = vand.u32 4294901760, %v3614_v54 }
 0x11b   :  { %4325 = vst [vmem:[#allocation6_spill] sm:$0xff] %v3561_v60 }
 0x11e   :  { %v1060_v63 = vpop.f32.mrf.mxu2  ;;  %v1121_v3 = vpop.f32.mrf.mxu0 }
 0x11f   :  { %v1109_v0 = vpop.f32.mrf.mxu3  ;;  %v1061_v2 = vadd.f32 %v1060_v63, %v1012_v59  ;;  %v1170_v5 = vpop.f32.mrf.mxu1  ;;  %v1122_v6 = vadd.f32 %v1121_v3, %v3347_v53  ;;  %v1380_v53 = vld [vmem:[%s4271_s2 + $0x70] sm:$0xff] }
 0x120   :  { %v3587_v19 = vand.u32 4294901760, %v1380_v53 }
 0x121   :  { %v3574_v9 = vadd.f32 %v1109_v0, %v1061_v2  ;;  %v1171_v11 = vadd.f32 %v1170_v5, %v1122_v6  ;;  %v3631_v0 = vand.u32 4294901760, %v1378_v58 }
 0x122   :  { %v3592_v31 = vsub.f32 %v1380_v53, %v3587_v19  ;;  %1385 = vmatpush.msra.mxu0 %v3587_v19  ;;  %1581 = vmatpush.msra.mxu3 %v3587_v19 }
 0x123   :  { %4327 = vst [vmem:[#allocation8_spill] sm:$0xff] %v3574_v9 }
 0x124   :  { %4328 = vst [vmem:[#allocation9_spill] sm:$0xff] %v3592_v31  ;;  %1529 = vmatpush.msra.mxu2 %v3592_v31  ;;  %v3600_v35 = vand.u32 4294901760, %v3592_v31  ;;  %1387 = vmatpush.msra.mxu0 %v3609_v45 }
 0x125   :  { %1583 = vmatpush.msra.mxu3 %v3609_v45 }
 0x126   :  { %v1219_v14 = vpop.f32.mrf.mxu2  ;;  %v1123_v23 = vpop.f32.mrf.mxu0  ;;  %1532 = vmatpush.msra.mxu2 %v3614_v54  ;;  %1389 = vmatpush.msra.mxu0 %v3631_v0 }
 0x127   :  { %v1268_v16 = vpop.f32.mrf.mxu3  ;;  %v1220_v22 = vadd.f32 %v1219_v14, %v1171_v11  ;;  %v1172_v29 = vpop.f32.mrf.mxu1  ;;  %v1124_v30 = vadd.f32 %v1123_v23, %v3373_v8  ;;  %v1432_v8 = vsub.f32 %v3592_v31, %v3600_v35  ;;  %v3636_v11 = vsub.f32 %v1378_v58, %v3631_v0  ;;  %1585 = vmatpush.msra.mxu3 %v3631_v0 }
 0x129   :  { %v3595_v32 = vadd.f32 %v1268_v16, %v1220_v22  ;;  %v1173_v33 = vadd.f32 %v1172_v29, %v1124_v30  ;;  %v3607_v42 = vand.u32 4294901760, %v1432_v8  ;;  %4332 = vst [vmem:[#allocation13_spill] sm:$0xff] %v3636_v11  ;;  %1535 = vmatpush.msra.mxu2 %v3636_v11  ;;  %v3644_v14 = vand.u32 4294901760, %v3636_v11  ;;  %v1377_v16 = vld [vmem:[%s4271_s2 + $0x58] sm:$0xff] }
 0x12a   :  { %v3653_v30 = vand.u32 4294901760, %v1377_v16 }
 0x12b   :  { %4329 = vst [vmem:[#allocation10_spill] sm:$0xff] %v3595_v32  ;;  %1434 = vmatpush.msra.mxu1 %v3607_v42  ;;  %v1368_v32 = vld [vmem:[%s4271_s2 + $0x10] sm:$0xff] }
 0x12c   :  { %1391 = vmatpush.msra.mxu0 %v3653_v30  ;;  %1587 = vmatpush.msra.mxu3 %v3653_v30 }
 0x12e   :  { %v1221_v37 = vpop.f32.mrf.mxu2  ;;  %v1126_v49 = vpop.f32.mrf.mxu0 }
 0x12f   :  { %v1270_v40 = vpop.f32.mrf.mxu3  ;;  %v1222_v46 = vadd.f32 %v1221_v37, %v1173_v33  ;;  %v1175_v50 = vpop.f32.mrf.mxu1  ;;  %v1127_v51 = vadd.f32 %v1126_v49, %v3375_v15  ;;  %v1438_v15 = vsub.f32 %v3614_v54, %v3622_v57 }
 0x131   :  { %v3617_v55 = vadd.f32 %v1270_v40, %v1222_v46  ;;  %v1176_v56 = vadd.f32 %v1175_v50, %v1127_v51  ;;  %v3629_v63 = vand.u32 4294901760, %v1438_v15  ;;  %v3658_v40 = vsub.f32 %v1377_v16, %v3653_v30  ;;  %v1376_v51 = vld [vmem:[%s4271_s2 + $0x50] sm:$0xff]  ;;  %v1375_v16 = vld [vmem:[%s4271_s2 + $0x48] sm:$0xff] }
 0x133   :  { %4331 = vst [vmem:[#allocation12_spill] sm:$0xff] %v3617_v55  ;;  %1440 = vmatpush.msra.mxu1 %v3629_v63  ;;  %1538 = vmatpush.msra.mxu2 %v3658_v40  ;;  %v3666_v50 = vand.u32 4294901760, %v3658_v40 }
 0x134   :  { %4334 = vst [vmem:[#allocation15_spill] sm:$0xff] %v3658_v40 }
 0x136   :  { %v1224_v59 = vpop.f32.mrf.mxu2  ;;  %v1128_v3 = vpop.f32.mrf.mxu0 }
 0x137   :  { %v1273_v62 = vpop.f32.mrf.mxu3  ;;  %v1225_v2 = vadd.f32 %v1224_v59, %v1176_v56  ;;  %v1177_v5 = vpop.f32.mrf.mxu1  ;;  %v1129_v6 = vadd.f32 %v1128_v3, %v3401_v34  ;;  %v1444_v34 = vsub.f32 %v3636_v11, %v3644_v14  ;;  %v3675_v59 = vand.u32 4294901760, %v1376_v51  ;;  %v1373_v11 = vld [vmem:[%s4271_s2 + $0x38] sm:$0xff] }
 0x138   :  { %v3750_v54 = vand.u32 4294901760, %v1373_v11 }
 0x139   :  { %v3639_v13 = vadd.f32 %v1273_v62, %v1225_v2  ;;  %v1178_v53 = vadd.f32 %v1177_v5, %v1129_v6  ;;  %v3651_v29 = vand.u32 4294901760, %v1444_v34  ;;  %v3683_v5 = vsub.f32 %v1376_v51, %v3675_v59  ;;  %1393 = vmatpush.msra.mxu0 %v3675_v59  ;;  %1589 = vmatpush.msra.mxu3 %v3675_v59 }
 0x13a   :  { %4347 = vst [vmem:[#allocation28_spill] sm:$0xff] %v3750_v54  ;;  %v3758_v7 = vsub.f32 %v1373_v11, %v3750_v54 }
 0x13b   :  { %4333 = vst [vmem:[#allocation14_spill] sm:$0xff] %v3639_v13  ;;  %1446 = vmatpush.msra.mxu1 %v3651_v29  ;;  %1541 = vmatpush.msra.mxu2 %v3683_v5 }
 0x13c   :  { %4336 = vst [vmem:[#allocation17_spill] sm:$0xff] %v3683_v5 }
 0x13d   :  { %4348 = vst [vmem:[#allocation29_spill] sm:$0xff] %v3758_v7 }
 0x13e   :  { %v1226_v22 = vpop.f32.mrf.mxu2  ;;  %v1131_v8 = vpop.f32.mrf.mxu0 }
 0x13f   :  { %v1275_v23 = vpop.f32.mrf.mxu3  ;;  %v1227_v33 = vadd.f32 %v1226_v22, %v1178_v53  ;;  %v1180_v36 = vpop.f32.mrf.mxu1  ;;  %v1132_v37 = vadd.f32 %v1131_v8, %v3403_v41  ;;  %v1450_v41 = vsub.f32 %v3658_v40, %v3666_v50  ;;  %v3691_v53 = vand.u32 4294901760, %v3683_v5 }
 0x140   :  { %v3704_v8 = vand.u32 4294901760, %v1375_v16 }
 0x141   :  { %v3661_v46 = vadd.f32 %v1275_v23, %v1227_v33  ;;  %v1181_v49 = vadd.f32 %v1180_v36, %v1132_v37  ;;  %v3673_v58 = vand.u32 4294901760, %v1450_v41  ;;  %v1456_v34 = vsub.f32 %v3683_v5, %v3691_v53 }
 0x142   :  { %1395 = vmatpush.msra.mxu0 %v3704_v8  ;;  %1591 = vmatpush.msra.mxu3 %v3704_v8 }
 0x143   :  { %4335 = vst [vmem:[#allocation16_spill] sm:$0xff] %v3661_v46  ;;  %1452 = vmatpush.msra.mxu1 %v3673_v58  ;;  %v3702_v33 = vand.u32 4294901760, %v1456_v34  ;;  %v1369_v46 = vld [vmem:[%s4271_s2 + $0x18] sm:$0xff] }
 0x144   :  { %v3819_v13 = vand.u32 4294901760, %v1369_v46 }
 0x145   :  { %1458 = vmatpush.msra.mxu1 %v3702_v33 }
 0x146   :  { %v1229_v56 = vpop.f32.mrf.mxu2  ;;  %v3677_v2 = vpop.f32.mrf.mxu0  ;;  %4361 = vst [vmem:[#allocation42_spill] sm:$0xff] %v3819_v13 }
 0x147   :  { %v1278_v15 = vpop.f32.mrf.mxu3  ;;  %v1230_v62 = vadd.f32 %v1229_v56, %v1181_v49  ;;  %v3679_v3 = vpop.f32.mrf.mxu1  ;;  %v3712_v49 = vsub.f32 %v1375_v16, %v3704_v8  ;;  %v1374_v56 = vld [vmem:[%s4271_s2 + $0x40] sm:$0xff] }
 0x148   :  { %v3731_v16 = vand.u32 4294901760, %v1374_v56 }
 0x149   :  { %v3686_v6 = vadd.f32 %v1278_v15, %v1230_v62  ;;  %4341 = vst [vmem:[#allocation22_spill] sm:$0xff] %v3712_v49  ;;  %1544 = vmatpush.msra.mxu2 %v3712_v49  ;;  %v3718_v41 = vand.u32 4294901760, %v3712_v49 }
 0x14a   :  { %1397 = vmatpush.msra.mxu0 %v3731_v16  ;;  %1593 = vmatpush.msra.mxu3 %v3731_v16 }
 0x14b   :  { %4337 = vst [vmem:[#allocation18_spill] sm:$0xff] %v3686_v6  ;;  %v1462_v51 = vsub.f32 %v3712_v49, %v3718_v41  ;;  %v3739_v49 = vsub.f32 %v1374_v56, %v3731_v16  ;;  %v1372_v56 = vld [vmem:[%s4271_s2 + $0x30] sm:$0xff] }
 0x14c   :  { %1399 = vmatpush.msra.mxu0 %v3750_v54  ;;  %1595 = vmatpush.msra.mxu3 %v3750_v54  ;;  %v3762_v9 = vand.u32 4294901760, %v1372_v56 }
 0x14d   :  { %v3729_v34 = vand.u32 4294901760, %v1462_v51  ;;  %4345 = vst [vmem:[#allocation26_spill] sm:$0xff] %v3739_v49  ;;  %1547 = vmatpush.msra.mxu2 %v3739_v49  ;;  %v3745_v51 = vand.u32 4294901760, %v3739_v49 }
 0x14e   :  { %v3698_v22 = vpop.f32.mrf.mxu2  ;;  %v3706_v36 = vpop.f32.mrf.mxu0  ;;  %v3782_v6 = vsub.f32 %v1372_v56, %v3762_v9  ;;  %1401 = vmatpush.msra.mxu0 %v3762_v9  ;;  %1597 = vmatpush.msra.mxu3 %v3762_v9 }
 0x14f   :  { %4338 = vst [vmem:[#allocation19_spill] sm:$0xff] %v3698_v22  ;;  %v3700_v23 = vpop.f32.mrf.mxu3  ;;  %v3708_v37 = vpop.f32.mrf.mxu1  ;;  %1464 = vmatpush.msra.mxu1 %v3729_v34  ;;  %v1468_v31 = vsub.f32 %v3739_v49, %v3745_v51  ;;  %v1371_v49 = vld [vmem:[%s4271_s2 + $0x28] sm:$0xff]  ;;  %1550 = vmatpush.msra.mxu2 %v3758_v7 }
 0x150   :  { %4339 = vst [vmem:[#allocation20_spill] sm:$0xff] %v3700_v23  ;;  %v3796_v56 = vand.u32 4294901760, %v3782_v6 }
 0x151   :  { %4340 = vst [vmem:[#allocation21_spill] sm:$0xff] %v3708_v37  ;;  %v3768_v18 = vand.u32 4294901760, %v1468_v31  ;;  %v3785_v31 = vand.u32 4294901760, %v1371_v49  ;;  %1553 = vmatpush.msra.mxu2 %v3782_v6 }
 0x152   :  { %4346 = vst [vmem:[#allocation27_spill] sm:$0xff] %v3745_v51 }
 0x153   :  { %4354 = vst [vmem:[#allocation35_spill] sm:$0xff] %v3782_v6  ;;  %1470 = vmatpush.msra.mxu1 %v3768_v18  ;;  %1403 = vmatpush.msra.mxu0 %v3785_v31 }
 0x154   :  { %4355 = vst [vmem:[#allocation36_spill] sm:$0xff] %v3785_v31  ;;  %1599 = vmatpush.msra.mxu3 %v3785_v31 }
 0x155   :  { %4356 = vst [vmem:[#allocation37_spill] sm:$0xff] %v3796_v56 }
 0x156   :  { %v3725_v15 = vpop.f32.mrf.mxu2  ;;  %v3733_v5 = vpop.f32.mrf.mxu0 }
 0x157   :  { %4342 = vst [vmem:[#allocation23_spill] sm:$0xff] %v3725_v15  ;;  %v3727_v62 = vpop.f32.mrf.mxu3  ;;  %v3735_v40 = vpop.f32.mrf.mxu1 }
 0x158   :  { %4343 = vst [vmem:[#allocation24_spill] sm:$0xff] %v3727_v62  ;;  %v3779_v62 = vand.u32 4294901760, %v3758_v7 }
 0x159   :  { %4344 = vst [vmem:[#allocation25_spill] sm:$0xff] %v3735_v40 }
 0x15a   :  { %4353 = vst [vmem:[#allocation34_spill] sm:$0xff] %v3779_v62 }
 0x15e   :  { %v3764_v60 = vpop.f32.mrf.mxu2  ;;  %v3773_v10 = vpop.f32.mrf.mxu0 }
 0x15f   :  { %4349 = vst [vmem:[#allocation30_spill] sm:$0xff] %v3764_v60  ;;  %v3766_v52 = vpop.f32.mrf.mxu3  ;;  %v3775_v11 = vpop.f32.mrf.mxu1  ;;  %v3799_v60 = vsub.f32 %v1371_v49, %v3785_v31  ;;  %v3841_v31 = vsub.f32 %v1369_v46, %v3819_v13 }
 0x160   :  { %4350 = vst [vmem:[#allocation31_spill] sm:$0xff] %v3766_v52  ;;  %v1370_v52 = vld [vmem:[%s4271_s2 + $0x20] sm:$0xff] }
 0x161   :  { %4351 = vst [vmem:[#allocation32_spill] sm:$0xff] %v3773_v10  ;;  %v3802_v23 = vand.u32 4294901760, %v1370_v52  ;;  %1556 = vmatpush.msra.mxu2 %v3799_v60  ;;  %v3814_v49 = vand.u32 4294901760, %v3799_v60  ;;  %v3864_v55 = vand.u32 4294901760, %v3841_v31 }
 0x162   :  { %4352 = vst [vmem:[#allocation33_spill] sm:$0xff] %v3775_v11  ;;  %v1474_v11 = vsub.f32 %v3758_v7, %v3779_v62  ;;  %v1480_v7 = vsub.f32 %v3782_v6, %v3796_v56  ;;  %v3829_v6 = vand.u32 4294901760, %v1368_v32 }
 0x163   :  { %4357 = vst [vmem:[#allocation38_spill] sm:$0xff] %v3799_v60  ;;  %v3817_v15 = vsub.f32 %v1370_v52, %v3802_v23  ;;  %1601 = vmatpush.msra.mxu3 %v3802_v23  ;;  %1405 = vmatpush.msra.mxu0 %v3802_v23  ;;  %v1486_v37 = vsub.f32 %v3799_v60, %v3814_v49 }
 0x164   :  { %4358 = vst [vmem:[#allocation39_spill] sm:$0xff] %v3802_v23  ;;  %v3808_v40 = vand.u32 4294901760, %v1474_v11  ;;  %v3827_v11 = vand.u32 4294901760, %v1480_v7  ;;  %v1367_v7 = vld [vmem:[%s4271_s2 + $0x8] sm:$0xff]  ;;  %v3854_v60 = vsub.f32 %v1368_v32, %v3829_v6 }
 0x165   :  { %4359 = vst [vmem:[#allocation40_spill] sm:$0xff] %v3814_v49  ;;  %v3838_v22 = vand.u32 4294901760, %v3817_v15  ;;  %1559 = vmatpush.msra.mxu2 %v3817_v15  ;;  %1603 = vmatpush.msra.mxu3 %v3819_v13  ;;  %v3856_v23 = vand.u32 4294901760, %v1367_v7  ;;  %v3859_v46 = vand.u32 4294901760, %v1486_v37 }
 0x166   :  { %4360 = vst [vmem:[#allocation41_spill] sm:$0xff] %v3817_v15  ;;  %1476 = vmatpush.msra.mxu1 %v3808_v40  ;;  %v3831_v10 = vpop.f32.mrf.mxu2  ;;  %1407 = vmatpush.msra.mxu0 %v3819_v13  ;;  %v3872_v32 = vand.u32 4294901760, %v3854_v60 }
 0x167   :  { %4362 = vst [vmem:[#allocation43_spill] sm:$0xff] %v3831_v10  ;;  %v3833_v52 = vpop.f32.mrf.mxu3  ;;  %v3848_v10 = vpop.f32.mrf.mxu0  ;;  %v1492_v49 = vsub.f32 %v3817_v15, %v3838_v22  ;;  %1562 = vmatpush.msra.mxu2 %v3841_v31  ;;  %1605 = vmatpush.msra.mxu3 %v3829_v6  ;;  %v3875_v37 = vsub.f32 %v1367_v7, %v3856_v23 }
 0x168   :  { %4363 = vst [vmem:[#allocation44_spill] sm:$0xff] %v3833_v52  ;;  %v3850_v52 = vpop.f32.mrf.mxu1  ;;  %1482 = vmatpush.msra.mxu1 %v3827_v11  ;;  %1409 = vmatpush.msra.mxu0 %v3829_v6 }
 0x169   :  { %4364 = vst [vmem:[#allocation45_spill] sm:$0xff] %v3838_v22  ;;  %v3881_v15 = vand.u32 4294901760, %v1492_v49  ;;  %v1498_v22 = vsub.f32 %v3841_v31, %v3864_v55  ;;  %1565 = vmatpush.msra.mxu2 %v3854_v60  ;;  %v3889_v48 = vand.u32 4294901760, %v3875_v37  ;;  %1607 = vmatpush.msra.mxu3 %v3856_v23 }
 0x16a   :  { %4365 = vst [vmem:[#allocation46_spill] sm:$0xff] %v3841_v31  ;;  %1488 = vmatpush.msra.mxu1 %v3859_v46  ;;  %1411 = vmatpush.msra.mxu0 %v3856_v23 }
 0x16b   :  { %4366 = vst [vmem:[#allocation47_spill] sm:$0xff] %v3848_v10  ;;  %v1504_v10 = vsub.f32 %v3854_v60, %v3872_v32  ;;  %v3894_v7 = vand.u32 4294901760, %v1498_v22  ;;  %1568 = vmatpush.msra.mxu2 %v3875_v37 }
 0x16c   :  { %4367 = vst [vmem:[#allocation48_spill] sm:$0xff] %v3850_v52  ;;  %v1366_v52 = vld [vmem:[%s4271_s2] sm:$0xff]  ;;  %1494 = vmatpush.msra.mxu1 %v3881_v15 }
 0x16d   :  { %4368 = vst [vmem:[#allocation49_spill] sm:$0xff] %v3854_v60  ;;  %v3877_v13 = vand.u32 4294901760, %v1366_v52  ;;  %v3900_v31 = vand.u32 4294901760, %v1504_v10  ;;  %v1510_v60 = vsub.f32 %v3875_v37, %v3889_v48 }
 0x16e   :  { %4369 = vst [vmem:[#allocation50_spill] sm:$0xff] %v3856_v23  ;;  %1500 = vmatpush.msra.mxu1 %v3894_v7 }
 0x16f   :  { %4370 = vst [vmem:[#allocation51_spill] sm:$0xff] %v3864_v55  ;;  %v3897_v49 = vsub.f32 %v1366_v52, %v3877_v13  ;;  %1609 = vmatpush.msra.mxu3 %v3877_v13  ;;  %1413 = vmatpush.msra.mxu0 %v3877_v13  ;;  %v3908_v23 = vpop.f32.mrf.mxu3  ;;  %v3915_v10 = vpop.f32.mrf.mxu0 }
 0x170   :  { %4371 = vst [vmem:[#allocation52_spill] sm:$0xff] %v3872_v32  ;;  %v3906_v32 = vpop.f32.mrf.mxu2  ;;  %v3917_v52 = vpop.f32.mrf.mxu1  ;;  %1506 = vmatpush.msra.mxu1 %v3900_v31 }
 0x171   :  { %4372 = vst [vmem:[#allocation53_spill] sm:$0xff] %v3875_v37  ;;  %v3912_v22 = vand.u32 4294901760, %v3897_v49  ;;  %1571 = vmatpush.msra.mxu2 %v3897_v49  ;;  %v3919_v37 = vand.u32 4294901760, %v1510_v60  ;;  %1769 = vmatpush.msrb.mxu3 %v3585_v17 }
 0x172   :  { %4373 = vst [vmem:[#allocation54_spill] sm:$0xff] %v3877_v13  ;;  %1620 = vmatpush.msrb.mxu0 %v3578_v12 }
 0x173   :  { %4374 = vst [vmem:[#allocation55_spill] sm:$0xff] %v3897_v49  ;;  %1724 = vmatpush.msrb.mxu2 %v3566_v1  ;;  %1775 = vmatpush.msrb.mxu3 %v3607_v42 }
 0x174   :  { %4375 = vst [vmem:[#allocation56_spill] sm:$0xff] %v3908_v23  ;;  %v1516_v23 = vsub.f32 %v3897_v49, %v3912_v22  ;;  %1512 = vmatpush.msra.mxu1 %v3919_v37  ;;  %1624 = vmatpush.msrb.mxu0 %v3600_v35  ;;  %v1134_v49 = vadd.f32 %v3677_v2, %v3429_v61  ;;  %v4377_v2 = vld [vmem:[#allocation12_spill] sm:$0xff] }
 0x175   :  { %1726 = vmatpush.msrb.mxu2 %v3587_v19  ;;  %1781 = vmatpush.msrb.mxu3 %v3629_v63  ;;  %v995_v63 = vadd.f32 %v3459_v21, %v3457_v20  ;;  %v1137_v61 = vadd.f32 %v3706_v36, %v3431_v4  ;;  %v1330_v36 = vmul.f32 %v4377_v2, %v4377_v2 }
 0x176   :  { %v3930_v13 = vand.u32 4294901760, %v1516_v23  ;;  %1628 = vmatpush.msrb.mxu0 %v3622_v57 }
 0x177   :  { %1728 = vmatpush.msrb.mxu2 %v3609_v45  ;;  %v3941_v17 = vpop.f32.mrf.mxu3  ;;  %1787 = vmatpush.msrb.mxu3 %v3651_v29  ;;  %v3945_v42 = vpop.f32.mrf.mxu0  ;;  %v997_v29 = vadd.f32 %v3469_v28, %v3467_v27 }
 0x178   :  { %1518 = vmatpush.msra.mxu1 %v3930_v13  ;;  %v3939_v60 = vpop.f32.mrf.mxu2  ;;  %1632 = vmatpush.msrb.mxu0 %v3644_v14  ;;  %v3947_v23 = vpop.f32.mrf.mxu1 }
 0x179   :  { %1730 = vmatpush.msrb.mxu2 %v3631_v0  ;;  %1793 = vmatpush.msrb.mxu3 %v3673_v58  ;;  %v1000_v58 = vadd.f32 %v3501_v44, %v3499_v43  ;;  %v1046_v27 = vadd.f32 %v3495_v38, %v997_v29  ;;  %v1183_v38 = vadd.f32 %v3679_v3, %v1134_v49  ;;  %v4380_v49 = vld [vmem:[#allocation21_spill] sm:$0xff] }
 0x17a   :  { %1687 = vmatpush.msrb.mxu1 %v3566_v1  ;;  %1636 = vmatpush.msrb.mxu0 %v3666_v50 }
 0x17b   :  { %1732 = vmatpush.msrb.mxu2 %v3653_v30  ;;  %1799 = vmatpush.msrb.mxu3 %v3702_v33  ;;  %v1044_v33 = vadd.f32 %v3463_v25, %v995_v63  ;;  %v1049_v28 = vadd.f32 %v3503_v47, %v1000_v58  ;;  %v1139_v47 = vadd.f32 %v3733_v5, %v3461_v24  ;;  %v4381_v24 = vld [vmem:[#allocation32_spill] sm:$0xff] }
 0x17c   :  { %1689 = vmatpush.msrb.mxu1 %v3587_v19  ;;  %1640 = vmatpush.msrb.mxu0 %v3691_v53  ;;  %v1095_v4 = vadd.f32 %v3497_v39, %v1046_v27  ;;  %v1186_v63 = vadd.f32 %v4380_v49, %v1137_v61  ;;  %v4383_v39 = vld [vmem:[#allocation10_spill] sm:$0xff]  ;;  %v4386_v61 = vld [vmem:[#allocation23_spill] sm:$0xff] }
 0x17d   :  { %1734 = vmatpush.msrb.mxu2 %v3675_v59  ;;  %1805 = vmatpush.msrb.mxu3 %v3729_v34  ;;  %v1093_v25 = vadd.f32 %v3465_v26, %v1044_v33  ;;  %v4378_v34 = vld [vmem:[#allocation36_spill] sm:$0xff]  ;;  %v4379_v26 = vld [vmem:[#allocation19_spill] sm:$0xff]  ;;  %v1329_v29 = vmul.f32 %v4383_v39, %v4383_v39  ;;  %v1308_v58 = vadd.f32 %v4377_v2, %v4383_v39  ;;  %v4384_v33 = vld [vmem:[#allocation14_spill] sm:$0xff] }
 0x17e   :  { %1691 = vmatpush.msrb.mxu1 %v3609_v45  ;;  %1644 = vmatpush.msrb.mxu0 %v3718_v41  ;;  %v1232_v3 = vadd.f32 %v4379_v26, %v1183_v38  ;;  %v1331_v27 = vmul.f32 %v4384_v33, %v4384_v33  ;;  %v1235_v38 = vadd.f32 %v4386_v61, %v1186_v63  ;;  %v4389_v2 = vld [vmem:[#allocation45_spill] sm:$0xff]  ;;  %v4393_v61 = vld [vmem:[#allocation30_spill] sm:$0xff] }
 0x17f   :  { %1736 = vmatpush.msrb.mxu2 %v3704_v8  ;;  %v3974_v21 = vpop.f32.mrf.mxu3  ;;  %1811 = vmatpush.msrb.mxu3 %v3768_v18  ;;  %v3980_v43 = vpop.f32.mrf.mxu0  ;;  %v4376_v18 = vld [vmem:[#allocation2_spill] sm:$0xff]  ;;  %v1142_v5 = vadd.f32 %v4381_v24, %v1093_v25  ;;  %v4387_v25 = vld [vmem:[#allocation25_spill] sm:$0xff]  ;;  %v1345_v39 = vadd.f32 %v1330_v36, %v1329_v29 }
 0x180   :  { %1693 = vmatpush.msrb.mxu1 %v3631_v0  ;;  %v3972_v20 = vpop.f32.mrf.mxu2  ;;  %1648 = vmatpush.msrb.mxu0 %v3745_v51  ;;  %v3982_v44 = vpop.f32.mrf.mxu1  ;;  %v4395_v29 = vld [vmem:[#allocation18_spill] sm:$0xff] }
 0x181   :  { %1738 = vmatpush.msrb.mxu2 %v3731_v16  ;;  %1817 = vmatpush.msrb.mxu3 %v3808_v40  ;;  %v1098_v40 = vadd.f32 %v4376_v18, %v1049_v28  ;;  %v4385_v28 = vld [vmem:[#allocation39_spill] sm:$0xff]  ;;  %v1188_v18 = vadd.f32 %v4387_v25, %v1139_v47  ;;  %v4391_v47 = vld [vmem:[#allocation42_spill] sm:$0xff]  ;;  %v1346_v36 = vadd.f32 %v1345_v39, %v1331_v27 }
 0x182   :  { %1695 = vmatpush.msrb.mxu1 %v3653_v30  ;;  %1652 = vmatpush.msrb.mxu0 %v3779_v62 }
 0x183   :  { %1740 = vmatpush.msrb.mxu2 %v3750_v54  ;;  %1823 = vmatpush.msrb.mxu3 %v3827_v11  ;;  %v4382_v11 = vld [vmem:[#allocation40_spill] sm:$0xff]  ;;  %v1237_v25 = vadd.f32 %v4393_v61, %v1188_v18  ;;  %v4397_v18 = vld [vmem:[#allocation43_spill] sm:$0xff] }
 0x184   :  { %1697 = vmatpush.msrb.mxu1 %v3675_v59  ;;  %1656 = vmatpush.msrb.mxu0 %v3796_v56  ;;  %v4390_v56 = vld [vmem:[#allocation16_spill] sm:$0xff] }
 0x185   :  { %1742 = vmatpush.msrb.mxu2 %v3762_v9  ;;  %1829 = vmatpush.msrb.mxu3 %v3859_v46  ;;  %v4388_v46 = vld [vmem:[#allocation47_spill] sm:$0xff]  ;;  %v1332_v62 = vmul.f32 %v4390_v56, %v4390_v56  ;;  %v4398_v61 = vld [vmem:[#allocation48_spill] sm:$0xff] }
 0x186   :  { %1699 = vmatpush.msrb.mxu1 %v3704_v8  ;;  %1660 = vmatpush.msrb.mxu0 %v4382_v11  ;;  %v1144_v26 = vadd.f32 %v4388_v46, %v1095_v4  ;;  %v1309_v11 = vadd.f32 %v1308_v58, %v4384_v33  ;;  %v4392_v4 = vld [vmem:[#allocation20_spill] sm:$0xff]  ;;  %v4394_v46 = vld [vmem:[#allocation33_spill] sm:$0xff]  ;;  %v1333_v58 = vmul.f32 %v4395_v29, %v4395_v29 }
 0x187   :  { %1744 = vmatpush.msrb.mxu2 %v4378_v34  ;;  %v4022_v24 = vpop.f32.mrf.mxu3  ;;  %1835 = vmatpush.msrb.mxu3 %v3881_v15  ;;  %v1153_v51 = vpop.f32.mrf.mxu0  ;;  %v4032_v63 = vadd.f32 %v4392_v4, %v1232_v3  ;;  %v1191_v15 = vadd.f32 %v4394_v46, %v1142_v5  ;;  %v1147_v33 = vadd.f32 %v3915_v10, %v1098_v40  ;;  %v4396_v3 = vld [vmem:[#allocation24_spill] sm:$0xff]  ;;  %v4401_v40 = vld [vmem:[#allocation50_spill] sm:$0xff] }
 0x188   :  { %1701 = vmatpush.msrb.mxu1 %v3731_v16  ;;  %v4020_v49 = vpop.f32.mrf.mxu2  ;;  %1664 = vmatpush.msrb.mxu0 %v4389_v2  ;;  %v4044_v4 = vadd.f32 %v4396_v3, %v1235_v38  ;;  %v1193_v46 = vadd.f32 %v4398_v61, %v1144_v26  ;;  %v1310_v39 = vadd.f32 %v1309_v11, %v4390_v56  ;;  %v4404_v26 = vld [vmem:[#allocation54_spill] sm:$0xff] }
 0x189   :  { %1746 = vmatpush.msrb.mxu2 %v4385_v28  ;;  %1841 = vmatpush.msrb.mxu3 %v3894_v7  ;;  %v1240_v5 = vadd.f32 %v4397_v18, %v1191_v15  ;;  %v4399_v7 = vld [vmem:[#allocation52_spill] sm:$0xff]  ;;  %v1347_v27 = vadd.f32 %v1346_v36, %v1332_v62  ;;  %v1334_v38 = vmul.f32 %v4032_v63, %v4032_v63  ;;  %v4402_v15 = vld [vmem:[#allocation31_spill] sm:$0xff] }
 0x18a   :  { %1703 = vmatpush.msrb.mxu1 %v3750_v54  ;;  %v1202_v54 = vpop.f32.mrf.mxu1  ;;  %1668 = vmatpush.msrb.mxu0 %v3864_v55  ;;  %v4400_v55 = vld [vmem:[#allocation3_spill] sm:$0xff]  ;;  %v4058_v3 = vadd.f32 %v4402_v15, %v1237_v25  ;;  %v1311_v62 = vadd.f32 %v1310_v39, %v4395_v29  ;;  %v1335_v25 = vmul.f32 %v4044_v4, %v4044_v4  ;;  %v4407_v15 = vld [vmem:[#allocation56_spill] sm:$0xff] }
 0x18b   :  { %1748 = vmatpush.msrb.mxu2 %v4391_v47  ;;  %1847 = vmatpush.msrb.mxu3 %v3900_v31  ;;  %v1149_v10 = vadd.f32 %v3945_v42, %v4400_v55  ;;  %v1242_v31 = vadd.f32 %v3906_v32, %v1193_v46  ;;  %v1196_v55 = vadd.f32 %v3917_v52, %v1147_v33  ;;  %v4403_v42 = vld [vmem:[#allocation4_spill] sm:$0xff]  ;;  %v4406_v46 = vld [vmem:[#allocation5_spill] sm:$0xff] }
 0x18c   :  { %1705 = vmatpush.msrb.mxu1 %v3762_v9  ;;  %1672 = vmatpush.msrb.mxu0 %v4399_v7  ;;  %v1152_v11 = vadd.f32 %v3980_v43, %v4403_v42  ;;  %v1348_v36 = vadd.f32 %v1347_v27, %v1333_v58  ;;  %v4405_v32 = vld [vmem:[#allocation44_spill] sm:$0xff]  ;;  %v1312_v52 = vadd.f32 %v1311_v62, %v4032_v63 }
 0x18d   :  { %1750 = vmatpush.msrb.mxu2 %v3829_v6  ;;  %1853 = vmatpush.msrb.mxu3 %v3919_v37  ;;  %v4072_v18 = vadd.f32 %v4405_v32, %v1240_v5  ;;  %v1245_v43 = vadd.f32 %v3939_v60, %v1196_v55  ;;  %v1198_v33 = vadd.f32 %v3947_v23, %v1149_v10  ;;  %v4408_v55 = vld [vmem:[#allocation6_spill] sm:$0xff] }
 0x18e   :  { %1707 = vmatpush.msrb.mxu1 %v4378_v34  ;;  %1676 = vmatpush.msrb.mxu0 %v3889_v48  ;;  %v1154_v58 = vadd.f32 %v1153_v51, %v4406_v46  ;;  %v1349_v27 = vadd.f32 %v1348_v36, %v1334_v38  ;;  %v1336_v5 = vmul.f32 %v4058_v3, %v4058_v3 }
 0x18f   :  { %1752 = vmatpush.msrb.mxu2 %v4401_v40  ;;  %v1300_v61 = vpop.f32.mrf.mxu3  ;;  %1859 = vmatpush.msrb.mxu3 %v3930_v13  ;;  %v1156_v39 = vpop.f32.mrf.mxu0  ;;  %v4084_v42 = vadd.f32 %v4407_v15, %v1242_v31  ;;  %v1313_v13 = vadd.f32 %v1312_v52, %v4044_v4  ;;  %v1247_v62 = vadd.f32 %v3972_v20, %v1198_v33 }
 0x190   :  { %1709 = vmatpush.msrb.mxu1 %v4385_v28  ;;  %v1251_v37 = vpop.f32.mrf.mxu2  ;;  %1680 = vmatpush.msrb.mxu0 %v3912_v22  ;;  %v1201_v60 = vadd.f32 %v3982_v44, %v1152_v11  ;;  %v1157_v23 = vadd.f32 %v1156_v39, %v4408_v55  ;;  %v1350_v51 = vadd.f32 %v1349_v27, %v1335_v25 }
 0x191   :  { %1754 = vmatpush.msrb.mxu2 %v4404_v26  ;;  %v1337_v10 = vmul.f32 %v4072_v18, %v4072_v18  ;;  %v1314_v36 = vadd.f32 %v1313_v13, %v4058_v3  ;;  %v4095_v31 = vadd.f32 %v3941_v17, %v1245_v43  ;;  %v1203_v52 = vadd.f32 %v1202_v54, %v1154_v58 }
 0x192   :  { %1711 = vmatpush.msrb.mxu1 %v4391_v47  ;;  %v1205_v38 = vpop.f32.mrf.mxu1  ;;  %v1250_v32 = vadd.f32 %v4020_v49, %v1201_v60  ;;  %v1351_v20 = vadd.f32 %v1350_v51, %v1336_v5  ;;  %v1338_v44 = vmul.f32 %v4084_v42, %v4084_v42  ;;  %v4103_v25 = vadd.f32 %v3974_v21, %v1247_v62  ;;  %v4409_v62 = vld [vmem:[#allocation8_spill] sm:$0xff] }
 0x193   :  { %v1315_v11 = vadd.f32 %v1314_v36, %v4072_v18  ;;  %v1252_v33 = vadd.f32 %v1251_v37, %v1203_v52  ;;  %v1206_v46 = vadd.f32 %v1205_v38, %v1157_v23  ;;  %v1339_v54 = vmul.f32 %v4095_v31, %v4095_v31 }
 0x194   :  { %1713 = vmatpush.msrb.mxu1 %v3829_v6  ;;  %v1352_v39 = vadd.f32 %v1351_v20, %v1337_v10  ;;  %v4109_v49 = vadd.f32 %v4022_v24, %v1250_v32  ;;  %v1340_v21 = vmul.f32 %v4103_v25, %v4103_v25 }
 0x195   :  { %v1316_v43 = vadd.f32 %v1315_v11, %v4084_v42  ;;  %v4114_v37 = vadd.f32 %v1300_v61, %v1252_v33 }
 0x196   :  { %1715 = vmatpush.msrb.mxu1 %v4401_v40  ;;  %v1353_v15 = vadd.f32 %v1352_v39, %v1338_v44  ;;  %v1341_v51 = vmul.f32 %v4109_v49, %v4109_v49 }
 0x197   :  { %v1303_v17 = vpop.f32.mrf.mxu3  ;;  %v1158_v5 = vpop.f32.mrf.mxu0  ;;  %v1317_v13 = vadd.f32 %v1316_v43, %v4095_v31  ;;  %v1342_v32 = vmul.f32 %v4114_v37, %v4114_v37 }
 0x198   :  { %1717 = vmatpush.msrb.mxu1 %v4404_v26  ;;  %v1254_v27 = vpop.f32.mrf.mxu2  ;;  %v1159_v60 = vadd.f32 %v1158_v5, %v4409_v62  ;;  %v1354_v55 = vadd.f32 %v1353_v15, %v1339_v54 }
 0x199   :  { %v1255_v58 = vadd.f32 %v1254_v27, %v1206_v46  ;;  %v1318_v23 = vadd.f32 %v1317_v13, %v4103_v25 }
 0x19a   :  { %v1207_v10 = vpop.f32.mrf.mxu1  ;;  %v1355_v38 = vadd.f32 %v1354_v55, %v1340_v21 }
 0x19b   :  { %v4120_v24 = vadd.f32 %v1303_v17, %v1255_v58  ;;  %v1319_v36 = vadd.f32 %v1318_v23, %v4109_v49  ;;  %v1208_v52 = vadd.f32 %v1207_v10, %v1159_v60 }
 0x19c   :  { %v1356_v20 = vadd.f32 %v1355_v38, %v1341_v51 }
 0x19d   :  { %v1320_v44 = vadd.f32 %v1319_v36, %v4114_v37  ;;  %v1343_v11 = vmul.f32 %v4120_v24, %v4120_v24 }
 0x19e   :  { %v1357_v39 = vadd.f32 %v1356_v20, %v1342_v32 }
 0x19f   :  { %v1305_v46 = vpop.f32.mrf.mxu3  ;;  %v1321_v27 = vadd.f32 %v1320_v44, %v4120_v24 }
 0x1a0   :  { %v1256_v61 = vpop.f32.mrf.mxu2  ;;  %v1358_v43 = vadd.f32 %v1357_v39, %v1343_v11 }
 0x1a1   :  { %v1257_v33 = vadd.f32 %v1256_v61, %v1208_v52 }
 0x1a3   :  { %v4129_v17 = vadd.f32 %v1305_v46, %v1257_v33 }
 0x1a5   :  { %v1322_v54 = vadd.f32 %v1321_v27, %v4129_v17  ;;  %v1344_v58 = vmul.f32 %v4129_v17, %v4129_v17 }
 0x1a7   :  { %v1323_v5 = vrot.slane %v1322_v54, 4  ;;  %v1359_v15 = vadd.f32 %v1358_v43, %v1344_v58  ;;  %v4410_v43 = vld [vmem:[#allocation7_spill] sm:$0xff]  ;;  %v4426_v58 = vld [vmem:[#allocation38_spill] sm:$0xff] }
 0x1a9   :  { %v1324_v13 = vadd.f32 %v1323_v5, %v1322_v54  ;;  %v1360_v21 = vrot.slane %v1359_v15, 4  ;;  %v4425_v54 = vld [vmem:[#allocation51_spill] sm:$0xff] }
 0x1ab   :  { %v1325_v62 = vrot.slane %v1324_v13, 2  ;;  %v1361_v60 = vadd.f32 %v1360_v21, %v1359_v15 }
 0x1ad   :  { %v1326_v55 = vadd.f32 %v1325_v62, %v1324_v13  ;;  %v1362_v23 = vrot.slane %v1361_v60, 2 }
 0x1af   :  { %v1327_v51 = vrot.slane %v1326_v55, 1  ;;  %v1363_v10 = vadd.f32 %v1362_v23, %v1361_v60 }
 0x1b1   :  { %v1328_v38 = vadd.f32 %v1327_v51, %v1326_v55  ;;  %v1364_v36 = vrot.slane %v1363_v10, 1 }
 0x1b3   :  { %v1365_v32 = vadd.f32 %v1364_v36, %v1363_v10  ;;  %v1414_v52 = vand.u32 4294901760, %v1328_v38 }
 0x1b5   :  { %v4134_v61 = vand.u32 4294901760, %v1365_v32  ;;  %1520 = vmatmul.f32.vlgmr.msra.gmra.mxu1 %v1414_v52  ;;  %v1415_v20 = vsub.f32 %v1328_v38, %v1414_v52 }
 0x1b6   :  { %1920 = vmatpush.msra.mxu1 %v3566_v1 }
 0x1b7   :  { %v4138_v44 = vsub.f32 %v1365_v32, %v4134_v61  ;;  %1574 = vmatmul.f32.vlgmr.msra.gmra.mxu2 %v1415_v20  ;;  %v1416_v11 = vand.u32 4294901760, %v1415_v20 }
 0x1b8   :  { %1922 = vmatpush.msra.mxu1 %v3587_v19  ;;  %1961 = vmatpush.msra.mxu2 %v3578_v12 }
 0x1b9   :  { %1613 = vmatmul.f32.vlgmr.msra.gmra.mxu3 %v1416_v11  ;;  %v1417_v33 = vsub.f32 %v1415_v20, %v1416_v11  ;;  %v1757_v46 = vand.u32 4294901760, %v4138_v44 }
 0x1ba   :  { %1924 = vmatpush.msra.mxu1 %v3609_v45  ;;  %1965 = vmatpush.msra.mxu2 %v3600_v35  ;;  %v4413_v35 = vld [vmem:[#allocation13_spill] sm:$0xff] }
 0x1bb   :  { %2028 = vmatpush.msra.mxu3 %v3566_v1  ;;  %v1418_v39 = vand.u32 4294901760, %v1417_v33  ;;  %v1758_v27 = vsub.f32 %v4138_v44, %v1757_v46  ;;  %v4411_v1 = vld [vmem:[#allocation9_spill] sm:$0xff] }
 0x1bc   :  { %1926 = vmatpush.msra.mxu1 %v3631_v0  ;;  %1969 = vmatpush.msra.mxu2 %v3622_v57  ;;  %v4415_v57 = vld [vmem:[#allocation28_spill] sm:$0xff] }
 0x1bd   :  { %2030 = vmatpush.msra.mxu3 %v3587_v19  ;;  %1419 = vmatmul.f32.vlgmr.msra.gmra.mxu0 %v1418_v39  ;;  %v1759_v12 = vand.u32 4294901760, %v1758_v27  ;;  %v4412_v19 = vld [vmem:[#allocation11_spill] sm:$0xff] }
 0x1be   :  { %1719 = vmatmul.f32.vlgmr.msrb.gmra.mxu1 %v1414_v52  ;;  %1867 = vmatpush.msra.mxu0 %v4410_v43 }
 0x1bf   :  { %1928 = vmatpush.msra.mxu1 %v3653_v30  ;;  %1973 = vmatpush.msra.mxu2 %v3644_v14  ;;  %v4417_v14 = vld [vmem:[#allocation17_spill] sm:$0xff] }
 0x1c0   :  { %2032 = vmatpush.msra.mxu3 %v3609_v45  ;;  %1760 = vmatmul.f32.vlgmr.msrb.gmra.mxu2 %v1759_v12  ;;  %v4414_v45 = vld [vmem:[#allocation15_spill] sm:$0xff] }
 0x1c1   :  { %1870 = vmatpush.msra.mxu0 %v4411_v1  ;;  %1930 = vmatpush.msra.mxu1 %v3675_v59 }
 0x1c2   :  { %1977 = vmatpush.msra.mxu2 %v3666_v50  ;;  %2034 = vmatpush.msra.mxu3 %v3631_v0  ;;  %v4416_v0 = vld [vmem:[#allocation27_spill] sm:$0xff]  ;;  %v4419_v50 = vld [vmem:[#allocation22_spill] sm:$0xff] }
 0x1c3   :  { %1861 = vmatmul.f32.vlgmr.msrb.gmra.mxu3 %v4134_v61  ;;  %1873 = vmatpush.msra.mxu0 %v4412_v19 }
 0x1c4   :  { %1932 = vmatpush.msra.mxu1 %v3704_v8  ;;  %1981 = vmatpush.msra.mxu2 %v3691_v53  ;;  %v4421_v53 = vld [vmem:[#allocation26_spill] sm:$0xff] }
 0x1c5   :  { %2036 = vmatpush.msra.mxu3 %v3653_v30  ;;  %1876 = vmatpush.msra.mxu0 %v4413_v35  ;;  %v4418_v30 = vld [vmem:[#allocation34_spill] sm:$0xff] }
 0x1c6   :  { %1934 = vmatpush.msra.mxu1 %v3731_v16  ;;  %1985 = vmatpush.msra.mxu2 %v3718_v41  ;;  %v4423_v41 = vld [vmem:[#allocation29_spill] sm:$0xff] }
 0x1c7   :  { %2038 = vmatpush.msra.mxu3 %v3675_v59  ;;  %1682 = vmatmul.f32.vlgmr.msrb.gmra.mxu0 %v1414_v52  ;;  %v4420_v59 = vld [vmem:[#allocation37_spill] sm:$0xff] }
 0x1c8   :  { %1879 = vmatpush.msra.mxu0 %v4414_v45  ;;  %1936 = vmatpush.msra.mxu1 %v4415_v57 }
 0x1c9   :  { %1989 = vmatpush.msra.mxu2 %v4416_v0  ;;  %2040 = vmatpush.msra.mxu3 %v3704_v8  ;;  %v4422_v8 = vld [vmem:[#allocation40_spill] sm:$0xff] }
 0x1ca   :  { %1882 = vmatpush.msra.mxu0 %v4417_v14  ;;  %1938 = vmatpush.msra.mxu1 %v3762_v9 }
 0x1cb   :  { %1993 = vmatpush.msra.mxu2 %v4418_v30  ;;  %2042 = vmatpush.msra.mxu3 %v3731_v16  ;;  %v4424_v16 = vld [vmem:[#allocation35_spill] sm:$0xff]  ;;  %v4432_v30 = vld [vmem:[#allocation10_spill] sm:$0xff] }
 0x1cc   :  { %1885 = vmatpush.msra.mxu0 %v4419_v50  ;;  %1940 = vmatpush.msra.mxu1 %v4378_v34 }
 0x1cd   :  { %1997 = vmatpush.msra.mxu2 %v4420_v59  ;;  %2044 = vmatpush.msra.mxu3 %v4415_v57  ;;  %v2096_v57 = vld [vmem:[%s4273_s3] sm:$0x1]  ;;  %v4433_v59 = vld [vmem:[#allocation12_spill] sm:$0xff] }
 0x1ce   :  { %1888 = vmatpush.msra.mxu0 %v4421_v53  ;;  %1942 = vmatpush.msra.mxu1 %v4385_v28 }
 0x1cf   :  { %2001 = vmatpush.msra.mxu2 %v4422_v8  ;;  %2046 = vmatpush.msra.mxu3 %v3762_v9  ;;  %v4427_v9 = vld [vmem:[#allocation41_spill] sm:$0xff]  ;;  %v4434_v8 = vld [vmem:[#allocation14_spill] sm:$0xff] }
 0x1d0   :  { %1891 = vmatpush.msra.mxu0 %v4423_v41  ;;  %1944 = vmatpush.msra.mxu1 %v4391_v47 }
 0x1d1   :  { %2005 = vmatpush.msra.mxu2 %v4389_v2  ;;  %2048 = vmatpush.msra.mxu3 %v4378_v34  ;;  %v4428_v2 = vld [vmem:[#allocation46_spill] sm:$0xff]  ;;  %v4429_v34 = vld [vmem:[#allocation49_spill] sm:$0xff] }
 0x1d2   :  { %1894 = vmatpush.msra.mxu0 %v4424_v16  ;;  %1946 = vmatpush.msra.mxu1 %v3829_v6 }
 0x1d3   :  { %2009 = vmatpush.msra.mxu2 %v4425_v54  ;;  %2050 = vmatpush.msra.mxu3 %v4385_v28  ;;  %v4430_v28 = vld [vmem:[#allocation53_spill] sm:$0xff] }
 0x1d4   :  { %1897 = vmatpush.msra.mxu0 %v4426_v58  ;;  %1948 = vmatpush.msra.mxu1 %v4401_v40 }
 0x1d5   :  { %2013 = vmatpush.msra.mxu2 %v4399_v7  ;;  %2052 = vmatpush.msra.mxu3 %v4391_v47 }
 0x1d6   :  { %1900 = vmatpush.msra.mxu0 %v4427_v9  ;;  %1950 = vmatpush.msra.mxu1 %v4404_v26 }
 0x1d7   :  { %2017 = vmatpush.msra.mxu2 %v3889_v48  ;;  %2054 = vmatpush.msra.mxu3 %v3829_v6  ;;  %v4431_v48 = vld [vmem:[#allocation55_spill] sm:$0xff] }
 0x1d8   :  { %1954 = vmatmul.f32.vlgmr.msra.gmra.mxu1 %v1757_v46  ;;  %1903 = vmatpush.msra.mxu0 %v4428_v2 }
 0x1d9   :  { %2021 = vmatpush.msra.mxu2 %v3912_v22  ;;  %2056 = vmatpush.msra.mxu3 %v4401_v40 }
 0x1da   :  { %2023 = vmatmul.f32.vlgmr.msra.gmra.mxu2 %v4134_v61  ;;  %1906 = vmatpush.msra.mxu0 %v4429_v34 }
 0x1db   :  { %2058 = vmatpush.msra.mxu3 %v4404_v26 }
 0x1dc   :  { %2060 = vmatmul.f32.vlgmr.msra.gmra.mxu3 %v4134_v61  ;;  %1909 = vmatpush.msra.mxu0 %v4430_v28 }
 0x1de   :  { %1912 = vmatpush.msra.mxu0 %v4431_v48 }
 0x1df   :  { %1915 = vmatmul.f32.vlgmr.msra.gmra.mxu0 %v4138_v44 }
 0x232   :  { %v1521_v47 = vpop.f32.mrf.mxu1 }
 0x23a   :  { %v1420_v6 = vpop.f32.mrf.mxu0  ;;  %v1575_v7 = vpop.f32.mrf.mxu2 }
 0x23b   :  { %v1522_v5 = vadd.f32 %v1521_v47, %v1420_v6  ;;  %v1720_v13 = vpop.f32.mrf.mxu1 }
 0x23c   :  { %v1614_v22 = vpop.f32.mrf.mxu3 }
 0x23d   :  { %v1576_v40 = vadd.f32 %v1575_v7, %v1522_v5 }
 0x23f   :  { %v1615_v21 = vadd.f32 %v1614_v22, %v1576_v40 }
 0x243   :  { %v1761_v62 = vpop.f32.mrf.mxu2 }
 0x244   :  { %v1683_v15 = vpop.f32.mrf.mxu0 }
 0x245   :  { %v1684_v26 = vadd.f32 %v1683_v15, %v1615_v21 }
 0x246   :  { %v1862_v60 = vpop.f32.mrf.mxu3 }
 0x247   :  { %v1863_v55 = vadd.f32 %v1862_v60, %v1761_v62  ;;  %v1721_v51 = vadd.f32 %v1720_v13, %v1684_v26 }
 0x249   :  { %v2064_v52 = vmul.f32 0.001953125, %v1721_v51 }
 0x24b   :  { %v2066_v33 = vmul.f32 %v2064_v52, %v2064_v52  ;;  %v2079_v35 = vperm.slane %v2064_v52, 0 }
 0x24d   :  { %v2080_v50 = vsub.f32 %v4432_v30, %v2079_v35  ;;  %v2081_v53 = vsub.f32 %v4433_v59, %v2079_v35  ;;  %v2082_v41 = vsub.f32 %v4434_v8, %v2079_v35  ;;  %v2083_v16 = vsub.f32 %v4390_v56, %v2079_v35 }
 0x24e   :  { %v2084_v54 = vsub.f32 %v4395_v29, %v2079_v35  ;;  %v2085_v58 = vsub.f32 %v4032_v63, %v2079_v35  ;;  %v2086_v9 = vsub.f32 %v4044_v4, %v2079_v35  ;;  %v2087_v34 = vsub.f32 %v4058_v3, %v2079_v35  ;;  %v2906_v3 = vld [vmem:[%s4272_s4] ss:$0 sm:$0xff] }
 0x24f   :  { %v2088_v28 = vsub.f32 %v4072_v18, %v2079_v35  ;;  %v2089_v48 = vsub.f32 %v4084_v42, %v2079_v35  ;;  %v2090_v6 = vsub.f32 %v4095_v31, %v2079_v35  ;;  %v2091_v47 = vsub.f32 %v4103_v25, %v2079_v35 }
 0x250   :  { %v2092_v7 = vsub.f32 %v4109_v49, %v2079_v35  ;;  %v2093_v56 = vsub.f32 %v4114_v37, %v2079_v35  ;;  %v2094_v29 = vsub.f32 %v4120_v24, %v2079_v35  ;;  %v2095_v37 = vsub.f32 %v4129_v17, %v2079_v35 }
 0x255   :  { %v1955_v38 = vpop.f32.mrf.mxu1 }
 0x25c   :  { %v1916_v23 = vpop.f32.mrf.mxu0 }
 0x25d   :  { %v1917_v10 = vadd.f32 %v1916_v23, %v1863_v55  ;;  %v2024_v32 = vpop.f32.mrf.mxu2 }
 0x25f   :  { %v1956_v36 = vadd.f32 %v1955_v38, %v1917_v10  ;;  %v2061_v20 = vpop.f32.mrf.mxu3 }
 0x261   :  { %v2025_v61 = vadd.f32 %v2024_v32, %v1956_v36 }
 0x263   :  { %v2062_v44 = vadd.f32 %v2061_v20, %v2025_v61 }
 0x265   :  { %v2065_v11 = vmul.f32 0.001953125, %v2062_v44 }
 0x267   :  { %v2067_v46 = vsub.f32 %v2065_v11, %v2066_v33 }
 0x269   :  { %v2068_v39 = vadd.f32 1e-05, %v2067_v46 }
 0x26b   :  { %2907 = vrsqrt.f32 %v2068_v39  ;;  %vm2075_vm1 = vweird.f32 %v2068_v39 }
 0x271   :  { %v2908_v27 = vpop.eup %2907 }
 0x272   :  { %v2070_v12 = vmul.f32 %v2908_v27, %v2068_v39  ;;  %vm2076_vm0 = vweird.f32 %v2908_v27 }
 0x273   :  { %vm2077_vm2 = vmor %vm2075_vm1, %vm2076_vm0 }
 0x274   :  { %v2071_v43 = vmul.f32 %v2908_v27, %v2070_v12 }
 0x276   :  { %v2072_v1 = vmul.f32 0.5, %v2071_v43 }
 0x278   :  { %v2073_v19 = vsub.f32 1.5, %v2072_v1 }
 0x27a   :  { %v2074_v45 = vmul.f32 %v2908_v27, %v2073_v19 }
 0x27c   :  { %v2078_v0 = vsel %vm2077_vm2, %v2908_v27, %v2074_v45 }
 0x27d   :  { %v2097_v14 = vmul.f32 %v2096_v57, %v2078_v0 }
 0x27f   :  { %v2098_v2 = vperm.slane %v2097_v14, 0 }
 0x281   :  { %v2099_v63 = vmul.f32 %v2098_v2, %v2080_v50  ;;  %v2100_v22 = vmul.f32 %v2098_v2, %v2081_v53  ;;  %v2101_v4 = vmul.f32 %v2098_v2, %v2082_v41  ;;  %v2102_v5 = vmul.f32 %v2098_v2, %v2083_v16 }
 0x282   :  { %v2103_v18 = vmul.f32 %v2098_v2, %v2084_v54  ;;  %v2104_v42 = vmul.f32 %v2098_v2, %v2085_v58  ;;  %v2105_v40 = vmul.f32 %v2098_v2, %v2086_v9  ;;  %v2106_v31 = vmul.f32 %v2098_v2, %v2087_v34 }
 0x283   :  { %v2107_v15 = vmul.f32 %v2098_v2, %v2088_v28  ;;  %v2108_v25 = vmul.f32 %v2098_v2, %v2089_v48  ;;  %v2109_v13 = vmul.f32 %v2098_v2, %v2090_v6  ;;  %v2110_v49 = vmul.f32 %v2098_v2, %v2091_v47 }
 0x284   :  { %v2111_v21 = vmul.f32 %v2098_v2, %v2092_v7  ;;  %v2112_v24 = vmul.f32 %v2098_v2, %v2093_v56  ;;  %v2113_v62 = vmul.f32 %v2098_v2, %v2094_v29  ;;  %v2119_v60 = vadd.f32 %v2906_v3, %v2099_v63 }
 0x285   :  { %v2120_v26 = vadd.f32 %v2906_v3, %v2100_v22  ;;  %v2121_v55 = vadd.f32 %v2906_v3, %v2101_v4  ;;  %v2122_v23 = vadd.f32 %v2906_v3, %v2102_v5  ;;  %v2123_v51 = vadd.f32 %v2906_v3, %v2103_v18 }
 0x286   :  { %v2124_v10 = vadd.f32 %v2906_v3, %v2104_v42  ;;  %v2125_v38 = vadd.f32 %v2906_v3, %v2105_v40  ;;  %v2126_v36 = vadd.f32 %v2906_v3, %v2106_v31  ;;  %v2127_v32 = vadd.f32 %v2906_v3, %v2107_v15 }
 0x287   :  { %v2128_v52 = vadd.f32 %v2906_v3, %v2108_v25  ;;  %v2129_v61 = vadd.f32 %v2906_v3, %v2109_v13  ;;  %v2130_v20 = vadd.f32 %v2906_v3, %v2110_v49  ;;  %v2114_v44 = vmul.f32 %v2098_v2, %v2095_v37 }
 0x288   :  { %v2131_v11 = vadd.f32 %v2906_v3, %v2111_v21  ;;  %v2132_v33 = vadd.f32 %v2906_v3, %v2112_v24  ;;  %v2133_v46 = vadd.f32 %v2906_v3, %v2113_v62  ;;  %vm2135_vm3 = vcmp.gt.f32.partialorder %v2119_v60, 0.0 }
 0x289   :  { %vm2136_vm4 = vcmp.gt.f32.partialorder %v2120_v26, 0.0  ;;  %vm2137_vm5 = vcmp.gt.f32.partialorder %v2121_v55, 0.0  ;;  %vm2138_vm6 = vcmp.gt.f32.partialorder %v2122_v23, 0.0  ;;  %vm2139_vm7 = vcmp.gt.f32.partialorder %v2123_v51, 0.0 }
 0x28a   :  { %vm2140_vm8 = vcmp.gt.f32.partialorder %v2124_v10, 0.0  ;;  %vm2141_vm9 = vcmp.gt.f32.partialorder %v2125_v38, 0.0  ;;  %vm2142_vm10 = vcmp.gt.f32.partialorder %v2126_v36, 0.0  ;;  %vm2143_vm11 = vcmp.gt.f32.partialorder %v2127_v32, 0.0 }
 0x28b   :  { %vm2144_vm12 = vcmp.gt.f32.partialorder %v2128_v52, 0.0  ;;  %vm2145_vm13 = vcmp.gt.f32.partialorder %v2129_v61, 0.0  ;;  %vm2146_vm14 = vcmp.gt.f32.partialorder %v2130_v20, 0.0  ;;  %vm2147_vm15 = vcmp.gt.f32.partialorder %v2131_v11, 0.0 }
 0x28c   :  { %vm2148_vm0 = vcmp.gt.f32.partialorder %v2132_v33, 0.0  ;;  %v2151_v17 = vmul.f32 0.2, %v2119_v60  ;;  %v2152_v39 = vmul.f32 0.2, %v2120_v26  ;;  %v2134_v27 = vadd.f32 %v2906_v3, %v2114_v44 }
 0x28d   :  { %v2153_v12 = vmul.f32 0.2, %v2121_v55  ;;  %v2154_v43 = vmul.f32 0.2, %v2122_v23  ;;  %v2155_v1 = vmul.f32 0.2, %v2123_v51 }
 0x28e   :  { %v2156_v19 = vmul.f32 0.2, %v2124_v10  ;;  %v2157_v35 = vmul.f32 0.2, %v2125_v38  ;;  %v2158_v45 = vmul.f32 0.2, %v2126_v36  ;;  %v2167_v30 = vsel %vm2135_vm3, %v2119_v60, %v2151_v17 }
 0x28f   :  { %v2159_v57 = vmul.f32 0.2, %v2127_v32  ;;  %v2160_v0 = vmul.f32 0.2, %v2128_v52  ;;  %v2161_v14 = vmul.f32 0.2, %v2129_v61  ;;  %v2168_v8 = vsel %vm2136_vm4, %v2120_v26, %v2152_v39 }
 0x290   :  { %v2162_v50 = vmul.f32 0.2, %v2130_v20  ;;  %v2163_v59 = vmul.f32 0.2, %v2131_v11  ;;  %v2164_v53 = vmul.f32 0.2, %v2132_v33  ;;  %v2169_v54 = vsel %vm2137_vm5, %v2121_v55, %v2153_v12 }
 0x291   :  { %v2165_v41 = vmul.f32 0.2, %v2133_v46  ;;  %v2166_v16 = vmul.f32 0.2, %v2134_v27  ;;  %v2170_v58 = vsel %vm2138_vm6, %v2122_v23, %v2154_v43  ;;  %v2171_v9 = vsel %vm2139_vm7, %v2123_v51, %v2155_v1 }
 0x292   :  { %v2172_v2 = vsel %vm2140_vm8, %v2124_v10, %v2156_v19  ;;  %v2173_v34 = vsel %vm2141_vm9, %v2125_v38, %v2157_v35  ;;  %v2174_v28 = vsel %vm2142_vm10, %v2126_v36, %v2158_v45  ;;  %vm2149_vm1 = vcmp.gt.f32.partialorder %v2133_v46, 0.0 }
 0x293   :  { %vm2150_vm2 = vcmp.gt.f32.partialorder %v2134_v27, 0.0  ;;  %v2175_v48 = vsel %vm2143_vm11, %v2127_v32, %v2159_v57  ;;  %v2176_v6 = vsel %vm2144_vm12, %v2128_v52, %v2160_v0  ;;  %v2177_v47 = vsel %vm2145_vm13, %v2129_v61, %v2161_v14 }
 0x294   :  { %v2178_v7 = vsel %vm2146_vm14, %v2130_v20, %v2162_v50  ;;  %v2862_v56 = vpack.c.bf16 %v2168_v8, %v2167_v30  ;;  %v2867_v29 = vpack.c.bf16 %v2170_v58, %v2169_v54  ;;  %v2179_v63 = vsel %vm2147_vm15, %v2131_v11, %v2163_v59 }
 0x295   :  { %v2180_v22 = vsel %vm2148_vm0, %v2132_v33, %v2164_v53  ;;  %v2872_v4 = vpack.c.bf16 %v2172_v2, %v2171_v9  ;;  %v2877_v5 = vpack.c.bf16 %v2174_v28, %v2173_v34  ;;  %v2181_v3 = vsel %vm2149_vm1, %v2133_v46, %v2165_v41 }
 0x296   :  { %v2182_v18 = vsel %vm2150_vm2, %v2134_v27, %v2166_v16  ;;  %2863 = vst [vmem:[%s4274_s5] sm:$0xff] %v2862_v56   ;;  %v2882_v42 = vpack.c.bf16 %v2176_v6, %v2175_v48  ;;  %v2887_v40 = vpack.c.bf16 %v2178_v7, %v2177_v47  ;;  %v2892_v31 = vpack.c.bf16 %v2180_v22, %v2179_v63 }
 0x297   :  { %2899 = vst [vmem:[%s4274_s5 + $0x8] sm:$0xff] %v2867_v29   ;;  %v2897_v15 = vpack.c.bf16 %v2182_v18, %v2181_v3 }
 0x298   :  { %2900 = vst [vmem:[%s4274_s5 + $0x10] sm:$0xff] %v2872_v4  }
 0x299   :  { %2901 = vst [vmem:[%s4274_s5 + $0x18] sm:$0xff] %v2877_v5  }
 0x29a   :  { %2902 = vst [vmem:[%s4274_s5 + $0x20] sm:$0xff] %v2882_v42  }
 0x29b   :  { %2903 = vst [vmem:[%s4274_s5 + $0x28] sm:$0xff] %v2887_v40  }
 0x29c   :  { %2904 = vst [vmem:[%s4274_s5 + $0x30] sm:$0xff] %v2892_v31  }
 0x29d   :  { %2905 = vst [vmem:[%s4274_s5 + $0x38] sm:$0xff] %v2897_v15  }

// kernel: discriminator_forward.5
= control target key start
LH: loop header
LB: loop body
LE: loop exit
PB: predicated region body
PF: predicated region fallthrough
CT: control target
= control target key end

     0   :  { %vm676_vm0 = vcmask 523264   ;;  %vm899_vm1 = vcmask 518144   ;;  %vm958_vm8 = vsmask.f32 2306  ;;  %vm1319_vm13 = vcmask 1041408   ;;  %s5808_s1 = inlined_call_operand.vmem [shape: bf16[512,64], index: 1, kind: input, shape index: {}]   ;;  %s5809_s0 = inlined_call_operand.vmem [shape: bf16[128,512], index: 0, kind: input, shape index: {}]   ;;  %s5810_s3 = inlined_call_operand.vmem [shape: f32[1,64], index: 3, kind: input, shape index: {}]   ;;  %s5811_s4 = inlined_call_operand.vmem [shape: bf16[16,64,128], index: 4, kind: input, shape index: {}]   ;;  %s5812_s2 = inlined_call_operand.vmem [shape: f32[1,64], index: 2, kind: input, shape index: {}]   ;;  %s5813_s6 = inlined_call_operand.vmem [shape: f32[1,128], index: 6, kind: input, shape index: {}]   ;;  %s5814_s5 = inlined_call_operand.vmem [shape: f32[1,128], index: 5, kind: input, shape index: {}]   ;;  %s5815_s7 = inlined_call_operand.vmem [shape: bf16[16,128], index: 7, kind: input, shape index: {}]   ;;  %s5816_s8 = inlined_call_operand.vmem [shape: f32[2,1], index: 8, kind: output, shape index: {}]  }
   0x1   :  { %v4041_v0 = vld [vmem:[%s5808_s1 + $0x38] sm:$0xff]  ;;  %v4040_v4 = vld [vmem:[%s5808_s1 + $0x30] sm:$0xff]  ;;  %v4039_v8 = vld [vmem:[%s5808_s1 + $0x28] sm:$0xff]  ;;  %vm1323_vm14 = vcmask 1043456   ;;  %vm1326_vm15 = vcmask 1045504  }
   0x2   :  { %v4049_v1 = vld [vmem:[%s5808_s1 + $0x78] sm:$0xff]  ;;  %478 = vmatpush.bf16.msra.mxu0 %v4041_v0  ;;  %v4048_v5 = vld [vmem:[%s5808_s1 + $0x70] sm:$0xff]  ;;  %v4047_v9 = vld [vmem:[%s5808_s1 + $0x68] sm:$0xff] }
   0x3   :  { %v4057_v2 = vld [vmem:[%s5808_s1 + $0xb8] sm:$0xff]  ;;  %527 = vmatpush.bf16.msra.mxu1 %v4049_v1  ;;  %v4056_v6 = vld [vmem:[%s5808_s1 + $0xb0] sm:$0xff]  ;;  %v4055_v10 = vld [vmem:[%s5808_s1 + $0xa8] sm:$0xff] }
   0x4   :  { %v4065_v3 = vld [vmem:[%s5808_s1 + $0xf8] sm:$0xff]  ;;  %576 = vmatpush.bf16.msra.mxu2 %v4057_v2  ;;  %v4064_v7 = vld [vmem:[%s5808_s1 + $0xf0] sm:$0xff]  ;;  %v4063_v11 = vld [vmem:[%s5808_s1 + $0xe8] sm:$0xff] }
   0x5   :  { %625 = vmatpush.bf16.msra.mxu3 %v4065_v3  ;;  %v4038_v12 = vld [vmem:[%s5808_s1 + $0x20] sm:$0xff]  ;;  %v4037_v16 = vld [vmem:[%s5808_s1 + $0x18] sm:$0xff]  ;;  %v4036_v20 = vld [vmem:[%s5808_s1 + $0x10] sm:$0xff] }
   0x6   :  { %479 = vmatpush.bf16.msra.mxu0 %v4040_v4  ;;  %v4046_v13 = vld [vmem:[%s5808_s1 + $0x60] sm:$0xff]  ;;  %v4045_v17 = vld [vmem:[%s5808_s1 + $0x58] sm:$0xff]  ;;  %v4044_v21 = vld [vmem:[%s5808_s1 + $0x50] sm:$0xff] }
   0x7   :  { %528 = vmatpush.bf16.msra.mxu1 %v4048_v5  ;;  %v4054_v14 = vld [vmem:[%s5808_s1 + $0xa0] sm:$0xff]  ;;  %v4053_v18 = vld [vmem:[%s5808_s1 + $0x98] sm:$0xff]  ;;  %v4052_v22 = vld [vmem:[%s5808_s1 + $0x90] sm:$0xff] }
   0x8   :  { %577 = vmatpush.bf16.msra.mxu2 %v4056_v6  ;;  %v4062_v15 = vld [vmem:[%s5808_s1 + $0xe0] sm:$0xff]  ;;  %v4061_v19 = vld [vmem:[%s5808_s1 + $0xd8] sm:$0xff]  ;;  %v4060_v23 = vld [vmem:[%s5808_s1 + $0xd0] sm:$0xff] }
   0x9   :  { %626 = vmatpush.bf16.msra.mxu3 %v4064_v7  ;;  %v4035_v24 = vld [vmem:[%s5808_s1 + $0x8] sm:$0xff]  ;;  %v4034_v28 = vld [vmem:[%s5808_s1] sm:$0xff]  ;;  %v4004_v33 = vld [vmem:[%s5809_s0 + $0xc] sm:$0xf0] }
   0xa   :  { %480 = vmatpush.bf16.msra.mxu0 %v4039_v8  ;;  %v4043_v25 = vld [vmem:[%s5808_s1 + $0x48] sm:$0xff]  ;;  %v4042_v29 = vld [vmem:[%s5808_s1 + $0x40] sm:$0xff]  ;;  %v3342_v35 = vld [vmem:[%s5809_s0 + $0x10] sm:$0xf0] }
   0xb   :  { %529 = vmatpush.bf16.msra.mxu1 %v4047_v9  ;;  %v4051_v26 = vld [vmem:[%s5808_s1 + $0x88] sm:$0xff]  ;;  %v4050_v30 = vld [vmem:[%s5808_s1 + $0x80] sm:$0xff]  ;;  %v4005_v37 = vld [vmem:[%s5809_s0 + $0x14] sm:$0xf0] }
   0xc   :  { %578 = vmatpush.bf16.msra.mxu2 %v4055_v10  ;;  %v4059_v27 = vld [vmem:[%s5808_s1 + $0xc8] sm:$0xff]  ;;  %v4058_v31 = vld [vmem:[%s5808_s1 + $0xc0] sm:$0xff]  ;;  %v3350_v39 = vld [vmem:[%s5809_s0 + $0x18] sm:$0xf0] }
   0xd   :  { %627 = vmatpush.bf16.msra.mxu3 %v4063_v11  ;;  %v3340_v32 = vld [vmem:[%s5809_s0] sm:$0xf]  ;;  %v4002_v34 = vld [vmem:[%s5809_s0 + $0x4] sm:$0xf]  ;;  %v3348_v36 = vld [vmem:[%s5809_s0 + $0x8] sm:$0xf] }
   0xe   :  { %481 = vmatpush.bf16.msra.mxu0 %v4038_v12  ;;  %v4003_v38 = vld [vmem:[%s5809_s0 + $0xc] sm:$0xf]  ;;  %v3341_v40 = vor.u32 %v4004_v33, %v3340_v32  ;;  %v3345_v41 = vor.u32 %v4002_v34, %v3342_v35  ;;  %v3349_v42 = vor.u32 %v4005_v37, %v3348_v36  ;;  %v3356_v44 = vld [vmem:[%s5809_s0 + $0x20] sm:$0xf]  ;;  %v4008_v45 = vld [vmem:[%s5809_s0 + $0x2c] sm:$0xf0] }
   0xf   :  { %530 = vmatpush.bf16.msra.mxu1 %v4046_v13  ;;  %v3353_v43 = vor.u32 %v4003_v38, %v3350_v39  ;;  %v4006_v46 = vld [vmem:[%s5809_s0 + $0x24] sm:$0xf]  ;;  %v3358_v47 = vld [vmem:[%s5809_s0 + $0x30] sm:$0xf0]  ;;  %v3364_v48 = vld [vmem:[%s5809_s0 + $0x28] sm:$0xf]  ;;  %v3357_v52 = vor.u32 %v4008_v45, %v3356_v44 }
  0x10   :  { %579 = vmatpush.bf16.msra.mxu2 %v4054_v14  ;;  %v4009_v49 = vld [vmem:[%s5809_s0 + $0x34] sm:$0xf0]  ;;  %v4007_v50 = vld [vmem:[%s5809_s0 + $0x2c] sm:$0xf]  ;;  %v3366_v51 = vld [vmem:[%s5809_s0 + $0x38] sm:$0xf0]  ;;  %v3361_v53 = vor.u32 %v4006_v46, %v3358_v47 }
  0x11   :  { %628 = vmatpush.bf16.msra.mxu3 %v4062_v15  ;;  %v3365_v54 = vor.u32 %v4009_v49, %v3364_v48  ;;  %v3369_v55 = vor.u32 %v4007_v50, %v3366_v51  ;;  %v3372_v56 = vld [vmem:[%s5809_s0 + $0x40] sm:$0xf]  ;;  %v4012_v57 = vld [vmem:[%s5809_s0 + $0x4c] sm:$0xf0]  ;;  %v4010_v58 = vld [vmem:[%s5809_s0 + $0x44] sm:$0xf] }
  0x12   :  { %482 = vmatpush.bf16.msra.mxu0 %v4037_v16  ;;  %v3374_v59 = vld [vmem:[%s5809_s0 + $0x50] sm:$0xf0]  ;;  %v3380_v60 = vld [vmem:[%s5809_s0 + $0x48] sm:$0xf]  ;;  %v4013_v61 = vld [vmem:[%s5809_s0 + $0x54] sm:$0xf0]  ;;  %v3373_v0 = vor.u32 %v4012_v57, %v3372_v56 }
  0x13   :  { %531 = vmatpush.bf16.msra.mxu1 %v4045_v17  ;;  %v4011_v62 = vld [vmem:[%s5809_s0 + $0x4c] sm:$0xf]  ;;  %v3382_v63 = vld [vmem:[%s5809_s0 + $0x58] sm:$0xf0]  ;;  %v3377_v1 = vor.u32 %v4010_v58, %v3374_v59  ;;  %v3381_v2 = vor.u32 %v4013_v61, %v3380_v60  ;;  %v3388_v4 = vld [vmem:[%s5809_s0 + $0x60] sm:$0xf] }
  0x14   :  { %580 = vmatpush.bf16.msra.mxu2 %v4053_v18  ;;  %v3385_v3 = vor.u32 %v4011_v62, %v3382_v63  ;;  %v4016_v5 = vld [vmem:[%s5809_s0 + $0x6c] sm:$0xf0]  ;;  %v4014_v6 = vld [vmem:[%s5809_s0 + $0x64] sm:$0xf]  ;;  %v3390_v7 = vld [vmem:[%s5809_s0 + $0x70] sm:$0xf0] }
  0x15   :  { %629 = vmatpush.bf16.msra.mxu3 %v4061_v19  ;;  %v3396_v8 = vld [vmem:[%s5809_s0 + $0x68] sm:$0xf]  ;;  %v4017_v9 = vld [vmem:[%s5809_s0 + $0x74] sm:$0xf0]  ;;  %v4015_v10 = vld [vmem:[%s5809_s0 + $0x6c] sm:$0xf]  ;;  %v3389_v12 = vor.u32 %v4016_v5, %v3388_v4  ;;  %v3393_v13 = vor.u32 %v4014_v6, %v3390_v7 }
  0x16   :  { %483 = vmatpush.bf16.msra.mxu0 %v4036_v20  ;;  %v3398_v11 = vld [vmem:[%s5809_s0 + $0x78] sm:$0xf0]  ;;  %v3397_v14 = vor.u32 %v4017_v9, %v3396_v8  ;;  %v3404_v16 = vld [vmem:[%s5809_s0 + $0x80] sm:$0xf]  ;;  %v4020_v17 = vld [vmem:[%s5809_s0 + $0x8c] sm:$0xf0] }
  0x17   :  { %532 = vmatpush.bf16.msra.mxu1 %v4044_v21  ;;  %v3401_v15 = vor.u32 %v4015_v10, %v3398_v11  ;;  %v4018_v18 = vld [vmem:[%s5809_s0 + $0x84] sm:$0xf]  ;;  %v3406_v19 = vld [vmem:[%s5809_s0 + $0x90] sm:$0xf0]  ;;  %v3412_v20 = vld [vmem:[%s5809_s0 + $0x88] sm:$0xf] }
  0x18   :  { %581 = vmatpush.bf16.msra.mxu2 %v4052_v22  ;;  %v4021_v21 = vld [vmem:[%s5809_s0 + $0x94] sm:$0xf0]  ;;  %v4019_v22 = vld [vmem:[%s5809_s0 + $0x8c] sm:$0xf]  ;;  %v3428_v32 = vld [vmem:[%s5809_s0 + $0xa8] sm:$0xf] }
  0x19   :  { %630 = vmatpush.bf16.msra.mxu3 %v4060_v23  ;;  %v3414_v23 = vld [vmem:[%s5809_s0 + $0x98] sm:$0xf0]  ;;  %v4025_v33 = vld [vmem:[%s5809_s0 + $0xb4] sm:$0xf0]  ;;  %v4023_v34 = vld [vmem:[%s5809_s0 + $0xac] sm:$0xf] }
  0x1a   :  { %484 = vmatpush.bf16.msra.mxu0 %v4035_v24  ;;  %v3405_v24 = vor.u32 %v4020_v17, %v3404_v16  ;;  %v3430_v35 = vld [vmem:[%s5809_s0 + $0xb8] sm:$0xf0]  ;;  %v3429_v38 = vor.u32 %v4025_v33, %v3428_v32  ;;  %v3444_v44 = vld [vmem:[%s5809_s0 + $0xc8] sm:$0xf]  ;;  %v4029_v45 = vld [vmem:[%s5809_s0 + $0xd4] sm:$0xf0] }
  0x1b   :  { %533 = vmatpush.bf16.msra.mxu1 %v4043_v25  ;;  %v3409_v25 = vor.u32 %v4018_v18, %v3406_v19  ;;  %v3433_v39 = vor.u32 %v4023_v34, %v3430_v35  ;;  %v4027_v46 = vld [vmem:[%s5809_s0 + $0xcc] sm:$0xf]  ;;  %v3446_v47 = vld [vmem:[%s5809_s0 + $0xd8] sm:$0xf0]  ;;  %v3445_v50 = vor.u32 %v4029_v45, %v3444_v44  ;;  %v3460_v56 = vld [vmem:[%s5809_s0 + $0xe8] sm:$0xf] }
  0x1c   :  { %582 = vmatpush.bf16.msra.mxu2 %v4051_v26  ;;  %v3413_v26 = vor.u32 %v4021_v21, %v3412_v20  ;;  %v3449_v51 = vor.u32 %v4027_v46, %v3446_v47  ;;  %v4033_v57 = vld [vmem:[%s5809_s0 + $0xf4] sm:$0xf0]  ;;  %v4031_v58 = vld [vmem:[%s5809_s0 + $0xec] sm:$0xf]  ;;  %v3462_v59 = vld [vmem:[%s5809_s0 + $0xf8] sm:$0xf0] }
  0x1d   :  { %631 = vmatpush.bf16.msra.mxu3 %v4059_v27  ;;  %v3417_v27 = vor.u32 %v4019_v22, %v3414_v23  ;;  %v3461_v62 = vor.u32 %v4033_v57, %v3460_v56  ;;  %v3465_v63 = vor.u32 %v4031_v58, %v3462_v59  ;;  %v4069_v46 = vld [vmem:[%s5811_s4 + $0x18] sm:$0xff]  ;;  %vm4784_vm11 = vmand %vm899_vm1, %vm958_vm8 }
  0x1e   :  { %485 = vmatpush.bf16.msra.mxu0 %v4034_v28  ;;  %v3420_v28 = vld [vmem:[%s5809_s0 + $0xa0] sm:$0xf] }
  0x1f   :  { %534 = vmatpush.bf16.msra.mxu1 %v4042_v29  ;;  %v4024_v29 = vld [vmem:[%s5809_s0 + $0xac] sm:$0xf0] }
  0x20   :  { %583 = vmatpush.bf16.msra.mxu2 %v4050_v30  ;;  %v4022_v30 = vld [vmem:[%s5809_s0 + $0xa4] sm:$0xf]  ;;  %v3421_v36 = vor.u32 %v4024_v29, %v3420_v28 }
  0x21   :  { %632 = vmatpush.bf16.msra.mxu3 %v4058_v31  ;;  %486 = vmatmul.bf16.vlgmr.msra.gmra.mxu0 %v3341_v40  ;;  %v3422_v31 = vld [vmem:[%s5809_s0 + $0xb0] sm:$0xf0]  ;;  %v3436_v40 = vld [vmem:[%s5809_s0 + $0xc0] sm:$0xf] }
  0x22   :  { %535 = vmatmul.bf16.vlgmr.msra.gmra.mxu1 %v3345_v41  ;;  %v3425_v37 = vor.u32 %v4022_v30, %v3422_v31  ;;  %v4028_v41 = vld [vmem:[%s5809_s0 + $0xcc] sm:$0xf0] }
  0x23   :  { %584 = vmatmul.bf16.vlgmr.msra.gmra.mxu2 %v3349_v42  ;;  %v4026_v42 = vld [vmem:[%s5809_s0 + $0xc4] sm:$0xf]  ;;  %v3437_v48 = vor.u32 %v4028_v41, %v3436_v40  ;;  %v4077_v41 = vld [vmem:[%s5811_s4 + $0x58] sm:$0xff]  ;;  %1542 = vmatpush.bf16.msrb.mxu1 %v4069_v46 }
  0x24   :  { %633 = vmatmul.bf16.vlgmr.msra.gmra.mxu3 %v3353_v43  ;;  %v3438_v43 = vld [vmem:[%s5809_s0 + $0xd0] sm:$0xf0]  ;;  %1706 = vmatpush.bf16.msrb.mxu2 %v4077_v41 }
  0x25   :  { %v3441_v49 = vor.u32 %v4026_v42, %v3438_v43  ;;  %v4073_v42 = vld [vmem:[%s5811_s4 + $0x38] sm:$0xff] }
  0x26   :  { %v4081_v43 = vld [vmem:[%s5811_s4 + $0x78] sm:$0xff]  ;;  %1495 = vmatpush.bf16.msrb.mxu0 %v4073_v42 }
  0x27   :  { %1820 = vmatpush.bf16.msrb.mxu3 %v4081_v43 }
  0x31   :  { %491 = vmatmul.bf16.gmra.mxu0 %v3357_v52  ;;  %v3452_v52 = vld [vmem:[%s5809_s0 + $0xe0] sm:$0xf] }
  0x32   :  { %540 = vmatmul.bf16.gmra.mxu1 %v3361_v53  ;;  %v4032_v53 = vld [vmem:[%s5809_s0 + $0xec] sm:$0xf0] }
  0x33   :  { %589 = vmatmul.bf16.gmra.mxu2 %v3365_v54  ;;  %v4030_v54 = vld [vmem:[%s5809_s0 + $0xe4] sm:$0xf]  ;;  %v3453_v60 = vor.u32 %v4032_v53, %v3452_v52 }
  0x34   :  { %638 = vmatmul.bf16.gmra.mxu3 %v3369_v55  ;;  %v3454_v55 = vld [vmem:[%s5809_s0 + $0xf0] sm:$0xf0] }
  0x35   :  { %v3457_v61 = vor.u32 %v4030_v54, %v3454_v55 }
  0x41   :  { %496 = vmatmul.bf16.gmra.mxu0 %v3373_v0 }
  0x42   :  { %545 = vmatmul.bf16.gmra.mxu1 %v3377_v1 }
  0x43   :  { %594 = vmatmul.bf16.gmra.mxu2 %v3381_v2 }
  0x44   :  { %643 = vmatmul.bf16.gmra.mxu3 %v3385_v3 }
  0x51   :  { %501 = vmatmul.bf16.gmra.mxu0 %v3389_v12 }
  0x52   :  { %550 = vmatmul.bf16.gmra.mxu1 %v3393_v13 }
  0x53   :  { %599 = vmatmul.bf16.gmra.mxu2 %v3397_v14 }
  0x54   :  { %648 = vmatmul.bf16.gmra.mxu3 %v3401_v15 }
  0x61   :  { %506 = vmatmul.bf16.gmra.mxu0 %v3405_v24 }
  0x62   :  { %555 = vmatmul.bf16.gmra.mxu1 %v3409_v25 }
  0x63   :  { %604 = vmatmul.bf16.gmra.mxu2 %v3413_v26 }
  0x64   :  { %653 = vmatmul.bf16.gmra.mxu3 %v3417_v27 }
  0x71   :  { %511 = vmatmul.bf16.gmra.mxu0 %v3421_v36 }
  0x72   :  { %560 = vmatmul.bf16.gmra.mxu1 %v3425_v37 }
  0x73   :  { %609 = vmatmul.bf16.gmra.mxu2 %v3429_v38 }
  0x74   :  { %658 = vmatmul.bf16.gmra.mxu3 %v3433_v39 }
  0x81   :  { %516 = vmatmul.bf16.gmra.mxu0 %v3437_v48 }
  0x82   :  { %565 = vmatmul.bf16.gmra.mxu1 %v3441_v49 }
  0x83   :  { %614 = vmatmul.bf16.gmra.mxu2 %v3445_v50 }
  0x84   :  { %663 = vmatmul.bf16.gmra.mxu3 %v3449_v51 }
  0x91   :  { %521 = vmatmul.bf16.gmra.mxu0 %v3453_v60 }
  0x92   :  { %570 = vmatmul.bf16.gmra.mxu1 %v3457_v61 }
  0x93   :  { %619 = vmatmul.bf16.gmra.mxu2 %v3461_v62 }
  0x94   :  { %668 = vmatmul.bf16.gmra.mxu3 %v3465_v63 }
  0x9e   :  { %v487_v0 = vpop.f32.mrf.mxu0 }
  0x9f   :  { %v536_v1 = vpop.f32.mrf.mxu1 }
  0xa0   :  { %v537_v2 = vadd.f32 %v536_v1, %v487_v0  ;;  %v4076_v1 = vld [vmem:[%s5811_s4 + $0x50] sm:$0xff] }
  0xa1   :  { %1707 = vmatpush.bf16.msrb.mxu2 %v4076_v1 }
  0xa6   :  { %v585_v3 = vpop.f32.mrf.mxu2  ;;  %v489_v6 = vpop.f32.mrf.mxu0 }
  0xa7   :  { %v634_v4 = vpop.f32.mrf.mxu3  ;;  %v586_v5 = vadd.f32 %v585_v3, %v537_v2  ;;  %v538_v7 = vpop.f32.mrf.mxu1  ;;  %v4072_v2 = vld [vmem:[%s5811_s4 + $0x30] sm:$0xff] }
  0xa8   :  { %v539_v59 = vadd.f32 %v538_v7, %v489_v6  ;;  %v4080_v3 = vld [vmem:[%s5811_s4 + $0x70] sm:$0xff]  ;;  %1496 = vmatpush.bf16.msrb.mxu0 %v4072_v2 }
  0xa9   :  { %v4482_v8 = vadd.f32 %v634_v4, %v586_v5  ;;  %v4068_v7 = vld [vmem:[%s5811_s4 + $0x10] sm:$0xff]  ;;  %1821 = vmatpush.bf16.msrb.mxu3 %v4080_v3 }
  0xaa   :  { %1543 = vmatpush.bf16.msrb.mxu1 %v4068_v7 }
  0xae   :  { %v587_v9 = vpop.f32.mrf.mxu2  ;;  %v492_v11 = vpop.f32.mrf.mxu0 }
  0xaf   :  { %v636_v10 = vpop.f32.mrf.mxu3  ;;  %v541_v12 = vpop.f32.mrf.mxu1  ;;  %v588_v60 = vadd.f32 %v587_v9, %v539_v59 }
  0xb0   :  { %v542_v13 = vadd.f32 %v541_v12, %v492_v11  ;;  %v714_v11 = vmul.f32 %v4482_v8, %v4482_v8 }
  0xb1   :  { %v4520_v62 = vadd.f32 %v636_v10, %v588_v60 }
  0xb3   :  { %v715_v12 = vmul.f32 %v4520_v62, %v4520_v62 }
  0xb6   :  { %v590_v14 = vpop.f32.mrf.mxu2  ;;  %v494_v17 = vpop.f32.mrf.mxu0 }
  0xb7   :  { %v639_v15 = vpop.f32.mrf.mxu3  ;;  %v591_v16 = vadd.f32 %v590_v14, %v542_v13  ;;  %v543_v18 = vpop.f32.mrf.mxu1 }
  0xb8   :  { %v544_v61 = vadd.f32 %v543_v18, %v494_v17 }
  0xb9   :  { %v4484_v19 = vadd.f32 %v639_v15, %v591_v16  ;;  %v678_v15 = vsel %vm676_vm0, %v4520_v62, 0.0 }
  0xbb   :  { %v716_v16 = vmul.f32 %v4484_v19, %v4484_v19 }
  0xbe   :  { %v592_v20 = vpop.f32.mrf.mxu2  ;;  %v497_v22 = vpop.f32.mrf.mxu0 }
  0xbf   :  { %v4486_v21 = vpop.f32.mrf.mxu3  ;;  %v546_v23 = vpop.f32.mrf.mxu1  ;;  %v593_v4 = vadd.f32 %v592_v20, %v544_v61 }
  0xc0   :  { %v547_v24 = vadd.f32 %v546_v23, %v497_v22  ;;  %v677_v22 = vsel %vm676_vm0, %v4482_v8, 0.0  ;;  %v730_v23 = vsel %vm676_vm0, %v714_v11, 0.0 }
  0xc1   :  { %v4543_v13 = vadd.f32 %v4486_v21, %v593_v4 }
  0xc3   :  { %v682_v42 = vsel %vm676_vm0, %v4543_v13, 0.0 }
  0xc6   :  { %v595_v25 = vpop.f32.mrf.mxu2  ;;  %v499_v28 = vpop.f32.mrf.mxu0 }
  0xc7   :  { %v644_v26 = vpop.f32.mrf.mxu3  ;;  %v596_v27 = vadd.f32 %v595_v25, %v547_v24  ;;  %v548_v29 = vpop.f32.mrf.mxu1  ;;  %v731_v24 = vsel %vm676_vm0, %v715_v12, 0.0 }
  0xc8   :  { %v549_v10 = vadd.f32 %v548_v29, %v499_v28  ;;  %v680_v28 = vsel %vm676_vm0, %v4484_v19, 0.0  ;;  %v717_v29 = vmul.f32 %v4543_v13, %v4543_v13  ;;  %v732_v41 = vadd.f32 %v731_v24, %v730_v23 }
  0xc9   :  { %v4488_v30 = vadd.f32 %v644_v26, %v596_v27  ;;  %v679_v27 = vadd.f32 %v678_v15, %v677_v22 }
  0xca   :  { %v735_v60 = vsel %vm676_vm0, %v717_v29, 0.0 }
  0xcb   :  { %v684_v61 = vsel %vm676_vm0, %v4488_v30, 0.0 }
  0xce   :  { %v597_v31 = vpop.f32.mrf.mxu2  ;;  %v502_v33 = vpop.f32.mrf.mxu0 }
  0xcf   :  { %v4490_v32 = vpop.f32.mrf.mxu3  ;;  %v551_v34 = vpop.f32.mrf.mxu1  ;;  %v598_v14 = vadd.f32 %v597_v31, %v549_v10 }
  0xd0   :  { %v552_v9 = vadd.f32 %v551_v34, %v502_v33 }
  0xd1   :  { %v4558_v31 = vadd.f32 %v4490_v32, %v598_v14 }
  0xd6   :  { %v600_v35 = vpop.f32.mrf.mxu2  ;;  %v504_v37 = vpop.f32.mrf.mxu0 }
  0xd7   :  { %v4492_v36 = vpop.f32.mrf.mxu3  ;;  %v553_v38 = vpop.f32.mrf.mxu1  ;;  %v601_v17 = vadd.f32 %v600_v35, %v552_v9  ;;  %v733_v35 = vsel %vm676_vm0, %v716_v16, 0.0 }
  0xd8   :  { %v554_v18 = vadd.f32 %v553_v38, %v504_v37  ;;  %v718_v37 = vmul.f32 %v4488_v30, %v4488_v30  ;;  %v734_v59 = vadd.f32 %v733_v35, %v732_v41 }
  0xd9   :  { %v4564_v38 = vadd.f32 %v4492_v36, %v601_v17  ;;  %v719_v36 = vmul.f32 %v4558_v31, %v4558_v31 }
  0xda   :  { %v736_v2 = vadd.f32 %v735_v60, %v734_v59 }
  0xdb   :  { %v739_v11 = vsel %vm676_vm0, %v719_v36, 0.0 }
  0xde   :  { %v602_v39 = vpop.f32.mrf.mxu2  ;;  %v507_v44 = vpop.f32.mrf.mxu0 }
  0xdf   :  { %v4494_v40 = vpop.f32.mrf.mxu3  ;;  %v556_v45 = vpop.f32.mrf.mxu1  ;;  %v603_v25 = vadd.f32 %v602_v39, %v554_v18 }
  0xe0   :  { %v557_v20 = vadd.f32 %v556_v45, %v507_v44  ;;  %v681_v45 = vadd.f32 %v680_v28, %v679_v27 }
  0xe1   :  { %v4569_v32 = vadd.f32 %v4494_v40, %v603_v25  ;;  %v720_v40 = vmul.f32 %v4564_v38, %v4564_v38 }
  0xe3   :  { %v721_v4 = vmul.f32 %v4569_v32, %v4569_v32 }
  0xe6   :  { %v605_v47 = vpop.f32.mrf.mxu2  ;;  %v509_v49 = vpop.f32.mrf.mxu0 }
  0xe7   :  { %v4508_v48 = vpop.f32.mrf.mxu3  ;;  %v558_v50 = vpop.f32.mrf.mxu1  ;;  %v606_v43 = vadd.f32 %v605_v47, %v557_v20  ;;  %v686_v47 = vsel %vm676_vm0, %v4558_v31, 0.0 }
  0xe8   :  { %v559_v39 = vadd.f32 %v558_v50, %v509_v49  ;;  %v683_v49 = vadd.f32 %v682_v42, %v681_v45  ;;  %v737_v50 = vsel %vm676_vm0, %v718_v37, 0.0 }
  0xe9   :  { %v738_v12 = vadd.f32 %v737_v50, %v736_v2 }
  0xea   :  { %v685_v3 = vadd.f32 %v684_v61, %v683_v49 }
  0xeb   :  { %v740_v18 = vadd.f32 %v739_v11, %v738_v12 }
  0xee   :  { %v607_v51 = vpop.f32.mrf.mxu2  ;;  %v512_v53 = vpop.f32.mrf.mxu0 }
  0xef   :  { %v4510_v52 = vpop.f32.mrf.mxu3  ;;  %v561_v54 = vpop.f32.mrf.mxu1  ;;  %v608_v46 = vadd.f32 %v607_v51, %v559_v39  ;;  %v4582_v51 = vadd.f32 %v4508_v48, %v606_v43  ;;  %v688_v48 = vsel %vm676_vm0, %v4564_v38, 0.0 }
  0xf0   :  { %v562_v44 = vadd.f32 %v561_v54, %v512_v53 }
  0xf1   :  { %v4590_v7 = vadd.f32 %v4510_v52, %v608_v46  ;;  %v722_v52 = vmul.f32 %v4582_v51, %v4582_v51  ;;  %v692_v23 = vsel %vm676_vm0, %v4582_v51, 0.0 }
  0xf3   :  { %v723_v22 = vmul.f32 %v4590_v7, %v4590_v7  ;;  %v694_v29 = vsel %vm676_vm0, %v4590_v7, 0.0 }
  0xf5   :  { %v747_v39 = vsel %vm676_vm0, %v723_v22, 0.0 }
  0xf6   :  { %v4512_v55 = vpop.f32.mrf.mxu2  ;;  %v4516_v57 = vpop.f32.mrf.mxu0 }
  0xf7   :  { %v4514_v56 = vpop.f32.mrf.mxu3  ;;  %v4518_v58 = vpop.f32.mrf.mxu1  ;;  %v611_v53 = vadd.f32 %v4512_v55, %v562_v44 }
  0xf8   :  { %v564_v54 = vadd.f32 %v4518_v58, %v4516_v57  ;;  %v687_v57 = vadd.f32 %v686_v47, %v685_v3  ;;  %v741_v58 = vsel %vm676_vm0, %v720_v40, 0.0 }
  0xf9   :  { %v4602_v15 = vadd.f32 %v4514_v56, %v611_v53  ;;  %v742_v28 = vadd.f32 %v741_v58, %v740_v18 }
  0xfa   :  { %v689_v20 = vadd.f32 %v688_v48, %v687_v57 }
  0xfb   :  { %v696_v42 = vsel %vm676_vm0, %v4602_v15, 0.0 }
  0xfe   :  { %v4522_v63 = vpop.f32.mrf.mxu2  ;;  %v517_v5 = vpop.f32.mrf.mxu0 }
  0xff   :  { %v4524_v0 = vpop.f32.mrf.mxu3  ;;  %v566_v6 = vpop.f32.mrf.mxu1  ;;  %v613_v55 = vadd.f32 %v4522_v63, %v564_v54  ;;  %v743_v63 = vsel %vm676_vm0, %v721_v4, 0.0 }
 0x100   :  { %v567_v1 = vadd.f32 %v566_v6, %v517_v5  ;;  %v690_v5 = vsel %vm676_vm0, %v4569_v32, 0.0  ;;  %v744_v35 = vadd.f32 %v743_v63, %v742_v28 }
 0x101   :  { %v4610_v24 = vadd.f32 %v4524_v0, %v613_v55  ;;  %v691_v56 = vadd.f32 %v690_v5, %v689_v20 }
 0x103   :  { %v693_v37 = vadd.f32 %v692_v23, %v691_v56  ;;  %v725_v43 = vmul.f32 %v4610_v24, %v4610_v24  ;;  %v698_v60 = vsel %vm676_vm0, %v4610_v24, 0.0 }
 0x105   :  { %v695_v59 = vadd.f32 %v694_v29, %v693_v37  ;;  %v751_v53 = vsel %vm676_vm0, %v725_v43, 0.0 }
 0x106   :  { %v615_v21 = vpop.f32.mrf.mxu2  ;;  %v519_v33 = vpop.f32.mrf.mxu0 }
 0x107   :  { %v664_v26 = vpop.f32.mrf.mxu3  ;;  %v568_v34 = vpop.f32.mrf.mxu1  ;;  %v616_v16 = vadd.f32 %v615_v21, %v567_v1  ;;  %v745_v21 = vsel %vm676_vm0, %v722_v52, 0.0  ;;  %v697_v50 = vadd.f32 %v696_v42, %v695_v59 }
 0x108   :  { %v569_v17 = vadd.f32 %v568_v34, %v519_v33  ;;  %v724_v33 = vmul.f32 %v4602_v15, %v4602_v15  ;;  %v746_v46 = vadd.f32 %v745_v21, %v744_v35 }
 0x109   :  { %v4617_v34 = vadd.f32 %v664_v26, %v616_v16  ;;  %v699_v3 = vadd.f32 %v698_v60, %v697_v50 }
 0x10a   :  { %v749_v26 = vsel %vm676_vm0, %v724_v33, 0.0  ;;  %v748_v49 = vadd.f32 %v747_v39, %v746_v46 }
 0x10b   :  { %v726_v61 = vmul.f32 %v4617_v34, %v4617_v34  ;;  %v700_v54 = vsel %vm676_vm0, %v4617_v34, 0.0 }
 0x10c   :  { %v750_v2 = vadd.f32 %v749_v26, %v748_v49  ;;  %v701_v55 = vadd.f32 %v700_v54, %v699_v3  ;;  %v4079_v3 = vld [vmem:[%s5811_s4 + $0x68] sm:$0xff] }
 0x10d   :  { %v753_v4 = vsel %vm676_vm0, %v726_v61, 0.0  ;;  %v4148_v61 = vmov 0   ;;  %1822 = vmatpush.bf16.msrb.mxu3 %v4079_v3 }
 0x10e   :  { %v617_v9 = vpop.f32.mrf.mxu2  ;;  %v522_v6 = vpop.f32.mrf.mxu0  ;;  %v752_v48 = vadd.f32 %v751_v53, %v750_v2  ;;  %945 = vst.msk [vmem:[#allocation2 + $0xb4] sm:$0x7] %vm899_vm1, %v4148_v61  ;;  %v4071_v2 = vld [vmem:[%s5811_s4 + $0x28] sm:$0xff] }
 0x10f   :  { %v666_v10 = vpop.f32.mrf.mxu3  ;;  %v571_v14 = vpop.f32.mrf.mxu1  ;;  %v618_v25 = vadd.f32 %v617_v9, %v569_v17  ;;  %946 = vst.msk [vmem:[#allocation2 + $0xb8] sm:$0x7] %vm899_vm1, %v4148_v61  ;;  %1497 = vmatpush.bf16.msrb.mxu0 %v4071_v2 }
 0x110   :  { %v572_v27 = vadd.f32 %v571_v14, %v522_v6  ;;  %v754_v6 = vadd.f32 %v753_v4, %v752_v48  ;;  %901 = vst.msk [vmem:[#allocation2 + $0x4] sm:$0x7] %vm899_vm1, %v4148_v61  ;;  %v674_v4 = vld [vmem:[%s5812_s2] sm:$0x1] }
 0x111   :  { %v4624_v44 = vadd.f32 %v666_v10, %v618_v25  ;;  %902 = vst.msk [vmem:[#allocation2 + $0x8] sm:$0x7] %vm899_vm1, %v4148_v61  ;;  %v4070_v48 = vld [vmem:[%s5811_s4 + $0x20] sm:$0xff] }
 0x112   :  { %903 = vst.msk [vmem:[#allocation2 + $0xc] sm:$0x7] %vm899_vm1, %v4148_v61 }
 0x113   :  { %v727_v1 = vmul.f32 %v4624_v44, %v4624_v44  ;;  %v702_v9 = vsel %vm676_vm0, %v4624_v44, 0.0  ;;  %904 = vst.msk [vmem:[#allocation2 + $0x10] sm:$0x7] %vm899_vm1, %v4148_v61  ;;  %1498 = vmatpush.bf16.msrb.mxu0 %v4070_v48 }
 0x114   :  { %v703_v14 = vadd.f32 %v702_v9, %v701_v55  ;;  %905 = vst.msk [vmem:[#allocation2 + $0x14] sm:$0x7] %vm899_vm1, %v4148_v61 }
 0x115   :  { %v755_v57 = vsel %vm676_vm0, %v727_v1, 0.0  ;;  %907 = vst.msk [vmem:[#allocation2 + $0x1c] sm:$0x7] %vm899_vm1, %v4148_v61  ;;  %v4075_v1 = vld [vmem:[%s5811_s4 + $0x48] sm:$0xff] }
 0x116   :  { %v620_v0 = vpop.f32.mrf.mxu2  ;;  %v524_v47 = vpop.f32.mrf.mxu0  ;;  %v756_v18 = vadd.f32 %v755_v57, %v754_v6  ;;  %908 = vst.msk [vmem:[#allocation2 + $0x20] sm:$0x7] %vm899_vm1, %v4148_v61  ;;  %1708 = vmatpush.bf16.msrb.mxu2 %v4075_v1  ;;  %v4066_v57 = vld [vmem:[%s5811_s4] sm:$0xff]  ;;  %v1284_v48 = vld [vmem:[#allocation2 + $0xb8] sm:$0x7] }
 0x117   :  { %v669_v41 = vpop.f32.mrf.mxu3  ;;  %v621_v45 = vadd.f32 %v620_v0, %v572_v27  ;;  %v573_v40 = vpop.f32.mrf.mxu1  ;;  %909 = vst.msk [vmem:[#allocation2 + $0x24] sm:$0x7] %vm899_vm1, %v4148_v61 }
 0x118   :  { %v574_v11 = vadd.f32 %v573_v40, %v524_v47  ;;  %910 = vst.msk [vmem:[#allocation2 + $0x28] sm:$0x7] %vm899_vm1, %v4148_v61 }
 0x119   :  { %v4631_v36 = vadd.f32 %v669_v41, %v621_v45  ;;  %911 = vst.msk [vmem:[#allocation2 + $0x2c] sm:$0x7] %vm899_vm1, %v4148_v61 }
 0x11a   :  { %913 = vst.msk [vmem:[#allocation2 + $0x34] sm:$0x7] %vm899_vm1, %v4148_v61 }
 0x11b   :  { %v728_v10 = vmul.f32 %v4631_v36, %v4631_v36  ;;  %v704_v58 = vsel %vm676_vm0, %v4631_v36, 0.0  ;;  %914 = vst.msk [vmem:[#allocation2 + $0x38] sm:$0x7] %vm899_vm1, %v4148_v61 }
 0x11c   :  { %v705_v20 = vadd.f32 %v704_v58, %v703_v14  ;;  %915 = vst.msk [vmem:[#allocation2 + $0x3c] sm:$0x7] %vm899_vm1, %v4148_v61 }
 0x11d   :  { %v757_v16 = vsel %vm676_vm0, %v728_v10, 0.0  ;;  %916 = vst.msk [vmem:[#allocation2 + $0x40] sm:$0x7] %vm899_vm1, %v4148_v61  ;;  %v4067_v10 = vld [vmem:[%s5811_s4 + $0x8] sm:$0xff] }
 0x11e   :  { %v622_v12 = vpop.f32.mrf.mxu2  ;;  %v758_v23 = vadd.f32 %v757_v16, %v756_v18  ;;  %917 = vst.msk [vmem:[#allocation2 + $0x44] sm:$0x7] %vm899_vm1, %v4148_v61  ;;  %1544 = vmatpush.bf16.msrb.mxu1 %v4067_v10 }
 0x11f   :  { %v623_v5 = vadd.f32 %v622_v12, %v574_v11  ;;  %v671_v52 = vpop.f32.mrf.mxu3  ;;  %v4074_v11 = vld [vmem:[%s5811_s4 + $0x40] sm:$0xff]  ;;  %919 = vst.msk [vmem:[#allocation2 + $0x4c] sm:$0x7] %vm899_vm1, %v4148_v61 }
 0x120   :  { %v4078_v12 = vld [vmem:[%s5811_s4 + $0x60] sm:$0xff]  ;;  %920 = vst.msk [vmem:[#allocation2 + $0x50] sm:$0x7] %vm899_vm1, %v4148_v61  ;;  %1709 = vmatpush.bf16.msrb.mxu2 %v4074_v11 }
 0x121   :  { %v4647_v17 = vadd.f32 %v671_v52, %v623_v5  ;;  %v4732_v52 = vld [vmem:[%s5810_s3] ss:$0 sm:$0xff]  ;;  %921 = vst.msk [vmem:[#allocation2 + $0x54] sm:$0x7] %vm899_vm1, %v4148_v61  ;;  %1823 = vmatpush.bf16.msrb.mxu3 %v4078_v12 }
 0x122   :  { %922 = vst.msk [vmem:[#allocation2 + $0x58] sm:$0x7] %vm899_vm1, %v4148_v61  ;;  %1545 = vmatpush.bf16.msrb.mxu1 %v4066_v57 }
 0x123   :  { %v706_v63 = vsel %vm676_vm0, %v4647_v17, 0.0  ;;  %v729_v22 = vmul.f32 %v4647_v17, %v4647_v17  ;;  %923 = vst.msk [vmem:[#allocation2 + $0x5c] sm:$0x7] %vm899_vm1, %v4148_v61 }
 0x124   :  { %v707_v25 = vadd.f32 %v706_v63, %v705_v20  ;;  %924 = vst.msk [vmem:[#allocation2 + $0x60] sm:$0x7] %vm899_vm1, %v4148_v61 }
 0x125   :  { %v759_v27 = vsel %vm676_vm0, %v729_v22, 0.0  ;;  %925 = vst.msk [vmem:[#allocation2 + $0x64] sm:$0x7] %vm899_vm1, %v4148_v61 }
 0x126   :  { %v708_v28 = vrot.slane %v707_v25, 4  ;;  %v760_v56 = vadd.f32 %v759_v27, %v758_v23  ;;  %926 = vst.msk [vmem:[#allocation2 + $0x68] sm:$0x7] %vm899_vm1, %v4148_v61 }
 0x127   :  { %927 = vst.msk [vmem:[#allocation2 + $0x6c] sm:$0x7] %vm899_vm1, %v4148_v61 }
 0x128   :  { %v709_v21 = vadd.f32 %v708_v28, %v707_v25  ;;  %v761_v29 = vrot.slane %v760_v56, 4  ;;  %928 = vst.msk [vmem:[#allocation2 + $0x70] sm:$0x7] %vm899_vm1, %v4148_v61 }
 0x129   :  { %930 = vst.msk [vmem:[#allocation2 + $0x78] sm:$0x7] %vm899_vm1, %v4148_v61 }
 0x12a   :  { %v710_v33 = vrot.slane %v709_v21, 2  ;;  %v762_v35 = vadd.f32 %v761_v29, %v760_v56  ;;  %931 = vst.msk [vmem:[#allocation2 + $0x7c] sm:$0x7] %vm899_vm1, %v4148_v61 }
 0x12b   :  { %932 = vst.msk [vmem:[#allocation2 + $0x80] sm:$0x7] %vm899_vm1, %v4148_v61 }
 0x12c   :  { %v711_v37 = vadd.f32 %v710_v33, %v709_v21  ;;  %v763_v39 = vrot.slane %v762_v35, 2  ;;  %933 = vst.msk [vmem:[#allocation2 + $0x84] sm:$0x7] %vm899_vm1, %v4148_v61 }
 0x12d   :  { %934 = vst.msk [vmem:[#allocation2 + $0x88] sm:$0x7] %vm899_vm1, %v4148_v61 }
 0x12e   :  { %v712_v0 = vrot.slane %v711_v37, 1  ;;  %v764_v41 = vadd.f32 %v763_v39, %v762_v35  ;;  %936 = vst.msk [vmem:[#allocation2 + $0x90] sm:$0x7] %vm899_vm1, %v4148_v61 }
 0x12f   :  { %937 = vst.msk [vmem:[#allocation2 + $0x94] sm:$0x7] %vm899_vm1, %v4148_v61 }
 0x130   :  { %v713_v42 = vadd.f32 %v712_v0, %v711_v37  ;;  %v765_v43 = vrot.slane %v764_v41, 1  ;;  %938 = vst.msk [vmem:[#allocation2 + $0x98] sm:$0x7] %vm899_vm1, %v4148_v61 }
 0x131   :  { %939 = vst.msk [vmem:[#allocation2 + $0x9c] sm:$0x7] %vm899_vm1, %v4148_v61 }
 0x132   :  { %v766_v45 = vadd.f32 %v765_v43, %v764_v41  ;;  %v4654_v46 = vmul.f32 0.0078125, %v713_v42  ;;  %940 = vst.msk [vmem:[#allocation2 + $0xa0] sm:$0x7] %vm899_vm1, %v4148_v61 }
 0x133   :  { %942 = vst.msk [vmem:[#allocation2 + $0xa8] sm:$0x7] %vm899_vm1, %v4148_v61 }
 0x134   :  { %v768_v59 = vmul.f32 0.0078125, %v766_v45  ;;  %v769_v26 = vmul.f32 %v4654_v46, %v4654_v46  ;;  %v797_v5 = vsub.f32 %v4647_v17, %v4654_v46  ;;  %v794_v6 = vsub.f32 %v4617_v34, %v4654_v46  ;;  %943 = vst.msk [vmem:[#allocation2 + $0xac] sm:$0x7] %vm899_vm1, %v4148_v61 }
 0x135   :  { %v795_v16 = vsub.f32 %v4624_v44, %v4654_v46  ;;  %v790_v17 = vsub.f32 %v4582_v51, %v4654_v46  ;;  %v791_v34 = vsub.f32 %v4590_v7, %v4654_v46  ;;  %v796_v37 = vsub.f32 %v4631_v36, %v4654_v46  ;;  %944 = vst.msk [vmem:[#allocation2 + $0xb0] sm:$0x7] %vm899_vm1, %v4148_v61 }
 0x136   :  { %v770_v60 = vsub.f32 %v768_v59, %v769_v26  ;;  %v1275_v26 = vld [vmem:[#allocation2 + $0xb4] sm:$0x7] }
 0x138   :  { %v771_v49 = vadd.f32 1e-05, %v770_v60 }
 0x13a   :  { %4137 = vrsqrt.f32 %v771_v49  ;;  %vm778_vm3 = vweird.f32 %v771_v49 }
 0x140   :  { %v4138_v50 = vpop.eup %4137 }
 0x141   :  { %v773_v47 = vmul.f32 %v4138_v50, %v771_v49  ;;  %vm779_vm2 = vweird.f32 %v4138_v50 }
 0x142   :  { %vm780_vm4 = vmor %vm778_vm3, %vm779_vm2 }
 0x143   :  { %v774_v40 = vmul.f32 %v4138_v50, %v773_v47 }
 0x145   :  { %v775_v53 = vmul.f32 0.5, %v774_v40 }
 0x147   :  { %v776_v54 = vsub.f32 1.5, %v775_v53 }
 0x149   :  { %v777_v9 = vmul.f32 %v4138_v50, %v776_v54  ;;  %v4121_v54 = vld [vmem:[%s5811_s4 + $0x1b8] sm:$0xff] }
 0x14b   :  { %v781_v55 = vsel %vm780_vm4, %v4138_v50, %v777_v9 }
 0x14c   :  { %v798_v58 = vmul.f32 %v781_v55, %v674_v4 }
 0x14e   :  { %v4727_v14 = vperm.slane %v798_v58, 0 }
 0x150   :  { %v815_v18 = vmul.f32 %v4727_v14, %v797_v5  ;;  %v812_v20 = vmul.f32 %v4727_v14, %v794_v6  ;;  %v813_v44 = vmul.f32 %v4727_v14, %v795_v16  ;;  %v808_v63 = vmul.f32 %v4727_v14, %v790_v17 }
 0x151   :  { %v809_v51 = vmul.f32 %v4727_v14, %v791_v34  ;;  %v814_v49 = vmul.f32 %v4727_v14, %v796_v37  ;;  %v1725_v37 = vld [vmem:[#allocation2 + $0x60] sm:$0x6] }
 0x152   :  { %v834_v22 = vadd.f32 %v4732_v52, %v815_v18  ;;  %v831_v7 = vadd.f32 %v4732_v52, %v812_v20  ;;  %v832_v23 = vadd.f32 %v4732_v52, %v813_v44  ;;  %v827_v27 = vadd.f32 %v4732_v52, %v808_v63 }
 0x153   :  { %v828_v56 = vadd.f32 %v4732_v52, %v809_v51  ;;  %v4798_v6 = vadd.f32 %v4732_v52, %v814_v49 }
 0x154   :  { %vm850_vm5 = vcmp.gt.f32.partialorder %v834_v22, 0.0  ;;  %v866_v25 = vmul.f32 0.2, %v834_v22  ;;  %vm847_vm6 = vcmp.gt.f32.partialorder %v831_v7, 0.0  ;;  %vm848_vm7 = vcmp.gt.f32.partialorder %v832_v23, 0.0 }
 0x155   :  { %v863_v28 = vmul.f32 0.2, %v831_v7  ;;  %v864_v29 = vmul.f32 0.2, %v832_v23  ;;  %vm843_vm9 = vcmp.gt.f32.partialorder %v827_v27, 0.0  ;;  %vm844_vm10 = vcmp.gt.f32.partialorder %v828_v56, 0.0 }
 0x156   :  { %v882_v21 = vsel %vm850_vm5, %v834_v22, %v866_v25  ;;  %v859_v41 = vmul.f32 0.2, %v827_v27  ;;  %v860_v59 = vmul.f32 0.2, %v828_v56  ;;  %v1345_v22 = vld [vmem:[#allocation2 + $0x60] sm:$0x7] }
 0x157   :  { %v898_v33 = vpack.c.bf16 %v882_v21, %v882_v21  ;;  %v879_v35 = vsel %vm847_vm6, %v831_v7, %v863_v28  ;;  %v880_v39 = vsel %vm848_vm7, %v832_v23, %v864_v29  ;;  %v1355_v29 = vunpack.c.l.b16 %v1345_v22 }
 0x158   :  { %v895_v0 = vpack.c.bf16 %v879_v35, %v879_v35  ;;  %v4774_v45 = vpack.c.bf16 %v880_v39, %v880_v39  ;;  %v875_v53 = vsel %vm843_vm9, %v827_v27, %v859_v41  ;;  %v876_v11 = vsel %vm844_vm10, %v828_v56, %v860_v59  ;;  %v1212_v39 = vld [vmem:[#allocation2 + $0x94] sm:$0x7] }
 0x159   :  { %v1267_v42 = vshrl.u32 %v898_v33, 16  ;;  %v1270_v43 = vshll.u32 %v898_v33, 16  ;;  %v891_v12 = vpack.c.bf16 %v875_v53, %v875_v53  ;;  %v892_v5 = vpack.c.bf16 %v876_v11, %v876_v11  ;;  %v1128_v33 = vld [vmem:[#allocation2 + $0x64] sm:$0x7]  ;;  %v1233_v53 = vld [vmem:[#allocation2 + $0x9c] sm:$0x7] }
 0x15a   :  { %v1204_v36 = vshrl.u32 %v895_v0, 16  ;;  %v1207_v60 = vshll.u32 %v895_v0, 16  ;;  %v5818_v3 = vshrl.u32 %v4774_v45, 16  ;;  %v1228_v17 = vshll.u32 %v4774_v45, 16 }
 0x15b   :  { %v1269_v50 = vrot.slane %v1267_v42, 7  ;;  %v1278_v47 = vrot.slane %v1267_v42, 5  ;;  %v1279_v40 = vrot.slane %v1270_v43, 6  ;;  %v1120_v34 = vshrl.u32 %v891_v12, 16 }
 0x15c   :  { %v1215_v1 = vrot.slane %v1204_v36, 5  ;;  %v1216_v2 = vrot.slane %v1207_v60, 6  ;;  %v1206_v10 = vrot.slane %v1204_v36, 7  ;;  %v1227_v16 = vrot.slane %v5818_v3, 7 }
 0x15d   :  { %v1272_v4 = vor.u32 %v1270_v43, %v1269_v50  ;;  %v1280_v9 = vor.u32 %v1279_v40, %v1278_v47  ;;  %v1123_v18 = vshll.u32 %v891_v12, 16  ;;  %v1141_v63 = vshrl.u32 %v892_v5, 16  ;;  %v1557_v43 = vld [vmem:[#allocation2 + $0x90] sm:$0x7]  ;;  %v1137_v47 = vld [vmem:[#allocation2 + $0x68] sm:$0x7] }
 0x15e   :  { %v1217_v55 = vor.u32 %v1216_v2, %v1215_v1  ;;  %v1209_v44 = vor.u32 %v1207_v60, %v1206_v10  ;;  %v1144_v51 = vshll.u32 %v892_v5, 16  ;;  %v1122_v23 = vrot.slane %v1120_v34, 7  ;;  %v1149_v1 = vld [vmem:[#allocation2 + $0x6c] sm:$0x7]  ;;  %v4093_v12 = vld [vmem:[%s5811_s4 + $0xd8] sm:$0xff] }
 0x15f   :  { %v1276_v57 = vsel %vm4784_vm11, %v1272_v4, %v1275_v26  ;;  %v1281_v58 = vrot.slane %v1280_v9, 4  ;;  %v1131_v25 = vrot.slane %v1120_v34, 5  ;;  %v1132_v27 = vrot.slane %v1123_v18, 6  ;;  %v1221_v26 = vld [vmem:[#allocation2 + $0x98] sm:$0x7]  ;;  %2260 = vmatpush.bf16.msra.mxu2 %v4093_v12 }
 0x160   :  { %1277 = vst [vmem:[#allocation2 + $0xb4] sm:$0x7] %v1276_v57  ;;  %v1218_v7 = vrot.slane %v1217_v55, 4  ;;  %v1143_v28 = vrot.slane %v1141_v63, 7  ;;  %v4809_v56 = vrot.slane %v1141_v63, 5  ;;  %v4811_v21 = vrot.slane %v1144_v51, 6 }
 0x161   :  { %v1285_v20 = vsel %vm4784_vm11, %v1281_v58, %v1284_v48  ;;  %v1133_v35 = vor.u32 %v1132_v27, %v1131_v25  ;;  %v1230_v0 = vor.u32 %v1228_v17, %v1227_v16  ;;  %v1125_v41 = vor.u32 %v1123_v18, %v1122_v23  ;;  %v4085_v16 = vld [vmem:[%s5811_s4 + $0x98] sm:$0xff]  ;;  %v4092_v63 = vld [vmem:[%s5811_s4 + $0xd0] sm:$0xff] }
 0x162   :  { %1286 = vst [vmem:[#allocation2 + $0xb8] sm:$0x7] %v1285_v20  ;;  %v1154_v42 = vor.u32 %v4811_v21, %v4809_v56  ;;  %v1213_v59 = vsel %vm4784_vm11, %v1209_v44, %v1212_v39  ;;  %v4823_v60 = vpack.c.b16 %v1355_v29, %v1355_v29  ;;  %v1566_v49 = vunpack.c.l.b16 %v1557_v43  ;;  %v4097_v34 = vld [vmem:[%s5811_s4 + $0xf8] sm:$0xff]  ;;  %1924 = vmatpush.bf16.msra.mxu0 %v4085_v16 }
 0x163   :  { %v1134_v36 = vrot.slane %v1133_v35, 4  ;;  %v1222_v50 = vsel %vm4784_vm11, %v1218_v7, %v1221_v26  ;;  %v1146_v40 = vor.u32 %v1144_v51, %v1143_v28  ;;  %vm849_vm12 = vcmp.gt.f32.partialorder %v4798_v6, 0.0  ;;  %1214 = vst [vmem:[#allocation2 + $0x94] sm:$0x7] %v1213_v59  ;;  %2374 = vmatpush.bf16.msra.mxu3 %v4097_v34  ;;  %2261 = vmatpush.bf16.msra.mxu2 %v4092_v63 }
 0x164   :  { %v1734_v2 = vunpack.c.l.b16 %v1725_v37  ;;  %v4830_v4 = vpack.c.b16 %v1566_v49, %v1566_v49  ;;  %v792_v9 = vsub.f32 %v4602_v15, %v4654_v46  ;;  %v1234_v10 = vsel %vm4784_vm11, %v1230_v0, %v1233_v53  ;;  %1223 = vst [vmem:[#allocation2 + $0x98] sm:$0x7] %v1222_v50 }
 0x165   :  { %v1129_v61 = vsel %vm4784_vm11, %v1125_v41, %v1128_v33  ;;  %v865_v11 = vmul.f32 0.2, %v4798_v6  ;;  %v1138_v48 = vsel %vm4784_vm11, %v1134_v36, %v1137_v47  ;;  %v1360_v55 = vshll.u32 %v4823_v60, 16  ;;  %1235 = vst [vmem:[#allocation2 + $0x9c] sm:$0x7] %v1234_v10 }
 0x166   :  { %v793_v15 = vsub.f32 %v4610_v24, %v4654_v46  ;;  %v810_v57 = vmul.f32 %v4727_v14, %v792_v9  ;;  %v1150_v58 = vsel %vm4784_vm11, %v1146_v40, %v1149_v1  ;;  %v1571_v5 = vshll.u32 %v4830_v4, 16  ;;  %v4089_v24 = vld [vmem:[%s5811_s4 + $0xb8] sm:$0xff]  ;;  %1130 = vst [vmem:[#allocation2 + $0x64] sm:$0x7] %v1129_v61  ;;  %v1288_v9 = vld [vmem:[#allocation2 + $0x90] sm:$0x3] }
 0x167   :  { %v881_v18 = vsel %vm849_vm12, %v4798_v6, %v865_v11  ;;  %v782_v20 = vsub.f32 %v4482_v8, %v4654_v46  ;;  %v4865_v44 = vpack.c.b16 %v1734_v2, %v1734_v2  ;;  %1139 = vst [vmem:[#allocation2 + $0x68] sm:$0x7] %v1138_v48  ;;  %v4084_v6 = vld [vmem:[%s5811_s4 + $0x90] sm:$0xff]  ;;  %v783_v22 = vsub.f32 %v4520_v62, %v4654_v46 }
 0x168   :  { %v811_v51 = vmul.f32 %v4727_v14, %v793_v15  ;;  %v4096_v8 = vld [vmem:[%s5811_s4 + $0xf0] sm:$0xff]  ;;  %1151 = vst [vmem:[#allocation2 + $0x6c] sm:$0x7] %v1150_v58  ;;  %2092 = vmatpush.bf16.msra.mxu1 %v4089_v24  ;;  %v4880_v23 = vpack.c.bf16 %v881_v18, %v881_v18  ;;  %v4883_v25 = vadd.f32 %v4732_v52, %v810_v57  ;;  %v1358_v27 = vshrl.u32 %v4823_v60, 16 }
 0x169   :  { %v800_v7 = vmul.f32 %v4727_v14, %v782_v20  ;;  %v1362_v28 = vrot.slane %v1360_v55, 1  ;;  %v1569_v56 = vshrl.u32 %v4830_v4, 16  ;;  %v1573_v21 = vrot.slane %v1571_v5, 1  ;;  %1925 = vmatpush.bf16.msra.mxu0 %v4084_v6  ;;  %2375 = vmatpush.bf16.msra.mxu3 %v4096_v8 }
 0x16a   :  { %v4889_v62 = vrot.slane %v1228_v17, 6  ;;  %v1289_v29 = vld [vmem:[#allocation2 + $0x94] sm:$0x3]  ;;  %v4891_v33 = vrot.slane %v1154_v42, 4  ;;  %v1736_v35 = vrot.slane %v4865_v44, 1  ;;  %v4895_v37 = vadd.f32 %v4732_v52, %v811_v51 }
 0x16b   :  { %v1290_v39 = vld [vmem:[#allocation2 + $0x98] sm:$0x3]  ;;  %v1298_v0 = vunpack.c.l.b16 %v1289_v29  ;;  %v1558_v41 = vld [vmem:[#allocation2 + $0x94] sm:$0x7]  ;;  %v4898_v43 = vmul.f32 %v4727_v14, %v783_v22  ;;  %v4901_v17 = vadd.f32 %v4732_v52, %v800_v7  ;;  %v786_v42 = vsub.f32 %v4488_v30, %v4654_v46 }
 0x16c   :  { %v1291_v59 = vld [vmem:[#allocation2 + $0x9c] sm:$0x3]  ;;  %v1302_v26 = vunpack.c.l.b16 %v1290_v39  ;;  %v1246_v36 = vshrl.u32 %v4880_v23, 16  ;;  %v1249_v60 = vshll.u32 %v4880_v23, 16  ;;  %v4908_v49 = vmul.f32 0.2, %v4883_v25 }
 0x16d   :  { %v1299_v50 = vpack.c.b16 %v1298_v0, %v1298_v0  ;;  %v1305_v47 = vunpack.c.l.b16 %v1291_v59  ;;  %v1726_v40 = vld [vmem:[#allocation2 + $0x64] sm:$0x6]  ;;  %v4910_v1 = vor.u32 %v1362_v28, %v1358_v27  ;;  %v1559_v2 = vld [vmem:[#allocation2 + $0x98] sm:$0x7]  ;;  %v4912_v4 = vor.u32 %v1573_v21, %v1569_v56  ;;  %v1560_v20 = vld [vmem:[#allocation2 + $0x9c] sm:$0x7] }
 0x16e   :  { %v1346_v53 = vld [vmem:[#allocation2 + $0x64] sm:$0x7]  ;;  %v4914_v10 = vpack.c.b16 %v1302_v26, %v1302_v26  ;;  %v1727_v61 = vld [vmem:[#allocation2 + $0x68] sm:$0x6]  ;;  %v1738_v11 = vunpack.c.l.b16 %v1726_v40  ;;  %v1576_v12 = vunpack.c.l.b16 %v1558_v41  ;;  %v1587_v44 = vunpack.c.l.b16 %v1559_v2 }
 0x16f   :  { %v1347_v48 = vld [vmem:[#allocation2 + $0x68] sm:$0x7]  ;;  %v1365_v55 = vunpack.c.l.b16 %v1346_v53  ;;  %v1300_v15 = vrot.slane %v1299_v50, 6  ;;  %v4916_v57 = vpack.c.b16 %v1305_v47, %v1305_v47  ;;  %v1728_v58 = vld [vmem:[#allocation2 + $0x6c] sm:$0x6]  ;;  %v1742_v5 = vunpack.c.l.b16 %v1727_v61 }
 0x170   :  { %v1376_v16 = vunpack.c.l.b16 %v1347_v48  ;;  %v4918_v34 = vpack.c.b16 %v1738_v11, %v1738_v11  ;;  %v1746_v24 = vunpack.c.l.b16 %v1728_v58  ;;  %v4933_v28 = vpack.c.b16 %v1576_v12, %v1576_v12  ;;  %v1348_v29 = vld [vmem:[#allocation2 + $0x6c] sm:$0x7] }
 0x171   :  { %5878 = vst [vmem:[#allocation3_spill] sm:$0xff] %v4916_v57  ;;  %v4920_v18 = vpack.c.b16 %v1365_v55, %v1365_v55  ;;  %v1307_v63 = vrot.slane %v4916_v57, 2  ;;  %v1322_v51 = vsel %vm1319_vm13, %v1288_v9, %v1300_v15  ;;  %v4924_v6 = vpack.c.b16 %v1742_v5, %v1742_v5 }
 0x172   :  { %v4926_v8 = vpack.c.b16 %v1376_v16, %v1376_v16  ;;  %v1325_v22 = vsel %vm1323_vm14, %v1322_v51, %v4914_v10  ;;  %v1740_v7 = vrot.slane %v4918_v34, 7  ;;  %v4931_v27 = vpack.c.b16 %v1746_v24, %v1746_v24 }
 0x173   :  { %v1328_v56 = vsel %vm1326_vm15, %v1325_v22, %v1307_v63  ;;  %v1744_v21 = vrot.slane %v4924_v6, 5  ;;  %v5819_v39 = vshrl.u32 %v4920_v18, 16  ;;  %v1598_v0 = vunpack.c.l.b16 %v1560_v20 }
 0x174   :  { %vm845_vm1 = vcmp.gt.f32.partialorder %v4883_v25, 0.0  ;;  %3636 = vmatmul.msk.bf16.vlgmr.msrb.gmra.mxu1 %vm676_vm0, %v1328_v56  ;;  %v1748_v41 = vrot.slane %v4931_v27, 3  ;;  %v1767_v59 = vsel %vm1319_vm13, %v1736_v35, %v1740_v7  ;;  %v1371_v26 = vshll.u32 %v4920_v18, 16 }
 0x175   :  { %v4943_v50 = vpack.c.b16 %v1587_v44, %v1587_v44  ;;  %vm846_vm2 = vcmp.gt.f32.partialorder %v4895_v37, 0.0  ;;  %v1769_v47 = vsel %vm1323_vm14, %v1767_v59, %v1744_v21  ;;  %v1370_v40 = vrot.slane %v5819_v39, 6  ;;  %v1296_v39 = vld [vmem:[#allocation2 + $0xb4] sm:$0x3] }
 0x176   :  { %v5837_v53 = vshrl.u32 %v4926_v8, 16  ;;  %v5834_v2 = vshll.u32 %v4926_v8, 16  ;;  %v1771_v9 = vsel %vm1326_vm15, %v1769_v47, %v1748_v41  ;;  %v1373_v35 = vrot.slane %v1371_v26, 7 }
 0x177   :  { %v1387_v61 = vunpack.c.l.b16 %v1348_v29  ;;  %v862_v11 = vmul.f32 0.2, %v4895_v37  ;;  %3688 = vmatmul.msk.bf16.vlgmr.msrb.gmra.mxu3 %vm676_vm0, %v1771_v9  ;;  %v1248_v12 = vrot.slane %v1246_v36, 7  ;;  %v1257_v15 = vrot.slane %v1246_v36, 5 }
 0x178   :  { %v1381_v48 = vrot.slane %v5837_v53, 4  ;;  %v1384_v55 = vrot.slane %v5834_v2, 5  ;;  %v1374_v58 = vor.u32 %v1373_v35, %v1370_v40  ;;  %v5817_v16 = vshrl.u32 %v4933_v28, 16 }
 0x179   :  { %v4960_v5 = vpack.c.b16 %v1387_v61, %v1387_v61  ;;  %v5830_v24 = vshll.u32 %v4933_v28, 16  ;;  %v5829_v44 = vshrl.u32 %v4943_v50, 16  ;;  %v5823_v63 = vshll.u32 %v4943_v50, 16 }
 0x17a   :  { %v1385_v20 = vor.u32 %v1384_v55, %v1381_v48  ;;  %v4966_v51 = vpack.c.b16 %v1598_v0, %v1598_v0  ;;  %v1442_v36 = vsel %vm1319_vm13, %v4910_v1, %v1374_v58  ;;  %v1581_v56 = vrot.slane %v5817_v16, 6  ;;  %v1254_v55 = vld [vmem:[#allocation2 + $0xac] sm:$0x7]  ;;  %v4088_v58 = vld [vmem:[%s5811_s4 + $0xb0] sm:$0xff] }
 0x17b   :  { %v5832_v22 = vshrl.u32 %v4960_v5, 16  ;;  %v5831_v7 = vshll.u32 %v4960_v5, 16  ;;  %v1584_v21 = vrot.slane %v5830_v24, 7  ;;  %v1592_v29 = vrot.slane %v5829_v44, 4  ;;  %2093 = vmatpush.bf16.msra.mxu1 %v4088_v58 }
 0x17c   :  { %v1595_v0 = vrot.slane %v5823_v63, 5  ;;  %v1258_v41 = vrot.slane %v1249_v60, 6  ;;  %v1444_v47 = vsel %vm1323_vm14, %v1442_v36, %v1385_v20  ;;  %v1251_v40 = vor.u32 %v1249_v60, %v1248_v12  ;;  %v1729_v60 = vld [vmem:[#allocation2 + $0x78] sm:$0x6] }
 0x17d   :  { %v1392_v59 = vrot.slane %v5832_v22, 2  ;;  %v1395_v1 = vrot.slane %v5831_v7, 3  ;;  %v1585_v9 = vor.u32 %v1584_v21, %v1581_v56  ;;  %v5821_v61 = vshrl.u32 %v4966_v51, 16 }
 0x17e   :  { %v1596_v35 = vor.u32 %v1595_v0, %v1592_v29  ;;  %v5820_v48 = vshll.u32 %v4966_v51, 16  ;;  %v877_v23 = vsel %vm845_vm1, %v4883_v25, %v4908_v49  ;;  %v5001_v12 = vadd.f32 %v4732_v52, %v4898_v43  ;;  %v1350_v25 = vld [vmem:[#allocation2 + $0x78] sm:$0x7]  ;;  %v1561_v49 = vld [vmem:[#allocation2 + $0xa8] sm:$0x7] }
 0x17f   :  { %v1396_v3 = vor.u32 %v1395_v1, %v1392_v59  ;;  %v1603_v20 = vrot.slane %v5821_v61, 2  ;;  %v1653_v56 = vsel %vm1319_vm13, %v4912_v4, %v1585_v9  ;;  %v878_v21 = vsel %vm846_vm2, %v4895_v37, %v862_v11  ;;  %v4091_v37 = vld [vmem:[%s5811_s4 + $0xc8] sm:$0xff] }
 0x180   :  { %v1606_v36 = vrot.slane %v5820_v48, 3  ;;  %v1655_v0 = vsel %vm1323_vm14, %v1653_v56, %v1596_v35  ;;  %v1255_v59 = vsel %vm4784_vm11, %v1251_v40, %v1254_v55  ;;  %v1259_v4 = vor.u32 %v1258_v41, %v1257_v15  ;;  %v4095_v11 = vld [vmem:[%s5811_s4 + $0xe8] sm:$0xff]  ;;  %2262 = vmatpush.bf16.msra.mxu2 %v4091_v37  ;;  %v4086_v37 = vld [vmem:[%s5811_s4 + $0xa0] sm:$0xff] }
 0x181   :  { %v1446_v43 = vsel %vm1326_vm15, %v1444_v47, %v1396_v3  ;;  %1256 = vst [vmem:[#allocation2 + $0xac] sm:$0x7] %v1255_v59  ;;  %v1316_v9 = vunpack.c.l.b16 %v1296_v39  ;;  %v893_v16 = vpack.c.bf16 %v877_v23, %v877_v23  ;;  %v4083_v3 = vld [vmem:[%s5811_s4 + $0x88] sm:$0xff]  ;;  %v1263_v47 = vld [vmem:[#allocation2 + $0xb0] sm:$0x7]  ;;  %v5027_v40 = vpack.c.bf16 %v878_v21, %v878_v21  ;;  %2376 = vmatpush.bf16.msra.mxu3 %v4095_v11 }
 0x182   :  { %3618 = vmatmul.msk.bf16.vlgmr.msrb.gmra.mxu0 %vm676_vm0, %v1446_v43  ;;  %v1607_v1 = vor.u32 %v1606_v36, %v1603_v20  ;;  %v1750_v35 = vunpack.c.l.b16 %v1729_v60  ;;  %v1398_v55 = vunpack.c.l.b16 %v1350_v25  ;;  %v1609_v15 = vunpack.c.l.b16 %v1561_v49  ;;  %v4087_v39 = vld [vmem:[%s5811_s4 + $0xa8] sm:$0xff]  ;;  %v4090_v36 = vld [vmem:[%s5811_s4 + $0xc0] sm:$0xff]  ;;  %v1170_v25 = vld [vmem:[#allocation2 + $0x7c] sm:$0x7] }
 0x183   :  { %v1260_v58 = vrot.slane %v1259_v4, 4  ;;  %v5033_v23 = vpack.c.b16 %v1316_v9, %v1316_v9  ;;  %v1162_v20 = vshrl.u32 %v893_v16, 16  ;;  %1926 = vmatpush.bf16.msra.mxu0 %v4083_v3  ;;  %v4082_v60 = vld [vmem:[%s5811_s4 + $0x80] sm:$0xff]  ;;  %v1165_v21 = vshll.u32 %v893_v16, 16  ;;  %v1564_v16 = vld [vmem:[#allocation2 + $0xb4] sm:$0x7]  ;;  %2094 = vmatpush.bf16.msra.mxu1 %v4087_v39 }
 0x184   :  { %v1657_v41 = vsel %vm1326_vm15, %v1655_v0, %v1607_v1  ;;  %v5822_v49 = vshrl.u32 %v5027_v40, 16  ;;  %v5044_v43 = vpack.c.b16 %v1750_v35, %v1750_v35  ;;  %v4094_v0 = vld [vmem:[%s5811_s4 + $0xe0] sm:$0xff]  ;;  %v5051_v59 = vrot.slane %v1371_v26, 1  ;;  %2263 = vmatpush.bf16.msra.mxu2 %v4090_v36 }
 0x185   :  { %5879 = vst [vmem:[#allocation4_spill] sm:$0xff] %v5033_v23  ;;  %3662 = vmatmul.msk.bf16.vlgmr.msrb.gmra.mxu2 %vm676_vm0, %v1657_v41  ;;  %v1264_v1 = vsel %vm4784_vm11, %v1260_v58, %v1263_v47  ;;  %v1164_v4 = vrot.slane %v1162_v20, 7  ;;  %v1173_v9 = vrot.slane %v1162_v20, 5  ;;  %v1318_v3 = vrot.slane %v5033_v23, 2  ;;  %v1191_v56 = vld [vmem:[#allocation2 + $0x84] sm:$0x7]  ;;  %2377 = vmatpush.bf16.msra.mxu3 %v4094_v0 }
 0x186   :  { %1265 = vst [vmem:[#allocation2 + $0xb0] sm:$0x7] %v1264_v1  ;;  %v1174_v11 = vrot.slane %v1165_v21, 6  ;;  %v1185_v35 = vrot.slane %v5822_v49, 7  ;;  %v5826_v26 = vshll.u32 %v5027_v40, 16  ;;  %v1752_v47 = vrot.slane %v5044_v43, 1 }
 0x187   :  { %v1167_v41 = vor.u32 %v1165_v21, %v1164_v4  ;;  %v1399_v58 = vpack.c.b16 %v1398_v55, %v1398_v55  ;;  %v1610_v20 = vpack.c.b16 %v1609_v15, %v1609_v15  ;;  %1927 = vmatpush.bf16.msra.mxu0 %v4082_v60  ;;  %v1641_v61 = vunpack.c.l.b16 %v1564_v16  ;;  %v1179_v4 = vld [vmem:[#allocation2 + $0x80] sm:$0x7]  ;;  %2095 = vmatpush.bf16.msra.mxu1 %v4086_v37 }
 0x188   :  { %v1294_v39 = vld [vmem:[#allocation2 + $0xac] sm:$0x3]  ;;  %v1175_v29 = vor.u32 %v1174_v11, %v1173_v9  ;;  %v1188_v1 = vor.u32 %v5826_v26, %v1185_v35  ;;  %vm835_vm3 = vcmp.gt.f32.partialorder %v4901_v17, 0.0  ;;  %vm836_vm4 = vcmp.gt.f32.partialorder %v5001_v12, 0.0 }
 0x189   :  { %v1562_v48 = vld [vmem:[#allocation2 + $0xac] sm:$0x7]  ;;  %v1309_v49 = vunpack.c.l.b16 %v1294_v39  ;;  %v1171_v21 = vsel %vm4784_vm11, %v1167_v41, %v1170_v25  ;;  %v1401_v63 = vshrl.u32 %v1399_v58, 16  ;;  %v1403_v55 = vshll.u32 %v1399_v58, 16  ;;  %v1293_v39 = vld [vmem:[#allocation2 + $0xa8] sm:$0x3] }
 0x18a   :  { %1172 = vst [vmem:[#allocation2 + $0x7c] sm:$0x7] %v1171_v21  ;;  %v1176_v15 = vrot.slane %v1175_v29, 4  ;;  %v1192_v36 = vsel %vm4784_vm11, %v1188_v1, %v1191_v56  ;;  %v1612_v60 = vshrl.u32 %v1610_v20, 16  ;;  %v1614_v9 = vshll.u32 %v1610_v20, 16 }
 0x18b   :  { %v1310_v11 = vpack.c.b16 %v1309_v49, %v1309_v49  ;;  %1193 = vst [vmem:[#allocation2 + $0x84] sm:$0x7] %v1192_v36  ;;  %v1405_v0 = vrot.slane %v1403_v55, 1  ;;  %v1619_v16 = vunpack.c.l.b16 %v1562_v48  ;;  %v5070_v35 = vpack.c.b16 %v1641_v61, %v1641_v61 }
 0x18c   :  { %v1180_v25 = vsel %vm4784_vm11, %v1176_v15, %v1179_v4  ;;  %v1616_v41 = vrot.slane %v1614_v9, 1  ;;  %v851_v29 = vmul.f32 0.2, %v4901_v17  ;;  %v852_v4 = vmul.f32 0.2, %v5001_v12 }
 0x18d   :  { %5880 = vst [vmem:[#allocation5_spill] sm:$0xff] %v5070_v35  ;;  %v1295_v37 = vld [vmem:[#allocation2 + $0xb0] sm:$0x3]  ;;  %v1311_v58 = vrot.slane %v1310_v11, 6  ;;  %v5076_v56 = vpack.c.b16 %v1619_v16, %v1619_v16  ;;  %v5825_v49 = vshrl.u32 %v5070_v35, 16  ;;  %v5081_v20 = vor.u32 %v1405_v0, %v1401_v63 }
 0x18e   :  { %1181 = vst [vmem:[#allocation2 + $0x80] sm:$0x7] %v1180_v25  ;;  %v1313_v48 = vunpack.c.l.b16 %v1295_v37  ;;  %v1563_v1 = vld [vmem:[#allocation2 + $0xb0] sm:$0x7]  ;;  %v5824_v21 = vshll.u32 %v5070_v35, 16  ;;  %v1617_v16 = vor.u32 %v1616_v41, %v1612_v60  ;;  %v867_v60 = vsel %vm835_vm3, %v4901_v17, %v851_v29 }
 0x18f   :  { %5881 = vst [vmem:[#allocation6_spill] sm:$0xff] %v5076_v56  ;;  %v1331_v55 = vsel %vm1319_vm13, %v1293_v39, %v1311_v58  ;;  %v5827_v15 = vshrl.u32 %v5076_v56, 16  ;;  %v5828_v36 = vshll.u32 %v5076_v56, 16  ;;  %v1630_v9 = vunpack.c.l.b16 %v1563_v1 }
 0x190   :  { %v5088_v11 = vpack.c.b16 %v1313_v48, %v1313_v48  ;;  %v5092_v25 = vrot.slane %v5825_v49, 2  ;;  %v5096_v63 = vrot.slane %v5824_v21, 3  ;;  %vm3311_vm2 = vcmask 1040384  }
 0x191   :  { %v1730_v0 = vld [vmem:[#allocation2 + $0x7c] sm:$0x6]  ;;  %v1624_v39 = vrot.slane %v5827_v15, 6  ;;  %v1627_v58 = vrot.slane %v5828_v36, 7  ;;  %v5102_v1 = vpack.c.b16 %v1630_v9, %v1630_v9  ;;  %v868_v15 = vsel %vm836_vm4, %v5001_v12, %v852_v4 }
 0x192   :  { %v1351_v37 = vld [vmem:[#allocation2 + $0x7c] sm:$0x7]  ;;  %v1333_v41 = vsel %vm1323_vm14, %v1331_v55, %v5088_v11  ;;  %v1732_v48 = vld [vmem:[#allocation2 + $0x84] sm:$0x6]  ;;  %v1754_v21 = vunpack.c.l.b16 %v1730_v0 }
 0x193   :  { %5882 = vst [vmem:[#allocation7_spill] sm:$0xff] %v5102_v1  ;;  %v1353_v49 = vld [vmem:[#allocation2 + $0x84] sm:$0x7]  ;;  %v1408_v26 = vunpack.c.l.b16 %v1351_v37  ;;  %v1335_v9 = vsel %vm1326_vm15, %v1333_v41, %v1318_v3  ;;  %v1762_v36 = vunpack.c.l.b16 %v1732_v48  ;;  %v1628_v24 = vor.u32 %v1627_v58, %v1624_v39 }
 0x194   :  { %v1430_v44 = vunpack.c.l.b16 %v1353_v49  ;;  %3637 = vmatmul.msk.bf16.gmra.mxu1 %vm676_vm0, %v1335_v9  ;;  %v5116_v29 = vpack.c.b16 %v1754_v21, %v1754_v21  ;;  %v5833_v37 = vshrl.u32 %v5102_v1, 16  ;;  %v5840_v7 = vshll.u32 %v5102_v1, 16 }
 0x195   :  { %v1731_v17 = vld [vmem:[#allocation2 + $0x80] sm:$0x6]  ;;  %v5118_v0 = vpack.c.b16 %v1408_v26, %v1408_v26  ;;  %v5122_v4 = vpack.c.b16 %v1762_v36, %v1762_v36 }
 0x196   :  { %v1352_v55 = vld [vmem:[#allocation2 + $0x80] sm:$0x7]  ;;  %v1758_v12 = vunpack.c.l.b16 %v1731_v17  ;;  %v5124_v3 = vpack.c.b16 %v1430_v44, %v1430_v44  ;;  %v1756_v49 = vrot.slane %v5116_v29, 7  ;;  %v1635_v26 = vrot.slane %v5833_v37, 4 }
 0x197   :  { %5883 = vst [vmem:[#allocation8_spill] sm:$0xff] %v5122_v4  ;;  %v1419_v22 = vunpack.c.l.b16 %v1352_v55  ;;  %v5835_v39 = vshrl.u32 %v5118_v0, 16  ;;  %v5836_v21 = vshll.u32 %v5118_v0, 16  ;;  %v1764_v41 = vrot.slane %v5122_v4, 3 }
 0x198   :  { %v5131_v58 = vpack.c.b16 %v1758_v12, %v1758_v12  ;;  %v5838_v36 = vshrl.u32 %v5124_v3, 16  ;;  %v1774_v44 = vsel %vm1319_vm13, %v1752_v47, %v1756_v49  ;;  %v5839_v55 = vshll.u32 %v5124_v3, 16 }
 0x199   :  { %v5134_v48 = vpack.c.b16 %v1419_v22, %v1419_v22  ;;  %v1413_v9 = vrot.slane %v5835_v39, 6  ;;  %v1416_v17 = vrot.slane %v5836_v21, 7  ;;  %v1638_v49 = vrot.slane %v5840_v7, 5 }
 0x19a   :  { %v1760_v12 = vrot.slane %v5131_v58, 5  ;;  %v1435_v2 = vrot.slane %v5838_v36, 2  ;;  %v1438_v47 = vrot.slane %v5839_v55, 3  ;;  %v1650_v39 = vor.u32 %v5096_v63, %v5092_v25 }
 0x19b   :  { %v5842_v37 = vshrl.u32 %v5134_v48, 16  ;;  %v5841_v22 = vshll.u32 %v5134_v48, 16  ;;  %v1417_v43 = vor.u32 %v1416_v17, %v1413_v9  ;;  %v1660_v36 = vsel %vm1319_vm13, %v1617_v16, %v1628_v24 }
 0x19c   :  { %v1776_v21 = vsel %vm1323_vm14, %v1774_v44, %v1760_v12  ;;  %v1439_v17 = vor.u32 %v1438_v47, %v1435_v2  ;;  %v1639_v7 = vor.u32 %v1638_v49, %v1635_v26  ;;  %v883_v63 = vpack.c.bf16 %v867_v60, %v867_v60  ;;  %v981_v47 = vld [vmem:[#allocation2 + $0xc] sm:$0x7] }
 0x19d   :  { %v1424_v53 = vrot.slane %v5842_v37, 4  ;;  %v1427_v61 = vrot.slane %v5841_v22, 5  ;;  %v1778_v9 = vsel %vm1326_vm15, %v1776_v21, %v1764_v41  ;;  %v1449_v55 = vsel %vm1319_vm13, %v5081_v20, %v1417_v43  ;;  %v960_v41 = vld [vmem:[#allocation2 + $0x4] sm:$0x7] }
 0x19e   :  { %3689 = vmatmul.msk.bf16.gmra.mxu3 %vm676_vm0, %v1778_v9  ;;  %v884_v44 = vpack.c.bf16 %v868_v15, %v868_v15  ;;  %v804_v12 = vmul.f32 %v4727_v14, %v786_v42  ;;  %v1662_v22 = vsel %vm1323_vm14, %v1660_v36, %v1639_v7  ;;  %v5884_v24 = vsub.f32 %v4558_v31, %v4654_v46  ;;  %v969_v9 = vld [vmem:[#allocation2 + $0x8] sm:$0x7] }
 0x19f   :  { %v1428_v25 = vor.u32 %v1427_v61, %v1424_v53  ;;  %v784_v20 = vsub.f32 %v4484_v19, %v4654_v46  ;;  %v785_v53 = vsub.f32 %v4543_v13, %v4654_v46  ;;  %v1664_v15 = vsel %vm1326_vm15, %v1662_v22, %v1650_v39 }
 0x1a0   :  { %v805_v2 = vmul.f32 %v4727_v14, %v5884_v24  ;;  %v949_v30 = vshrl.u32 %v883_v63, 16  ;;  %v952_v16 = vshll.u32 %v883_v63, 16  ;;  %3663 = vmatmul.msk.bf16.gmra.mxu2 %vm676_vm0, %v1664_v15  ;;  %v973_v7 = vshrl.u32 %v884_v44, 16 }
 0x1a1   :  { %v1451_v61 = vsel %vm1323_vm14, %v1449_v55, %v1428_v25  ;;  %v976_v31 = vshll.u32 %v884_v44, 16  ;;  %v823_v60 = vadd.f32 %v4732_v52, %v804_v12  ;;  %v802_v44 = vmul.f32 %v4727_v14, %v784_v20 }
 0x1a2   :  { %v1453_v42 = vsel %vm1326_vm15, %v1451_v61, %v1439_v17  ;;  %v951_v19 = vrot.slane %v949_v30, 7  ;;  %v963_v21 = vrot.slane %v949_v30, 5  ;;  %v964_v26 = vrot.slane %v952_v16, 6 }
 0x1a3   :  { %3619 = vmatmul.msk.bf16.gmra.mxu0 %vm676_vm0, %v1453_v42  ;;  %v824_v13 = vadd.f32 %v4732_v52, %v805_v2  ;;  %v975_v36 = vrot.slane %v973_v7, 7  ;;  %v984_v39 = vrot.slane %v973_v7, 5  ;;  %v985_v55 = vrot.slane %v976_v31, 6  ;;  %v990_v2 = vld [vmem:[#allocation2 + $0x10] sm:$0x7] }
 0x1a4   :  { %vm839_vm5 = vcmp.gt.f32.partialorder %v823_v60, 0.0  ;;  %v954_v22 = vor.u32 %v952_v16, %v951_v19  ;;  %v965_v43 = vor.u32 %v964_v26, %v963_v21  ;;  %v855_v49 = vmul.f32 0.2, %v823_v60 }
 0x1a5   :  { %vm840_vm6 = vcmp.gt.f32.partialorder %v824_v13, 0.0  ;;  %v978_v17 = vor.u32 %v976_v31, %v975_v36  ;;  %v986_v25 = vor.u32 %v985_v55, %v984_v39  ;;  %v856_v63 = vmul.f32 0.2, %v824_v13 }
 0x1a6   :  { %v961_v12 = vsel %vm4784_vm11, %v954_v22, %v960_v41  ;;  %v966_v24 = vrot.slane %v965_v43, 4  ;;  %v871_v61 = vsel %vm839_vm5, %v823_v60, %v855_v49  ;;  %v803_v15 = vmul.f32 %v4727_v14, %v785_v53 }
 0x1a7   :  { %962 = vst [vmem:[#allocation2 + $0x4] sm:$0x7] %v961_v12  ;;  %v982_v30 = vsel %vm4784_vm11, %v978_v17, %v981_v47  ;;  %v987_v16 = vrot.slane %v986_v25, 4  ;;  %v872_v42 = vsel %vm840_vm6, %v824_v13, %v856_v63  ;;  %v887_v7 = vpack.c.bf16 %v871_v61, %v871_v61  ;;  %v1065_v61 = vld [vmem:[#allocation2 + $0x3c] sm:$0x7] }
 0x1a8   :  { %v5885_v31 = vshrl.u32 %v4926_v8, 16  ;;  %v970_v20 = vsel %vm4784_vm11, %v966_v24, %v969_v9  ;;  %983 = vst [vmem:[#allocation2 + $0xc] sm:$0x7] %v982_v30  ;;  %v888_v21 = vpack.c.bf16 %v872_v42, %v872_v42  ;;  %v821_v60 = vadd.f32 %v4732_v52, %v802_v44  ;;  %v1044_v24 = vld [vmem:[#allocation2 + $0x34] sm:$0x7] }
 0x1a9   :  { %971 = vst [vmem:[#allocation2 + $0x8] sm:$0x7] %v970_v20  ;;  %v991_v53 = vsel %vm4784_vm11, %v987_v16, %v990_v2  ;;  %v1036_v26 = vshrl.u32 %v887_v7, 16  ;;  %v1039_v41 = vshll.u32 %v887_v7, 16  ;;  %v822_v13 = vadd.f32 %v4732_v52, %v803_v15 }
 0x1aa   :  { %v5194_v19 = vrot.slane %v5885_v31, 6  ;;  %v5886_v36 = vshll.u32 %v4926_v8, 16  ;;  %v5887_v55 = vshrl.u32 %v4960_v5, 16  ;;  %v5888_v43 = vshll.u32 %v4960_v5, 16  ;;  %992 = vst [vmem:[#allocation2 + $0x10] sm:$0x7] %v991_v53 }
 0x1ab   :  { %v1057_v49 = vshrl.u32 %v888_v21, 16  ;;  %v1038_v9 = vrot.slane %v1036_v26, 7  ;;  %v1047_v17 = vrot.slane %v1036_v26, 5  ;;  %v1048_v25 = vrot.slane %v1039_v41, 6 }
 0x1ac   :  { %v5204_v39 = vrot.slane %v5886_v36, 7  ;;  %v5208_v22 = vrot.slane %v5887_v55, 4  ;;  %v5212_v47 = vrot.slane %v5888_v43, 5  ;;  %v1060_v63 = vshll.u32 %v888_v21, 16 }
 0x1ad   :  { %v5889_v52 = vshll.u32 %v4933_v28, 16  ;;  %v5890_v8 = vshrl.u32 %v4943_v50, 16  ;;  %v1059_v2 = vrot.slane %v1057_v49, 7  ;;  %vm837_vm7 = vcmp.gt.f32.partialorder %v821_v60, 0.0 }
 0x1ae   :  { %v1041_v5 = vor.u32 %v1039_v41, %v1038_v9  ;;  %v5222_v15 = vrot.slane %v1057_v49, 5  ;;  %vm838_vm8 = vcmp.gt.f32.partialorder %v822_v13, 0.0  ;;  %v853_v30 = vmul.f32 0.2, %v821_v60  ;;  %v1943_v16 = vld [vmem:[#allocation2 + $0x4] sm:$0x7] }
 0x1af   :  { %v5216_v44 = vrot.slane %v5889_v52, 1  ;;  %v5220_v12 = vrot.slane %v5890_v8, 6  ;;  %v2279_v42 = vld [vmem:[#allocation2 + $0x4] sm:$0x6]  ;;  %v1049_v7 = vor.u32 %v1048_v25, %v1047_v17  ;;  %v1062_v31 = vor.u32 %v1060_v63, %v1059_v2  ;;  %v1945_v21 = vld [vmem:[#allocation2 + $0xc] sm:$0x7] }
 0x1b0   :  { %v854_v20 = vmul.f32 0.2, %v822_v13  ;;  %v1952_v53 = vunpack.c.l.b16 %v1943_v16  ;;  %v2281_v26 = vld [vmem:[#allocation2 + $0xc] sm:$0x6]  ;;  %v2288_v36 = vunpack.c.l.b16 %v2279_v42  ;;  %v1045_v55 = vsel %vm4784_vm11, %v1041_v5, %v1044_v24  ;;  %v1944_v41 = vld [vmem:[#allocation2 + $0x8] sm:$0x7] }
 0x1b1   :  { %v5226_v43 = vrot.slane %v1060_v63, 6  ;;  %v1973_v9 = vunpack.c.l.b16 %v1945_v21  ;;  %v2280_v49 = vld [vmem:[#allocation2 + $0x8] sm:$0x6]  ;;  %v2296_v52 = vunpack.c.l.b16 %v2281_v26  ;;  %1046 = vst [vmem:[#allocation2 + $0x34] sm:$0x7] %v1045_v55  ;;  %v1066_v8 = vsel %vm4784_vm11, %v1062_v31, %v1065_v61  ;;  %v4109_v5 = vld [vmem:[%s5811_s4 + $0x158] sm:$0xff] }
 0x1b2   :  { %v1946_v17 = vld [vmem:[#allocation2 + $0x10] sm:$0x7]  ;;  %v1953_v25 = vpack.c.b16 %v1952_v53, %v1952_v53  ;;  %v1962_v2 = vunpack.c.l.b16 %v1944_v41  ;;  %v2292_v16 = vunpack.c.l.b16 %v2280_v49  ;;  %1067 = vst [vmem:[#allocation2 + $0x3c] sm:$0x7] %v1066_v8  ;;  %v869_v42 = vsel %vm837_vm7, %v821_v60, %v853_v30  ;;  %v4101_v61 = vld [vmem:[%s5811_s4 + $0x118] sm:$0xff]  ;;  %2688 = vmatpush.bf16.msrb.mxu2 %v4109_v5 }
 0x1b3   :  { %v2282_v37 = vld [vmem:[#allocation2 + $0x10] sm:$0x6]  ;;  %v5231_v35 = vpack.c.b16 %v1973_v9, %v1973_v9  ;;  %v1984_v63 = vunpack.c.l.b16 %v1946_v17  ;;  %v1050_v24 = vrot.slane %v1049_v7, 4  ;;  %v4113_v31 = vld [vmem:[%s5811_s4 + $0x178] sm:$0xff]  ;;  %v870_v21 = vsel %vm838_vm8, %v822_v13, %v854_v20  ;;  %2460 = vmatpush.bf16.msrb.mxu0 %v4101_v61 }
 0x1b4   :  { %v1957_v53 = vshll.u32 %v1953_v25, 16  ;;  %v5243_v60 = vpack.c.b16 %v1962_v2, %v1962_v2  ;;  %v2289_v30 = vpack.c.b16 %v2288_v36, %v2288_v36  ;;  %v5245_v26 = vpack.c.b16 %v2296_v52, %v2296_v52  ;;  %v4105_v7 = vld [vmem:[%s5811_s4 + $0x138] sm:$0xff]  ;;  %v4108_v13 = vld [vmem:[%s5811_s4 + $0x150] sm:$0xff]  ;;  %2778 = vmatpush.bf16.msrb.mxu3 %v4113_v31 }
 0x1b5   :  { %v5846_v55 = vshrl.u32 %v5231_v35, 16  ;;  %v5847_v41 = vshll.u32 %v5231_v35, 16  ;;  %v5252_v9 = vpack.c.b16 %v1984_v63, %v1984_v63  ;;  %v2300_v49 = vunpack.c.l.b16 %v2282_v37  ;;  %v4100_v20 = vld [vmem:[%s5811_s4 + $0x110] sm:$0xff]  ;;  %2574 = vmatpush.bf16.msrb.mxu1 %v4105_v7  ;;  %v1053_v7 = vld [vmem:[#allocation2 + $0x38] sm:$0x7] }
 0x1b6   :  { %5891 = vst [vmem:[#allocation9_spill] sm:$0xff] %v5243_v60  ;;  %v1959_v36 = vrot.slane %v1957_v53, 1  ;;  %v5852_v52 = vshrl.u32 %v5243_v60, 16  ;;  %v5854_v8 = vshll.u32 %v5243_v60, 16  ;;  %v5262_v17 = vpack.c.b16 %v2292_v16, %v2292_v16  ;;  %v4112_v37 = vld [vmem:[%s5811_s4 + $0x170] sm:$0xff]  ;;  %2689 = vmatpush.bf16.msrb.mxu2 %v4108_v13 }
 0x1b7   :  { %v1978_v2 = vrot.slane %v5846_v55, 4  ;;  %v1981_v63 = vrot.slane %v5847_v41, 5  ;;  %v5857_v5 = vshrl.u32 %v5252_v9, 16  ;;  %v5858_v61 = vshll.u32 %v5252_v9, 16  ;;  %2461 = vmatpush.bf16.msrb.mxu0 %v4100_v20 }
 0x1b8   :  { %5892 = vst [vmem:[#allocation10_spill] sm:$0xff] %v5262_v17  ;;  %v1955_v53 = vshrl.u32 %v1953_v25, 16  ;;  %v1967_v16 = vrot.slane %v5852_v52, 6  ;;  %v1970_v31 = vrot.slane %v5854_v8, 7  ;;  %v1070_v23 = vor.u32 %v5226_v43, %v5222_v15  ;;  %2779 = vmatpush.bf16.msrb.mxu3 %v4112_v37  ;;  %v2111_v13 = vld [vmem:[#allocation2 + $0x34] sm:$0x7] }
 0x1b9   :  { %v1989_v55 = vrot.slane %v5857_v5, 2  ;;  %v1992_v41 = vrot.slane %v5858_v61, 3  ;;  %v885_v1 = vpack.c.bf16 %v869_v42, %v869_v42  ;;  %v5283_v25 = vpack.c.bf16 %v870_v21, %v870_v21  ;;  %v1074_v61 = vld [vmem:[#allocation2 + $0x40] sm:$0x7]  ;;  %v1839_v4 = vld [vmem:[#allocation2 + $0x34] sm:$0x3] }
 0x1ba   :  { %v1960_v56 = vor.u32 %v1959_v36, %v1955_v53  ;;  %v1971_v52 = vor.u32 %v1970_v31, %v1967_v16  ;;  %v2290_v57 = vrot.slane %v2289_v30, 1  ;;  %v2294_v8 = vrot.slane %v5262_v17, 7  ;;  %v2113_v36 = vld [vmem:[#allocation2 + $0x3c] sm:$0x7] }
 0x1bb   :  { %v1982_v60 = vor.u32 %v1981_v63, %v1978_v2  ;;  %v2298_v15 = vrot.slane %v5245_v26, 5  ;;  %v5287_v43 = vpack.c.b16 %v2300_v49, %v2300_v49  ;;  %v1054_v5 = vsel %vm4784_vm11, %v1050_v24, %v1053_v7  ;;  %v1841_v53 = vld [vmem:[#allocation2 + $0x3c] sm:$0x3] }
 0x1bc   :  { %v1993_v20 = vor.u32 %v1992_v41, %v1989_v55  ;;  %v2039_v42 = vsel %vm1319_vm13, %v1960_v56, %v1971_v52  ;;  %v2321_v21 = vsel %vm1319_vm13, %v2290_v57, %v2294_v8  ;;  %1055 = vst [vmem:[#allocation2 + $0x38] sm:$0x7] %v1054_v5  ;;  %v1071_v30 = vrot.slane %v1070_v23, 4 }
 0x1bd   :  { %v5893_v37 = vshll.u32 %v4943_v50, 16  ;;  %v2041_v49 = vsel %vm1323_vm14, %v2039_v42, %v1982_v60  ;;  %v2302_v63 = vrot.slane %v5287_v43, 3  ;;  %v2323_v24 = vsel %vm1323_vm14, %v2321_v21, %v2298_v15  ;;  %v1002_v21 = vld [vmem:[#allocation2 + $0x1c] sm:$0x7] }
 0x1be   :  { %v5894_v55 = vshrl.u32 %v4966_v51, 16  ;;  %v2043_v57 = vsel %vm1326_vm15, %v2041_v49, %v1993_v20  ;;  %v1075_v23 = vsel %vm4784_vm11, %v1071_v30, %v1074_v61  ;;  %v2120_v56 = vunpack.c.l.b16 %v2111_v13 }
 0x1bf   :  { %v5295_v2 = vrot.slane %v5893_v37, 7  ;;  %3740 = vmatmul.msk.bf16.vlgmr.msra.gmra.mxu1 %vm676_vm0, %v2043_v57  ;;  %v2325_v50 = vsel %vm1326_vm15, %v2323_v24, %v2302_v63  ;;  %1076 = vst [vmem:[#allocation2 + $0x40] sm:$0x7] %v1075_v23  ;;  %v2141_v60 = vunpack.c.l.b16 %v2113_v36  ;;  %v994_v52 = vshrl.u32 %v885_v1, 16 }
 0x1c0   :  { %v5302_v41 = vrot.slane %v5894_v55, 4  ;;  %v997_v8 = vshll.u32 %v885_v1, 16  ;;  %3792 = vmatmul.msk.bf16.vlgmr.msra.gmra.mxu3 %vm676_vm0, %v2325_v50  ;;  %v1852_v5 = vunpack.c.l.b16 %v1841_v53  ;;  %v2121_v16 = vpack.c.b16 %v2120_v56, %v2120_v56  ;;  %v1011_v56 = vld [vmem:[#allocation2 + $0x20] sm:$0x7] }
 0x1c1   :  { %v1015_v31 = vshrl.u32 %v5283_v25, 16  ;;  %v788_v7 = vsub.f32 %v4564_v38, %v4654_v46  ;;  %v5313_v15 = vpack.c.b16 %v2141_v60, %v2141_v60  ;;  %v996_v61 = vrot.slane %v994_v52, 7 }
 0x1c2   :  { %v1005_v13 = vrot.slane %v994_v52, 5  ;;  %v1006_v20 = vrot.slane %v997_v8, 6  ;;  %v2125_v42 = vshll.u32 %v2121_v16, 16  ;;  %v1018_v36 = vshll.u32 %v5283_v25, 16  ;;  %v4104_v25 = vld [vmem:[%s5811_s4 + $0x130] sm:$0xff] }
 0x1c3   :  { %5895 = vst [vmem:[#allocation11_spill] sm:$0xff] %v5313_v15  ;;  %v1017_v30 = vrot.slane %v1015_v31, 7  ;;  %v789_v1 = vsub.f32 %v4569_v32, %v4654_v46  ;;  %v5318_v37 = vld [vmem:[#allocation2 + $0x38] sm:$0x3]  ;;  %v5861_v63 = vshrl.u32 %v5313_v15, 16  ;;  %v999_v24 = vor.u32 %v997_v8, %v996_v61  ;;  %2575 = vmatpush.bf16.msrb.mxu1 %v4104_v25 }
 0x1c4   :  { %5896 = vst [vmem:[#allocation12_spill] sm:$0xff] %v5318_v37  ;;  %v2112_v49 = vld [vmem:[#allocation2 + $0x38] sm:$0x7]  ;;  %v1007_v53 = vor.u32 %v1006_v20, %v1005_v13  ;;  %v1848_v55 = vunpack.c.l.b16 %v5318_v37  ;;  %v2127_v57 = vrot.slane %v2125_v42, 1  ;;  %v5326_v32 = vpack.c.b16 %v1852_v5, %v1852_v5  ;;  %v1023_v52 = vld [vmem:[#allocation2 + $0x24] sm:$0x7] }
 0x1c5   :  { %v2130_v23 = vunpack.c.l.b16 %v2112_v49  ;;  %v1020_v50 = vor.u32 %v1018_v36, %v1017_v30  ;;  %v2123_v46 = vshrl.u32 %v2121_v16, 16  ;;  %v2146_v60 = vrot.slane %v5861_v63, 4 }
 0x1c6   :  { %v1026_v38 = vrot.slane %v1015_v31, 5  ;;  %v1842_v8 = vld [vmem:[#allocation2 + $0x40] sm:$0x3]  ;;  %v1849_v61 = vpack.c.b16 %v1848_v55, %v1848_v55  ;;  %v5897_v42 = vshll.u32 %v5313_v15, 16  ;;  %v1003_v49 = vsel %vm4784_vm11, %v999_v24, %v1002_v21 }
 0x1c7   :  { %v2114_v13 = vld [vmem:[#allocation2 + $0x40] sm:$0x7]  ;;  %v5330_v20 = vpack.c.b16 %v2130_v23, %v2130_v23  ;;  %v1855_v5 = vunpack.c.l.b16 %v1842_v8  ;;  %v2128_v37 = vor.u32 %v2127_v57, %v2123_v46  ;;  %1004 = vst [vmem:[#allocation2 + $0x1c] sm:$0x7] %v1003_v49  ;;  %v1008_v17 = vrot.slane %v1007_v53, 4 }
 0x1c8   :  { %v2149_v30 = vrot.slane %v5897_v42, 5  ;;  %v2152_v16 = vunpack.c.l.b16 %v2114_v13  ;;  %v1850_v63 = vrot.slane %v1849_v61, 6  ;;  %v1024_v23 = vsel %vm4784_vm11, %v1020_v50, %v1023_v52  ;;  %v4145_v8 = vld [vmem:[%s5810_s3] ss:$0 sm:$0xff] }
 0x1c9   :  { %v5865_v31 = vshrl.u32 %v5330_v20, 16  ;;  %v5867_v55 = vshll.u32 %v5330_v20, 16  ;;  %v5340_v15 = vpack.c.b16 %v1855_v5, %v1855_v5  ;;  %v1012_v21 = vsel %vm4784_vm11, %v1008_v17, %v1011_v56  ;;  %1025 = vst [vmem:[#allocation2 + $0x24] sm:$0x7] %v1024_v23  ;;  %v1158_v23 = vld [vmem:[#allocation2 + $0x70] sm:$0x7] }
 0x1ca   :  { %v5342_v42 = vpack.c.b16 %v2152_v16, %v2152_v16  ;;  %v1027_v24 = vrot.slane %v1018_v36, 6  ;;  %v1871_v53 = vsel %vm1319_vm13, %v1839_v4, %v1850_v63  ;;  %1013 = vst [vmem:[#allocation2 + $0x20] sm:$0x7] %v1012_v21  ;;  %v806_v50 = vmul.f32 %v4727_v14, %v788_v7  ;;  %v1032_v16 = vld [vmem:[#allocation2 + $0x28] sm:$0x7] }
 0x1cb   :  { %v2135_v57 = vrot.slane %v5865_v31, 6  ;;  %v2138_v25 = vrot.slane %v5867_v55, 7  ;;  %v1857_v46 = vrot.slane %v5340_v15, 2  ;;  %v1873_v52 = vsel %vm1323_vm14, %v1871_v53, %v5326_v32 }
 0x1cc   :  { %v5870_v17 = vshrl.u32 %v5342_v42, 16  ;;  %v5869_v36 = vshll.u32 %v5342_v42, 16  ;;  %v1028_v4 = vor.u32 %v1027_v24, %v1026_v38  ;;  %v807_v63 = vmul.f32 %v4727_v14, %v789_v1 }
 0x1cd   :  { %v2139_v56 = vor.u32 %v2138_v25, %v2135_v57  ;;  %v825_v61 = vadd.f32 %v4145_v8, %v806_v50  ;;  %v1875_v7 = vsel %vm1326_vm15, %v1873_v52, %v1857_v46  ;;  %v2150_v13 = vor.u32 %v2149_v30, %v2146_v60 }
 0x1ce   :  { %v2157_v49 = vrot.slane %v5870_v17, 2  ;;  %v2160_v5 = vrot.slane %v5869_v36, 3  ;;  %v5898_v38 = vshll.u32 %v4966_v51, 16  ;;  %3714 = vmatmul.msk.bf16.vlgmr.msra.gmra.mxu0 %vm676_vm0, %v1875_v7  ;;  %v1029_v1 = vrot.slane %v1028_v4, 4  ;;  %v1947_v24 = vld [vmem:[#allocation2 + $0x1c] sm:$0x7] }
 0x1cf   :  { %v2207_v14 = vsel %vm1319_vm13, %v2128_v37, %v2139_v56  ;;  %v2283_v53 = vld [vmem:[#allocation2 + $0x1c] sm:$0x6]  ;;  %v826_v60 = vadd.f32 %v4145_v8, %v807_v63  ;;  %v1995_v25 = vunpack.c.l.b16 %v1947_v24  ;;  %vm841_vm9 = vcmp.gt.f32.partialorder %v825_v61, 0.0 }
 0x1d0   :  { %v5368_v21 = vrot.slane %v5898_v38, 5  ;;  %v2161_v30 = vor.u32 %v2160_v5, %v2157_v49  ;;  %v2209_v57 = vsel %vm1323_vm14, %v2207_v14, %v2150_v13  ;;  %v2304_v50 = vunpack.c.l.b16 %v2283_v53  ;;  %v1949_v52 = vld [vmem:[#allocation2 + $0x24] sm:$0x7] }
 0x1d1   :  { %v1033_v46 = vsel %vm4784_vm11, %v1029_v1, %v1032_v16  ;;  %v2285_v51 = vld [vmem:[#allocation2 + $0x24] sm:$0x6]  ;;  %vm842_vm10 = vcmp.gt.f32.partialorder %v826_v60, 0.0  ;;  %v1159_v37 = vsel %vm4784_vm11, %v4891_v33, %v1158_v23  ;;  %v1948_v4 = vld [vmem:[#allocation2 + $0x20] sm:$0x7]  ;;  %v1996_v63 = vpack.c.b16 %v1995_v25, %v1995_v25 }
 0x1d2   :  { %v2211_v56 = vsel %vm1326_vm15, %v2209_v57, %v2161_v30  ;;  %1034 = vst [vmem:[#allocation2 + $0x28] sm:$0x7] %v1033_v46  ;;  %v2016_v8 = vunpack.c.l.b16 %v1949_v52  ;;  %v2284_v7 = vld [vmem:[#allocation2 + $0x20] sm:$0x6]  ;;  %v2305_v13 = vpack.c.b16 %v2304_v50, %v2304_v50  ;;  %v2005_v49 = vunpack.c.l.b16 %v1948_v4 }
 0x1d3   :  { %3766 = vmatmul.msk.bf16.vlgmr.msra.gmra.mxu2 %vm676_vm0, %v2211_v56  ;;  %v2308_v5 = vunpack.c.l.b16 %v2284_v7  ;;  %v2312_v16 = vunpack.c.l.b16 %v2285_v51  ;;  %v857_v38 = vmul.f32 0.2, %v825_v61  ;;  %1160 = vst [vmem:[#allocation2 + $0x70] sm:$0x7] %v1159_v37  ;;  %v1998_v14 = vshrl.u32 %v1996_v63, 16 }
 0x1d4   :  { %v2000_v1 = vshll.u32 %v1996_v63, 16  ;;  %v5380_v24 = vpack.c.b16 %v2016_v8, %v2016_v8  ;;  %v2306_v33 = vrot.slane %v2305_v13, 1  ;;  %v5382_v23 = vpack.c.b16 %v2005_v49, %v2005_v49 }
 0x1d5   :  { %v5384_v53 = vpack.c.b16 %v2308_v5, %v2308_v5  ;;  %v5386_v30 = vpack.c.b16 %v2312_v16, %v2312_v16  ;;  %v858_v57 = vmul.f32 0.2, %v826_v60  ;;  %v873_v52 = vsel %vm841_vm9, %v825_v61, %v857_v38 }
 0x1d6   :  { %v2002_v25 = vrot.slane %v2000_v1, 1  ;;  %v5866_v50 = vshrl.u32 %v5380_v24, 16  ;;  %v5868_v46 = vshll.u32 %v5380_v24, 16  ;;  %v5871_v51 = vshrl.u32 %v5382_v23, 16 }
 0x1d7   :  { %v5872_v37 = vshll.u32 %v5382_v23, 16  ;;  %v2310_v56 = vrot.slane %v5384_v53, 7  ;;  %v2314_v4 = vrot.slane %v5386_v30, 5  ;;  %v874_v13 = vsel %vm842_vm10, %v826_v60, %v858_v57 }
 0x1d8   :  { %v2003_v63 = vor.u32 %v2002_v25, %v1998_v14  ;;  %v2021_v8 = vrot.slane %v5866_v50, 4  ;;  %v2024_v7 = vrot.slane %v5868_v46, 5  ;;  %v2010_v61 = vrot.slane %v5871_v51, 6 }
 0x1d9   :  { %v1950_v49 = vld [vmem:[#allocation2 + $0x28] sm:$0x7]  ;;  %v2013_v5 = vrot.slane %v5872_v37, 7  ;;  %v2328_v38 = vsel %vm1319_vm13, %v2306_v33, %v2310_v56  ;;  %v889_v1 = vpack.c.bf16 %v873_v52, %v873_v52  ;;  %v890_v46 = vpack.c.bf16 %v874_v13, %v874_v13 }
 0x1da   :  { %v2286_v16 = vld [vmem:[#allocation2 + $0x28] sm:$0x6]  ;;  %v2025_v14 = vor.u32 %v2024_v7, %v2021_v8  ;;  %v2027_v25 = vunpack.c.l.b16 %v1950_v49  ;;  %v2330_v50 = vsel %vm1323_vm14, %v2328_v38, %v2314_v4  ;;  %v5900_v51 = vshrl.u32 %v4920_v18, 16  ;;  %v2479_v38 = vld [vmem:[#allocation2 + $0x70] sm:$0x7] }
 0x1db   :  { %v2316_v31 = vunpack.c.l.b16 %v2286_v16  ;;  %v2014_v55 = vor.u32 %v2013_v5, %v2010_v61  ;;  %v1078_v36 = vshrl.u32 %v889_v1, 16  ;;  %v1081_v60 = vshll.u32 %v889_v1, 16  ;;  %v4107_v7 = vld [vmem:[%s5811_s4 + $0x148] sm:$0xff]  ;;  %v4106_v5 = vld [vmem:[%s5811_s4 + $0x140] sm:$0xff] }
 0x1dc   :  { %v5406_v57 = vpack.c.b16 %v2027_v25, %v2027_v25  ;;  %v2482_v37 = vor.u32 %v5051_v59, %v5900_v51  ;;  %v2485_v33 = vor.u32 %v5204_v39, %v5194_v19  ;;  %v4111_v18 = vld [vmem:[%s5811_s4 + $0x168] sm:$0xff]  ;;  %v1099_v49 = vshrl.u32 %v890_v46, 16  ;;  %2690 = vmatpush.bf16.msrb.mxu2 %v4107_v7  ;;  %v4098_v16 = vld [vmem:[%s5811_s4 + $0x100] sm:$0xff] }
 0x1dd   :  { %v5408_v17 = vpack.c.b16 %v2316_v31, %v2316_v31  ;;  %v2046_v52 = vsel %vm1319_vm13, %v2003_v63, %v2014_v55  ;;  %v1080_v56 = vrot.slane %v1078_v36, 7  ;;  %v1089_v8 = vrot.slane %v1078_v36, 5  ;;  %v4099_v31 = vld [vmem:[%s5811_s4 + $0x108] sm:$0xff]  ;;  %2780 = vmatpush.bf16.msrb.mxu3 %v4111_v18  ;;  %v1107_v18 = vld [vmem:[#allocation2 + $0x54] sm:$0x7] }
 0x1de   :  { %v1090_v4 = vrot.slane %v1081_v60, 6  ;;  %v5874_v59 = vshrl.u32 %v5406_v57, 16  ;;  %v5873_v19 = vshll.u32 %v5406_v57, 16  ;;  %v2048_v39 = vsel %vm1323_vm14, %v2046_v52, %v2025_v14  ;;  %v1086_v36 = vld [vmem:[#allocation2 + $0x4c] sm:$0x7]  ;;  %2462 = vmatpush.bf16.msrb.mxu0 %v4099_v31  ;;  %v4110_v52 = vld [vmem:[%s5811_s4 + $0x160] sm:$0xff] }
 0x1df   :  { %5899 = vst [vmem:[#allocation13_spill] sm:$0xff] %v5408_v17  ;;  %v2318_v55 = vrot.slane %v5408_v17, 3  ;;  %v4103_v51 = vld [vmem:[%s5811_s4 + $0x128] sm:$0xff]  ;;  %v1083_v63 = vor.u32 %v1081_v60, %v1080_v56  ;;  %v1102_v61 = vshll.u32 %v890_v46, 16  ;;  %v1095_v46 = vld [vmem:[#allocation2 + $0x50] sm:$0x7]  ;;  %v2488_v56 = vor.u32 %v5212_v47, %v5208_v22 }
 0x1e0   :  { %v1091_v13 = vor.u32 %v1090_v4, %v1089_v8  ;;  %v2032_v1 = vrot.slane %v5874_v59, 2  ;;  %v2035_v14 = vrot.slane %v5873_v19, 3  ;;  %2576 = vmatpush.bf16.msrb.mxu1 %v4103_v51  ;;  %v4102_v60 = vld [vmem:[%s5811_s4 + $0x120] sm:$0xff]  ;;  %v1101_v4 = vrot.slane %v1099_v49, 7  ;;  %2691 = vmatpush.bf16.msrb.mxu2 %v4106_v5  ;;  %v1116_v5 = vld [vmem:[#allocation2 + $0x58] sm:$0x7] }
 0x1e1   :  { %v2332_v25 = vsel %vm1326_vm15, %v2330_v50, %v2318_v55  ;;  %v1087_v8 = vsel %vm4784_vm11, %v1083_v63, %v1086_v36  ;;  %v1110_v7 = vrot.slane %v1099_v49, 5  ;;  %v1111_v55 = vrot.slane %v1102_v61, 6  ;;  %v2707_v63 = vld [vmem:[#allocation2 + $0x70] sm:$0x6]  ;;  %2781 = vmatpush.bf16.msrb.mxu3 %v4110_v52 }
 0x1e2   :  { %3793 = vmatmul.msk.bf16.gmra.mxu3 %vm676_vm0, %v2332_v25  ;;  %v1092_v50 = vrot.slane %v1091_v13, 4  ;;  %v2036_v31 = vor.u32 %v2035_v14, %v2032_v1  ;;  %1088 = vst [vmem:[#allocation2 + $0x4c] sm:$0x7] %v1087_v8  ;;  %v2490_v51 = vunpack.c.l.b16 %v2479_v38  ;;  %v2521_v19 = vsel %vm1319_vm13, %v2482_v37, %v2485_v33  ;;  %2463 = vmatpush.bf16.msrb.mxu0 %v4098_v16 }
 0x1e3   :  { %v5901_v59 = vshrl.u32 %v5027_v40, 16  ;;  %v1104_v47 = vor.u32 %v1102_v61, %v1101_v4  ;;  %v5460_v36 = vsel %vm1323_vm14, %v2521_v19, %v2488_v56  ;;  %v1112_v49 = vor.u32 %v1111_v55, %v1110_v7 }
 0x1e4   :  { %v1096_v22 = vsel %vm4784_vm11, %v1092_v50, %v1095_v46  ;;  %v2050_v13 = vsel %vm1326_vm15, %v2048_v39, %v2036_v31  ;;  %2577 = vmatpush.bf16.msrb.mxu1 %v4102_v60  ;;  %v2491_v37 = vpack.c.b16 %v2490_v51, %v2490_v51  ;;  %v5902_v33 = vshll.u32 %v5027_v40, 16 }
 0x1e5   :  { %v1194_v17 = vrot.slane %v5901_v59, 5  ;;  %1097 = vst [vmem:[#allocation2 + $0x50] sm:$0x7] %v1096_v22  ;;  %3741 = vmatmul.msk.bf16.gmra.mxu1 %vm676_vm0, %v2050_v13  ;;  %v1108_v61 = vsel %vm4784_vm11, %v1104_v47, %v1107_v18  ;;  %v5903_v19 = vrot.slane %v4924_v6, 7  ;;  %v5904_v16 = vrot.slane %v4918_v34, 1 }
 0x1e6   :  { %v1195_v59 = vrot.slane %v5902_v33, 6  ;;  %v5905_v38 = vshrl.u32 %v4774_v45, 16  ;;  %1109 = vst [vmem:[#allocation2 + $0x54] sm:$0x7] %v1108_v61  ;;  %v1113_v14 = vrot.slane %v1112_v49, 4  ;;  %v2713_v25 = vunpack.c.l.b16 %v2707_v63 }
 0x1e7   :  { %v2725_v39 = vsel %vm1319_vm13, %v5904_v16, %v5903_v19  ;;  %v5906_v40 = vrot.slane %v4931_v27, 5  ;;  %v2395_v60 = vrot.slane %v4914_v10, 6  ;;  %v2493_v52 = vshrl.u32 %v2491_v37, 16  ;;  %v1242_v13 = vld [vmem:[#allocation2 + $0xa0] sm:$0x7] }
 0x1e8   :  { %v1236_v1 = vrot.slane %v5905_v38, 5  ;;  %v2400_v6 = vrot.slane %v5088_v11, 6  ;;  %v5907_v34 = vshrl.u32 %v5231_v35, 16  ;;  %v1117_v45 = vsel %vm4784_vm11, %v1113_v14, %v1116_v5  ;;  %v1200_v49 = vld [vmem:[#allocation2 + $0x88] sm:$0x7]  ;;  %2982 = vmatpush.bf16.msra.mxu1 %v4121_v54 }
 0x1e9   :  { %v2727_v46 = vsel %vm1323_vm14, %v2725_v39, %v5906_v40  ;;  %v2496_v50 = vshll.u32 %v2491_v37, 16  ;;  %1118 = vst [vmem:[#allocation2 + $0x58] sm:$0x7] %v1117_v45  ;;  %v2115_v4 = vld [vmem:[#allocation2 + $0x4c] sm:$0x7]  ;;  %v5908_v27 = vshrl.u32 %v4933_v28, 16  ;;  %v2599_v31 = vor.u32 %v5295_v2, %v5220_v12 }
 0x1ea   :  { %v1238_v56 = vor.u32 %v4889_v62, %v1236_v1  ;;  %v5483_v8 = vrot.slane %v5907_v34, 6  ;;  %v2602_v62 = vor.u32 %v5368_v21, %v5302_v41  ;;  %v1196_v18 = vor.u32 %v1195_v59, %v1194_v17  ;;  %v4125_v39 = vld [vmem:[%s5811_s4 + $0x1d8] sm:$0xff] }
 0x1eb   :  { %v2596_v7 = vor.u32 %v5216_v44, %v5908_v27  ;;  %v5909_v55 = vshll.u32 %v5231_v35, 16  ;;  %v2163_v22 = vunpack.c.l.b16 %v2115_v4  ;;  %v2714_v47 = vpack.c.b16 %v2713_v25, %v2713_v25  ;;  %3096 = vmatpush.bf16.msra.mxu2 %v4125_v39  ;;  %v4116_v4 = vld [vmem:[%s5811_s4 + $0x190] sm:$0xff] }
 0x1ec   :  { %v1239_v63 = vrot.slane %v1238_v56, 4  ;;  %v5498_v37 = vld [vmem:[#allocation2 + $0x50] sm:$0x3]  ;;  %v2495_v44 = vrot.slane %v2493_v52, 2  ;;  %v1197_v12 = vrot.slane %v1196_v18, 4  ;;  %v2498_v21 = vrot.slane %v2496_v50, 3 }
 0x1ed   :  { %v5496_v51 = vrot.slane %v5909_v55, 7  ;;  %v2116_v28 = vld [vmem:[#allocation2 + $0x50] sm:$0x7]  ;;  %v2635_v33 = vsel %vm1319_vm13, %v2596_v7, %v2599_v31  ;;  %v1859_v2 = vunpack.c.l.b16 %v5498_v37  ;;  %v2164_v41 = vpack.c.b16 %v2163_v22, %v2163_v22  ;;  %v1845_v61 = vld [vmem:[#allocation2 + $0x54] sm:$0x3]  ;;  %v4117_v52 = vld [vmem:[%s5811_s4 + $0x198] sm:$0xff] }
 0x1ee   :  { %v2173_v17 = vunpack.c.l.b16 %v2116_v28  ;;  %v5910_v35 = vshrl.u32 %v5252_v9, 16  ;;  %v2117_v5 = vld [vmem:[#allocation2 + $0x54] sm:$0x7]  ;;  %v1243_v19 = vsel %vm4784_vm11, %v1239_v63, %v1242_v13  ;;  %v5509_v16 = vsel %vm1323_vm14, %v2635_v33, %v2602_v62  ;;  %v4129_v56 = vld [vmem:[%s5811_s4 + $0x1f8] sm:$0xff]  ;;  %2866 = vmatpush.bf16.msra.mxu0 %v4117_v52  ;;  %v1843_v63 = vld [vmem:[#allocation2 + $0x4c] sm:$0x3] }
 0x1ef   :  { %v1201_v38 = vsel %vm4784_vm11, %v1197_v12, %v1200_v49  ;;  %v1860_v1 = vpack.c.b16 %v1859_v2, %v1859_v2  ;;  %v1863_v14 = vunpack.c.l.b16 %v1845_v61  ;;  %v2168_v25 = vshll.u32 %v2164_v41, 16  ;;  %1244 = vst [vmem:[#allocation2 + $0xa0] sm:$0x7] %v1243_v19  ;;  %v4124_v50 = vld [vmem:[%s5811_s4 + $0x1d0] sm:$0xff]  ;;  %3186 = vmatpush.bf16.msra.mxu3 %v4129_v56 }
 0x1f0   :  { %v5504_v59 = vrot.slane %v5910_v35, 4  ;;  %v2715_v40 = vrot.slane %v2714_v47, 3  ;;  %v5522_v34 = vpack.c.b16 %v2173_v17, %v2173_v17  ;;  %v2184_v45 = vunpack.c.l.b16 %v2117_v5  ;;  %1202 = vst [vmem:[#allocation2 + $0x88] sm:$0x7] %v1201_v38  ;;  %v1846_v31 = vld [vmem:[#allocation2 + $0x58] sm:$0x3]  ;;  %3097 = vmatpush.bf16.msra.mxu2 %v4124_v50 }
 0x1f1   :  { %v5911_v27 = vshrl.u32 %v5134_v48, 16  ;;  %v1861_v62 = vrot.slane %v1860_v1, 6  ;;  %v2118_v18 = vld [vmem:[#allocation2 + $0x58] sm:$0x7]  ;;  %v2170_v55 = vrot.slane %v2168_v25, 1  ;;  %v2499_v22 = vor.u32 %v2498_v21, %v2495_v44  ;;  %v4128_v12 = vld [vmem:[%s5811_s4 + $0x1f0] sm:$0xff] }
 0x1f2   :  { %v2729_v47 = vsel %vm1326_vm15, %v2727_v46, %v2715_v40  ;;  %v1866_v13 = vunpack.c.l.b16 %v1846_v31  ;;  %v2176_v49 = vshrl.u32 %v5522_v34, 16  ;;  %v2179_v28 = vshll.u32 %v5522_v34, 16  ;;  %v4120_v21 = vld [vmem:[%s5811_s4 + $0x1b0] sm:$0xff]  ;;  %2867 = vmatpush.bf16.msra.mxu0 %v4116_v4 }
 0x1f3   :  { %v5535_v7 = vrot.slane %v5911_v27, 6  ;;  %v5540_v33 = vpack.c.b16 %v2184_v45, %v2184_v45  ;;  %3896 = vmatmul.msk.bf16.vlgmr.msrb.gmra.mxu3 %vm676_vm0, %v2729_v47  ;;  %v5546_v44 = vpack.c.b16 %v1863_v14, %v1863_v14  ;;  %v1878_v46 = vsel %vm1319_vm13, %v1843_v63, %v1861_v62  ;;  %2983 = vmatpush.bf16.msra.mxu1 %v4120_v21 }
 0x1f4   :  { %v2195_v2 = vunpack.c.l.b16 %v2118_v18  ;;  %v2525_v17 = vsel %vm1326_vm15, %v5460_v36, %v2499_v22  ;;  %v5554_v35 = vpack.c.b16 %v1866_v13, %v1866_v13  ;;  %v2166_v61 = vshrl.u32 %v2164_v41, 16  ;;  %3187 = vmatpush.bf16.msra.mxu3 %v4128_v12 }
 0x1f5   :  { %v2178_v5 = vrot.slane %v2176_v49, 6  ;;  %v2181_v19 = vrot.slane %v2179_v28, 7  ;;  %v1880_v39 = vsel %vm1323_vm14, %v1878_v46, %v5546_v44  ;;  %v2187_v38 = vshrl.u32 %v5540_v33, 16  ;;  %3844 = vmatmul.msk.bf16.vlgmr.msrb.gmra.mxu1 %vm676_vm0, %v2525_v17 }
 0x1f6   :  { %v2190_v36 = vshll.u32 %v5540_v33, 16  ;;  %v5564_v1 = vpack.c.b16 %v2195_v2, %v2195_v2  ;;  %v1868_v41 = vrot.slane %v5554_v35, 2  ;;  %v2171_v14 = vor.u32 %v2170_v55, %v2166_v61  ;;  %v2593_v40 = vld [vmem:[#allocation2 + $0xa0] sm:$0x7] }
 0x1f7   :  { %v2182_v25 = vor.u32 %v2181_v19, %v2178_v5  ;;  %v5912_v52 = vshll.u32 %v5134_v48, 16  ;;  %v2189_v45 = vrot.slane %v2187_v38, 4  ;;  %v2480_v27 = vld [vmem:[#allocation2 + $0x88] sm:$0x7]  ;;  %v2604_v18 = vunpack.c.l.b16 %v2593_v40  ;;  %v2393_v2 = vld [vmem:[#allocation2 + $0xa0] sm:$0x3] }
 0x1f8   :  { %v2192_v54 = vrot.slane %v2190_v36, 5  ;;  %v2198_v50 = vshrl.u32 %v5564_v1, 16  ;;  %v2201_v4 = vshll.u32 %v5564_v1, 16  ;;  %v1882_v31 = vsel %vm1326_vm15, %v1880_v39, %v1868_v41 }
 0x1f9   :  { %v2503_v56 = vrot.slane %v5912_v52, 7  ;;  %v2214_v62 = vsel %vm1319_vm13, %v2171_v14, %v2182_v25  ;;  %v5913_v48 = vshll.u32 %v5118_v0, 16  ;;  %v5914_v22 = vshll.u32 %v5252_v9, 16  ;;  %3715 = vmatmul.msk.bf16.gmra.mxu0 %vm676_vm0, %v1882_v31  ;;  %v2708_v31 = vld [vmem:[#allocation2 + $0x88] sm:$0x6] }
 0x1fa   :  { %v2193_v63 = vor.u32 %v2192_v54, %v2189_v45  ;;  %v2200_v13 = vrot.slane %v2198_v50, 2  ;;  %v2203_v12 = vrot.slane %v2201_v4, 3  ;;  %v3118_v46 = vrot.slane %v5245_v26, 7 }
 0x1fb   :  { %v2500_v55 = vrot.slane %v5913_v48, 1  ;;  %v5582_v47 = vrot.slane %v5914_v22, 5  ;;  %v2605_v17 = vpack.c.b16 %v2604_v18, %v2604_v18  ;;  %v2504_v21 = vor.u32 %v2503_v56, %v5535_v7  ;;  %v5918_v48 = vld [vmem:[#allocation11_spill] sm:$0xff] }
 0x1fc   :  { %v2509_v61 = vunpack.c.l.b16 %v2480_v27  ;;  %v3119_v9 = vrot.slane %v5287_v43, 5  ;;  %v2801_v5 = vrot.slane %v5326_v32, 6  ;;  %v2204_v19 = vor.u32 %v2203_v12, %v2200_v13 }
 0x1fd   :  { %v2216_v39 = vsel %vm1323_vm14, %v2214_v62, %v2193_v63  ;;  %v5915_v41 = vshrl.u32 %v5118_v0, 16  ;;  %v5916_v25 = vshrl.u32 %v5124_v3, 16  ;;  %v5917_v52 = vshll.u32 %v5124_v3, 16  ;;  %v4123_v63 = vld [vmem:[%s5811_s4 + $0x1c8] sm:$0xff] }
 0x1fe   :  { %v2510_v54 = vpack.c.b16 %v2509_v61, %v2509_v61  ;;  %v2218_v7 = vsel %vm1326_vm15, %v2216_v39, %v2204_v19  ;;  %v2397_v56 = vunpack.c.l.b16 %v2393_v2  ;;  %v2716_v27 = vrot.slane %v5116_v29, 1  ;;  %v4115_v29 = vld [vmem:[%s5811_s4 + $0x188] sm:$0xff]  ;;  %v2394_v19 = vld [vmem:[#allocation2 + $0xb8] sm:$0x3]  ;;  %3098 = vmatpush.bf16.msra.mxu2 %v4123_v63 }
 0x1ff   :  { %v2501_v14 = vor.u32 %v2500_v55, %v5915_v41  ;;  %v2505_v40 = vrot.slane %v5916_v25, 4  ;;  %v2506_v45 = vrot.slane %v5917_v52, 5  ;;  %v2717_v18 = vrot.slane %v5131_v58, 7  ;;  %3767 = vmatmul.msk.bf16.gmra.mxu2 %vm676_vm0, %v2218_v7  ;;  %v4127_v58 = vld [vmem:[%s5811_s4 + $0x1e8] sm:$0xff]  ;;  %2868 = vmatpush.bf16.msra.mxu0 %v4115_v29 }
 0x200   :  { %v5919_v62 = vshrl.u32 %v5918_v48, 16  ;;  %v2607_v0 = vshrl.u32 %v2605_v17, 16  ;;  %v2512_v55 = vshrl.u32 %v2510_v54, 16  ;;  %v2610_v13 = vshll.u32 %v2605_v17, 16  ;;  %v5921_v52 = vld [vmem:[#allocation8_spill] sm:$0xff]  ;;  %v4122_v17 = vld [vmem:[%s5811_s4 + $0x1c0] sm:$0xff]  ;;  %3188 = vmatpush.bf16.msra.mxu3 %v4127_v58 }
 0x201   :  { %v2528_v3 = vsel %vm1319_vm13, %v2501_v14, %v2504_v21  ;;  %v2515_v12 = vshll.u32 %v2510_v54, 16  ;;  %v2720_v2 = vunpack.c.l.b16 %v2708_v31  ;;  %v2732_v61 = vsel %vm1319_vm13, %v2716_v27, %v2717_v18  ;;  %v4119_v21 = vld [vmem:[%s5811_s4 + $0x1a8] sm:$0xff]  ;;  %v4114_v54 = vld [vmem:[%s5811_s4 + $0x180] sm:$0xff]  ;;  %v4146_v27 = vld [vmem:[#allocation2 + $0x94] sm:$0x3] }
 0x202   :  { %v5605_v22 = vrot.slane %v5919_v62, 6  ;;  %v5920_v39 = vshll.u32 %v5918_v48, 16  ;;  %v2507_v14 = vor.u32 %v2506_v45, %v2505_v40  ;;  %v2514_v25 = vrot.slane %v2512_v55, 2  ;;  %2984 = vmatpush.bf16.msra.mxu1 %v4119_v21  ;;  %v4118_v48 = vld [vmem:[%s5811_s4 + $0x1a0] sm:$0xff]  ;;  %3099 = vmatpush.bf16.msra.mxu2 %v4122_v17  ;;  %v3115_v17 = vld [vmem:[#allocation2 + $0x14] sm:$0x6] }
 0x203   :  { %v2718_v7 = vrot.slane %v5921_v52, 5  ;;  %v2398_v31 = vpack.c.b16 %v2397_v56, %v2397_v56  ;;  %v2407_v18 = vsel %vm1319_vm13, %v4146_v27, %v2395_v60  ;;  %v2517_v40 = vrot.slane %v2515_v12, 3  ;;  %v4126_v58 = vld [vmem:[%s5811_s4 + $0x1e0] sm:$0xff]  ;;  %2869 = vmatpush.bf16.msra.mxu0 %v4114_v54  ;;  %v5924_v27 = vld [vmem:[#allocation9_spill] sm:$0xff] }
 0x204   :  { %v5624_v41 = vrot.slane %v5920_v39, 7  ;;  %v2721_v45 = vpack.c.b16 %v2720_v2, %v2720_v2  ;;  %v5922_v62 = vshrl.u32 %v5342_v42, 16  ;;  %v2530_v63 = vsel %vm1323_vm14, %v2528_v3, %v2507_v14  ;;  %v2886_v2 = vld [vmem:[#allocation2 + $0x14] sm:$0x7]  ;;  %v5923_v21 = vld [vmem:[#allocation3_spill] sm:$0xff]  ;;  %3189 = vmatpush.bf16.msra.mxu3 %v4126_v58 }
 0x205   :  { %v2734_v56 = vsel %vm1323_vm14, %v2732_v61, %v2718_v7  ;;  %v2402_v29 = vunpack.c.l.b16 %v2394_v19  ;;  %v2609_v10 = vrot.slane %v2607_v0, 2  ;;  %v2612_v39 = vrot.slane %v2610_v13, 3 }
 0x206   :  { %v5641_v55 = vrot.slane %v5922_v62, 4  ;;  %v2518_v60 = vor.u32 %v2517_v40, %v2514_v25  ;;  %v2722_v12 = vrot.slane %v2721_v45, 3  ;;  %v2409_v52 = vsel %vm1323_vm14, %v2407_v18, %v5923_v21  ;;  %2985 = vmatpush.bf16.msra.mxu1 %v4118_v48  ;;  %v4147_v45 = vld [vmem:[#allocation2 + $0xac] sm:$0x3] }
 0x207   :  { %v5925_v62 = vshll.u32 %v5924_v27, 16  ;;  %v2893_v61 = vor.u32 %v5496_v51, %v5483_v8  ;;  %v2896_v0 = vor.u32 %v5582_v47, %v5504_v59  ;;  %v5926_v13 = vshll.u32 %v5342_v42, 16  ;;  %v5928_v47 = vld [vmem:[#allocation10_spill] sm:$0xff] }
 0x208   :  { %v2399_v14 = vrot.slane %v2398_v31, 2  ;;  %v2532_v25 = vsel %vm1326_vm15, %v2530_v63, %v2518_v60  ;;  %v2736_v7 = vsel %vm1326_vm15, %v2734_v56, %v2722_v12  ;;  %v5662_v54 = vpack.c.b16 %v2402_v29, %v2402_v29  ;;  %v2594_v63 = vld [vmem:[#allocation2 + $0xb8] sm:$0x7]  ;;  %v1711_v1 = vpop.f32.mrf.mxu2 }
 0x209   :  { %v2889_v3 = vrot.slane %v5925_v62, 1  ;;  %v3009_v19 = vrot.slane %v5926_v13, 5  ;;  %3845 = vmatmul.msk.bf16.gmra.mxu1 %vm676_vm0, %v2532_v25  ;;  %3897 = vmatmul.msk.bf16.gmra.mxu3 %vm676_vm0, %v2736_v7  ;;  %v5927_v8 = vshrl.u32 %v5924_v27, 16  ;;  %v2898_v59 = vunpack.c.l.b16 %v2886_v2  ;;  %v5929_v2 = vld [vmem:[#allocation6_spill] sm:$0xff]  ;;  %v5934_v13 = vld [vmem:[#allocation4_spill] sm:$0xff] }
 0x20a   :  { %v3117_v42 = vrot.slane %v5928_v47, 1  ;;  %v2806_v31 = vrot.slane %v5546_v44, 6  ;;  %v2411_v18 = vsel %vm1326_vm15, %v2409_v52, %v2399_v14  ;;  %v2613_v40 = vor.u32 %v2612_v39, %v2609_v10  ;;  %v5931_v39 = vld [vmem:[#allocation7_spill] sm:$0xff]  ;;  %v5935_v25 = vld [vmem:[#allocation12_spill] sm:$0xff]  ;;  %v5938_v47 = vld [vmem:[#allocation5_spill] sm:$0xff] }
 0x20b   :  { %v2890_v51 = vor.u32 %v2889_v3, %v5927_v8  ;;  %v2414_v48 = vsel %vm1319_vm13, %v4147_v45, %v2400_v6  ;;  %v2899_v56 = vpack.c.b16 %v2898_v59, %v2898_v59  ;;  %v3121_v60 = vunpack.c.l.b16 %v3115_v17  ;;  %3818 = vmatmul.msk.bf16.vlgmr.msrb.gmra.mxu0 %vm676_vm0, %v2411_v18 }
 0x20c   :  { %v3133_v12 = vsel %vm1319_vm13, %v3117_v42, %v3118_v46  ;;  %v5930_v21 = vshll.u32 %v5929_v2, 16  ;;  %v5932_v52 = vshrl.u32 %v5931_v39, 16  ;;  %v5933_v6 = vshll.u32 %v5931_v39, 16 }
 0x20d   :  { %v2929_v29 = vsel %vm1319_vm13, %v2890_v51, %v2893_v61  ;;  %v2623_v62 = vunpack.c.l.b16 %v2594_v63  ;;  %v2901_v3 = vshrl.u32 %v2899_v56, 16  ;;  %v2904_v61 = vshll.u32 %v2899_v56, 16 }
 0x20e   :  { %v2614_v10 = vrot.slane %v5930_v21, 1  ;;  %v2616_v11 = vrot.slane %v5932_v52, 6  ;;  %v2617_v27 = vrot.slane %v5933_v6, 7  ;;  %v2931_v58 = vsel %vm1323_vm14, %v2929_v29, %v2896_v0  ;;  %v2888_v29 = vld [vmem:[#allocation2 + $0x2c] sm:$0x7] }
 0x20f   :  { %v3135_v26 = vsel %vm1323_vm14, %v3133_v12, %v3119_v9  ;;  %v2639_v46 = vsel %vm1326_vm15, %v5509_v16, %v2613_v40  ;;  %v2416_v14 = vsel %vm1323_vm14, %v2414_v48, %v5934_v13  ;;  %v2813_v7 = vsel %vm1319_vm13, %v5935_v25, %v2801_v5 }
 0x210   :  { %v5936_v0 = vshll.u32 %v5330_v20, 16  ;;  %v2903_v8 = vrot.slane %v2901_v3, 2  ;;  %v2906_v51 = vrot.slane %v2904_v61, 3  ;;  %v3122_v59 = vpack.c.b16 %v3121_v60, %v3121_v60  ;;  %3870 = vmatmul.msk.bf16.vlgmr.msrb.gmra.mxu2 %vm676_vm0, %v2639_v46 }
 0x211   :  { %v5699_v43 = vsel %vm1323_vm14, %v2813_v7, %v5340_v15  ;;  %v5937_v16 = vshrl.u32 %v5929_v2, 16  ;;  %v5939_v42 = vshrl.u32 %v5938_v47, 16  ;;  %v5940_v32 = vshrl.u32 %v5330_v20, 16 }
 0x212   :  { %v3003_v17 = vrot.slane %v5936_v0, 1  ;;  %v3007_v5 = vor.u32 %v5624_v41, %v5605_v22  ;;  %v2618_v45 = vor.u32 %v2617_v27, %v2616_v11  ;;  %v5941_v48 = vshll.u32 %v5938_v47, 16 }
 0x213   :  { %v2615_v9 = vor.u32 %v2614_v10, %v5937_v16  ;;  %v2619_v18 = vrot.slane %v5939_v42, 4  ;;  %v2624_v15 = vpack.c.b16 %v2623_v62, %v2623_v62  ;;  %v3010_v56 = vor.u32 %v3009_v19, %v5641_v55 }
 0x214   :  { %v3004_v40 = vor.u32 %v3003_v17, %v5940_v32  ;;  %v2620_v63 = vrot.slane %v5941_v48, 5  ;;  %v5942_v12 = vshll.u32 %v5382_v23, 16  ;;  %v5943_v20 = vshrl.u32 %v5380_v24, 16  ;;  %v3116_v32 = vld [vmem:[#allocation2 + $0x2c] sm:$0x6] }
 0x215   :  { %v5944_v22 = vshll.u32 %v5380_v24, 16  ;;  %v2907_v10 = vor.u32 %v2906_v51, %v2903_v8  ;;  %v3123_v39 = vrot.slane %v3122_v59, 3  ;;  %v5945_v11 = vshrl.u32 %v5406_v57, 16  ;;  %v5948_v8 = vld [vmem:[#allocation13_spill] sm:$0xff] }
 0x216   :  { %v3043_v60 = vsel %vm1319_vm13, %v3004_v40, %v3007_v5  ;;  %v2908_v2 = vrot.slane %v5942_v12, 1  ;;  %v2910_v21 = vrot.slane %v5943_v20, 6  ;;  %v5946_v19 = vshrl.u32 %v5382_v23, 16 }
 0x217   :  { %v2911_v41 = vrot.slane %v5944_v22, 7  ;;  %v5721_v52 = vsel %vm1323_vm14, %v3043_v60, %v3010_v56  ;;  %v2913_v55 = vrot.slane %v5945_v11, 4  ;;  %v5947_v62 = vshll.u32 %v5406_v57, 16 }
 0x218   :  { %v2909_v6 = vor.u32 %v2908_v2, %v5946_v19  ;;  %v2917_v61 = vunpack.c.l.b16 %v2888_v29  ;;  %v2626_v46 = vshrl.u32 %v2624_v15, 16  ;;  %v2629_v13 = vshll.u32 %v2624_v15, 16 }
 0x219   :  { %v2912_v27 = vor.u32 %v2911_v41, %v2910_v21  ;;  %v2914_v3 = vrot.slane %v5947_v62, 5  ;;  %v3124_v24 = vrot.slane %v5384_v53, 1  ;;  %v3125_v25 = vrot.slane %v5386_v30, 7  ;;  %v3001_v53 = vld [vmem:[#allocation2 + $0x44] sm:$0x7] }
 0x21a   :  { %v2404_v7 = vrot.slane %v5662_v54, 2  ;;  %v3126_v51 = vrot.slane %v5948_v8, 5  ;;  %v2621_v23 = vor.u32 %v2620_v63, %v2619_v18  ;;  %v2642_v59 = vsel %vm1319_vm13, %v2615_v9, %v2618_v45 }
 0x21b   :  { %v2915_v0 = vor.u32 %v2914_v3, %v2913_v55  ;;  %v2936_v17 = vsel %vm1319_vm13, %v2909_v6, %v2912_v27  ;;  %v2918_v16 = vpack.c.b16 %v2917_v61, %v2917_v61  ;;  %v3140_v57 = vsel %vm1319_vm13, %v3124_v24, %v3125_v25  ;;  %v1825_v6 = vpop.f32.mrf.mxu3  ;;  %v3002_v24 = vld [vmem:[#allocation2 + $0x5c] sm:$0x7] }
 0x21c   :  { %v2933_v47 = vsel %vm1326_vm15, %v2931_v58, %v2907_v10  ;;  %v3137_v42 = vsel %vm1326_vm15, %v3135_v26, %v3123_v39  ;;  %v3142_v54 = vsel %vm1323_vm14, %v3140_v57, %v3126_v51  ;;  %v2628_v40 = vrot.slane %v2626_v46, 2 }
 0x21d   :  { %v2938_v30 = vsel %vm1323_vm14, %v2936_v17, %v2915_v0  ;;  %v2631_v5 = vrot.slane %v2629_v13, 3  ;;  %3948 = vmatmul.msk.bf16.vlgmr.msra.gmra.mxu1 %vm676_vm0, %v2933_v47  ;;  %4000 = vmatmul.msk.bf16.vlgmr.msra.gmra.mxu3 %vm676_vm0, %v3137_v42  ;;  %v2820_v9 = vsel %vm1319_vm13, %v5498_v37, %v2806_v31  ;;  %v2418_v58 = vsel %vm1326_vm15, %v2416_v14, %v2404_v7  ;;  %v2798_v37 = vld [vmem:[#allocation2 + $0x44] sm:$0x3]  ;;  %v1713_v17 = vpop.f32.mrf.mxu2 }
 0x21e   :  { %v2644_v26 = vsel %vm1323_vm14, %v2642_v59, %v2621_v23  ;;  %v5750_v18 = vsel %vm1323_vm14, %v2820_v9, %v5554_v35  ;;  %v3022_v45 = vrot.slane %v2179_v28, 1  ;;  %v3012_v48 = vunpack.c.l.b16 %v3001_v53  ;;  %3819 = vmatmul.msk.bf16.gmra.mxu0 %vm676_vm0, %v2418_v58  ;;  %v2800_v23 = vld [vmem:[#allocation2 + $0x5c] sm:$0x3] }
 0x21f   :  { %v2920_v63 = vshrl.u32 %v2918_v16, 16  ;;  %v3128_v15 = vunpack.c.l.b16 %v3116_v32  ;;  %v3024_v44 = vrot.slane %v2187_v38, 6  ;;  %v2923_v31 = vshll.u32 %v2918_v16, 16 }
 0x220   :  { %v3023_v14 = vor.u32 %v3022_v45, %v2176_v49  ;;  %v3025_v35 = vrot.slane %v2190_v36, 7  ;;  %v3027_v56 = vrot.slane %v2198_v50, 4  ;;  %v2632_v28 = vor.u32 %v2631_v5, %v2628_v40  ;;  %v1547_v36 = vpop.f32.mrf.mxu1  ;;  %v1500_v50 = vpop.f32.mrf.mxu0 }
 0x221   :  { %v3028_v29 = vrot.slane %v2201_v4, 5  ;;  %v2803_v12 = vunpack.c.l.b16 %v2798_v37  ;;  %v3013_v2 = vpack.c.b16 %v3012_v48, %v3012_v48  ;;  %v2922_v21 = vrot.slane %v2920_v63, 2 }
 0x222   :  { %v3026_v60 = vor.u32 %v3025_v35, %v3024_v44  ;;  %v2646_v38 = vsel %vm1326_vm15, %v2644_v26, %v2632_v28  ;;  %v2925_v22 = vrot.slane %v2923_v31, 3  ;;  %v3129_v34 = vpack.c.b16 %v3128_v15, %v3128_v15 }
 0x223   :  { %v3029_v20 = vor.u32 %v3028_v29, %v3027_v56  ;;  %3871 = vmatmul.msk.bf16.gmra.mxu2 %vm676_vm0, %v2646_v38  ;;  %v1548_v41 = vadd.f32 %v1547_v36, %v1500_v50  ;;  %v2804_v4 = vpack.c.b16 %v2803_v12, %v2803_v12  ;;  %v3015_v10 = vshrl.u32 %v3013_v2, 16  ;;  %v1827_v15 = vpop.f32.mrf.mxu3 }
 0x224   :  { %v3050_v49 = vsel %vm1319_vm13, %v3023_v14, %v3026_v60  ;;  %v3018_v39 = vshll.u32 %v3013_v2, 16  ;;  %v2926_v11 = vor.u32 %v2925_v22, %v2922_v21  ;;  %v3130_v55 = vrot.slane %v3129_v34, 3 }
 0x225   :  { %v3052_v33 = vsel %vm1323_vm14, %v3050_v49, %v3029_v20  ;;  %v1721_v19 = vadd.f32 %v1711_v1, %v1548_v41  ;;  %v2805_v62 = vrot.slane %v2804_v4, 2  ;;  %v3017_v3 = vrot.slane %v3015_v10, 2 }
 0x226   :  { %v3020_v61 = vrot.slane %v3018_v39, 3  ;;  %v2940_v46 = vsel %vm1326_vm15, %v2938_v30, %v2926_v11  ;;  %v3144_v13 = vsel %vm1326_vm15, %v3142_v54, %v3130_v55  ;;  %v3031_v59 = vunpack.c.l.b16 %v3002_v24  ;;  %v1716_v54 = vpop.f32.mrf.mxu2 }
 0x227   :  { %v1835_v27 = vadd.f32 %v1825_v6, %v1721_v19  ;;  %v2817_v8 = vsel %vm1326_vm15, %v5699_v43, %v2805_v62  ;;  %v2808_v57 = vunpack.c.l.b16 %v2800_v23  ;;  %vm3332_vm5 = vcmask 1024  }
 0x228   :  { %v1549_v25 = vpop.f32.mrf.mxu1  ;;  %v1502_v7 = vpop.f32.mrf.mxu0  ;;  %v3021_v51 = vor.u32 %v3020_v61, %v3017_v3  ;;  %v3032_v42 = vpack.c.b16 %v3031_v59, %v3031_v59 }
 0x229   :  { %v1550_v0 = vadd.f32 %v1549_v25, %v1502_v7  ;;  %v2809_v40 = vpack.c.b16 %v2808_v57, %v2808_v57 }
 0x22a   :  { %v3047_v47 = vsel %vm1326_vm15, %v5721_v52, %v3021_v51  ;;  %v3034_v5 = vshrl.u32 %v3032_v42, 16  ;;  %v3037_v43 = vshll.u32 %v3032_v42, 16 }
 0x22b   :  { %v1722_v16 = vadd.f32 %v1713_v17, %v1550_v0  ;;  %v2810_v58 = vrot.slane %v2809_v40, 2  ;;  %v1830_v28 = vpop.f32.mrf.mxu3 }
 0x22c   :  { %v3036_v26 = vrot.slane %v3034_v5, 2  ;;  %v3039_v45 = vrot.slane %v3037_v43, 3 }
 0x22d   :  { %3949 = vmatmul.msk.bf16.gmra.mxu1 %vm676_vm0, %v2940_v46  ;;  %4001 = vmatmul.msk.bf16.gmra.mxu3 %vm676_vm0, %v3144_v13  ;;  %v2824_v52 = vsel %vm1326_vm15, %v5750_v18, %v2810_v58  ;;  %v1836_v31 = vadd.f32 %v1827_v15, %v1722_v16 }
 0x22e   :  { %3922 = vmatmul.msk.bf16.vlgmr.msra.gmra.mxu0 %vm676_vm0, %v2817_v8  ;;  %v1718_v37 = vpop.f32.mrf.mxu2  ;;  %v3040_v14 = vor.u32 %v3039_v45, %v3036_v26 }
 0x230   :  { %v1552_v53 = vpop.f32.mrf.mxu1  ;;  %v1505_v30 = vpop.f32.mrf.mxu0  ;;  %v3054_v56 = vsel %vm1326_vm15, %v3052_v33, %v3040_v14 }
 0x231   :  { %v1553_v32 = vadd.f32 %v1552_v53, %v1505_v30 }
 0x233   :  { %3974 = vmatmul.msk.bf16.vlgmr.msra.gmra.mxu2 %vm676_vm0, %v3047_v47  ;;  %v1723_v9 = vadd.f32 %v1716_v54, %v1553_v32  ;;  %v1832_v20 = vpop.f32.mrf.mxu3 }
 0x235   :  { %v1837_v29 = vadd.f32 %v1830_v28, %v1723_v9 }
 0x238   :  { %v1554_v48 = vpop.f32.mrf.mxu1  ;;  %v1507_v63 = vpop.f32.mrf.mxu0 }
 0x239   :  { %v1555_v44 = vadd.f32 %v1554_v48, %v1507_v63 }
 0x23b   :  { %v1724_v35 = vadd.f32 %v1718_v37, %v1555_v44 }
 0x23d   :  { %v1838_v18 = vadd.f32 %v1832_v20, %v1724_v35 }
 0x23e   :  { %3923 = vmatmul.msk.bf16.gmra.mxu0 %vm676_vm0, %v2824_v52 }
 0x240   :  { %v2097_v12 = vpop.f32.mrf.mxu1 }
 0x243   :  { %3975 = vmatmul.msk.bf16.gmra.mxu2 %vm676_vm0, %v3054_v56  ;;  %v2379_v34 = vpop.f32.mrf.mxu3 }
 0x248   :  { %v2099_v49 = vpop.f32.mrf.mxu1 }
 0x24b   :  { %v1929_v60 = vpop.f32.mrf.mxu0  ;;  %v2381_v36 = vpop.f32.mrf.mxu3 }
 0x24c   :  { %v1939_v38 = vadd.f32 %v1929_v60, %v1835_v27 }
 0x24e   :  { %v2107_v2 = vadd.f32 %v2097_v12, %v1939_v38 }
 0x253   :  { %v1931_v41 = vpop.f32.mrf.mxu0 }
 0x254   :  { %v1940_v8 = vadd.f32 %v1931_v41, %v1836_v31 }
 0x256   :  { %v2265_v21 = vpop.f32.mrf.mxu2  ;;  %v2108_v59 = vadd.f32 %v2099_v49, %v1940_v8 }
 0x257   :  { %v2275_v22 = vadd.f32 %v2265_v21, %v2107_v2 }
 0x259   :  { %v2389_v50 = vadd.f32 %v2379_v34, %v2275_v22 }
 0x25e   :  { %v2267_v10 = vpop.f32.mrf.mxu2 }
 0x25f   :  { %v2276_v57 = vadd.f32 %v2267_v10, %v2108_v59 }
 0x261   :  { %v2390_v30 = vadd.f32 %v2381_v36, %v2276_v57 }
 0x262   :  { %v2102_v1 = vpop.f32.mrf.mxu1 }
 0x265   :  { %v2384_v4 = vpop.f32.mrf.mxu3 }
 0x26a   :  { %v2104_v39 = vpop.f32.mrf.mxu1 }
 0x26d   :  { %v2386_v11 = vpop.f32.mrf.mxu3 }
 0x272   :  { %v2579_v6 = vpop.f32.mrf.mxu1 }
 0x276   :  { %v1934_v33 = vpop.f32.mrf.mxu0  ;;  %v2783_v27 = vpop.f32.mrf.mxu3 }
 0x277   :  { %v1941_v42 = vadd.f32 %v1934_v33, %v1837_v29 }
 0x279   :  { %v2109_v54 = vadd.f32 %v2102_v1, %v1941_v42 }
 0x27a   :  { %v2581_v61 = vpop.f32.mrf.mxu1 }
 0x27e   :  { %v1936_v55 = vpop.f32.mrf.mxu0  ;;  %v2785_v13 = vpop.f32.mrf.mxu3 }
 0x27f   :  { %v1942_v45 = vadd.f32 %v1936_v55, %v1838_v18 }
 0x281   :  { %v2110_v31 = vadd.f32 %v2104_v39, %v1942_v45 }
 0x282   :  { %v2270_v19 = vpop.f32.mrf.mxu2 }
 0x283   :  { %v2277_v58 = vadd.f32 %v2270_v19, %v2109_v54 }
 0x285   :  { %v2391_v44 = vadd.f32 %v2384_v4, %v2277_v58 }
 0x286   :  { %v2584_v25 = vpop.f32.mrf.mxu1 }
 0x288   :  { %v2465_v62 = vpop.f32.mrf.mxu0 }
 0x289   :  { %v2475_v53 = vadd.f32 %v2465_v62, %v2389_v50 }
 0x28a   :  { %v2272_v3 = vpop.f32.mrf.mxu2 }
 0x28b   :  { %v2589_v40 = vadd.f32 %v2579_v6, %v2475_v53  ;;  %v2278_v28 = vadd.f32 %v2272_v3, %v2110_v31 }
 0x28c   :  { %v2788_v0 = vpop.f32.mrf.mxu3 }
 0x28d   :  { %v2392_v21 = vadd.f32 %v2386_v11, %v2278_v28 }
 0x28e   :  { %v2586_v23 = vpop.f32.mrf.mxu1 }
 0x290   :  { %v2467_v46 = vpop.f32.mrf.mxu0 }
 0x291   :  { %v2476_v5 = vadd.f32 %v2467_v46, %v2390_v30 }
 0x293   :  { %v2693_v24 = vpop.f32.mrf.mxu2  ;;  %v2590_v48 = vadd.f32 %v2581_v61, %v2476_v5 }
 0x294   :  { %v2790_v47 = vpop.f32.mrf.mxu3  ;;  %v2703_v26 = vadd.f32 %v2693_v24, %v2589_v40 }
 0x296   :  { %v2793_v37 = vadd.f32 %v2783_v27, %v2703_v26 }
 0x29a   :  { %v2987_v43 = vpop.f32.mrf.mxu1 }
 0x29b   :  { %v2470_v7 = vpop.f32.mrf.mxu0  ;;  %v2695_v17 = vpop.f32.mrf.mxu2 }
 0x29c   :  { %v2704_v15 = vadd.f32 %v2695_v17, %v2590_v48  ;;  %v2477_v14 = vadd.f32 %v2470_v7, %v2391_v44 }
 0x29e   :  { %v2794_v29 = vadd.f32 %v2785_v13, %v2704_v15  ;;  %v2591_v38 = vadd.f32 %v2584_v25, %v2477_v14 }
 0x2a0   :  { %v3191_v63 = vpop.f32.mrf.mxu3 }
 0x2a2   :  { %v2989_v60 = vpop.f32.mrf.mxu1 }
 0x2a3   :  { %v2472_v51 = vpop.f32.mrf.mxu0 }
 0x2a4   :  { %v2478_v49 = vadd.f32 %v2472_v51, %v2392_v21 }
 0x2a6   :  { %v2698_v16 = vpop.f32.mrf.mxu2  ;;  %v2592_v33 = vadd.f32 %v2586_v23, %v2478_v49 }
 0x2a7   :  { %v2705_v20 = vadd.f32 %v2698_v16, %v2591_v38 }
 0x2a8   :  { %v3193_v34 = vpop.f32.mrf.mxu3 }
 0x2a9   :  { %v2795_v4 = vadd.f32 %v2788_v0, %v2705_v20 }
 0x2aa   :  { %v2992_v55 = vpop.f32.mrf.mxu1 }
 0x2ab   :  { %v2871_v32 = vpop.f32.mrf.mxu0 }
 0x2ac   :  { %v2881_v35 = vadd.f32 %v2871_v32, %v2793_v37 }
 0x2ae   :  { %v2700_v9 = vpop.f32.mrf.mxu2  ;;  %v2997_v12 = vadd.f32 %v2987_v43, %v2881_v35 }
 0x2af   :  { %v2706_v19 = vadd.f32 %v2700_v9, %v2592_v33 }
 0x2b0   :  { %v3196_v3 = vpop.f32.mrf.mxu3 }
 0x2b1   :  { %v2796_v25 = vadd.f32 %v2790_v47, %v2706_v19 }
 0x2b2   :  { %v2994_v51 = vpop.f32.mrf.mxu1 }
 0x2b3   :  { %v2873_v52 = vpop.f32.mrf.mxu0 }
 0x2b4   :  { %v2882_v2 = vadd.f32 %v2873_v52, %v2794_v29 }
 0x2b6   :  { %v3101_v56 = vpop.f32.mrf.mxu2  ;;  %v2998_v36 = vadd.f32 %v2989_v60, %v2882_v2 }
 0x2b7   :  { %v3111_v22 = vadd.f32 %v3101_v56, %v2997_v12 }
 0x2b8   :  { %v3198_v42 = vpop.f32.mrf.mxu3 }
 0x2b9   :  { %v5784_v41 = vadd.f32 %v3191_v63, %v3111_v22  ;;  %v3205_v22 = vld [vmem:[%s5814_s5] sm:$0x1] }
 0x2bb   :  { %v2876_v18 = vpop.f32.mrf.mxu0  ;;  %v3216_v6 = vmul.f32 %v5784_v41, %v5784_v41 }
 0x2bc   :  { %v2883_v39 = vadd.f32 %v2876_v18, %v2795_v4 }
 0x2be   :  { %v3103_v50 = vpop.f32.mrf.mxu2  ;;  %v2999_v61 = vadd.f32 %v2992_v55, %v2883_v39 }
 0x2bf   :  { %v3112_v1 = vadd.f32 %v3103_v50, %v2998_v36  ;;  %v4136_v50 = vld [vmem:[%s5813_s6] ss:$0 sm:$0xff] }
 0x2c1   :  { %v5786_v10 = vadd.f32 %v3193_v34, %v3112_v1 }
 0x2c3   :  { %v3207_v11 = vadd.f32 %v5786_v10, %v5784_v41  ;;  %v3217_v27 = vmul.f32 %v5786_v10, %v5786_v10  ;;  %v2878_v13 = vpop.f32.mrf.mxu0 }
 0x2c4   :  { %v2884_v0 = vadd.f32 %v2878_v13, %v2796_v25 }
 0x2c5   :  { %v3220_v62 = vadd.f32 %v3217_v27, %v3216_v6  ;;  %v4131_v6 = vld [vmem:[%s5815_s7] sm:$0xff]  }
 0x2c6   :  { %v3106_v46 = vpop.f32.mrf.mxu2  ;;  %v3000_v59 = vadd.f32 %v2994_v51, %v2884_v0 }
 0x2c7   :  { %v3113_v24 = vadd.f32 %v3106_v46, %v2999_v61 }
 0x2c9   :  { %v3203_v7 = vadd.f32 %v3196_v3, %v3113_v24  ;;  %v4132_v24 = vunpack.c.l.bf16 %v4131_v6 }
 0x2cb   :  { %v3208_v17 = vadd.f32 %v3207_v11, %v3203_v7  ;;  %v3218_v8 = vmul.f32 %v3203_v7, %v3203_v7 }
 0x2cd   :  { %v3221_v23 = vadd.f32 %v3220_v62, %v3218_v8 }
 0x2ce   :  { %v3108_v16 = vpop.f32.mrf.mxu2 }
 0x2cf   :  { %v3114_v57 = vadd.f32 %v3108_v16, %v3000_v59 }
 0x2d1   :  { %v3204_v53 = vadd.f32 %v3198_v42, %v3114_v57  ;;  %v4133_v42 = vunpack.c.h.bf16 %v4131_v6 }
 0x2d3   :  { %v3209_v30 = vadd.f32 %v3208_v17, %v3204_v53  ;;  %v3219_v32 = vmul.f32 %v3204_v53, %v3204_v53 }
 0x2d5   :  { %v3210_v54 = vrot.slane %v3209_v30, 4  ;;  %v3222_v40 = vadd.f32 %v3221_v23, %v3219_v32 }
 0x2d7   :  { %v3211_v5 = vadd.f32 %v3210_v54, %v3209_v30  ;;  %v3223_v43 = vrot.slane %v3222_v40, 4 }
 0x2d9   :  { %v3212_v9 = vrot.slane %v3211_v5, 2  ;;  %v3224_v58 = vadd.f32 %v3223_v43, %v3222_v40 }
 0x2db   :  { %v3213_v47 = vadd.f32 %v3212_v9, %v3211_v5  ;;  %v3225_v26 = vrot.slane %v3224_v58, 2 }
 0x2dd   :  { %v3214_v45 = vrot.slane %v3213_v47, 1  ;;  %v3226_v48 = vadd.f32 %v3225_v26, %v3224_v58 }
 0x2df   :  { %v3215_v63 = vadd.f32 %v3214_v45, %v3213_v47  ;;  %v3227_v15 = vrot.slane %v3226_v48, 1 }
 0x2e1   :  { %v3228_v44 = vadd.f32 %v3227_v15, %v3226_v48  ;;  %v3229_v37 = vmul.f32 0.03125, %v3215_v63 }
 0x2e3   :  { %v3230_v52 = vmul.f32 0.03125, %v3228_v44  ;;  %v3231_v31 = vmul.f32 %v3229_v37, %v3229_v37  ;;  %v3247_v14 = vsub.f32 %v3204_v53, %v3229_v37  ;;  %v3246_v35 = vsub.f32 %v3203_v7, %v3229_v37 }
 0x2e4   :  { %v3244_v29 = vsub.f32 %v5784_v41, %v3229_v37  ;;  %v3245_v20 = vsub.f32 %v5786_v10, %v3229_v37 }
 0x2e5   :  { %v3232_v56 = vsub.f32 %v3230_v52, %v3231_v31 }
 0x2e7   :  { %v3233_v28 = vadd.f32 1e-05, %v3232_v56 }
 0x2e9   :  { %4139 = vrsqrt.f32 %v3233_v28  ;;  %vm3240_vm11 = vweird.f32 %v3233_v28 }
 0x2ef   :  { %v4140_v60 = vpop.eup %4139 }
 0x2f0   :  { %v3235_v38 = vmul.f32 %v4140_v60, %v3233_v28  ;;  %vm3241_vm0 = vweird.f32 %v4140_v60 }
 0x2f1   :  { %vm3242_vm12 = vmor %vm3240_vm11, %vm3241_vm0 }
 0x2f2   :  { %v3236_v12 = vmul.f32 %v4140_v60, %v3235_v38 }
 0x2f4   :  { %v3237_v2 = vmul.f32 0.5, %v3236_v12 }
 0x2f6   :  { %v3238_v21 = vsub.f32 1.5, %v3237_v2 }
 0x2f8   :  { %v3239_v34 = vmul.f32 %v4140_v60, %v3238_v21 }
 0x2fa   :  { %v3243_v18 = vsel %vm3242_vm12, %v4140_v60, %v3239_v34 }
 0x2fb   :  { %v3248_v49 = vmul.f32 %v3243_v18, %v3205_v22 }
 0x2fd   :  { %v3249_v36 = vperm.slane %v3248_v49, 0 }
 0x2ff   :  { %v3253_v41 = vmul.f32 %v3249_v36, %v3247_v14  ;;  %v3252_v1 = vmul.f32 %v3249_v36, %v3246_v35  ;;  %v3250_v4 = vmul.f32 %v3249_v36, %v3244_v29  ;;  %v3251_v33 = vmul.f32 %v3249_v36, %v3245_v20 }
 0x301   :  { %v3259_v10 = vadd.f32 %v4136_v50, %v3252_v1  ;;  %v3257_v39 = vadd.f32 %v4136_v50, %v3250_v4  ;;  %v3260_v55 = vadd.f32 %v4136_v50, %v3253_v41  ;;  %v3258_v19 = vadd.f32 %v4136_v50, %v3251_v33 }
 0x303   :  { %vm3263_vm13 = vcmp.gt.f32.partialorder %v3259_v10, 0.0  ;;  %v3267_v11 = vmul.f32 0.2, %v3259_v10  ;;  %vm3261_vm14 = vcmp.gt.f32.partialorder %v3257_v39, 0.0  ;;  %v3265_v27 = vmul.f32 0.2, %v3257_v39 }
 0x304   :  { %vm3264_vm15 = vcmp.gt.f32.partialorder %v3260_v55, 0.0  ;;  %v3268_v62 = vmul.f32 0.2, %v3260_v55  ;;  %vm3262_vm1 = vcmp.gt.f32.partialorder %v3258_v19, 0.0  ;;  %v3266_v3 = vmul.f32 0.2, %v3258_v19 }
 0x305   :  { %v3271_v61 = vsel %vm3263_vm13, %v3259_v10, %v3267_v11  ;;  %v3269_v46 = vsel %vm3261_vm14, %v3257_v39, %v3265_v27 }
 0x306   :  { %v3275_v13 = vpack.c.bf16 %v3271_v61, %v3271_v61  ;;  %v3273_v25 = vpack.c.bf16 %v3269_v46, %v3269_v46  ;;  %v3272_v7 = vsel %vm3264_vm15, %v3260_v55, %v3268_v62  ;;  %v3270_v0 = vsel %vm3262_vm1, %v3258_v19, %v3266_v3 }
 0x307   :  { %v3276_v59 = vpack.c.bf16 %v3272_v7, %v3272_v7  ;;  %v3274_v16 = vpack.c.bf16 %v3270_v0, %v3270_v0 }
 0x308   :  { %v3279_v17 = vunpack.c.l.bf16 %v3275_v13  ;;  %v3277_v8 = vunpack.c.l.bf16 %v3273_v25 }
 0x309   :  { %v3280_v57 = vunpack.c.l.bf16 %v3276_v59  ;;  %v3278_v53 = vunpack.c.l.bf16 %v3274_v16 }
 0x30a   :  { %v3298_v51 = vmul.f32 %v4132_v24, %v3279_v17  ;;  %v3285_v23 = vmul.f32 %v4132_v24, %v3277_v8 }
 0x30b   :  { %v3299_v30 = vmul.f32 %v4133_v42, %v3280_v57  ;;  %v3286_v32 = vmul.f32 %v4133_v42, %v3278_v53 }
 0x30c   :  { %3300 = vadd.xlane.f32.xlu1 %v3298_v51  ;;  %3287 = vadd.xlane.f32.xlu0 %v3285_v23 }
 0x314   :  { %3302 = vadd.xlane.f32.xlu1 %v3299_v30  ;;  %3289 = vadd.xlane.f32.xlu0 %v3286_v32 }
 0x37f   :  { %v3301_v54 = vpop.xlane.xlu1 %3300  ;;  %v3288_v40 = vpop.xlane.xlu0 %3287 }
 0x387   :  { %v3303_v5 = vpop.xlane.xlu1 %3302  ;;  %v3290_v43 = vpop.xlane.xlu0 %3289 }
 0x388   :  { %v3304_v9 = vadd.f32 %v3303_v5, %v3301_v54  ;;  %v3291_v58 = vadd.f32 %v3290_v43, %v3288_v40 }
 0x38a   :  { %v3305_v47 = vrot.slane %v3304_v9, 4  ;;  %v3292_v26 = vrot.slane %v3291_v58, 4 }
 0x38c   :  { %v3306_v45 = vadd.f32 %v3305_v47, %v3304_v9  ;;  %v3293_v48 = vadd.f32 %v3292_v26, %v3291_v58 }
 0x38e   :  { %v3307_v63 = vrot.slane %v3306_v45, 2  ;;  %v3294_v15 = vrot.slane %v3293_v48, 2 }
 0x390   :  { %v3308_v44 = vadd.f32 %v3307_v63, %v3306_v45  ;;  %v3295_v37 = vadd.f32 %v3294_v15, %v3293_v48 }
 0x392   :  { %v3309_v52 = vrot.slane %v3308_v44, 1  ;;  %v3296_v31 = vrot.slane %v3295_v37, 1 }
 0x394   :  { %v3310_v14 = vadd.f32 %v3309_v52, %v3308_v44  ;;  %v3297_v35 = vadd.f32 %v3296_v31, %v3295_v37 }
 0x396   :  { %v3312_v56 = vsel %vm3311_vm2, %v3297_v35, %v3310_v14 }
 0x397   :  { %v3313_v28 = vsub.f32 0.0, %v3312_v56 }
 0x399   :  { %v3314_v29 = vmul.f32 1.442695, %v3313_v28 }
 0x39b   :  { %4141 = vpow2.f32 %v3314_v29 }
 0x3a1   :  { %v4142_v60 = vpop.eup %4141 }
 0x3a2   :  { %v3316_v38 = vadd.f32 1.0, %v4142_v60 }
 0x3a4   :  { %4143 = vrcp.f32 %v3316_v38  ;;  %v3328_v21 = vand.u32 2147483648, %v3316_v38  ;;  %v3326_v34 = vand.u32 2147483647, %v3316_v38  ;;  %vm3322_vm4 = vweird.f32 %v3316_v38 }
 0x3a6   :  { %v3329_v49 = vor.u32 1.1754944e-38, %v3328_v21  ;;  %vm3327_vm7 = vcmp.eq.f32.partialorder %v3326_v34, 8.507059e+37 }
 0x3aa   :  { %v4144_v12 = vpop.eup %4143 }
 0x3ab   :  { %v3318_v2 = vmul.f32 %v4144_v12, %v3316_v38  ;;  %vm3323_vm3 = vweird.f32 %v4144_v12 }
 0x3ac   :  { %vm3324_vm6 = vmor %vm3322_vm4, %vm3323_vm3 }
 0x3ad   :  { %v3319_v20 = vsub.f32 1.0, %v3318_v2 }
 0x3af   :  { %v3320_v22 = vmul.f32 %v4144_v12, %v3319_v20 }
 0x3b1   :  { %v3321_v18 = vadd.f32 %v4144_v12, %v3320_v22 }
 0x3b3   :  { %v3325_v36 = vsel %vm3324_vm6, %v4144_v12, %v3321_v18 }
 0x3b4   :  { %v3330_v50 = vsel %vm3327_vm7, %v3329_v49, %v3325_v36 }
 0x3b5   :  { %3333 = vst.msk [vmem:[%s5816_s8] sm:$0x3] %vm3332_vm5, %v3330_v50 }

</bundles_post_ra>
